<compile_context>
chip_gen: v6e
topology: v6e:2x2x1
jax: 0.10.0
libtpu: 0.0.40
codegen_flags: <defaults>
</compile_context>

<pallas_src>
from functools import partial

import jax
import jax.numpy as jnp
from jax.experimental import pallas as pl
from jax.experimental.pallas import tpu as pltpu

_LANE = 128


# ----------------------------------------------------------------------------
# Chip-aware sizing
# ----------------------------------------------------------------------------
_CHIP = {}


def _chip_profile():
    """Returns (per-block in+out byte budget, vmem_limit_bytes, small_vmem/2TC)."""
    if not _CHIP:
        vmem_cap = 0
        try:
            info = pltpu.get_tpu_info()
            vmem_cap = int(getattr(info, "vmem_capacity_bytes", 0) or 0)
        except Exception:
            vmem_cap = 0
        # 128 MiB VMEM parts (v5e/v6e, single TensorCore): bigger blocks, 64 MiB
        # scoped limit.  64 MiB parts (v7x-like, 2 TCs) or unknown: conservative.
        big_vmem = vmem_cap >= 100 * 1024 * 1024
        if big_vmem:
            _CHIP["budget"] = 4 * 1024 * 1024
            _CHIP["vmem_limit"] = 64 * 1024 * 1024
            _CHIP["two_tc"] = False
        else:
            _CHIP["budget"] = 2 * 1024 * 1024
            _CHIP["vmem_limit"] = 48 * 1024 * 1024
            _CHIP["two_tc"] = True
    return _CHIP["budget"], _CHIP["vmem_limit"], _CHIP["two_tc"]


def _round_up(v, m):
    return -(-v // m) * m


def _largest_divisor_leq(n, cap):
    cap = max(1, min(n, cap))
    for d in range(cap, 0, -1):
        if n % d == 0:
            return d
    return 1


def _block_bytes(tb, th, w, itemsize):
    """Padded VMEM bytes of one (input + output) block in the I/O dtype."""
    rows = _round_up(th, 8)
    in_b = tb * 4 * rows * _round_up(w, _LANE) * itemsize
    out_b = tb * rows * _round_up(4 * w, _LANE) * itemsize
    return in_b + out_b


def _choose_tiles(nc, h, w, itemsize, budget, two_tc):
    """Pick (TB items/block, TH input rows/block) under the per-block budget.

    The budget only counts in+out bytes; the 48/64 MiB vmem_limit leaves several
    times that for double-buffering and Mosaic's whole-block f32 temporaries.
    """
    # H tile: whole image unless a single item exceeds the budget.
    th = h
    if _block_bytes(1, h, w, itemsize) > budget and h % 8 == 0:
        th = 8
        cand = h - 8
        while cand >= 8:
            if h % cand == 0 and _block_bytes(1, cand, w, itemsize) <= budget:
                th = cand
                break
            cand -= 8
    # Items per block.
    per_item = _block_bytes(1, th, w, itemsize)
    tb_cap = max(1, budget // per_item)
    if two_tc and nc >= 2 and (h // th) == 1:
        # Keep >= 2 grid blocks over NC so both TensorCores get work (only
        # needed when the H axis does not already split the grid).
        tb_cap = min(tb_cap, max(1, nc // 2))
    tb = _largest_divisor_leq(nc, tb_cap)
    if two_tc and nc == 1 and (h // th) == 1:
        # Single item on a 2-TC part: split H so both cores get work.
        for cand in (h // 2, h // 4):
            if cand >= 8 and cand % 8 == 0 and h % cand == 0:
                th = cand
                break
    return tb, th


# ----------------------------------------------------------------------------
# Kernels
# ----------------------------------------------------------------------------
def _inv_haar_fused_kernel(x_ref, o_ref):
    """x_ref: (TB, 4, TH, W) bands [LL, LH, HL, HH].

    o_ref: (TB, TH, 4W); row i holds [output row 2i (2W) | output row 2i+1 (2W)],
    which is exactly the row-major layout of the (2*TH, 2W) output slab.
    """
    tb, _, th, w = x_ref.shape
    f32 = jnp.float32
    ll = x_ref[:, 0].astype(f32)          # per-band loads; no whole-block upcast
    lh = x_ref[:, 1].astype(f32)
    hl = x_ref[:, 2].astype(f32)
    hh = x_ref[:, 3].astype(f32)
    # Butterfly: 8 add/sub + 4 mul.
    s0 = ll + lh
    s1 = ll - lh
    t0 = hl + hh
    t1 = hl - hh
    ee = 0.5 * (s0 + t0)    # (even row, even col)
    eo = 0.5 * (s0 - t0)    # (even row, odd  col)
    oe = 0.5 * (s1 + t1)    # (odd  row, even col)
    oo = 0.5 * (s1 - t1)    # (odd  row, odd  col)
    # Column (lane) interleave only: (TB, TH, W, 2) -> (TB, TH, 2W).
    even = jnp.stack([ee, eo], axis=-1).reshape(tb, th, 2 * w)
    odd = jnp.stack([oe, oo], axis=-1).reshape(tb, th, 2 * w)
    dt = o_ref.dtype
    o_ref[:, :, : 2 * w] = even.astype(dt)   # output row 2i
    o_ref[:, :, 2 * w:] = odd.astype(dt)     # output row 2i+1


def _inv_haar_phases_kernel(x_ref, o_ref):
    """Fallback: x_ref/o_ref (TB, 4, TH, W); slot 2*p+q = (row p, col q) phase plane."""
    f32 = jnp.float32
    ll = x_ref[:, 0].astype(f32)
    lh = x_ref[:, 1].astype(f32)
    hl = x_ref[:, 2].astype(f32)
    hh = x_ref[:, 3].astype(f32)
    s0 = ll + lh
    s1 = ll - lh
    t0 = hl + hh
    t1 = hl - hh
    dt = o_ref.dtype
    o_ref[:, 0, :, :] = (0.5 * (s0 + t0)).astype(dt)
    o_ref[:, 1, :, :] = (0.5 * (s0 - t0)).astype(dt)
    o_ref[:, 2, :, :] = (0.5 * (s1 + t1)).astype(dt)
    o_ref[:, 3, :, :] = (0.5 * (s1 - t1)).astype(dt)


# ----------------------------------------------------------------------------
# Wrappers
# ----------------------------------------------------------------------------
@partial(jax.jit, static_argnums=(1, 2, 3))
def _fused_forward(x, tb, th, vmem_limit):
    n, tc, h, w = x.shape
    c = tc // 4
    nc = n * c
    xr = x.reshape(nc, 4, h, w)
    y = pl.pallas_call(
        _inv_haar_fused_kernel,
        out_shape=jax.ShapeDtypeStruct((nc, h, 4 * w), x.dtype),
        grid=(nc // tb, h // th),
        in_specs=[pl.BlockSpec((tb, 4, th, w), lambda i, j: (i, 0, j, 0))],
        out_specs=pl.BlockSpec((tb, th, 4 * w), lambda i, j: (i, j, 0)),
        compiler_params=pltpu.CompilerParams(
            dimension_semantics=("parallel", "parallel"),
            vmem_limit_bytes=vmem_limit),
        cost_estimate=pl.CostEstimate(
            flops=12 * nc * h * w,
            transcendentals=0,
            bytes_accessed=8 * nc * h * w * x.dtype.itemsize),
    )(xr)
    # (NC, H, 4W) is the row-major layout of (NC, 2H, 2W): contiguous (free) reshape.
    return y.reshape(n, c, 2 * h, 2 * w)


@partial(jax.jit, static_argnums=(1, 2, 3))
def _phases_forward(x, tb, th, vmem_limit):
    n, tc, h, w = x.shape
    c = tc // 4
    nc = n * c
    xr = x.reshape(nc, 4, h, w)
    phases = pl.pallas_call(
        _inv_haar_phases_kernel,
        out_shape=jax.ShapeDtypeStruct((nc, 4, h, w), x.dtype),
        grid=(nc // tb, h // th),
        in_specs=[pl.BlockSpec((tb, 4, th, w), lambda i, j: (i, 0, j, 0))],
        out_specs=pl.BlockSpec((tb, 4, th, w), lambda i, j: (i, 0, j, 0)),
        compiler_params=pltpu.CompilerParams(
            dimension_semantics=("parallel", "parallel"),
            vmem_limit_bytes=vmem_limit),
    )(xr)
    # phases[k, 2*p+q, i, j] -> y[k, 2*i+p, 2*j+q]  (interleave in XLA).
    phases = phases.reshape(n, c, 2, 2, h, w)
    return phases.transpose(0, 1, 4, 2, 5, 3).reshape(n, c, 2 * h, 2 * w)


_FUSED_OK = {}   # (shape, dtype) -> bool; one failing shape no longer poisons others


def inverse_wavelet_layer(x):
    """Pallas implementation of InverseWaveletLayer.forward (wavelet='haar').

    Args:
      x: (N, 4*C, H, W); channel dim is (C, 4) with bands [LL, LH, HL, HH].
    Returns:
      (N, C, 2H, 2W) reconstruction.
    """
    n, tc, h, w = x.shape
    assert tc % 4 == 0, "total channels must be divisible by 4"
    # TODO(synk): only the 'haar' wavelet (the module default) is implemented; longer
    # symmetric-padded synthesis filters would need the general filter-bank path.
    budget, vmem_limit, two_tc = _chip_profile()
    tb, th = _choose_tiles(n * (tc // 4), h, w, x.dtype.itemsize, budget, two_tc)
    key = (x.shape, str(x.dtype))
    if _FUSED_OK.get(key, True):
        try:
            y = _fused_forward(x, tb, th, vmem_limit)
            if key not in _FUSED_OK:
                jax.block_until_ready(y)     # surface first-use lowering/runtime issues
                _FUSED_OK[key] = True
            return y
        except Exception as e:               # per-shape fallback, logged (not silent/global)
            _FUSED_OK[key] = False
            print("inverse_wavelet_layer: fused Pallas path failed for "
                  f"{key} ({type(e).__name__}); using phases fallback for this shape.")
    return _phases_forward(x, tb, th, vmem_limit)


# ----------------------------------------------------------------------------
# Reference + self-test
# ----------------------------------------------------------------------------
def _reference_idwt_haar(x):
    """Pure-JAX reference of single-level inverse Haar DWT (pytorch_wavelets SFB2D)."""
    n, tc, h, w = x.shape
    c = tc // 4
    xr = x.reshape(n, c, 4, h, w)
    ll, lh, hl, hh = xr[:, :, 0], xr[:, :, 1], xr[:, :, 2], xr[:, :, 3]
    k = 1.0 / jnp.sqrt(jnp.asarray(2.0, jnp.float32))
    lo = jnp.stack([k * (ll + lh), k * (ll - lh)], axis=3).reshape(n, c, 2 * h, w)
    hi = jnp.stack([k * (hl + hh), k * (hl - hh)], axis=3).reshape(n, c, 2 * h, w)
    y = jnp.stack([k * (lo + hi), k * (lo - hi)], axis=4).reshape(n, c, 2 * h, 2 * w)
    return y.astype(x.dtype)


if __name__ == "__main__":
    key = jax.random.PRNGKey(0)
    k1, k2 = jax.random.split(key)

    # Shape implied by the module: batch=2, C=4 (=> 16 input channels), 16x16 spatial.
    N, C, H, W = 2, 4, 16, 16
    x = jax.random.normal(k1, (N, 4 * C, H, W), dtype=jnp.float32)
    y = jax.block_until_ready(inverse_wavelet_layer(x))
    y_ref = _reference_idwt_haar(x)
    assert y.shape == (N, C, 2 * H, 2 * W), y.shape
    assert jnp.allclose(y, y_ref, atol=1e-5, rtol=1e-5), "mismatch vs reference"

    # Second small shape to exercise a wider spatial extent (4W = 128 -> lane-dense stores).
    N2, C2, H2, W2 = 1, 8, 32, 32
    x2 = jax.random.normal(k2, (N2, 4 * C2, H2, W2), dtype=jnp.float32)
    y2 = jax.block_until_ready(inverse_wavelet_layer(x2))
    assert jnp.allclose(y2, _reference_idwt_haar(x2), atol=1e-5, rtol=1e-5), "mismatch (shape 2)"

    print("KERNEL_OK")
</pallas_src>

<mosaic_0001>
module attributes {stable_mosaic.version = 11 : i64} {
  func.func @_inv_haar_fused_kernel(%arg0: i32, %arg1: i32, %arg2: memref<4x4x16x16xf32, #tpu.memory_space<vmem>>, %arg3: memref<4x16x64xf32, #tpu.memory_space<vmem>>) attributes {dimension_semantics = [#tpu.dimension_semantics<parallel>, #tpu.dimension_semantics<parallel>], iteration_bounds = array<i64: 2, 1>, scalar_prefetch = 0 : i64, scratch_operands = 0 : i64, tpu.core_type = #tpu.core_type<tc>, window_params = [{transform_indices = @transform_0, window_bounds = array<i64: 4, 4, 16, 16>}, {transform_indices = @transform_1, window_bounds = array<i64: 4, 16, 64>}]} {
    %c0 = arith.constant 0 : index
    %c0_0 = arith.constant 0 : index
    %c0_1 = arith.constant 0 : index
    %c0_2 = arith.constant 0 : index
    %0 = vector.load %arg2[%c0, %c0_0, %c0_1, %c0_2] : memref<4x4x16x16xf32, #tpu.memory_space<vmem>>, vector<4x1x16x16xf32>
    %1 = vector.shape_cast %0 : vector<4x1x16x16xf32> to vector<4x16x16xf32>
    %c0_3 = arith.constant 0 : index
    %c1 = arith.constant 1 : index
    %c0_4 = arith.constant 0 : index
    %c0_5 = arith.constant 0 : index
    %2 = vector.load %arg2[%c0_3, %c1, %c0_4, %c0_5] : memref<4x4x16x16xf32, #tpu.memory_space<vmem>>, vector<4x1x16x16xf32>
    %3 = vector.shape_cast %2 : vector<4x1x16x16xf32> to vector<4x16x16xf32>
    %c0_6 = arith.constant 0 : index
    %c2 = arith.constant 2 : index
    %c0_7 = arith.constant 0 : index
    %c0_8 = arith.constant 0 : index
    %4 = vector.load %arg2[%c0_6, %c2, %c0_7, %c0_8] : memref<4x4x16x16xf32, #tpu.memory_space<vmem>>, vector<4x1x16x16xf32>
    %5 = vector.shape_cast %4 : vector<4x1x16x16xf32> to vector<4x16x16xf32>
    %c0_9 = arith.constant 0 : index
    %c3 = arith.constant 3 : index
    %c0_10 = arith.constant 0 : index
    %c0_11 = arith.constant 0 : index
    %6 = vector.load %arg2[%c0_9, %c3, %c0_10, %c0_11] : memref<4x4x16x16xf32, #tpu.memory_space<vmem>>, vector<4x1x16x16xf32>
    %7 = vector.shape_cast %6 : vector<4x1x16x16xf32> to vector<4x16x16xf32>
    %8 = arith.addf %1, %3 : vector<4x16x16xf32>
    %9 = arith.subf %1, %3 : vector<4x16x16xf32>
    %10 = arith.addf %5, %7 : vector<4x16x16xf32>
    %11 = arith.subf %5, %7 : vector<4x16x16xf32>
    %12 = arith.addf %8, %10 : vector<4x16x16xf32>
    %cst = arith.constant 5.000000e-01 : f32
    %13 = vector.broadcast %cst : f32 to vector<4x16x16xf32>
    %14 = arith.mulf %13, %12 : vector<4x16x16xf32>
    %15 = arith.subf %8, %10 : vector<4x16x16xf32>
    %cst_12 = arith.constant 5.000000e-01 : f32
    %16 = vector.broadcast %cst_12 : f32 to vector<4x16x16xf32>
    %17 = arith.mulf %16, %15 : vector<4x16x16xf32>
    %18 = arith.addf %9, %11 : vector<4x16x16xf32>
    %cst_13 = arith.constant 5.000000e-01 : f32
    %19 = vector.broadcast %cst_13 : f32 to vector<4x16x16xf32>
    %20 = arith.mulf %19, %18 : vector<4x16x16xf32>
    %21 = arith.subf %9, %11 : vector<4x16x16xf32>
    %cst_14 = arith.constant 5.000000e-01 : f32
    %22 = vector.broadcast %cst_14 : f32 to vector<4x16x16xf32>
    %23 = arith.mulf %22, %21 : vector<4x16x16xf32>
    %24 = vector.shape_cast %14 : vector<4x16x16xf32> to vector<4x16x16x1xf32>
    %25 = vector.shape_cast %17 : vector<4x16x16xf32> to vector<4x16x16x1xf32>
    %26 = tpu.concatenate %24, %25 in 3 : vector<4x16x16x1xf32>, vector<4x16x16x1xf32> -> vector<4x16x16x2xf32>
    %27 = vector.shape_cast %26 : vector<4x16x16x2xf32> to vector<4x16x32xf32>
    %28 = vector.shape_cast %20 : vector<4x16x16xf32> to vector<4x16x16x1xf32>
    %29 = vector.shape_cast %23 : vector<4x16x16xf32> to vector<4x16x16x1xf32>
    %30 = tpu.concatenate %28, %29 in 3 : vector<4x16x16x1xf32>, vector<4x16x16x1xf32> -> vector<4x16x16x2xf32>
    %31 = vector.shape_cast %30 : vector<4x16x16x2xf32> to vector<4x16x32xf32>
    %c0_15 = arith.constant 0 : index
    %c0_16 = arith.constant 0 : index
    %c0_17 = arith.constant 0 : index
    %32 = vector.load %arg3[%c0_15, %c0_16, %c0_17] : memref<4x16x64xf32, #tpu.memory_space<vmem>>, vector<4x16x32xf32>
    tpu.vector_store %arg3[%c0_15, %c0_16, %c0_17], %27 {strides = array<i32>} : memref<4x16x64xf32, #tpu.memory_space<vmem>>, vector<4x16x32xf32>,
    %c0_18 = arith.constant 0 : index
    %c0_19 = arith.constant 0 : index
    %c32 = arith.constant 32 : index
    %33 = vector.load %arg3[%c0_18, %c0_19, %c32] : memref<4x16x64xf32, #tpu.memory_space<vmem>>, vector<4x16x32xf32>
    tpu.vector_store %arg3[%c0_18, %c0_19, %c32], %31 {strides = array<i32>} : memref<4x16x64xf32, #tpu.memory_space<vmem>>, vector<4x16x32xf32>,
    return
  }
  func.func @transform_0(%arg0: i32, %arg1: i32) -> (i32, i32, i32, i32) {
    %c0_i32 = arith.constant 0 : i32
    %c0_i32_0 = arith.constant 0 : i32
    %c0_i32_1 = arith.constant 0 : i32
    return %arg0, %c0_i32, %arg1, %c0_i32_0 : i32, i32, i32, i32
  }
  func.func @transform_1(%arg0: i32, %arg1: i32) -> (i32, i32, i32) {
    %c0_i32 = arith.constant 0 : i32
    %c0_i32_0 = arith.constant 0 : i32
    return %arg0, %arg1, %c0_i32 : i32, i32, i32
  }
}

module attributes {stable_mosaic.version = 11 : i64} {
  func.func @_inv_haar_phases_kernel(%arg0: i32, %arg1: i32, %arg2: memref<4x4x16x16xf32, #tpu.memory_space<vmem>>, %arg3: memref<4x4x16x16xf32, #tpu.memory_space<vmem>>) attributes {dimension_semantics = [#tpu.dimension_semantics<parallel>, #tpu.dimension_semantics<parallel>], iteration_bounds = array<i64: 2, 1>, scalar_prefetch = 0 : i64, scratch_operands = 0 : i64, tpu.core_type = #tpu.core_type<tc>, window_params = [{transform_indices = @transform_0, window_bounds = array<i64: 4, 4, 16, 16>}, {transform_indices = @transform_1, window_bounds = array<i64: 4, 4, 16, 16>}]} {
    %c0 = arith.constant 0 : index
    %c0_0 = arith.constant 0 : index
    %c0_1 = arith.constant 0 : index
    %c0_2 = arith.constant 0 : index
    %0 = vector.load %arg2[%c0, %c0_0, %c0_1, %c0_2] : memref<4x4x16x16xf32, #tpu.memory_space<vmem>>, vector<4x1x16x16xf32>
    %1 = vector.shape_cast %0 : vector<4x1x16x16xf32> to vector<4x16x16xf32>
    %c0_3 = arith.constant 0 : index
    %c1 = arith.constant 1 : index
    %c0_4 = arith.constant 0 : index
    %c0_5 = arith.constant 0 : index
    %2 = vector.load %arg2[%c0_3, %c1, %c0_4, %c0_5] : memref<4x4x16x16xf32, #tpu.memory_space<vmem>>, vector<4x1x16x16xf32>
    %3 = vector.shape_cast %2 : vector<4x1x16x16xf32> to vector<4x16x16xf32>
    %c0_6 = arith.constant 0 : index
    %c2 = arith.constant 2 : index
    %c0_7 = arith.constant 0 : index
    %c0_8 = arith.constant 0 : index
    %4 = vector.load %arg2[%c0_6, %c2, %c0_7, %c0_8] : memref<4x4x16x16xf32, #tpu.memory_space<vmem>>, vector<4x1x16x16xf32>
    %5 = vector.shape_cast %4 : vector<4x1x16x16xf32> to vector<4x16x16xf32>
    %c0_9 = arith.constant 0 : index
    %c3 = arith.constant 3 : index
    %c0_10 = arith.constant 0 : index
    %c0_11 = arith.constant 0 : index
    %6 = vector.load %arg2[%c0_9, %c3, %c0_10, %c0_11] : memref<4x4x16x16xf32, #tpu.memory_space<vmem>>, vector<4x1x16x16xf32>
    %7 = vector.shape_cast %6 : vector<4x1x16x16xf32> to vector<4x16x16xf32>
    %8 = arith.addf %1, %3 : vector<4x16x16xf32>
    %9 = arith.subf %1, %3 : vector<4x16x16xf32>
    %10 = arith.addf %5, %7 : vector<4x16x16xf32>
    %11 = arith.subf %5, %7 : vector<4x16x16xf32>
    %12 = arith.addf %8, %10 : vector<4x16x16xf32>
    %cst = arith.constant 5.000000e-01 : f32
    %13 = vector.broadcast %cst : f32 to vector<4x16x16xf32>
    %14 = arith.mulf %13, %12 : vector<4x16x16xf32>
    %c0_12 = arith.constant 0 : index
    %c0_13 = arith.constant 0 : index
    %c0_14 = arith.constant 0 : index
    %c0_15 = arith.constant 0 : index
    %15 = vector.load %arg3[%c0_12, %c0_13, %c0_14, %c0_15] : memref<4x4x16x16xf32, #tpu.memory_space<vmem>>, vector<4x1x16x16xf32>
    %16 = vector.shape_cast %15 : vector<4x1x16x16xf32> to vector<4x16x16xf32>
    %17 = vector.shape_cast %14 : vector<4x16x16xf32> to vector<4x1x16x16xf32>
    tpu.vector_store %arg3[%c0_12, %c0_13, %c0_14, %c0_15], %17 {strides = array<i32>} : memref<4x4x16x16xf32, #tpu.memory_space<vmem>>, vector<4x1x16x16xf32>,
    %18 = arith.subf %8, %10 : vector<4x16x16xf32>
    %cst_16 = arith.constant 5.000000e-01 : f32
    %19 = vector.broadcast %cst_16 : f32 to vector<4x16x16xf32>
    %20 = arith.mulf %19, %18 : vector<4x16x16xf32>
    %c0_17 = arith.constant 0 : index
    %c1_18 = arith.constant 1 : index
    %c0_19 = arith.constant 0 : index
    %c0_20 = arith.constant 0 : index
    %21 = vector.load %arg3[%c0_17, %c1_18, %c0_19, %c0_20] : memref<4x4x16x16xf32, #tpu.memory_space<vmem>>, vector<4x1x16x16xf32>
    %22 = vector.shape_cast %21 : vector<4x1x16x16xf32> to vector<4x16x16xf32>
    %23 = vector.shape_cast %20 : vector<4x16x16xf32> to vector<4x1x16x16xf32>
    tpu.vector_store %arg3[%c0_17, %c1_18, %c0_19, %c0_20], %23 {strides = array<i32>} : memref<4x4x16x16xf32, #tpu.memory_space<vmem>>, vector<4x1x16x16xf32>,
    %24 = arith.addf %9, %11 : vector<4x16x16xf32>
    %cst_21 = arith.constant 5.000000e-01 : f32
    %25 = vector.broadcast %cst_21 : f32 to vector<4x16x16xf32>
    %26 = arith.mulf %25, %24 : vector<4x16x16xf32>
    %c0_22 = arith.constant 0 : index
    %c2_23 = arith.constant 2 : index
    %c0_24 = arith.constant 0 : index
    %c0_25 = arith.constant 0 : index
    %27 = vector.load %arg3[%c0_22, %c2_23, %c0_24, %c0_25] : memref<4x4x16x16xf32, #tpu.memory_space<vmem>>, vector<4x1x16x16xf32>
    %28 = vector.shape_cast %27 : vector<4x1x16x16xf32> to vector<4x16x16xf32>
    %29 = vector.shape_cast %26 : vector<4x16x16xf32> to vector<4x1x16x16xf32>
    tpu.vector_store %arg3[%c0_22, %c2_23, %c0_24, %c0_25], %29 {strides = array<i32>} : memref<4x4x16x16xf32, #tpu.memory_space<vmem>>, vector<4x1x16x16xf32>,
    %30 = arith.subf %9, %11 : vector<4x16x16xf32>
    %cst_26 = arith.constant 5.000000e-01 : f32
    %31 = vector.broadcast %cst_26 : f32 to vector<4x16x16xf32>
    %32 = arith.mulf %31, %30 : vector<4x16x16xf32>
    %c0_27 = arith.constant 0 : index
    %c3_28 = arith.constant 3 : index
    %c0_29 = arith.constant 0 : index
    %c0_30 = arith.constant 0 : index
    %33 = vector.load %arg3[%c0_27, %c3_28, %c0_29, %c0_30] : memref<4x4x16x16xf32, #tpu.memory_space<vmem>>, vector<4x1x16x16xf32>
    %34 = vector.shape_cast %33 : vector<4x1x16x16xf32> to vector<4x16x16xf32>
    %35 = vector.shape_cast %32 : vector<4x16x16xf32> to vector<4x1x16x16xf32>
    tpu.vector_store %arg3[%c0_27, %c3_28, %c0_29, %c0_30], %35 {strides = array<i32>} : memref<4x4x16x16xf32, #tpu.memory_space<vmem>>, vector<4x1x16x16xf32>,
    return
  }
  func.func @transform_0(%arg0: i32, %arg1: i32) -> (i32, i32, i32, i32) {
    %c0_i32 = arith.constant 0 : i32
    %c0_i32_0 = arith.constant 0 : i32
    %c0_i32_1 = arith.constant 0 : i32
    return %arg0, %c0_i32, %arg1, %c0_i32_0 : i32, i32, i32, i32
  }
  func.func @transform_1(%arg0: i32, %arg1: i32) -> (i32, i32, i32, i32) {
    %c0_i32 = arith.constant 0 : i32
    %c0_i32_0 = arith.constant 0 : i32
    %c0_i32_1 = arith.constant 0 : i32
    return %arg0, %c0_i32, %arg1, %c0_i32_0 : i32, i32, i32, i32
  }
}

</mosaic_0001>

<bundles_post_ra>
// kernel: _fused_forward.1
= control target key start
LH: loop header
LB: loop body
LE: loop exit
PB: predicated region body
PF: predicated region fallthrough
CT: control target
= control target key end

     0   :  { %6 = vsyncpa [#allocation3], 0  ;;  %s15257_s0 = inlined_call_operand.hbm [shape: f32[8,4,16,16], index: 0, kind: input, shape index: {}]   ;;  %s15258_s1 = inlined_call_operand.vmem [shape: f32[8,16,64], index: 1, kind: output, shape index: {}]  }
   0x1   :  { %8 = vsyncpa [#allocation3 + $0x1], 0  ;;  %s9321_s6 = smov 0   ;;  %s9323_s7 = smov 0  }
   0x2   :  { %s9325_s8 = smov 0   ;;  %s9327_s9 = smov 0  }
   0x3   :  { %s9329_s10 = smov 0   ;;  %s9331_s11 = smov 0  }
   0x4 LB: > { %s9089_s12 = sadd.s32 4294967295, %s9288_s11   ;;  %s26_s13 = sadd.s32 1, %s9284_s10  ;;  %s9288_s11 = sphi %s9331_s11, %s14_s11   ;;  %s9284_s10 = sphi %s9329_s10, %s16917_s10   ;;  %s9280_s9 = sphi %s9327_s9, %s16916_s9   ;;  %s9276_s8 = sphi %s9325_s8, %s16915_s8   ;;  %s9272_s7 = sphi %s9323_s7, %s16914_s7   ;;  %s9268_s6 = sphi %s9321_s6, %s16913_s6  }
   0x5   : > { %p28_p0 = scmp.ge.s32.totalorder %s26_s13, 2  ;;  %s35_s14 = sadd.s32 1, %s9276_s8 }
   0x6   : > { %p42_p1 = scmp.ne.s32.totalorder %s9276_s8, %s9272_s7  ;;  %p43_p2 = scmp.eq.s32.totalorder %s9288_s11, 0 }
   0x7   : > { %s16919_s13 = smov (%p28_p0, %s26_s13), 0  ;;  %p48_p4 = scmp.ne.s32.totalorder %s9272_s7, %s9268_s6 }
   0x8   : > { %p9357_p3 = por %p43_p2, %p42_p1  ;;  %s30_s16 = ssub.s32 %s9284_s10, %s16919_s13 }
   0x9   : > { %p49_p5 = scmp.eq.s32.totalorder %s9089_s12, 0  ;;  %p33_p6 = scmp.eq.s32.totalorder %s30_s16, 0 }
   0xa   : > { %p9137_p8 = scmp.lt.s32.totalorder %s9288_s11, 2  ;;  %s100_s19 = sand.u32 1, %s9276_s8  }
   0xb   : > { %p9364_p7 = por %p49_p5, %p48_p4  ;;  %s9129_s20 = sshll.u32 %s9284_s10, 12 }
   0xc   : > { %s9370_s18 = scalar_select %p33_p6, %s9276_s8, %s35_s14  }
   0xd   : > { %s9093_s21 = sshll.u32 %s100_s19, 8  ;;  %s113_s24 = scalar_lea.hbm %s15257_s0, %s9129_s20 }
   0xe   : > { %s104_s25 = scalar_lea.vmem [#allocation2], %s9093_s21  ;;  %p9379_p9 = pnand %p9137_p8, %p9357_p3 }
   0xf   : > { %s114_s26 = sshll.u32 %s104_s25, 4  ;;  %s101_s28 = scalar_lea.sflag [#allocation3], %s100_s19  ;;  %s115_s26 = int_to_ptr.vmem [resolvable:$true] %s114_s26 }
  0x10   : > { %p9212_p10 = pneg %p9379_p9  ;;  %s9223_s29 = scalar_lea.vmem %s115_s26, 4096 }
  0x11   : > { %p9224_p11 = scmp.ne.s32.totalorder %s115_s26, %s9223_s29  ;;  %s9290_s30 = smov [#allocation2]  }
  0x12   : > { %s9228_s2 = sshll.u32 %s9290_s30, 4  ;;  %s9229_s2 = int_to_ptr.vmem [resolvable:$false] %s9228_s2 }
  0x13   : > { %p9226_p12 = pnand %p9224_p11, %p9212_p10  ;;  %s9230_s3 = scalar_lea.vmem %s9229_s2, 8192 }
  0x14   : > { %p9231_p0 = scmp.lt.s32.totalorder %s115_s26, %s9229_s2  ;;  %p9232_p1 = scmp.lt.s32.totalorder %s9230_s3, %s9223_s29 }
  0x15   : > { %p9227_p13 = pneg %p9226_p12 }
  0x16   : > { %p9233_p2 = por %p9232_p1, %p9231_p0 }
  0x18   : > { %p9234_p3 = pnand %p9233_p2, %p9227_p13 }
  0x1a   : > { %9237 = shalt.err (!%p9234_p3)
}
  0x1b   : > { %s9291_s4 = smov 128   ;;  %s9292_s5 = smov 8  }
  0x1c   : > { %9136 = dma.hbm_to_vmem [thread:$0]  (!%p9379_p9), %s113_s24, 4096, %s115_s26, %s101_s28, %s9291_s4, %s9291_s4, %s9292_s5  }
  0x1d   : > { %p9097_p4 = scmp.ge.s32.totalorder %s9288_s11, 1  ;;  %p122_p5 = scmp.lt.s32.totalorder %s9288_s11, 3 }
  0x1f   : > { %p123_p6 = pnand %p9097_p4, %p122_p5 }
  0x21   : > { %126 = sbr.rel (%p123_p6) target bundleno = 1974 (0x7b6), region = 24 }
  0x26   : > { %s128_s6 = sand.u32 1, %s9272_s7  }
  0x27   : > { %s9098_s12 = sshll.u32 %s128_s6, 8  ;;  %s129_s14 = scalar_lea.sflag [#allocation3], %s128_s6 }
  0x28   : > { %s9390_s15 = scalar_lea.vmem [#allocation2], %s9098_s12 }
  0x29   : > { %9263 = dma.done.wait (%p9364_p7), %s129_s14, 4096  }
  0x2a   : > { %9265 = vsyncadd (%p9364_p7), %s129_s14, 4294963200  ;;  %v301_v0 = vlaneseq  ;;  %v170_v1 = vld [vmem:[%s9390_s15] sm:$0xff]  ;;  %v9102_v2 = vld [vmem:[%s9390_s15 + $0x10] sm:$0xff]  ;;  %vm15453_vm0 = vcmask 7168   ;;  %s9295_s16 = smov 2   ;;  %s9296_s17 = smov 4  }
  0x2b   : > { %v9110_v3 = vld [vmem:[%s9390_s15 + $0x20] sm:$0xff]  ;;  %v9118_v5 = vld [vmem:[%s9390_s15 + $0x30] sm:$0xff]  ;;  %v9402_v6 = vadd.f32 %v9102_v2, %v170_v1  ;;  %v9404_v7 = vsub.f32 %v170_v1, %v9102_v2  ;;  %v171_v8 = vld [vmem:[%s9390_s15 + $0x8] sm:$0xff]  ;;  %s9297_s19 = smov 6   ;;  %s9298_s20 = smov 8   ;;  %vm4494_vm1 = vcmask 15360  }
  0x2c   : > { %v9399_v4 = vshrl.u32 %v301_v0, 7  ;;  %v9103_v9 = vld [vmem:[%s9390_s15 + $0x18] sm:$0xff]  ;;  %v9408_v10 = vadd.f32 %v9118_v5, %v9110_v3  ;;  %v9410_v11 = vsub.f32 %v9110_v3, %v9118_v5  ;;  %v9111_v12 = vld [vmem:[%s9390_s15 + $0x28] sm:$0xff]  ;;  %v9419_v16 = vld [vmem:[%s9390_s15 + $0x40] sm:$0xff]  ;;  %s9299_s21 = smov 10   ;;  %s9300_s22 = smov 12  }
  0x2d   : > { %15575 = vst [vmem:[#allocation5_spill] sm:$0xff] %v9404_v7  ;;  %v9119_v13 = vld [vmem:[%s9390_s15 + $0x38] sm:$0xff]  ;;  %v9414_v14 = vsub.f32 %v171_v8, %v9103_v9  ;;  %v9422_v17 = vld [vmem:[%s9390_s15 + $0x50] sm:$0xff]  ;;  %v9425_v18 = vld [vmem:[%s9390_s15 + $0x60] sm:$0xff]  ;;  %v9507_v49 = vadd.f32 %v9103_v9, %v171_v8  ;;  %s9301_s23 = smov 14   ;;  %s9302_s24 = smov 16  }
  0x2e   : > { %15576 = vst [vmem:[#allocation6_spill] sm:$0xff] %v9410_v11  ;;  %v9416_v15 = vsub.f32 %v9111_v12, %v9119_v13  ;;  %v237_v19 = vadd.f32 %v9408_v10, %v9402_v6  ;;  %v9430_v20 = vsub.s32 1, %v9399_v4  ;;  %v9433_v21 = vsub.s32 0, %v9399_v4  ;;  %v9436_v22 = vld [vmem:[%s9390_s15 + $0x70] sm:$0xff]  ;;  %v9443_v24 = vld [vmem:[%s9390_s15 + $0x48] sm:$0xff]  ;;  %v9446_v25 = vld [vmem:[%s9390_s15 + $0x58] sm:$0xff] }
  0x2f   : > { %15577 = vst [vmem:[#allocation7_spill] sm:$0xff] %v9414_v14  ;;  %v9440_v23 = vsub.f32 %v9419_v16, %v9422_v17  ;;  %v9450_v26 = vsub.f32 %v9425_v18, %v9436_v22  ;;  %v9453_v27 = vld [vmem:[%s9390_s15 + $0x68] sm:$0xff]  ;;  %v9456_v28 = vld [vmem:[%s9390_s15 + $0x78] sm:$0xff]  ;;  %v9460_v29 = vsub.f32 %v9443_v24, %v9446_v25  ;;  %v9469_v34 = vsub.s32 2, %v9399_v4  ;;  %v9472_v35 = vld [vmem:[%s9390_s15 + $0x80] sm:$0xff]  ;;  %s9303_s25 = smov 18  }
  0x30   : > { %15578 = vst [vmem:[#allocation8_spill] sm:$0xff] %v9416_v15  ;;  %15579 = vst [vmem:[#allocation9_spill] sm:$0xff] %v9430_v20  ;;  %v245_v30 = vmul.f32 0.5, %v237_v19  ;;  %v9464_v31 = vsub.f32 %v9453_v27, %v9456_v28  ;;  %v9475_v36 = vld [vmem:[%s9390_s15 + $0x90] sm:$0xff]  ;;  %v9479_v38 = vsub.s32 3, %v9399_v4  ;;  %v9482_v39 = vld [vmem:[%s9390_s15 + $0xa0] sm:$0xff]  ;;  %v9509_v50 = vadd.f32 %v9119_v13, %v9111_v12 }
  0x31   : > { %15580 = vst [vmem:[#allocation10_spill] sm:$0xff] %v9433_v21  ;;  %15581 = vst [vmem:[#allocation11_spill] sm:$0xff] %v9440_v23  ;;  %v9485_v40 = vld [vmem:[%s9390_s15 + $0xb0] sm:$0xff]  ;;  %v9489_v41 = vsub.f32 %v9472_v35, %v9475_v36  ;;  %v9497_v44 = vsub.s32 4, %v9399_v4  ;;  %v9501_v46 = vsub.s32 5, %v9399_v4  ;;  %v9505_v48 = vsub.s32 6, %v9399_v4 }
  0x32   : > { %15582 = vst [vmem:[#allocation12_spill] sm:$0xff] %v9450_v26  ;;  %15583 = vst [vmem:[#allocation13_spill] sm:$0xff] %v9460_v29  ;;  %v315_v32 = vrot.slane %v245_v30, %v9430_v20  ;;  %v304_v33 = vrot.slane %v245_v30, %v9433_v21  ;;  %v326_v37 = vrot.slane %v245_v30, %v9469_v34  ;;  %v9513_v52 = vsub.s32 7, %v9399_v4  ;;  %v9520_v57 = vld [vmem:[%s9390_s15 + $0x88] sm:$0xff]  ;;  %v9523_v58 = vld [vmem:[%s9390_s15 + $0x98] sm:$0xff]  ;;  %s9304_s26 = smov 20  }
  0x33   : > { %15584 = vst [vmem:[#allocation14_spill] sm:$0xff] %v9464_v31  ;;  %15585 = vst [vmem:[#allocation15_spill] sm:$0xff] %v9469_v34  ;;  %v9493_v42 = vsub.f32 %v9482_v39, %v9485_v40  ;;  %v337_v43 = vrot.slane %v245_v30, %v9479_v38  ;;  %v348_v45 = vrot.slane %v245_v30, %v9497_v44  ;;  %v9526_v59 = vld [vmem:[%s9390_s15 + $0xa8] sm:$0xff]  ;;  %v9529_v60 = vld [vmem:[%s9390_s15 + $0xb8] sm:$0xff]  ;;  %s9305_s27 = smov 22   ;;  %s9306_s28 = smov 24  }
  0x34   : > { %317 = vbcast.lane.b32.xlu1 %v315_v32, 256  ;;  %306 = vbcast.lane.b32.xlu0 %v304_v33, 256  ;;  %15586 = vst [vmem:[#allocation16_spill] sm:$0xff] %v9479_v38  ;;  %15587 = vst [vmem:[#allocation17_spill] sm:$0xff] %v9489_v41  ;;  %v359_v47 = vrot.slane %v245_v30, %v9501_v46  ;;  %v370_v51 = vrot.slane %v245_v30, %v9505_v48  ;;  %s9307_s29 = smov 26   ;;  %s9308_s30 = smov 28  }
  0x35   : > { %15588 = vst [vmem:[#allocation18_spill] sm:$0xff] %v9493_v42  ;;  %15589 = vst [vmem:[#allocation19_spill] sm:$0xff] %v9497_v44  ;;  %v238_v53 = vadd.f32 %v9509_v50, %v9507_v49  ;;  %v381_v54 = vrot.slane %v245_v30, %v9513_v52  ;;  %v9533_v61 = vsub.f32 %v9520_v57, %v9523_v58  ;;  %v9567_v30 = vld [vmem:[%s9390_s15 + $0xf0] sm:$0xff]  ;;  %s9309_s2 = smov 30   ;;  %vm4503_vm2 = vcmask 31744   ;;  %s9099_s3 = sshll.u32 %s9280_s9, 2 }
  0x36   : > { %15590 = vst [vmem:[#allocation20_spill] sm:$0xff] %v9501_v46  ;;  %15591 = vst [vmem:[#allocation21_spill] sm:$0xff] %v9505_v48  ;;  %v9537_v62 = vsub.f32 %v9526_v59, %v9529_v60  ;;  %v9546_v5 = vadd.f32 %v9422_v17, %v9419_v16  ;;  %v9550_v8 = vadd.f32 %v9436_v22, %v9425_v18  ;;  %v9558_v17 = vld [vmem:[%s9390_s15 + $0xc0] sm:$0xff]  ;;  %v9561_v18 = vld [vmem:[%s9390_s15 + $0xd0] sm:$0xff]  ;;  %vm4512_vm3 = vcmask 48128   ;;  %p12124_p7 = scmp.lt.s32.totalorder %s9099_s3, 7 }
  0x37   : > { %15592 = vst [vmem:[#allocation22_spill] sm:$0xff] %v9513_v52  ;;  %v246_v55 = vmul.f32 0.5, %v238_v53  ;;  %15593 = vst [vmem:[#allocation23_spill] sm:$0xff] %v9533_v61  ;;  %v9564_v22 = vld [vmem:[%s9390_s15 + $0xe0] sm:$0xff]  ;;  %v9584_v53 = vadd.f32 %v9446_v25, %v9443_v24  ;;  %vm4521_vm4 = vcmask 64512   ;;  %vm4530_vm5 = vcmask 80896  }
  0x38   : > { %321 = vbcast.lane.b32.xlu1 %v315_v32, 264  ;;  %310 = vbcast.lane.b32.xlu0 %v304_v33, 264  ;;  %15594 = vst [vmem:[#allocation24_spill] sm:$0xff] %v9537_v62  ;;  %v239_v12 = vadd.f32 %v9550_v8, %v9546_v5  ;;  %v9571_v32 = vsub.f32 %v9558_v17, %v9561_v18  ;;  %vm4539_vm6 = vcmask 97280   ;;  %vm4548_vm7 = vcmask 113664   ;;  %s16921_s3 = smov (!%p12124_p7, %s9099_s3), 7 }
  0x39   : > { %v392_v56 = vrot.slane %v246_v55, %v9433_v21  ;;  %v403_v63 = vrot.slane %v246_v55, %v9430_v20  ;;  %v414_v0 = vrot.slane %v246_v55, %v9469_v34  ;;  %v425_v1 = vrot.slane %v246_v55, %v9479_v38  ;;  %s9130_s9 = sshll.u32 %s16921_s3, 4  ;;  %s9310_s14 = smov 32  }
  0x3a   : > { %v436_v2 = vrot.slane %v246_v55, %v9497_v44  ;;  %v447_v3 = vrot.slane %v246_v55, %v9501_v46  ;;  %v458_v9 = vrot.slane %v246_v55, %v9505_v48  ;;  %v469_v13 = vrot.slane %v246_v55, %v9513_v52  ;;  %15595 = vst [vmem:[#allocation25_spill] sm:$0xff] %v9571_v32  ;;  %s12227_s12 = scalar_lea.vmem %s15258_s1, %s9130_s9 }
  0x3b   : > { %v247_v19 = vmul.f32 0.5, %v239_v12  ;;  %v9575_v33 = vsub.f32 %v9564_v22, %v9567_v30  ;;  %v9706_v11 = vadd.f32 %v9567_v30, %v9564_v22  ;;  %vm4557_vm8 = vcmask 130048  }
  0x3c   : > { %332 = vbcast.lane.b32.xlu1 %v326_v37, 264  ;;  %328 = vbcast.lane.b32.xlu0 %v326_v37, 256  ;;  %vm4566_vm9 = vcmask 146432   ;;  %vm4575_vm10 = vcmask 162816   ;;  %vm4584_vm11 = vcmask 179200   ;;  %vm15473_vm12 = vcmask 195584  }
  0x3d   : > { %v480_v16 = vrot.slane %v247_v19, %v9433_v21  ;;  %15596 = vst [vmem:[#allocation26_spill] sm:$0xff] %v9575_v33  ;;  %v491_v37 = vrot.slane %v247_v19, %v9430_v20  ;;  %v546_v55 = vrot.slane %v247_v19, %v9505_v48  ;;  %15601 = vst [vmem:[#allocation31_spill] sm:$0xff] %v9706_v11  ;;  %vm15464_vm13 = vcmask 211968  }
  0x3e   : > { %vm15455_vm14 = vcmask 228352   ;;  %vm15454_vm15 = vcmask 244736  }
  0x40   : > { %343 = vbcast.lane.b32.xlu1 %v337_v43, 264  ;;  %339 = vbcast.lane.b32.xlu0 %v337_v43, 256  ;;  %v502_v43 = vrot.slane %v247_v19, %v9469_v34 }
  0x44   : > { %354 = vbcast.lane.b32.xlu1 %v348_v45, 264  ;;  %350 = vbcast.lane.b32.xlu0 %v348_v45, 256  ;;  %v513_v45 = vrot.slane %v247_v19, %v9479_v38 }
  0x48   : > { %365 = vbcast.lane.b32.xlu1 %v359_v47, 264  ;;  %361 = vbcast.lane.b32.xlu0 %v359_v47, 256  ;;  %v524_v47 = vrot.slane %v247_v19, %v9497_v44 }
  0x4c   : > { %376 = vbcast.lane.b32.xlu1 %v370_v51, 264  ;;  %372 = vbcast.lane.b32.xlu0 %v370_v51, 256  ;;  %v535_v51 = vrot.slane %v247_v19, %v9501_v46 }
  0x50   : > { %387 = vbcast.lane.b32.xlu1 %v381_v54, 264  ;;  %383 = vbcast.lane.b32.xlu0 %v381_v54, 256  ;;  %v9588_v54 = vadd.f32 %v9456_v28, %v9453_v27 }
  0x54   : > { %398 = vbcast.lane.b32.xlu1 %v392_v56, 264  ;;  %394 = vbcast.lane.b32.xlu0 %v392_v56, 256  ;;  %v240_v56 = vadd.f32 %v9588_v54, %v9584_v53 }
  0x58   : > { %409 = vbcast.lane.b32.xlu1 %v403_v63, 264  ;;  %405 = vbcast.lane.b32.xlu0 %v403_v63, 256  ;;  %v557_v63 = vrot.slane %v247_v19, %v9513_v52 }
  0x5c   : > { %420 = vbcast.lane.b32.xlu1 %v414_v0, 264  ;;  %416 = vbcast.lane.b32.xlu0 %v414_v0, 256  ;;  %v248_v0 = vmul.f32 0.5, %v240_v56 }
  0x5e   : > { %v568_v24 = vrot.slane %v248_v0, %v9433_v21  ;;  %v579_v25 = vrot.slane %v248_v0, %v9430_v20  ;;  %v590_v27 = vrot.slane %v248_v0, %v9469_v34  ;;  %v601_v28 = vrot.slane %v248_v0, %v9479_v38 }
  0x5f   : > { %v634_v19 = vrot.slane %v248_v0, %v9505_v48 }
  0x60   : > { %431 = vbcast.lane.b32.xlu1 %v425_v1, 264  ;;  %427 = vbcast.lane.b32.xlu0 %v425_v1, 256  ;;  %v612_v1 = vrot.slane %v248_v0, %v9497_v44 }
  0x64   : > { %442 = vbcast.lane.b32.xlu1 %v436_v2, 264  ;;  %438 = vbcast.lane.b32.xlu0 %v436_v2, 256  ;;  %v623_v2 = vrot.slane %v248_v0, %v9501_v46 }
  0x68   : > { %453 = vbcast.lane.b32.xlu1 %v447_v3, 264  ;;  %449 = vbcast.lane.b32.xlu0 %v447_v3, 256  ;;  %v9602_v3 = vadd.f32 %v9475_v36, %v9472_v35  ;;  %v645_v35 = vrot.slane %v248_v0, %v9513_v52 }
  0x6c   : > { %464 = vbcast.lane.b32.xlu1 %v458_v9, 264  ;;  %460 = vbcast.lane.b32.xlu0 %v458_v9, 256  ;;  %v9606_v9 = vadd.f32 %v9485_v40, %v9482_v39 }
  0x70   : > { %475 = vbcast.lane.b32.xlu1 %v469_v13, 264  ;;  %471 = vbcast.lane.b32.xlu0 %v469_v13, 256 }
  0x74   : > { %486 = vbcast.lane.b32.xlu1 %v480_v16, 264  ;;  %482 = vbcast.lane.b32.xlu0 %v480_v16, 256  ;;  %v241_v16 = vadd.f32 %v9606_v9, %v9602_v3 }
  0x76   : > { %v249_v36 = vmul.f32 0.5, %v241_v16 }
  0x78   : > { %497 = vbcast.lane.b32.xlu1 %v491_v37, 264  ;;  %493 = vbcast.lane.b32.xlu0 %v491_v37, 256  ;;  %v678_v0 = vrot.slane %v249_v36, %v9469_v34  ;;  %v722_v33 = vrot.slane %v249_v36, %v9505_v48 }
  0x7c   : > { %508 = vbcast.lane.b32.xlu1 %v502_v43, 264  ;;  %504 = vbcast.lane.b32.xlu0 %v502_v43, 256 }
  0x80   : > { %519 = vbcast.lane.b32.xlu1 %v513_v45, 264  ;;  %515 = vbcast.lane.b32.xlu0 %v513_v45, 256  ;;  %v656_v45 = vrot.slane %v249_v36, %v9433_v21 }
  0x84   : > { %530 = vbcast.lane.b32.xlu1 %v524_v47, 264  ;;  %526 = vbcast.lane.b32.xlu0 %v524_v47, 256 }
  0x88   : > { %541 = vbcast.lane.b32.xlu1 %v535_v51, 264  ;;  %537 = vbcast.lane.b32.xlu0 %v535_v51, 256 }
  0x8c   : > { %552 = vbcast.lane.b32.xlu1 %v546_v55, 264  ;;  %548 = vbcast.lane.b32.xlu0 %v546_v55, 256  ;;  %v667_v55 = vrot.slane %v249_v36, %v9430_v20 }
  0x90   : > { %563 = vbcast.lane.b32.xlu1 %v557_v63, 264  ;;  %559 = vbcast.lane.b32.xlu0 %v557_v63, 256 }
  0x94   : > { %574 = vbcast.lane.b32.xlu1 %v568_v24, 264  ;;  %570 = vbcast.lane.b32.xlu0 %v568_v24, 256 }
  0x98   : > { %585 = vbcast.lane.b32.xlu1 %v579_v25, 264  ;;  %581 = vbcast.lane.b32.xlu0 %v579_v25, 256 }
  0x9c   : > { %596 = vbcast.lane.b32.xlu1 %v590_v27, 264  ;;  %592 = vbcast.lane.b32.xlu0 %v590_v27, 256  ;;  %v689_v27 = vrot.slane %v249_v36, %v9479_v38 }
  0xa0   : > { %607 = vbcast.lane.b32.xlu1 %v601_v28, 264  ;;  %603 = vbcast.lane.b32.xlu0 %v601_v28, 256 }
  0xa4   : > { %618 = vbcast.lane.b32.xlu1 %v612_v1, 264  ;;  %614 = vbcast.lane.b32.xlu0 %v612_v1, 256 }
  0xa6   : > { %v9608_v12 = vpop.permute.xlu1 %317  ;;  %v9610_v13 = vpop.permute.xlu0 %306 }
  0xa8   : > { %629 = vbcast.lane.b32.xlu1 %v623_v2, 264  ;;  %625 = vbcast.lane.b32.xlu0 %v623_v2, 256  ;;  %v700_v2 = vrot.slane %v249_v36, %v9497_v44 }
  0xaa   : > { %v9615_v37 = vpop.permute.xlu1 %321  ;;  %v9617_v43 = vpop.permute.xlu0 %310 }
  0xac   : > { %640 = vbcast.lane.b32.xlu1 %v634_v19, 264  ;;  %636 = vbcast.lane.b32.xlu0 %v634_v19, 256 }
  0xae   : > { %v9620_v39 = vpop.permute.xlu1 %332  ;;  %v9622_v40 = vpop.permute.xlu0 %328 }
  0xb0   : > { %651 = vbcast.lane.b32.xlu1 %v645_v35, 264  ;;  %647 = vbcast.lane.b32.xlu0 %v645_v35, 256  ;;  %v711_v35 = vrot.slane %v249_v36, %v9501_v46 }
  0xb2   : > { %v9625_v47 = vpop.permute.xlu1 %343  ;;  %v9627_v51 = vpop.permute.xlu0 %339 }
  0xb4   : > { %662 = vbcast.lane.b32.xlu1 %v656_v45, 264  ;;  %658 = vbcast.lane.b32.xlu0 %v656_v45, 256  ;;  %v9652_v45 = vadd.f32 %v9523_v58, %v9520_v57  ;;  %v733_v57 = vrot.slane %v249_v36, %v9513_v52 }
  0xb6   : > { %v9630_v56 = vpop.permute.xlu1 %354  ;;  %v9632_v63 = vpop.permute.xlu0 %350 }
  0xb8   : > { %673 = vbcast.lane.b32.xlu1 %v667_v55, 264  ;;  %669 = vbcast.lane.b32.xlu0 %v667_v55, 256  ;;  %v9656_v55 = vadd.f32 %v9529_v60, %v9526_v59 }
  0xba   : > { %v9635_v24 = vpop.permute.xlu1 %365  ;;  %v9637_v25 = vpop.permute.xlu0 %361 }
  0xbc   : > { %684 = vbcast.lane.b32.xlu1 %v678_v0, 264  ;;  %680 = vbcast.lane.b32.xlu0 %v678_v0, 256 }
  0xbe   : > { %v9640_v28 = vpop.permute.xlu1 %376  ;;  %v9642_v1 = vpop.permute.xlu0 %372 }
  0xc0   : > { %695 = vbcast.lane.b32.xlu1 %v689_v27, 264  ;;  %691 = vbcast.lane.b32.xlu0 %v689_v27, 256 }
  0xc2   : > { %v9645_v19 = vpop.permute.xlu1 %387  ;;  %v9647_v16 = vpop.permute.xlu0 %383 }
  0xc4   : > { %706 = vbcast.lane.b32.xlu1 %v700_v2, 264  ;;  %702 = vbcast.lane.b32.xlu0 %v700_v2, 256  ;;  %v242_v2 = vadd.f32 %v9656_v55, %v9652_v45 }
  0xc6   : > { %v9658_v0 = vpop.permute.xlu1 %398  ;;  %v9660_v27 = vpop.permute.xlu0 %394  ;;  %v250_v58 = vmul.f32 0.5, %v242_v2 }
  0xc8   : > { %717 = vbcast.lane.b32.xlu1 %v711_v35, 264  ;;  %713 = vbcast.lane.b32.xlu0 %v711_v35, 256  ;;  %v744_v35 = vrot.slane %v250_v58, %v9433_v21  ;;  %v755_v41 = vrot.slane %v250_v58, %v9430_v20  ;;  %v766_v2 = vrot.slane %v250_v58, %v9469_v34 }
  0xc9   : > { %v777_v29 = vrot.slane %v250_v58, %v9479_v38  ;;  %v788_v23 = vrot.slane %v250_v58, %v9497_v44  ;;  %v799_v14 = vrot.slane %v250_v58, %v9501_v46 }
  0xca   : > { %v9665_v32 = vpop.permute.xlu1 %409  ;;  %v9667_v62 = vpop.permute.xlu0 %405 }
  0xcc   : > { %728 = vbcast.lane.b32.xlu1 %v722_v33, 264  ;;  %724 = vbcast.lane.b32.xlu0 %v722_v33, 256 }
  0xce   : > { %v9670_v59 = vpop.permute.xlu1 %420  ;;  %v9672_v60 = vpop.permute.xlu0 %416 }
  0xd0   : > { %739 = vbcast.lane.b32.xlu1 %v733_v57, 264  ;;  %735 = vbcast.lane.b32.xlu0 %v733_v57, 256 }
  0xd2   : > { %v9675_v61 = vpop.permute.xlu1 %431  ;;  %v9677_v42 = vpop.permute.xlu0 %427 }
  0xd4   : > { %750 = vbcast.lane.b32.xlu1 %v744_v35, 264  ;;  %746 = vbcast.lane.b32.xlu0 %v744_v35, 256 }
  0xd6   : > { %v9680_v33 = vpop.permute.xlu1 %442  ;;  %v9682_v36 = vpop.permute.xlu0 %438 }
  0xd8   : > { %761 = vbcast.lane.b32.xlu1 %v755_v41, 264  ;;  %757 = vbcast.lane.b32.xlu0 %v755_v41, 256 }
  0xda   : > { %v9685_v31 = vpop.permute.xlu1 %453  ;;  %v9687_v57 = vpop.permute.xlu0 %449 }
  0xdb   : > { %15597 = vst [vmem:[#allocation27_spill] sm:$0xff] %v9687_v57 }
  0xdc   : > { %772 = vbcast.lane.b32.xlu1 %v766_v2, 264  ;;  %768 = vbcast.lane.b32.xlu0 %v766_v2, 256  ;;  %v9702_v2 = vadd.f32 %v9561_v18, %v9558_v17  ;;  %v821_v17 = vrot.slane %v250_v58, %v9513_v52 }
  0xde   : > { %v9690_v26 = vpop.permute.xlu1 %464  ;;  %v9692_v35 = vpop.permute.xlu0 %460  ;;  %15600 = vst [vmem:[#allocation30_spill] sm:$0xff] %v9702_v2 }
  0xe0   : > { %783 = vbcast.lane.b32.xlu1 %v777_v29, 264  ;;  %779 = vbcast.lane.b32.xlu0 %v777_v29, 256 }
  0xe2   : > { %v9695_v15 = vpop.permute.xlu1 %475  ;;  %v9697_v41 = vpop.permute.xlu0 %471 }
  0xe3   : > { %15598 = vst [vmem:[#allocation28_spill] sm:$0xff] %v9695_v15  ;;  %15599 = vst [vmem:[#allocation29_spill] sm:$0xff] %v9697_v41  ;;  %v810_v41 = vrot.slane %v250_v58, %v9505_v48 }
  0xe4   : > { %794 = vbcast.lane.b32.xlu1 %v788_v23, 264  ;;  %790 = vbcast.lane.b32.xlu0 %v788_v23, 256  ;;  %v243_v23 = vadd.f32 %v9706_v11, %v9702_v2 }
  0xe6   : > { %v9708_v7 = vpop.permute.xlu1 %486  ;;  %v9710_v29 = vpop.permute.xlu0 %482  ;;  %v251_v18 = vmul.f32 0.5, %v243_v23 }
  0xe7   : > { %15602 = vst [vmem:[#allocation32_spill] sm:$0xff] %v9708_v7  ;;  %15603 = vst [vmem:[#allocation33_spill] sm:$0xff] %v9710_v29 }
  0xe8   : > { %805 = vbcast.lane.b32.xlu1 %v799_v14, 264  ;;  %801 = vbcast.lane.b32.xlu0 %v799_v14, 256  ;;  %v832_v14 = vrot.slane %v251_v18, %v9433_v21  ;;  %v854_v23 = vrot.slane %v251_v18, %v9469_v34  ;;  %v898_v11 = vrot.slane %v251_v18, %v9505_v48 }
  0xea   : > { %v9715_v15 = vpop.permute.xlu1 %497  ;;  %v9717_v57 = vpop.permute.xlu0 %493 }
  0xeb   : > { %15604 = vst [vmem:[#allocation34_spill] sm:$0xff] %v9715_v15  ;;  %15605 = vst [vmem:[#allocation35_spill] sm:$0xff] %v9717_v57  ;;  %v843_v57 = vrot.slane %v251_v18, %v9430_v20  ;;  %v177_v15 = vld [vmem:[%s9390_s15 + $0xc8] sm:$0xff] }
  0xec   : > { %816 = vbcast.lane.b32.xlu1 %v810_v41, 264  ;;  %812 = vbcast.lane.b32.xlu0 %v810_v41, 256 }
  0xee   : > { %v9720_v22 = vpop.permute.xlu1 %508  ;;  %v9722_v30 = vpop.permute.xlu0 %504 }
  0xef   : > { %15606 = vst [vmem:[#allocation36_spill] sm:$0xff] %v9720_v22  ;;  %15607 = vst [vmem:[#allocation37_spill] sm:$0xff] %v9722_v30  ;;  %v9117_v30 = vld [vmem:[%s9390_s15 + $0xe8] sm:$0xff]  ;;  %v9125_v22 = vld [vmem:[%s9390_s15 + $0xf8] sm:$0xff] }
  0xf0   : > { %827 = vbcast.lane.b32.xlu1 %v821_v17, 264  ;;  %823 = vbcast.lane.b32.xlu0 %v821_v17, 256 }
  0xf2   : > { %v9725_v29 = vpop.permute.xlu1 %519  ;;  %v9727_v7 = vpop.permute.xlu0 %515 }
  0xf3   : > { %15608 = vst [vmem:[#allocation38_spill] sm:$0xff] %v9725_v29  ;;  %15609 = vst [vmem:[#allocation39_spill] sm:$0xff] %v9727_v7 }
  0xf4   : > { %838 = vbcast.lane.b32.xlu1 %v832_v14, 264  ;;  %834 = vbcast.lane.b32.xlu0 %v832_v14, 256  ;;  %v865_v14 = vrot.slane %v251_v18, %v9479_v38 }
  0xf6   : > { %v9730_v41 = vpop.permute.xlu1 %530  ;;  %v9732_v58 = vpop.permute.xlu0 %526 }
  0xf7   : > { %15610 = vst [vmem:[#allocation40_spill] sm:$0xff] %v9730_v41  ;;  %15611 = vst [vmem:[#allocation41_spill] sm:$0xff] %v9732_v58  ;;  %v876_v58 = vrot.slane %v251_v18, %v9497_v44 }
  0xf8   : > { %849 = vbcast.lane.b32.xlu1 %v843_v57, 264  ;;  %845 = vbcast.lane.b32.xlu0 %v843_v57, 256  ;;  %v9109_v57 = vld [vmem:[%s9390_s15 + $0xd8] sm:$0xff] }
  0xfa   : > { %v9735_v17 = vpop.permute.xlu1 %541  ;;  %v9737_v29 = vpop.permute.xlu0 %537 }
  0xfb   : > { %15612 = vst [vmem:[#allocation42_spill] sm:$0xff] %v9735_v17  ;;  %15613 = vst [vmem:[#allocation43_spill] sm:$0xff] %v9737_v29  ;;  %v9754_v29 = vadd.f32 %v9109_v57, %v177_v15  ;;  %v909_v15 = vrot.slane %v251_v18, %v9513_v52 }
  0xfc   : > { %860 = vbcast.lane.b32.xlu1 %v854_v23, 264  ;;  %856 = vbcast.lane.b32.xlu0 %v854_v23, 256  ;;  %v887_v23 = vrot.slane %v251_v18, %v9501_v46 }
  0xfe   : > { %v9740_v7 = vpop.permute.xlu1 %552  ;;  %v9742_v41 = vpop.permute.xlu0 %548 }
  0xff   : > { %15614 = vst [vmem:[#allocation44_spill] sm:$0xff] %v9740_v7  ;;  %15615 = vst [vmem:[#allocation45_spill] sm:$0xff] %v9742_v41  ;;  %v9756_v7 = vadd.f32 %v9125_v22, %v9117_v30 }
 0x100   : > { %871 = vbcast.lane.b32.xlu1 %v865_v14, 264  ;;  %867 = vbcast.lane.b32.xlu0 %v865_v14, 256 }
 0x102   : > { %v9749_v2 = vpop.permute.xlu1 %563  ;;  %v9751_v17 = vpop.permute.xlu0 %559 }
 0x103   : > { %15616 = vst [vmem:[#allocation46_spill] sm:$0xff] %v9749_v2  ;;  %15617 = vst [vmem:[#allocation47_spill] sm:$0xff] %v9751_v17  ;;  %v244_v2 = vadd.f32 %v9756_v7, %v9754_v29 }
 0x104   : > { %882 = vbcast.lane.b32.xlu1 %v876_v58, 264  ;;  %878 = vbcast.lane.b32.xlu0 %v876_v58, 256 }
 0x105   : > { %v252_v22 = vmul.f32 0.5, %v244_v2 }
 0x106   : > { %v9758_v41 = vpop.permute.xlu1 %574  ;;  %v9760_v14 = vpop.permute.xlu0 %570 }
 0x107   : > { %15618 = vst [vmem:[#allocation48_spill] sm:$0xff] %v9758_v41  ;;  %15619 = vst [vmem:[#allocation49_spill] sm:$0xff] %v9760_v14  ;;  %v942_v2 = vrot.slane %v252_v22, %v9469_v34 }
 0x108   : > { %893 = vbcast.lane.b32.xlu1 %v887_v23, 264  ;;  %889 = vbcast.lane.b32.xlu0 %v887_v23, 256  ;;  %v920_v23 = vrot.slane %v252_v22, %v9433_v21 }
 0x10a   : > { %v9765_v17 = vpop.permute.xlu1 %585  ;;  %v9767_v58 = vpop.permute.xlu0 %581 }
 0x10b   : > { %15620 = vst [vmem:[#allocation50_spill] sm:$0xff] %v9765_v17  ;;  %15621 = vst [vmem:[#allocation51_spill] sm:$0xff] %v9767_v58  ;;  %v931_v58 = vrot.slane %v252_v22, %v9430_v20 }
 0x10c   : > { %904 = vbcast.lane.b32.xlu1 %v898_v11, 264  ;;  %900 = vbcast.lane.b32.xlu0 %v898_v11, 256 }
 0x10e   : > { %v9770_v30 = vpop.permute.xlu1 %596  ;;  %v9772_v57 = vpop.permute.xlu0 %592 }
 0x10f   : > { %15622 = vst [vmem:[#allocation52_spill] sm:$0xff] %v9772_v57 }
 0x110   : > { %915 = vbcast.lane.b32.xlu1 %v909_v15, 264  ;;  %911 = vbcast.lane.b32.xlu0 %v909_v15, 256 }
 0x112   : > { %v9775_v14 = vpop.permute.xlu1 %607  ;;  %v9777_v41 = vpop.permute.xlu0 %603 }
 0x113   : > { %15623 = vst [vmem:[#allocation53_spill] sm:$0xff] %v9775_v14  ;;  %15624 = vst [vmem:[#allocation54_spill] sm:$0xff] %v9777_v41  ;;  %v953_v41 = vrot.slane %v252_v22, %v9479_v38 }
 0x114   : > { %926 = vbcast.lane.b32.xlu1 %v920_v23, 264  ;;  %922 = vbcast.lane.b32.xlu0 %v920_v23, 256 }
 0x116   : > { %v9780_v11 = vpop.permute.xlu1 %618  ;;  %v9782_v18 = vpop.permute.xlu0 %614 }
 0x117   : > { %15625 = vst [vmem:[#allocation55_spill] sm:$0xff] %v9780_v11  ;;  %15626 = vst [vmem:[#allocation56_spill] sm:$0xff] %v9782_v18  ;;  %v964_v18 = vrot.slane %v252_v22, %v9497_v44 }
 0x118   : > { %937 = vbcast.lane.b32.xlu1 %v931_v58, 264  ;;  %933 = vbcast.lane.b32.xlu0 %v931_v58, 256 }
 0x11a   : > { %v9785_v17 = vpop.permute.xlu1 %629  ;;  %v9787_v15 = vpop.permute.xlu0 %625 }
 0x11b   : > { %15627 = vst [vmem:[#allocation57_spill] sm:$0xff] %v9785_v17  ;;  %15628 = vst [vmem:[#allocation58_spill] sm:$0xff] %v9787_v15  ;;  %v975_v15 = vrot.slane %v252_v22, %v9501_v46 }
 0x11c   : > { %948 = vbcast.lane.b32.xlu1 %v942_v2, 264  ;;  %944 = vbcast.lane.b32.xlu0 %v942_v2, 256 }
 0x11e   : > { %v9790_v14 = vpop.permute.xlu1 %640  ;;  %v9792_v23 = vpop.permute.xlu0 %636 }
 0x11f   : > { %15629 = vst [vmem:[#allocation59_spill] sm:$0xff] %v9790_v14  ;;  %15630 = vst [vmem:[#allocation60_spill] sm:$0xff] %v9792_v23  ;;  %v986_v23 = vrot.slane %v252_v22, %v9505_v48 }
 0x120   : > { %959 = vbcast.lane.b32.xlu1 %v953_v41, 264  ;;  %955 = vbcast.lane.b32.xlu0 %v953_v41, 256  ;;  %v253_v41 = vsub.f32 %v9402_v6, %v9408_v10 }
 0x122   : > { %v9795_v11 = vpop.permute.xlu1 %651  ;;  %v9797_v58 = vpop.permute.xlu0 %647 }
 0x123   : > { %15631 = vst [vmem:[#allocation61_spill] sm:$0xff] %v9795_v11  ;;  %15632 = vst [vmem:[#allocation62_spill] sm:$0xff] %v9797_v58  ;;  %v261_v58 = vmul.f32 0.5, %v253_v41 }
 0x124   : > { %970 = vbcast.lane.b32.xlu1 %v964_v18, 264  ;;  %966 = vbcast.lane.b32.xlu0 %v964_v18, 256  ;;  %v997_v18 = vrot.slane %v252_v22, %v9513_v52 }
 0x125   : > { %v1019_v10 = vrot.slane %v261_v58, %v9430_v20  ;;  %v1030_v41 = vrot.slane %v261_v58, %v9469_v34 }
 0x126   : > { %v9800_v17 = vpop.permute.xlu1 %662  ;;  %v9802_v2 = vpop.permute.xlu0 %658 }
 0x127   : > { %15633 = vst [vmem:[#allocation63_spill] sm:$0xff] %v9800_v17  ;;  %15634 = vst [vmem:[#allocation64_spill] sm:$0xff] %v9802_v2 }
 0x128   : > { %981 = vbcast.lane.b32.xlu1 %v975_v15, 264  ;;  %977 = vbcast.lane.b32.xlu0 %v975_v15, 256  ;;  %v1008_v15 = vrot.slane %v261_v58, %v9433_v21 }
 0x12a   : > { %v9807_v14 = vpop.permute.xlu1 %673  ;;  %v9809_v11 = vpop.permute.xlu0 %669 }
 0x12b   : > { %15635 = vst [vmem:[#allocation65_spill] sm:$0xff] %v9807_v14  ;;  %15636 = vst [vmem:[#allocation66_spill] sm:$0xff] %v9809_v11 }
 0x12c   : > { %992 = vbcast.lane.b32.xlu1 %v986_v23, 264  ;;  %988 = vbcast.lane.b32.xlu0 %v986_v23, 256 }
 0x12e   : > { %v9812_v57 = vpop.permute.xlu1 %684  ;;  %v9814_v17 = vpop.permute.xlu0 %680 }
 0x130   : > { %1003 = vbcast.lane.b32.xlu1 %v997_v18, 264  ;;  %999 = vbcast.lane.b32.xlu0 %v997_v18, 256 }
 0x132   : > { %v9817_v2 = vpop.permute.xlu1 %695  ;;  %v9819_v6 = vpop.permute.xlu0 %691 }
 0x133   : > { %15637 = vst [vmem:[#allocation67_spill] sm:$0xff] %v9817_v2  ;;  %15638 = vst [vmem:[#allocation68_spill] sm:$0xff] %v9819_v6  ;;  %v1041_v6 = vrot.slane %v261_v58, %v9479_v38 }
 0x134   : > { %1014 = vbcast.lane.b32.xlu1 %v1008_v15, 264  ;;  %1010 = vbcast.lane.b32.xlu0 %v1008_v15, 256 }
 0x136   : > { %v9822_v23 = vpop.permute.xlu1 %706  ;;  %v9824_v22 = vpop.permute.xlu0 %702 }
 0x137   : > { %15639 = vst [vmem:[#allocation69_spill] sm:$0xff] %v9822_v23  ;;  %15640 = vst [vmem:[#allocation70_spill] sm:$0xff] %v9824_v22  ;;  %v1052_v22 = vrot.slane %v261_v58, %v9497_v44 }
 0x138   : > { %1025 = vbcast.lane.b32.xlu1 %v1019_v10, 264  ;;  %1021 = vbcast.lane.b32.xlu0 %v1019_v10, 256 }
 0x13a   : > { %v9827_v11 = vpop.permute.xlu1 %717  ;;  %v9829_v18 = vpop.permute.xlu0 %713 }
 0x13b   : > { %15641 = vst [vmem:[#allocation71_spill] sm:$0xff] %v9827_v11  ;;  %15642 = vst [vmem:[#allocation72_spill] sm:$0xff] %v9829_v18  ;;  %v1063_v18 = vrot.slane %v261_v58, %v9501_v46 }
 0x13c   : > { %1036 = vbcast.lane.b32.xlu1 %v1030_v41, 264  ;;  %1032 = vbcast.lane.b32.xlu0 %v1030_v41, 256 }
 0x13e   : > { %v9832_v2 = vpop.permute.xlu1 %728  ;;  %v9834_v15 = vpop.permute.xlu0 %724 }
 0x13f   : > { %15643 = vst [vmem:[#allocation73_spill] sm:$0xff] %v9832_v2  ;;  %15644 = vst [vmem:[#allocation74_spill] sm:$0xff] %v9834_v15  ;;  %v1074_v15 = vrot.slane %v261_v58, %v9505_v48 }
 0x140   : > { %1047 = vbcast.lane.b32.xlu1 %v1041_v6, 264  ;;  %1043 = vbcast.lane.b32.xlu0 %v1041_v6, 256  ;;  %v254_v6 = vsub.f32 %v9507_v49, %v9509_v50 }
 0x142   : > { %v9837_v23 = vpop.permute.xlu1 %739  ;;  %v9839_v10 = vpop.permute.xlu0 %735 }
 0x143   : > { %15645 = vst [vmem:[#allocation75_spill] sm:$0xff] %v9837_v23  ;;  %15646 = vst [vmem:[#allocation76_spill] sm:$0xff] %v9839_v10  ;;  %v262_v10 = vmul.f32 0.5, %v254_v6 }
 0x144   : > { %1058 = vbcast.lane.b32.xlu1 %v1052_v22, 264  ;;  %1054 = vbcast.lane.b32.xlu0 %v1052_v22, 256  ;;  %v1085_v22 = vrot.slane %v261_v58, %v9513_v52 }
 0x145   : > { %v1107_v50 = vrot.slane %v262_v10, %v9430_v20  ;;  %v1118_v6 = vrot.slane %v262_v10, %v9469_v34 }
 0x146   : > { %v9842_v11 = vpop.permute.xlu1 %750  ;;  %v9844_v41 = vpop.permute.xlu0 %746 }
 0x147   : > { %15647 = vst [vmem:[#allocation77_spill] sm:$0xff] %v9842_v11  ;;  %15648 = vst [vmem:[#allocation78_spill] sm:$0xff] %v9844_v41 }
 0x148   : > { %1069 = vbcast.lane.b32.xlu1 %v1063_v18, 264  ;;  %1065 = vbcast.lane.b32.xlu0 %v1063_v18, 256  ;;  %v1096_v18 = vrot.slane %v262_v10, %v9433_v21 }
 0x14a   : > { %v9849_v2 = vpop.permute.xlu1 %761  ;;  %v9851_v23 = vpop.permute.xlu0 %757 }
 0x14b   : > { %15649 = vst [vmem:[#allocation79_spill] sm:$0xff] %v9849_v2  ;;  %15650 = vst [vmem:[#allocation80_spill] sm:$0xff] %v9851_v23 }
 0x14c   : > { %1080 = vbcast.lane.b32.xlu1 %v1074_v15, 264  ;;  %1076 = vbcast.lane.b32.xlu0 %v1074_v15, 256 }
 0x14e   : > { %v9854_v14 = vpop.permute.xlu1 %772  ;;  %v9856_v11 = vpop.permute.xlu0 %768 }
 0x150   : > { %1091 = vbcast.lane.b32.xlu1 %v1085_v22, 264  ;;  %1087 = vbcast.lane.b32.xlu0 %v1085_v22, 256 }
 0x152   : > { %v9859_v41 = vpop.permute.xlu1 %783  ;;  %v9861_v49 = vpop.permute.xlu0 %779 }
 0x153   : > { %15651 = vst [vmem:[#allocation81_spill] sm:$0xff] %v9859_v41  ;;  %15652 = vst [vmem:[#allocation82_spill] sm:$0xff] %v9861_v49  ;;  %v1129_v49 = vrot.slane %v262_v10, %v9479_v38 }
 0x154   : > { %1102 = vbcast.lane.b32.xlu1 %v1096_v18, 264  ;;  %1098 = vbcast.lane.b32.xlu0 %v1096_v18, 256 }
 0x156   : > { %v9864_v15 = vpop.permute.xlu1 %794  ;;  %v9866_v58 = vpop.permute.xlu0 %790 }
 0x157   : > { %15653 = vst [vmem:[#allocation83_spill] sm:$0xff] %v9864_v15  ;;  %15654 = vst [vmem:[#allocation84_spill] sm:$0xff] %v9866_v58  ;;  %v1140_v58 = vrot.slane %v262_v10, %v9497_v44 }
 0x158   : > { %1113 = vbcast.lane.b32.xlu1 %v1107_v50, 264  ;;  %1109 = vbcast.lane.b32.xlu0 %v1107_v50, 256 }
 0x15a   : > { %v9869_v23 = vpop.permute.xlu1 %805  ;;  %v9871_v22 = vpop.permute.xlu0 %801 }
 0x15b   : > { %15655 = vst [vmem:[#allocation85_spill] sm:$0xff] %v9869_v23  ;;  %15656 = vst [vmem:[#allocation86_spill] sm:$0xff] %v9871_v22  ;;  %v1151_v22 = vrot.slane %v262_v10, %v9501_v46 }
 0x15c   : > { %1124 = vbcast.lane.b32.xlu1 %v1118_v6, 264  ;;  %1120 = vbcast.lane.b32.xlu0 %v1118_v6, 256 }
 0x15e   : > { %v9874_v41 = vpop.permute.xlu1 %816  ;;  %v9876_v18 = vpop.permute.xlu0 %812 }
 0x15f   : > { %15657 = vst [vmem:[#allocation87_spill] sm:$0xff] %v9874_v41  ;;  %15658 = vst [vmem:[#allocation88_spill] sm:$0xff] %v9876_v18  ;;  %v1162_v18 = vrot.slane %v262_v10, %v9505_v48 }
 0x160   : > { %1135 = vbcast.lane.b32.xlu1 %v1129_v49, 264  ;;  %1131 = vbcast.lane.b32.xlu0 %v1129_v49, 256  ;;  %v255_v49 = vsub.f32 %v9546_v5, %v9550_v8 }
 0x162   : > { %v9879_v15 = vpop.permute.xlu1 %827  ;;  %v9881_v50 = vpop.permute.xlu0 %823 }
 0x163   : > { %15659 = vst [vmem:[#allocation89_spill] sm:$0xff] %v9879_v15  ;;  %15660 = vst [vmem:[#allocation90_spill] sm:$0xff] %v9881_v50  ;;  %v263_v50 = vmul.f32 0.5, %v255_v49 }
 0x164   : > { %1146 = vbcast.lane.b32.xlu1 %v1140_v58, 264  ;;  %1142 = vbcast.lane.b32.xlu0 %v1140_v58, 256  ;;  %v1173_v58 = vrot.slane %v262_v10, %v9513_v52 }
 0x165   : > { %v1195_v8 = vrot.slane %v263_v50, %v9430_v20  ;;  %v1206_v49 = vrot.slane %v263_v50, %v9469_v34 }
 0x166   : > { %v9884_v23 = vpop.permute.xlu1 %838  ;;  %v9886_v6 = vpop.permute.xlu0 %834 }
 0x167   : > { %15661 = vst [vmem:[#allocation91_spill] sm:$0xff] %v9884_v23  ;;  %15662 = vst [vmem:[#allocation92_spill] sm:$0xff] %v9886_v6 }
 0x168   : > { %1157 = vbcast.lane.b32.xlu1 %v1151_v22, 264  ;;  %1153 = vbcast.lane.b32.xlu0 %v1151_v22, 256  ;;  %v1184_v22 = vrot.slane %v263_v50, %v9433_v21 }
 0x16a   : > { %v9891_v41 = vpop.permute.xlu1 %849  ;;  %v9893_v15 = vpop.permute.xlu0 %845 }
 0x16b   : > { %15663 = vst [vmem:[#allocation93_spill] sm:$0xff] %v9891_v41  ;;  %15664 = vst [vmem:[#allocation94_spill] sm:$0xff] %v9893_v15  ;;  %v1217_v15 = vrot.slane %v263_v50, %v9479_v38 }
 0x16c   : > { %1168 = vbcast.lane.b32.xlu1 %v1162_v18, 264  ;;  %1164 = vbcast.lane.b32.xlu0 %v1162_v18, 256 }
 0x16e   : > { %v9896_v2 = vpop.permute.xlu1 %860  ;;  %v9898_v23 = vpop.permute.xlu0 %856 }
 0x16f   : > { %15665 = vst [vmem:[#allocation95_spill] sm:$0xff] %v9896_v2  ;;  %15666 = vst [vmem:[#allocation96_spill] sm:$0xff] %v9898_v23 }
 0x170   : > { %1179 = vbcast.lane.b32.xlu1 %v1173_v58, 264  ;;  %1175 = vbcast.lane.b32.xlu0 %v1173_v58, 256 }
 0x172   : > { %v9901_v6 = vpop.permute.xlu1 %871  ;;  %v9903_v5 = vpop.permute.xlu0 %867 }
 0x173   : > { %15667 = vst [vmem:[#allocation97_spill] sm:$0xff] %v9901_v6  ;;  %15668 = vst [vmem:[#allocation98_spill] sm:$0xff] %v9903_v5 }
 0x174   : > { %1190 = vbcast.lane.b32.xlu1 %v1184_v22, 264  ;;  %1186 = vbcast.lane.b32.xlu0 %v1184_v22, 256 }
 0x176   : > { %v9906_v18 = vpop.permute.xlu1 %882  ;;  %v9908_v10 = vpop.permute.xlu0 %878 }
 0x177   : > { %15669 = vst [vmem:[#allocation99_spill] sm:$0xff] %v9906_v18  ;;  %15670 = vst [vmem:[#allocation100_spill] sm:$0xff] %v9908_v10  ;;  %v1228_v10 = vrot.slane %v263_v50, %v9497_v44 }
 0x178   : > { %1201 = vbcast.lane.b32.xlu1 %v1195_v8, 264  ;;  %1197 = vbcast.lane.b32.xlu0 %v1195_v8, 256 }
 0x17a   : > { %v9911_v23 = vpop.permute.xlu1 %893  ;;  %v9913_v58 = vpop.permute.xlu0 %889 }
 0x17b   : > { %15671 = vst [vmem:[#allocation101_spill] sm:$0xff] %v9911_v23  ;;  %15672 = vst [vmem:[#allocation102_spill] sm:$0xff] %v9913_v58  ;;  %v1239_v58 = vrot.slane %v263_v50, %v9501_v46 }
 0x17c   : > { %1212 = vbcast.lane.b32.xlu1 %v1206_v49, 264  ;;  %1208 = vbcast.lane.b32.xlu0 %v1206_v49, 256 }
 0x17e   : > { %v9916_v5 = vpop.permute.xlu1 %904  ;;  %v9918_v22 = vpop.permute.xlu0 %900 }
 0x17f   : > { %15673 = vst [vmem:[#allocation103_spill] sm:$0xff] %v9916_v5  ;;  %15674 = vst [vmem:[#allocation104_spill] sm:$0xff] %v9918_v22  ;;  %v1250_v22 = vrot.slane %v263_v50, %v9505_v48 }
 0x180   : > { %1223 = vbcast.lane.b32.xlu1 %v1217_v15, 264  ;;  %1219 = vbcast.lane.b32.xlu0 %v1217_v15, 256  ;;  %v256_v15 = vsub.f32 %v9584_v53, %v9588_v54 }
 0x182   : > { %v9921_v18 = vpop.permute.xlu1 %915  ;;  %v9923_v8 = vpop.permute.xlu0 %911 }
 0x183   : > { %15675 = vst [vmem:[#allocation105_spill] sm:$0xff] %v9921_v18  ;;  %15676 = vst [vmem:[#allocation106_spill] sm:$0xff] %v9923_v8  ;;  %v264_v8 = vmul.f32 0.5, %v256_v15 }
 0x184   : > { %1234 = vbcast.lane.b32.xlu1 %v1228_v10, 264  ;;  %1230 = vbcast.lane.b32.xlu0 %v1228_v10, 256  ;;  %v1261_v10 = vrot.slane %v263_v50, %v9513_v52 }
 0x185   : > { %v1283_v54 = vrot.slane %v264_v8, %v9430_v20  ;;  %v1294_v15 = vrot.slane %v264_v8, %v9469_v34 }
 0x186   : > { %v9926_v23 = vpop.permute.xlu1 %926  ;;  %v9928_v49 = vpop.permute.xlu0 %922 }
 0x187   : > { %15677 = vst [vmem:[#allocation107_spill] sm:$0xff] %v9926_v23  ;;  %15678 = vst [vmem:[#allocation108_spill] sm:$0xff] %v9928_v49 }
 0x188   : > { %1245 = vbcast.lane.b32.xlu1 %v1239_v58, 264  ;;  %1241 = vbcast.lane.b32.xlu0 %v1239_v58, 256  ;;  %v1272_v58 = vrot.slane %v264_v8, %v9433_v21 }
 0x18a   : > { %v9933_v5 = vpop.permute.xlu1 %937  ;;  %v9935_v18 = vpop.permute.xlu0 %933 }
 0x18b   : > { %15679 = vst [vmem:[#allocation109_spill] sm:$0xff] %v9933_v5  ;;  %15680 = vst [vmem:[#allocation110_spill] sm:$0xff] %v9935_v18  ;;  %v1305_v18 = vrot.slane %v264_v8, %v9479_v38 }
 0x18c   : > { %1256 = vbcast.lane.b32.xlu1 %v1250_v22, 264  ;;  %1252 = vbcast.lane.b32.xlu0 %v1250_v22, 256 }
 0x18e   : > { %v9938_v6 = vpop.permute.xlu1 %948  ;;  %v9940_v23 = vpop.permute.xlu0 %944 }
 0x18f   : > { %15681 = vst [vmem:[#allocation111_spill] sm:$0xff] %v9938_v6  ;;  %15682 = vst [vmem:[#allocation112_spill] sm:$0xff] %v9940_v23 }
 0x190   : > { %1267 = vbcast.lane.b32.xlu1 %v1261_v10, 264  ;;  %1263 = vbcast.lane.b32.xlu0 %v1261_v10, 256 }
 0x192   : > { %v9943_v49 = vpop.permute.xlu1 %959  ;;  %v9945_v53 = vpop.permute.xlu0 %955 }
 0x193   : > { %15683 = vst [vmem:[#allocation113_spill] sm:$0xff] %v9943_v49  ;;  %15684 = vst [vmem:[#allocation114_spill] sm:$0xff] %v9945_v53 }
 0x194   : > { %1278 = vbcast.lane.b32.xlu1 %v1272_v58, 264  ;;  %1274 = vbcast.lane.b32.xlu0 %v1272_v58, 256 }
 0x196   : > { %v9948_v22 = vpop.permute.xlu1 %970  ;;  %v9950_v50 = vpop.permute.xlu0 %966 }
 0x197   : > { %15685 = vst [vmem:[#allocation115_spill] sm:$0xff] %v9948_v22  ;;  %15686 = vst [vmem:[#allocation116_spill] sm:$0xff] %v9950_v50  ;;  %v1316_v50 = vrot.slane %v264_v8, %v9497_v44 }
 0x198   : > { %1289 = vbcast.lane.b32.xlu1 %v1283_v54, 264  ;;  %1285 = vbcast.lane.b32.xlu0 %v1283_v54, 256 }
 0x19a   : > { %v9953_v23 = vpop.permute.xlu1 %981  ;;  %v9955_v10 = vpop.permute.xlu0 %977 }
 0x19b   : > { %15687 = vst [vmem:[#allocation117_spill] sm:$0xff] %v9953_v23  ;;  %15688 = vst [vmem:[#allocation118_spill] sm:$0xff] %v9955_v10  ;;  %v1327_v10 = vrot.slane %v264_v8, %v9501_v46 }
 0x19c   : > { %1300 = vbcast.lane.b32.xlu1 %v1294_v15, 264  ;;  %1296 = vbcast.lane.b32.xlu0 %v1294_v15, 256 }
 0x19e   : > { %v9958_v53 = vpop.permute.xlu1 %992  ;;  %v9960_v58 = vpop.permute.xlu0 %988 }
 0x19f   : > { %15689 = vst [vmem:[#allocation119_spill] sm:$0xff] %v9958_v53  ;;  %15690 = vst [vmem:[#allocation120_spill] sm:$0xff] %v9960_v58  ;;  %v1338_v53 = vrot.slane %v264_v8, %v9505_v48  ;;  %v257_v58 = vsub.f32 %v9602_v3, %v9606_v9 }
 0x1a0   : > { %1311 = vbcast.lane.b32.xlu1 %v1305_v18, 264  ;;  %1307 = vbcast.lane.b32.xlu0 %v1305_v18, 256  ;;  %v9293_v18 = vmov 1983009808  }
 0x1a1   : > { %v1841_v49 = vunpack.c.l.s4 %v9293_v18 }
 0x1a2   : > { %v9963_v22 = vpop.permute.xlu1 %1003  ;;  %v9965_v54 = vpop.permute.xlu0 %999 }
 0x1a3   : > { %15691 = vst [vmem:[#allocation121_spill] sm:$0xff] %v9963_v22  ;;  %15692 = vst [vmem:[#allocation122_spill] sm:$0xff] %v9965_v54  ;;  %v9972_v54 = vmul.f32 0.5, %v257_v58  ;;  %v1842_v22 = vunpack.c.0.s8 %v1841_v49 }
 0x1a4   : > { %1322 = vbcast.lane.b32.xlu1 %v1316_v50, 264  ;;  %1318 = vbcast.lane.b32.xlu0 %v1316_v50, 256  ;;  %v1349_v50 = vrot.slane %v264_v8, %v9513_v52 }
 0x1a5   : > { %v1360_v58 = vrot.slane %v9972_v54, %v9433_v21 }
 0x1a6   : > { %v1015_v23 = vpop.permute.xlu1 %1014  ;;  %v1011_v15 = vpop.permute.xlu0 %1010 }
 0x1a7   : > { %v1710_v3 = vsel %vm15453_vm0, %v9610_v13, %v1011_v15 }
 0x1a8   : > { %1333 = vbcast.lane.b32.xlu1 %v1327_v10, 264  ;;  %1329 = vbcast.lane.b32.xlu0 %v1327_v10, 256  ;;  %v9976_v10 = vsel %vm15453_vm0, %v9617_v43, %v1015_v23  ;;  %v9991_v43 = vsub.s32 %v1842_v22, %v9399_v4 }
 0x1a9   : > { %15693 = vst [vmem:[#allocation123_spill] sm:$0xff] %v9976_v10 }
 0x1aa   : > { %v1026_v5 = vpop.permute.xlu1 %1025  ;;  %v1022_v6 = vpop.permute.xlu0 %1021  ;;  %15695 = vst [vmem:[#allocation125_spill] sm:$0xff] %v9991_v43 }
 0x1ab   : > { %v9995_v13 = vsel %vm15453_vm0, %v9615_v37, %v1026_v5  ;;  %v1371_v37 = vrot.slane %v9972_v54, %v9430_v20 }
 0x1ac   : > { %1344 = vbcast.lane.b32.xlu1 %v1338_v53, 264  ;;  %1340 = vbcast.lane.b32.xlu0 %v1338_v53, 256  ;;  %15696 = vst [vmem:[#allocation126_spill] sm:$0xff] %v9995_v13 }
 0x1ae   : > { %v1037_v41 = vpop.permute.xlu1 %1036  ;;  %v1033_v2 = vpop.permute.xlu0 %1032 }
 0x1af   : > { %v9982_v9 = vsel %vm15453_vm0, %v9620_v39, %v1037_v41  ;;  %v1714_v53 = vsel %vm15453_vm0, %v9622_v40, %v1033_v2  ;;  %v1712_v40 = vsel %vm15453_vm0, %v9608_v12, %v1022_v6 }
 0x1b0   : > { %15694 = vst [vmem:[#allocation124_spill] sm:$0xff] %v9982_v9  ;;  %v2111_v8 = vcombine.high %v9976_v10, %v9982_v9  ;;  %v1839_v49 = vcombine.high %v1710_v3, %v1714_v53  ;;  %1355 = vbcast.lane.b32.xlu1 %v1349_v50, 264  ;;  %1351 = vbcast.lane.b32.xlu0 %v1349_v50, 256 }
 0x1b1   : > { %v1838_v2 = vcombine.low %v1710_v3, %v1714_v53 }
 0x1b2   : > { %v1048_v39 = vpop.permute.xlu1 %1047  ;;  %v1044_v23 = vpop.permute.xlu0 %1043  ;;  %v10010_v12 = vrot.slane %v2111_v8, %v9991_v43 }
 0x1b3   : > { %v10001_v41 = vsel %vm15453_vm0, %v9625_v47, %v1048_v39  ;;  %v1716_v15 = vsel %vm15453_vm0, %v9627_v51, %v1044_v23  ;;  %v10022_v53 = vrot.slane %v1838_v2, %v9991_v43  ;;  %v10025_v39 = vrot.slane %v1839_v49, %v9991_v43 }
 0x1b4   : > { %15697 = vst [vmem:[#allocation127_spill] sm:$0xff] %v10001_v41  ;;  %v2127_v22 = vcombine.high %v9995_v13, %v10001_v41  ;;  %v1854_v18 = vcombine.low %v1712_v40, %v1716_v15  ;;  %v1855_v50 = vcombine.high %v1712_v40, %v1716_v15  ;;  %1366 = vbcast.lane.b32.xlu1 %v1360_v58, 264 }
 0x1b5   : > { %1362 = vbcast.lane.b32.xlu0 %v1360_v58, 256  ;;  %v1382_v23 = vrot.slane %v9972_v54, %v9469_v34  ;;  %v1404_v41 = vrot.slane %v9972_v54, %v9497_v44 }
 0x1b6   : > { %v10013_v6 = vrot.slane %v2127_v22, %v9991_v43  ;;  %v10016_v47 = vrot.slane %v1854_v18, %v9991_v43  ;;  %v10019_v51 = vrot.slane %v1855_v50, %v9991_v43  ;;  %v1059_v5 = vpop.permute.xlu1 %1058  ;;  %v1055_v3 = vpop.permute.xlu0 %1054  ;;  %v1393_v18 = vrot.slane %v9972_v54, %v9479_v38 }
 0x1b7   : > { %v9294_v50 = vmov 1934713408   ;;  %v10043_v13 = vsel %vm15453_vm0, %v9630_v56, %v1059_v5  ;;  %v1718_v2 = vsel %vm15453_vm0, %v9632_v63, %v1055_v3 }
 0x1b8   : > { %v2190_v8 = vcombine.low %v10010_v12, %v10013_v6  ;;  %1377 = vbcast.lane.b32.xlu1 %v1371_v37, 264  ;;  %v1903_v40 = vcombine.high %v10022_v53, %v10016_v47  ;;  %v1905_v58 = vunpack.c.l.s4 %v9294_v50  ;;  %15698 = vst [vmem:[#allocation128_spill] sm:$0xff] %v10043_v13 }
 0x1b9   : > { %1373 = vbcast.lane.b32.xlu0 %v1371_v37, 256 }
 0x1ba   : > { %v1070_v15 = vpop.permute.xlu1 %1069  ;;  %v1066_v22 = vpop.permute.xlu0 %1065  ;;  %v1906_v56 = vunpack.c.0.s8 %v1905_v58 }
 0x1bb   : > { %v10059_v63 = vsel %vm15453_vm0, %v9635_v24, %v1070_v15  ;;  %v1415_v24 = vrot.slane %v9972_v54, %v9501_v46 }
 0x1bc   : > { %1388 = vbcast.lane.b32.xlu1 %v1382_v23, 264  ;;  %15700 = vst [vmem:[#allocation130_spill] sm:$0xff] %v10059_v63  ;;  %v10074_v15 = vsub.s32 %v1906_v56, %v9399_v4 }
 0x1bd   : > { %1384 = vbcast.lane.b32.xlu0 %v1382_v23, 256 }
 0x1be   : > { %v1081_v10 = vpop.permute.xlu1 %1080  ;;  %v1077_v9 = vpop.permute.xlu0 %1076  ;;  %15702 = vst [vmem:[#allocation132_spill] sm:$0xff] %v10074_v15 }
 0x1bf   : > { %v10049_v37 = vsel %vm15453_vm0, %v9640_v28, %v1081_v10  ;;  %v1722_v49 = vsel %vm15453_vm0, %v9642_v1, %v1077_v9  ;;  %v1720_v10 = vsel %vm15453_vm0, %v9637_v25, %v1066_v22  ;;  %v1902_v25 = vcombine.low %v10022_v53, %v10016_v47 }
 0x1c0   : > { %15699 = vst [vmem:[#allocation129_spill] sm:$0xff] %v10049_v37  ;;  %v2143_v50 = vcombine.high %v10043_v13, %v10049_v37  ;;  %v1871_v23 = vcombine.high %v1718_v2, %v1722_v49  ;;  %1399 = vbcast.lane.b32.xlu1 %v1393_v18, 264  ;;  %v1870_v1 = vcombine.low %v1718_v2, %v1722_v49 }
 0x1c1   : > { %1395 = vbcast.lane.b32.xlu0 %v1393_v18, 256 }
 0x1c2   : > { %v1092_v5 = vpop.permute.xlu1 %1091  ;;  %v1088_v28 = vpop.permute.xlu0 %1087  ;;  %v1878_v4 = vrot.slane %v1870_v1, %v9991_v43  ;;  %v1885_v56 = vrot.slane %v1871_v23, %v9991_v43  ;;  %v10094_v1 = vrot.slane %v1902_v25, %v10074_v15  ;;  %v10097_v23 = vrot.slane %v1903_v40, %v10074_v15 }
 0x1c3   : > { %v10065_v9 = vsel %vm15453_vm0, %v9645_v19, %v1092_v5  ;;  %v1724_v3 = vsel %vm15453_vm0, %v9647_v16, %v1088_v28  ;;  %v258_v19 = vsub.f32 %v9652_v45, %v9656_v55  ;;  %v2157_v16 = vrot.slane %v2143_v50, %v9991_v43 }
 0x1c4   : > { %15701 = vst [vmem:[#allocation131_spill] sm:$0xff] %v10065_v9  ;;  %v2159_v58 = vcombine.high %v10059_v63, %v10065_v9  ;;  %v1886_v18 = vcombine.low %v1720_v10, %v1724_v3  ;;  %v1887_v13 = vcombine.high %v1720_v10, %v1724_v3  ;;  %1410 = vbcast.lane.b32.xlu1 %v1404_v41, 264  ;;  %15704 = vst [vmem:[#allocation134_spill] sm:$0xff] %v10094_v1  ;;  %v15895_v63 = vld [vmem:[#allocation111_spill] sm:$0xff] }
 0x1c5   : > { %1406 = vbcast.lane.b32.xlu0 %v1404_v41, 256  ;;  %v1426_v45 = vrot.slane %v9972_v54, %v9505_v48  ;;  %v1437_v55 = vrot.slane %v9972_v54, %v9513_v52  ;;  %v15706_v40 = vcombine.high %v10010_v12, %v10013_v6 }
 0x1c6   : > { %v2173_v2 = vrot.slane %v2159_v58, %v9991_v43  ;;  %v1894_v49 = vrot.slane %v1886_v18, %v9991_v43  ;;  %v1901_v22 = vrot.slane %v1887_v13, %v9991_v43  ;;  %v1103_v5 = vpop.permute.xlu1 %1102  ;;  %v1099_v28 = vpop.permute.xlu0 %1098  ;;  %v10091_v13 = vrot.slane %v2190_v8, %v10074_v15 }
 0x1c7   : > { %v10117_v25 = vrot.slane %v15706_v40, %v10074_v15  ;;  %v1726_v40 = vsel %vm15453_vm0, %v9660_v27, %v1099_v28 }
 0x1c8   : > { %v2222_v10 = vcombine.low %v2157_v16, %v2173_v2  ;;  %v2223_v47 = vcombine.high %v2157_v16, %v2173_v2  ;;  %1421 = vbcast.lane.b32.xlu1 %v1415_v24, 264  ;;  %v1934_v41 = vcombine.low %v1878_v4, %v1894_v49  ;;  %v1935_v53 = vcombine.high %v1878_v4, %v1894_v49 }
 0x1c9   : > { %v1950_v50 = vcombine.low %v1885_v56, %v1901_v22  ;;  %v1951_v3 = vcombine.high %v1885_v56, %v1901_v22  ;;  %1417 = vbcast.lane.b32.xlu0 %v1415_v24, 256  ;;  %15703 = vst [vmem:[#allocation133_spill] sm:$0xff] %v10091_v13  ;;  %v10099_v16 = vmul.f32 0.5, %v258_v19  ;;  %15707 = vst [vmem:[#allocation136_spill] sm:$0xff] %v10117_v25 }
 0x1ca   : > { %v1114_v58 = vpop.permute.xlu1 %1113  ;;  %v1110_v18 = vpop.permute.xlu0 %1109  ;;  %v10102_v54 = vrot.slane %v1934_v41, %v10074_v15  ;;  %v10105_v2 = vrot.slane %v1935_v53, %v10074_v15  ;;  %v15708_v19 = vcombine.low %v10025_v39, %v10019_v51  ;;  %v15709_v22 = vcombine.high %v10025_v39, %v10019_v51 }
 0x1cb   : > { %v10108_v24 = vrot.slane %v1950_v50, %v10074_v15  ;;  %v10111_v8 = vrot.slane %v1951_v3, %v10074_v15  ;;  %v10132_v56 = vrot.slane %v2222_v10, %v10074_v15  ;;  %v10135_v12 = vrot.slane %v2223_v47, %v10074_v15 }
 0x1cc   : > { %15705 = vst [vmem:[#allocation135_spill] sm:$0xff] %v10102_v54  ;;  %v10123_v49 = vrot.slane %v15708_v19, %v10074_v15  ;;  %v10129_v4 = vrot.slane %v15709_v22, %v10074_v15  ;;  %1432 = vbcast.lane.b32.xlu1 %v1426_v45, 264  ;;  %v10153_v3 = vsel %vm15453_vm0, %v9658_v0, %v1103_v5 }
 0x1cd   : > { %15710 = vst [vmem:[#allocation137_spill] sm:$0xff] %v10132_v56  ;;  %15711 = vst [vmem:[#allocation138_spill] sm:$0xff] %v10135_v12  ;;  %1428 = vbcast.lane.b32.xlu0 %v1426_v45, 256  ;;  %v1448_v45 = vrot.slane %v10099_v16, %v9433_v21  ;;  %v10177_v5 = vsel %vm15453_vm0, %v9665_v32, %v1114_v58  ;;  %v1459_v32 = vrot.slane %v10099_v16, %v9430_v20  ;;  %v15722_v12 = vld [vmem:[#allocation29_spill] sm:$0xff] }
 0x1ce   : > { %v1125_v51 = vpop.permute.xlu1 %1124  ;;  %v1121_v39 = vpop.permute.xlu0 %1120  ;;  %15712 = vst [vmem:[#allocation139_spill] sm:$0xff] %v10153_v3  ;;  %15714 = vst [vmem:[#allocation141_spill] sm:$0xff] %v10177_v5 }
 0x1cf   : > { %v10159_v19 = vsel %vm15453_vm0, %v9670_v59, %v1125_v51  ;;  %v1730_v22 = vsel %vm15453_vm0, %v9672_v60, %v1121_v39 }
 0x1d0   : > { %15713 = vst [vmem:[#allocation140_spill] sm:$0xff] %v10159_v19  ;;  %v2247_v53 = vcombine.high %v10153_v3, %v10159_v19  ;;  %v1975_v47 = vcombine.high %v1726_v40, %v1730_v22  ;;  %1443 = vbcast.lane.b32.xlu1 %v1437_v55, 264  ;;  %v1974_v39 = vcombine.low %v1726_v40, %v1730_v22 }
 0x1d1   : > { %1439 = vbcast.lane.b32.xlu0 %v1437_v55, 256  ;;  %v1728_v55 = vsel %vm15453_vm0, %v9667_v62, %v1110_v18 }
 0x1d2   : > { %v1136_v28 = vpop.permute.xlu1 %1135  ;;  %v1132_v51 = vpop.permute.xlu0 %1131  ;;  %v10192_v62 = vrot.slane %v2247_v53, %v9991_v43  ;;  %v1982_v22 = vrot.slane %v1974_v39, %v9991_v43 }
 0x1d3   : > { %v10183_v0 = vsel %vm15453_vm0, %v9675_v61, %v1136_v28  ;;  %v1732_v59 = vsel %vm15453_vm0, %v9677_v42, %v1132_v51 }
 0x1d4   : > { %15715 = vst [vmem:[#allocation142_spill] sm:$0xff] %v10183_v0  ;;  %v2263_v60 = vcombine.high %v10177_v5, %v10183_v0  ;;  %v1990_v27 = vcombine.low %v1728_v55, %v1732_v59  ;;  %v1991_v50 = vcombine.high %v1728_v55, %v1732_v59  ;;  %1454 = vbcast.lane.b32.xlu1 %v1448_v45, 264  ;;  %v15744_v0 = vld [vmem:[#allocation35_spill] sm:$0xff] }
 0x1d5   : > { %1450 = vbcast.lane.b32.xlu0 %v1448_v45, 256  ;;  %v10205_v59 = vrot.slane %v1975_v47, %v9991_v43  ;;  %v1481_v55 = vrot.slane %v10099_v16, %v9479_v38  ;;  %v1492_v45 = vrot.slane %v10099_v16, %v9497_v44 }
 0x1d6   : > { %v10195_v58 = vrot.slane %v2263_v60, %v9991_v43  ;;  %v10198_v61 = vrot.slane %v1990_v27, %v9991_v43  ;;  %v10201_v42 = vrot.slane %v1991_v50, %v9991_v43  ;;  %v1147_v18 = vpop.permute.xlu1 %1146  ;;  %v1143_v40 = vpop.permute.xlu0 %1142  ;;  %v1470_v27 = vrot.slane %v10099_v16, %v9469_v34 }
 0x1d7   : > { %v10222_v41 = vsel %vm15453_vm0, %v9680_v33, %v1147_v18  ;;  %v1734_v6 = vsel %vm15453_vm0, %v9682_v36, %v1143_v40 }
 0x1d8   : > { %v2326_v53 = vcombine.low %v10192_v62, %v10195_v58  ;;  %1465 = vbcast.lane.b32.xlu1 %v1459_v32, 264  ;;  %v2039_v50 = vcombine.high %v1982_v22, %v10198_v61  ;;  %15716 = vst [vmem:[#allocation143_spill] sm:$0xff] %v10222_v41 }
 0x1d9   : > { %1461 = vbcast.lane.b32.xlu0 %v1459_v32, 256 }
 0x1da   : > { %v1158_v47 = vpop.permute.xlu1 %1157  ;;  %v1154_v51 = vpop.permute.xlu0 %1153 }
 0x1db   : > { %v10238_v33 = vsel %vm15453_vm0, %v9685_v31, %v1158_v47  ;;  %v1503_v31 = vrot.slane %v10099_v16, %v9501_v46  ;;  %v2038_v47 = vcombine.low %v1982_v22, %v10198_v61  ;;  %v1514_v22 = vrot.slane %v10099_v16, %v9505_v48 }
 0x1dc   : > { %1476 = vbcast.lane.b32.xlu1 %v1470_v27, 264  ;;  %15718 = vst [vmem:[#allocation145_spill] sm:$0xff] %v10238_v33 }
 0x1dd   : > { %1472 = vbcast.lane.b32.xlu0 %v1470_v27, 256 }
 0x1de   : > { %v1169_v39 = vpop.permute.xlu1 %1168  ;;  %v1165_v10 = vpop.permute.xlu0 %1164 }
 0x1df   : > { %v10228_v28 = vsel %vm15453_vm0, %v9690_v26, %v1169_v39  ;;  %v1738_v32 = vsel %vm15453_vm0, %v9692_v35, %v1165_v10  ;;  %v15719_v26 = vld [vmem:[#allocation27_spill] sm:$0xff]  ;;  %v15720_v35 = vld [vmem:[#allocation28_spill] sm:$0xff] }
 0x1e0   : > { %15717 = vst [vmem:[#allocation144_spill] sm:$0xff] %v10228_v28  ;;  %v2279_v60 = vcombine.high %v10222_v41, %v10228_v28  ;;  %v2007_v27 = vcombine.high %v1734_v6, %v1738_v32  ;;  %1487 = vbcast.lane.b32.xlu1 %v1481_v55, 264  ;;  %v1736_v40 = vsel %vm15453_vm0, %v15719_v26, %v1154_v51  ;;  %v15724_v51 = vld [vmem:[#allocation30_spill] sm:$0xff] }
 0x1e1   : > { %1483 = vbcast.lane.b32.xlu0 %v1481_v55, 256  ;;  %v2006_v39 = vcombine.low %v1734_v6, %v1738_v32  ;;  %v15723_v6 = vld [vmem:[#allocation31_spill] sm:$0xff] }
 0x1e2   : > { %v1180_v36 = vpop.permute.xlu1 %1179  ;;  %v1176_v18 = vpop.permute.xlu0 %1175  ;;  %v259_v32 = vsub.f32 %v15724_v51, %v15723_v6  ;;  %v2021_v3 = vrot.slane %v2007_v27, %v9991_v43  ;;  %v10272_v27 = vrot.slane %v2039_v50, %v10074_v15  ;;  %v15729_v50 = vcombine.high %v10192_v62, %v10195_v58 }
 0x1e3   : > { %v10244_v10 = vsel %vm15453_vm0, %v15720_v35, %v1180_v36  ;;  %v1740_v25 = vsel %vm15453_vm0, %v15722_v12, %v1176_v18  ;;  %v2293_v36 = vrot.slane %v2279_v60, %v9991_v43 }
 0x1e4   : > { %15721 = vst [vmem:[#allocation27_spill] sm:$0xff] %v10244_v10  ;;  %v2295_v55 = vcombine.high %v10238_v33, %v10244_v10  ;;  %v2022_v56 = vcombine.low %v1736_v40, %v1740_v25  ;;  %v2023_v13 = vcombine.high %v1736_v40, %v1740_v25  ;;  %1498 = vbcast.lane.b32.xlu1 %v1492_v45, 264  ;;  %v15750_v33 = vld [vmem:[#allocation41_spill] sm:$0xff]  ;;  %v15751_v10 = vld [vmem:[#allocation44_spill] sm:$0xff] }
 0x1e5   : > { %1494 = vbcast.lane.b32.xlu0 %v1492_v45, 256  ;;  %v2014_v40 = vrot.slane %v2006_v39, %v9991_v43  ;;  %v1525_v45 = vrot.slane %v10099_v16, %v9513_v52  ;;  %v10269_v39 = vrot.slane %v2038_v47, %v10074_v15  ;;  %v15731_v47 = vcombine.low %v10205_v59, %v10201_v42 }
 0x1e6   : > { %v2309_v26 = vrot.slane %v2295_v55, %v9991_v43  ;;  %v2030_v12 = vrot.slane %v2022_v56, %v9991_v43  ;;  %v2037_v18 = vrot.slane %v2023_v13, %v9991_v43  ;;  %v1191_v35 = vpop.permute.xlu1 %1190  ;;  %v1187_v25 = vpop.permute.xlu0 %1186  ;;  %v10266_v13 = vrot.slane %v2326_v53, %v10074_v15 }
 0x1e7   : > { %15726 = vst [vmem:[#allocation29_spill] sm:$0xff] %v10269_v39 }
 0x1e8   : > { %v2358_v19 = vcombine.low %v2293_v36, %v2309_v26  ;;  %v2359_v61 = vcombine.high %v2293_v36, %v2309_v26  ;;  %1509 = vbcast.lane.b32.xlu1 %v1503_v31, 264  ;;  %v2070_v60 = vcombine.low %v2014_v40, %v2030_v12  ;;  %v2071_v55 = vcombine.high %v2014_v40, %v2030_v12 }
 0x1e9   : > { %v2086_v56 = vcombine.low %v2021_v3, %v2037_v18  ;;  %v2087_v6 = vcombine.high %v2021_v3, %v2037_v18  ;;  %1505 = vbcast.lane.b32.xlu0 %v1503_v31, 256  ;;  %15725 = vst [vmem:[#allocation28_spill] sm:$0xff] %v10266_v13  ;;  %v10274_v26 = vmul.f32 0.5, %v259_v32  ;;  %v10292_v31 = vrot.slane %v15729_v50, %v10074_v15  ;;  %v15736_v50 = vld [vmem:[#allocation32_spill] sm:$0xff] }
 0x1ea   : > { %v1202_v51 = vpop.permute.xlu1 %1201  ;;  %v1198_v36 = vpop.permute.xlu0 %1197  ;;  %v10277_v16 = vrot.slane %v2070_v60, %v10074_v15  ;;  %v10280_v12 = vrot.slane %v2071_v55, %v10074_v15  ;;  %v10298_v32 = vrot.slane %v15731_v47, %v10074_v15  ;;  %v15732_v18 = vcombine.high %v10205_v59, %v10201_v42 }
 0x1eb   : > { %v10283_v3 = vrot.slane %v2086_v56, %v10074_v15  ;;  %v10286_v53 = vrot.slane %v2087_v6, %v10074_v15  ;;  %15730 = vst [vmem:[#allocation146_spill] sm:$0xff] %v10292_v31  ;;  %v10307_v60 = vrot.slane %v2358_v19, %v10074_v15  ;;  %v10310_v62 = vrot.slane %v2359_v61, %v10074_v15  ;;  %v15739_v56 = vld [vmem:[#allocation36_spill] sm:$0xff]  ;;  %v15741_v19 = vld [vmem:[#allocation37_spill] sm:$0xff] }
 0x1ec   : > { %15727 = vst [vmem:[#allocation31_spill] sm:$0xff] %v10277_v16  ;;  %v10304_v40 = vrot.slane %v15732_v18, %v10074_v15  ;;  %1520 = vbcast.lane.b32.xlu1 %v1514_v22, 264  ;;  %v10328_v47 = vsel %vm15453_vm0, %v15736_v50, %v1191_v35  ;;  %v15738_v18 = vld [vmem:[#allocation33_spill] sm:$0xff]  ;;  %v15745_v35 = vld [vmem:[#allocation38_spill] sm:$0xff] }
 0x1ed   : > { %15728 = vst [vmem:[#allocation30_spill] sm:$0xff] %v10286_v53  ;;  %15734 = vst [vmem:[#allocation148_spill] sm:$0xff] %v10307_v60  ;;  %1516 = vbcast.lane.b32.xlu0 %v1514_v22, 256  ;;  %v1742_v58 = vsel %vm15453_vm0, %v15738_v18, %v1187_v25  ;;  %v1536_v22 = vrot.slane %v10274_v26, %v9433_v21  ;;  %v15747_v25 = vld [vmem:[#allocation39_spill] sm:$0xff]  ;;  %v15748_v60 = vld [vmem:[#allocation40_spill] sm:$0xff] }
 0x1ee   : > { %15733 = vst [vmem:[#allocation147_spill] sm:$0xff] %v10304_v40  ;;  %15735 = vst [vmem:[#allocation149_spill] sm:$0xff] %v10310_v62  ;;  %v1213_v42 = vpop.permute.xlu1 %1212  ;;  %v1209_v59 = vpop.permute.xlu0 %1208 }
 0x1ef   : > { %15737 = vst [vmem:[#allocation32_spill] sm:$0xff] %v10328_v47  ;;  %v10334_v55 = vsel %vm15453_vm0, %v15739_v56, %v1213_v42  ;;  %v1746_v6 = vsel %vm15453_vm0, %v15741_v19, %v1209_v59  ;;  %v15742_v59 = vld [vmem:[#allocation34_spill] sm:$0xff] }
 0x1f0   : > { %15740 = vst [vmem:[#allocation33_spill] sm:$0xff] %v10334_v55  ;;  %v2655_v61 = vcombine.high %v10328_v47, %v10334_v55  ;;  %v2383_v5 = vcombine.high %v1742_v58, %v1746_v6  ;;  %1531 = vbcast.lane.b32.xlu1 %v1525_v45, 264  ;;  %v10352_v19 = vsel %vm15453_vm0, %v15742_v59, %v1202_v51 }
 0x1f1   : > { %1527 = vbcast.lane.b32.xlu0 %v1525_v45, 256  ;;  %15743 = vst [vmem:[#allocation36_spill] sm:$0xff] %v10352_v19  ;;  %v1744_v45 = vsel %vm15453_vm0, %v15744_v0, %v1198_v36  ;;  %v2382_v41 = vcombine.low %v1742_v58, %v1746_v6  ;;  %v1547_v51 = vrot.slane %v10274_v26, %v9430_v20 }
 0x1f2   : > { %v1224_v50 = vpop.permute.xlu1 %1223  ;;  %v1220_v18 = vpop.permute.xlu0 %1219  ;;  %v10367_v0 = vrot.slane %v2655_v61, %v9991_v43  ;;  %v10380_v59 = vrot.slane %v2383_v5, %v9991_v43  ;;  %v1580_v47 = vrot.slane %v10274_v26, %v9497_v44 }
 0x1f3   : > { %v10358_v28 = vsel %vm15453_vm0, %v15745_v35, %v1224_v50  ;;  %v1748_v56 = vsel %vm15453_vm0, %v15747_v25, %v1220_v18  ;;  %v1569_v18 = vrot.slane %v10274_v26, %v9479_v38 }
 0x1f4   : > { %15746 = vst [vmem:[#allocation37_spill] sm:$0xff] %v10358_v28  ;;  %v2671_v42 = vcombine.high %v10352_v19, %v10358_v28  ;;  %v2398_v62 = vcombine.low %v1744_v45, %v1748_v56  ;;  %v2399_v31 = vcombine.high %v1744_v45, %v1748_v56  ;;  %1542 = vbcast.lane.b32.xlu1 %v1536_v22, 264 }
 0x1f5   : > { %1538 = vbcast.lane.b32.xlu0 %v1536_v22, 256  ;;  %v2390_v56 = vrot.slane %v2382_v41, %v9991_v43 }
 0x1f6   : > { %v10370_v36 = vrot.slane %v2671_v42, %v9991_v43  ;;  %v10373_v58 = vrot.slane %v2398_v62, %v9991_v43  ;;  %v10376_v6 = vrot.slane %v2399_v31, %v9991_v43  ;;  %v1235_v35 = vpop.permute.xlu1 %1234  ;;  %v1231_v25 = vpop.permute.xlu0 %1230  ;;  %v1558_v62 = vrot.slane %v10274_v26, %v9469_v34 }
 0x1f7   : > { %v10397_v13 = vsel %vm15453_vm0, %v15748_v60, %v1235_v35  ;;  %v1750_v42 = vsel %vm15453_vm0, %v15750_v33, %v1231_v25  ;;  %v15754_v60 = vld [vmem:[#allocation42_spill] sm:$0xff] }
 0x1f8   : > { %v2734_v61 = vcombine.low %v10367_v0, %v10370_v36  ;;  %1553 = vbcast.lane.b32.xlu1 %v1547_v51, 264  ;;  %v2447_v31 = vcombine.high %v2390_v56, %v10373_v58  ;;  %15749 = vst [vmem:[#allocation34_spill] sm:$0xff] %v10397_v13 }
 0x1f9   : > { %1549 = vbcast.lane.b32.xlu0 %v1547_v51, 256  ;;  %v15753_v51 = vld [vmem:[#allocation45_spill] sm:$0xff] }
 0x1fa   : > { %v1246_v5 = vpop.permute.xlu1 %1245  ;;  %v1242_v50 = vpop.permute.xlu0 %1241 }
 0x1fb   : > { %v10413_v35 = vsel %vm15453_vm0, %v15754_v60, %v1246_v5  ;;  %v1591_v5 = vrot.slane %v10274_v26, %v9501_v46  ;;  %v2446_v60 = vcombine.low %v2390_v56, %v10373_v58 }
 0x1fc   : > { %1564 = vbcast.lane.b32.xlu1 %v1558_v62, 264  ;;  %15755 = vst [vmem:[#allocation38_spill] sm:$0xff] %v10413_v35 }
 0x1fd   : > { %1560 = vbcast.lane.b32.xlu0 %v1558_v62, 256 }
 0x1fe   : > { %v1257_v45 = vpop.permute.xlu1 %1256  ;;  %v1253_v22 = vpop.permute.xlu0 %1252 }
 0x1ff   : > { %v10403_v41 = vsel %vm15453_vm0, %v15751_v10, %v1257_v45  ;;  %v1754_v53 = vsel %vm15453_vm0, %v15753_v51, %v1253_v22  ;;  %v15756_v10 = vld [vmem:[#allocation43_spill] sm:$0xff]  ;;  %v15757_v22 = vld [vmem:[#allocation46_spill] sm:$0xff] }
 0x200   : > { %15752 = vst [vmem:[#allocation35_spill] sm:$0xff] %v10403_v41  ;;  %v2687_v40 = vcombine.high %v10397_v13, %v10403_v41  ;;  %v2415_v62 = vcombine.high %v1750_v42, %v1754_v53  ;;  %1575 = vbcast.lane.b32.xlu1 %v1569_v18, 264  ;;  %v1752_v45 = vsel %vm15453_vm0, %v15756_v10, %v1242_v50  ;;  %v15759_v13 = vld [vmem:[#allocation47_spill] sm:$0xff] }
 0x201   : > { %1571 = vbcast.lane.b32.xlu0 %v1569_v18, 256  ;;  %v2414_v55 = vcombine.low %v1750_v42, %v1754_v53  ;;  %v260_v53 = vsub.f32 %v9754_v29, %v9756_v7  ;;  %v1602_v7 = vrot.slane %v10274_v26, %v9505_v48  ;;  %v1613_v29 = vrot.slane %v10274_v26, %v9513_v52 }
 0x202   : > { %v1268_v33 = vpop.permute.xlu1 %1267  ;;  %v1264_v25 = vpop.permute.xlu0 %1263  ;;  %v2701_v42 = vrot.slane %v2687_v40, %v9991_v43 }
 0x203   : > { %v10419_v51 = vsel %vm15453_vm0, %v15757_v22, %v1268_v33  ;;  %v1756_v41 = vsel %vm15453_vm0, %v15759_v13, %v1264_v25  ;;  %v2422_v10 = vrot.slane %v2414_v55, %v9991_v43  ;;  %v10444_v55 = vrot.slane %v2446_v60, %v10074_v15 }
 0x204   : > { %15758 = vst [vmem:[#allocation39_spill] sm:$0xff] %v10419_v51  ;;  %v2703_v18 = vcombine.high %v10413_v35, %v10419_v51  ;;  %v2430_v19 = vcombine.low %v1752_v45, %v1756_v41  ;;  %v2431_v28 = vcombine.high %v1752_v45, %v1756_v41  ;;  %1586 = vbcast.lane.b32.xlu1 %v1580_v47, 264 }
 0x205   : > { %1582 = vbcast.lane.b32.xlu0 %v1580_v47, 256  ;;  %v2429_v45 = vrot.slane %v2415_v62, %v9991_v43  ;;  %15761 = vst [vmem:[#allocation41_spill] sm:$0xff] %v10444_v55  ;;  %v10447_v62 = vrot.slane %v2447_v31, %v10074_v15  ;;  %v15763_v31 = vcombine.high %v10367_v0, %v10370_v36 }
 0x206   : > { %v2717_v50 = vrot.slane %v2703_v18, %v9991_v43  ;;  %v2438_v13 = vrot.slane %v2430_v19, %v9991_v43  ;;  %v2445_v33 = vrot.slane %v2431_v28, %v9991_v43  ;;  %v1279_v25 = vpop.permute.xlu1 %1278  ;;  %v1275_v41 = vpop.permute.xlu0 %1274  ;;  %v10441_v28 = vrot.slane %v2734_v61, %v10074_v15 }
 0x207   : > { %v10467_v60 = vrot.slane %v15763_v31, %v10074_v15  ;;  %v15769_v31 = vld [vmem:[#allocation48_spill] sm:$0xff] }
 0x208   : > { %v2766_v22 = vcombine.low %v2701_v42, %v2717_v50  ;;  %v2767_v58 = vcombine.high %v2701_v42, %v2717_v50  ;;  %1597 = vbcast.lane.b32.xlu1 %v1591_v5, 264  ;;  %v2478_v40 = vcombine.low %v2422_v10, %v2438_v13  ;;  %v2479_v47 = vcombine.high %v2422_v10, %v2438_v13 }
 0x209   : > { %v2494_v19 = vcombine.low %v2429_v45, %v2445_v33  ;;  %v2495_v56 = vcombine.high %v2429_v45, %v2445_v33  ;;  %1593 = vbcast.lane.b32.xlu0 %v1591_v5, 256  ;;  %15760 = vst [vmem:[#allocation40_spill] sm:$0xff] %v10441_v28  ;;  %v10449_v50 = vmul.f32 0.5, %v260_v53  ;;  %15764 = vst [vmem:[#allocation45_spill] sm:$0xff] %v10467_v60  ;;  %v15783_v28 = vld [vmem:[#allocation59_spill] sm:$0xff] }
 0x20a   : > { %v1290_v18 = vpop.permute.xlu1 %1289  ;;  %v1286_v42 = vpop.permute.xlu0 %1285  ;;  %v10452_v26 = vrot.slane %v2478_v40, %v10074_v15  ;;  %v10455_v13 = vrot.slane %v2479_v47, %v10074_v15  ;;  %v15765_v53 = vcombine.low %v10380_v59, %v10376_v6  ;;  %v15766_v10 = vcombine.high %v10380_v59, %v10376_v6 }
 0x20b   : > { %v10458_v5 = vrot.slane %v2494_v19, %v10074_v15  ;;  %v10461_v61 = vrot.slane %v2495_v56, %v10074_v15  ;;  %v10482_v40 = vrot.slane %v2766_v22, %v10074_v15  ;;  %v10485_v0 = vrot.slane %v2767_v58, %v10074_v15  ;;  %v15773_v22 = vld [vmem:[#allocation52_spill] sm:$0xff] }
 0x20c   : > { %15762 = vst [vmem:[#allocation44_spill] sm:$0xff] %v10452_v26  ;;  %v10473_v33 = vrot.slane %v15765_v53, %v10074_v15  ;;  %v10479_v45 = vrot.slane %v15766_v10, %v10074_v15  ;;  %1608 = vbcast.lane.b32.xlu1 %v1602_v7, 264  ;;  %v10503_v53 = vsel %vm15453_vm0, %v15769_v31, %v1279_v25  ;;  %v15771_v10 = vld [vmem:[#allocation49_spill] sm:$0xff] }
 0x20d   : > { %15767 = vst [vmem:[#allocation42_spill] sm:$0xff] %v10482_v40  ;;  %15768 = vst [vmem:[#allocation43_spill] sm:$0xff] %v10485_v0  ;;  %1604 = vbcast.lane.b32.xlu0 %v1602_v7, 256  ;;  %v1758_v19 = vsel %vm15453_vm0, %v15771_v10, %v1275_v41  ;;  %v1624_v7 = vrot.slane %v10449_v50, %v9433_v21  ;;  %v15776_v21 = vld [vmem:[#allocation51_spill] sm:$0xff]  ;;  %v15777_v25 = vld [vmem:[#allocation53_spill] sm:$0xff] }
 0x20e   : > { %v1301_v6 = vpop.permute.xlu1 %1300  ;;  %v1297_v59 = vpop.permute.xlu0 %1296  ;;  %15770 = vst [vmem:[#allocation46_spill] sm:$0xff] %v10503_v53  ;;  %v15779_v41 = vld [vmem:[#allocation54_spill] sm:$0xff] }
 0x20f   : > { %v10509_v47 = vsel %vm15453_vm0, %v9770_v30, %v1301_v6  ;;  %v1762_v56 = vsel %vm15453_vm0, %v15773_v22, %v1297_v59  ;;  %v15774_v59 = vld [vmem:[#allocation50_spill] sm:$0xff] }
 0x210   : > { %15772 = vst [vmem:[#allocation47_spill] sm:$0xff] %v10509_v47  ;;  %v2791_v58 = vcombine.high %v10503_v53, %v10509_v47  ;;  %v2519_v36 = vcombine.high %v1758_v19, %v1762_v56  ;;  %1619 = vbcast.lane.b32.xlu1 %v1613_v29, 264  ;;  %v10527_v22 = vsel %vm15453_vm0, %v15774_v59, %v1290_v18 }
 0x211   : > { %1615 = vbcast.lane.b32.xlu0 %v1613_v29, 256  ;;  %15775 = vst [vmem:[#allocation48_spill] sm:$0xff] %v10527_v22  ;;  %v1760_v29 = vsel %vm15453_vm0, %v15776_v21, %v1286_v42  ;;  %v2518_v53 = vcombine.low %v1758_v19, %v1762_v56  ;;  %v1635_v18 = vrot.slane %v10449_v50, %v9430_v20  ;;  %v15782_v20 = vld [vmem:[#allocation56_spill] sm:$0xff] }
 0x212   : > { %v1312_v31 = vpop.permute.xlu1 %1311  ;;  %v1308_v10 = vpop.permute.xlu0 %1307  ;;  %v10542_v21 = vrot.slane %v2791_v58, %v9991_v43  ;;  %v10555_v59 = vrot.slane %v2519_v36, %v9991_v43  ;;  %v15780_v58 = vld [vmem:[#allocation55_spill] sm:$0xff] }
 0x213   : > { %v10533_v47 = vsel %vm15453_vm0, %v15777_v25, %v1312_v31  ;;  %v1764_v30 = vsel %vm15453_vm0, %v15779_v41, %v1308_v10  ;;  %v1657_v10 = vrot.slane %v10449_v50, %v9479_v38 }
 0x214   : > { %15778 = vst [vmem:[#allocation49_spill] sm:$0xff] %v10533_v47  ;;  %v2807_v6 = vcombine.high %v10527_v22, %v10533_v47  ;;  %v2534_v0 = vcombine.low %v1760_v29, %v1764_v30  ;;  %v2535_v60 = vcombine.high %v1760_v29, %v1764_v30  ;;  %1630 = vbcast.lane.b32.xlu1 %v1624_v7, 264  ;;  %v15791_v47 = vld [vmem:[#allocation62_spill] sm:$0xff] }
 0x215   : > { %1626 = vbcast.lane.b32.xlu0 %v1624_v7, 256  ;;  %v2526_v30 = vrot.slane %v2518_v53, %v9991_v43  ;;  %v1668_v22 = vrot.slane %v10449_v50, %v9497_v44 }
 0x216   : > { %v10545_v42 = vrot.slane %v2807_v6, %v9991_v43  ;;  %v10548_v19 = vrot.slane %v2534_v0, %v9991_v43  ;;  %v10551_v56 = vrot.slane %v2535_v60, %v9991_v43  ;;  %v1323_v25 = vpop.permute.xlu1 %1322  ;;  %v1319_v41 = vpop.permute.xlu0 %1318  ;;  %v1646_v0 = vrot.slane %v10449_v50, %v9469_v34 }
 0x217   : > { %v10572_v34 = vsel %vm15453_vm0, %v15780_v58, %v1323_v25  ;;  %v1766_v40 = vsel %vm15453_vm0, %v15782_v20, %v1319_v41  ;;  %v15786_v58 = vld [vmem:[#allocation57_spill] sm:$0xff] }
 0x218   : > { %1641 = vbcast.lane.b32.xlu1 %v1635_v18, 264  ;;  %v2583_v60 = vcombine.high %v2526_v30, %v10548_v19  ;;  %v2598_v6 = vcombine.low %v10555_v59, %v10551_v56  ;;  %v2599_v53 = vcombine.high %v10555_v59, %v10551_v56  ;;  %15781 = vst [vmem:[#allocation52_spill] sm:$0xff] %v10572_v34 }
 0x219   : > { %1637 = vbcast.lane.b32.xlu0 %v1635_v18, 256  ;;  %v15785_v18 = vld [vmem:[#allocation60_spill] sm:$0xff] }
 0x21a   : > { %v1334_v36 = vpop.permute.xlu1 %1333  ;;  %v1330_v31 = vpop.permute.xlu0 %1329 }
 0x21b   : > { %v10588_v20 = vsel %vm15453_vm0, %v15786_v58, %v1334_v36  ;;  %v1679_v36 = vrot.slane %v10449_v50, %v9501_v46 }
 0x21c   : > { %1652 = vbcast.lane.b32.xlu1 %v1646_v0, 264  ;;  %15787 = vst [vmem:[#allocation51_spill] sm:$0xff] %v10588_v20 }
 0x21d   : > { %1648 = vbcast.lane.b32.xlu0 %v1646_v0, 256 }
 0x21e   : > { %v1345_v29 = vpop.permute.xlu1 %1344  ;;  %v1341_v7 = vpop.permute.xlu0 %1340 }
 0x21f   : > { %v10578_v56 = vsel %vm15453_vm0, %v15783_v28, %v1345_v29  ;;  %v1770_v59 = vsel %vm15453_vm0, %v15785_v18, %v1341_v7  ;;  %v15788_v28 = vld [vmem:[#allocation61_spill] sm:$0xff]  ;;  %v15790_v18 = vld [vmem:[#allocation58_spill] sm:$0xff] }
 0x220   : > { %15784 = vst [vmem:[#allocation50_spill] sm:$0xff] %v10578_v56  ;;  %v2823_v38 = vcombine.high %v10572_v34, %v10578_v56  ;;  %v2551_v0 = vcombine.high %v1766_v40, %v1770_v59  ;;  %1663 = vbcast.lane.b32.xlu1 %v1657_v10, 264  ;;  %v2550_v41 = vcombine.low %v1766_v40, %v1770_v59 }
 0x221   : > { %1659 = vbcast.lane.b32.xlu0 %v1657_v10, 256  ;;  %v1768_v34 = vsel %vm15453_vm0, %v15790_v18, %v1330_v31  ;;  %v2582_v59 = vcombine.low %v2526_v30, %v10548_v19 }
 0x222   : > { %v1356_v25 = vpop.permute.xlu1 %1355  ;;  %v1352_v7 = vpop.permute.xlu0 %1351  ;;  %v2558_v18 = vrot.slane %v2550_v41, %v9991_v43  ;;  %v2565_v44 = vrot.slane %v2551_v0, %v9991_v43  ;;  %v10615_v0 = vrot.slane %v2583_v60, %v10074_v15  ;;  %v10633_v60 = vrot.slane %v2599_v53, %v10074_v15 }
 0x223   : > { %v10592_v29 = vsel %vm15453_vm0, %v15788_v28, %v1356_v25  ;;  %v1772_v10 = vsel %vm15453_vm0, %v15791_v47, %v1352_v7  ;;  %v2837_v25 = vrot.slane %v2823_v38, %v9991_v43 }
 0x224   : > { %15789 = vst [vmem:[#allocation53_spill] sm:$0xff] %v10592_v29  ;;  %v2839_v56 = vcombine.high %v10588_v20, %v10592_v29  ;;  %1674 = vbcast.lane.b32.xlu1 %v1668_v22, 264  ;;  %v2566_v58 = vcombine.low %v1768_v34, %v1772_v10  ;;  %v2567_v40 = vcombine.high %v1768_v34, %v1772_v10  ;;  %15795 = vst [vmem:[#allocation59_spill] sm:$0xff] %v10633_v60 }
 0x225   : > { %1670 = vbcast.lane.b32.xlu0 %v1668_v22, 256  ;;  %v1690_v34 = vrot.slane %v10449_v50, %v9505_v48 }
 0x226   : > { %v2853_v28 = vrot.slane %v2839_v56, %v9991_v43  ;;  %v1367_v31 = vpop.permute.xlu1 %1366  ;;  %v2574_v47 = vrot.slane %v2566_v58, %v9991_v43  ;;  %v2581_v7 = vrot.slane %v2567_v40, %v9991_v43  ;;  %v10612_v56 = vrot.slane %v2582_v59, %v10074_v15 }
 0x227   : > { %v1363_v20 = vpop.permute.xlu0 %1362 }
 0x228   : > { %v2902_v46 = vcombine.low %v2837_v25, %v2853_v28  ;;  %v2903_v29 = vcombine.high %v2837_v25, %v2853_v28  ;;  %1685 = vbcast.lane.b32.xlu1 %v1679_v36, 264  ;;  %v2614_v22 = vcombine.low %v2558_v18, %v2574_v47  ;;  %v2615_v38 = vcombine.high %v2558_v18, %v2574_v47 }
 0x229   : > { %v2630_v19 = vcombine.low %v2565_v44, %v2581_v7  ;;  %v2631_v30 = vcombine.high %v2565_v44, %v2581_v7  ;;  %1681 = vbcast.lane.b32.xlu0 %v1679_v36, 256  ;;  %15792 = vst [vmem:[#allocation54_spill] sm:$0xff] %v10612_v56  ;;  %v10630_v36 = vrot.slane %v2598_v6, %v10074_v15 }
 0x22a   : > { %v1378_v41 = vpop.permute.xlu1 %1377  ;;  %v10618_v10 = vrot.slane %v2614_v22, %v10074_v15  ;;  %v10621_v58 = vrot.slane %v2615_v38, %v10074_v15  ;;  %v10636_v59 = vrot.slane %v2902_v46, %v10074_v15  ;;  %v1701_v28 = vrot.slane %v10449_v50, %v9513_v52  ;;  %v15805_v46 = vld [vmem:[#allocation64_spill] sm:$0xff] }
 0x22b   : > { %v10624_v40 = vrot.slane %v2630_v19, %v10074_v15  ;;  %v10627_v25 = vrot.slane %v2631_v30, %v10074_v15  ;;  %v1374_v44 = vpop.permute.xlu0 %1373  ;;  %v10641_v18 = vrot.slane %v2903_v29, %v10074_v15  ;;  %v15798_v22 = vcombine.low %v10542_v21, %v10545_v42  ;;  %v15800_v19 = vld [vmem:[#allocation63_spill] sm:$0xff] }
 0x22c   : > { %15793 = vst [vmem:[#allocation55_spill] sm:$0xff] %v10618_v10  ;;  %15796 = vst [vmem:[#allocation60_spill] sm:$0xff] %v10636_v59  ;;  %1696 = vbcast.lane.b32.xlu1 %v1690_v34, 264  ;;  %v10665_v30 = vsel %vm15453_vm0, %v15800_v19, %v1367_v31  ;;  %v15803_v29 = vcombine.high %v10542_v21, %v10545_v42  ;;  %v1774_v53 = vsel %vm15453_vm0, %v15805_v46, %v1363_v20  ;;  %v15811_v46 = vld [vmem:[#allocation68_spill] sm:$0xff] }
 0x22d   : > { %15794 = vst [vmem:[#allocation56_spill] sm:$0xff] %v10627_v25  ;;  %15797 = vst [vmem:[#allocation57_spill] sm:$0xff] %v10641_v18  ;;  %1692 = vbcast.lane.b32.xlu0 %v1690_v34, 256  ;;  %v10661_v38 = vrot.slane %v15798_v22, %v10074_v15  ;;  %v1967_v6 = vcombine.high %v10094_v1, %v10102_v54  ;;  %v15818_v18 = vld [vmem:[#allocation71_spill] sm:$0xff]  ;;  %v15822_v59 = vld [vmem:[#allocation72_spill] sm:$0xff] }
 0x22e   : > { %v1389_v7 = vpop.permute.xlu1 %1388  ;;  %15801 = vst [vmem:[#allocation58_spill] sm:$0xff] %v10665_v30  ;;  %v10675_v34 = vrot.slane %v15803_v29, %v10074_v15  ;;  %v15808_v29 = vld [vmem:[#allocation67_spill] sm:$0xff] }
 0x22f   : > { %15799 = vst [vmem:[#allocation61_spill] sm:$0xff] %v10661_v38  ;;  %v10669_v47 = vsel %vm15453_vm0, %v9812_v57, %v1389_v7  ;;  %v1385_v50 = vpop.permute.xlu0 %1384  ;;  %v2103_v7 = vcombine.high %v10269_v39, %v10277_v16  ;;  %v15810_v16 = vld [vmem:[#allocation66_spill] sm:$0xff]  ;;  %v15823_v38 = vld [vmem:[#allocation76_spill] sm:$0xff] }
 0x230   : > { %15802 = vst [vmem:[#allocation62_spill] sm:$0xff] %v10669_v47  ;;  %15804 = vst [vmem:[#allocation63_spill] sm:$0xff] %v10675_v34  ;;  %v3199_v22 = vcombine.high %v10665_v30, %v10669_v47  ;;  %v1778_v31 = vsel %vm15453_vm0, %v9814_v17, %v1385_v50  ;;  %1707 = vbcast.lane.b32.xlu1 %v1701_v28, 264  ;;  %v15806_v17 = vld [vmem:[#allocation65_spill] sm:$0xff]  ;;  %v1776_v39 = vsel %vm15453_vm0, %v15810_v16, %v1374_v44  ;;  %v15820_v34 = vld [vmem:[#allocation75_spill] sm:$0xff] }
 0x231   : > { %v2927_v19 = vcombine.high %v1774_v53, %v1778_v31  ;;  %1703 = vbcast.lane.b32.xlu0 %v1701_v28, 256  ;;  %v10695_v50 = vsel %vm15453_vm0, %v15806_v17, %v1378_v41  ;;  %v2926_v28 = vcombine.low %v1774_v53, %v1778_v31  ;;  %v2511_v44 = vcombine.high %v10444_v55, %v10452_v26  ;;  %v15814_v26 = vld [vmem:[#allocation73_spill] sm:$0xff] }
 0x232   : > { %v1400_v42 = vpop.permute.xlu1 %1399  ;;  %15807 = vst [vmem:[#allocation64_spill] sm:$0xff] %v10695_v50  ;;  %v10712_v31 = vrot.slane %v3199_v22, %v9991_v43 }
 0x233   : > { %v10699_v57 = vsel %vm15453_vm0, %v15808_v29, %v1400_v42  ;;  %v1396_v21 = vpop.permute.xlu0 %1395 }
 0x234   : > { %15809 = vst [vmem:[#allocation65_spill] sm:$0xff] %v10699_v57  ;;  %v3215_v20 = vcombine.high %v10695_v50, %v10699_v57  ;;  %v1780_v52 = vsel %vm15453_vm0, %v15811_v46, %v1396_v21  ;;  %4024 = vrot.lane.b32.xlu1 %v2103_v7, %s9295_s16  ;;  %v2647_v21 = vcombine.high %v10612_v56, %v10618_v10 }
 0x235   : > { %v2942_v41 = vcombine.low %v1776_v39, %v1780_v52  ;;  %v2943_v53 = vcombine.high %v1776_v39, %v1780_v52  ;;  %4022 = vrot.lane.b32.xlu0 %v1967_v6, %s9295_s16  ;;  %v2934_v46 = vrot.slane %v2926_v28, %v9991_v43  ;;  %v2941_v7 = vrot.slane %v2927_v19, %v9991_v43 }
 0x236   : > { %v10715_v42 = vrot.slane %v3215_v20, %v9991_v43  ;;  %v1411_v16 = vpop.permute.xlu1 %1410  ;;  %v15816_v20 = vld [vmem:[#allocation70_spill] sm:$0xff] }
 0x237   : > { %v2950_v52 = vrot.slane %v2942_v41, %v9991_v43  ;;  %v2957_v39 = vrot.slane %v2943_v53, %v9991_v43  ;;  %v1407_v6 = vpop.permute.xlu0 %1406  ;;  %v15812_v41 = vld [vmem:[#allocation69_spill] sm:$0xff] }
 0x238   : > { %v3278_v22 = vcombine.low %v10712_v31, %v10715_v42  ;;  %4028 = vrot.lane.b32.xlu1 %v2647_v21, %s9295_s16  ;;  %v10733_v53 = vsel %vm15453_vm0, %v15812_v41, %v1411_v16  ;;  %v1782_v21 = vsel %vm15453_vm0, %v15816_v20, %v1407_v6 }
 0x239   : > { %v2991_v17 = vcombine.high %v2934_v46, %v2950_v52  ;;  %v3006_v29 = vcombine.low %v2941_v7, %v2957_v39  ;;  %v3007_v10 = vcombine.high %v2941_v7, %v2957_v39  ;;  %4026 = vrot.lane.b32.xlu0 %v2511_v44, %s9295_s16  ;;  %15813 = vst [vmem:[#allocation67_spill] sm:$0xff] %v10733_v53  ;;  %v15817_v39 = vld [vmem:[#allocation74_spill] sm:$0xff] }
 0x23a   : > { %v1422_v28 = vpop.permute.xlu1 %1421  ;;  %v2990_v60 = vcombine.low %v2934_v46, %v2950_v52 }
 0x23b   : > { %v1418_v19 = vpop.permute.xlu0 %1417  ;;  %v10747_v16 = vsel %vm15453_vm0, %v15818_v18, %v1422_v28 }
 0x23c   : > { %15819 = vst [vmem:[#allocation68_spill] sm:$0xff] %v10747_v16  ;;  %v1784_v6 = vsel %vm15453_vm0, %v15822_v59, %v1418_v19  ;;  %v10766_v52 = vrot.slane %v2990_v60, %v10074_v15 }
 0x23e   : > { %v1433_v56 = vpop.permute.xlu1 %1432  ;;  %15824 = vst [vmem:[#allocation73_spill] sm:$0xff] %v10766_v52 }
 0x23f   : > { %v10737_v55 = vsel %vm15453_vm0, %v15814_v26, %v1433_v56  ;;  %v1429_v54 = vpop.permute.xlu0 %1428 }
 0x240   : > { %15815 = vst [vmem:[#allocation66_spill] sm:$0xff] %v10737_v55  ;;  %v3231_v7 = vcombine.high %v10733_v53, %v10737_v55  ;;  %v1786_v44 = vsel %vm15453_vm0, %v15817_v39, %v1429_v54  ;;  %v15849_v53 = vld [vmem:[#allocation89_spill] sm:$0xff]  ;;  %v15851_v55 = vld [vmem:[#allocation86_spill] sm:$0xff] }
 0x241   : > { %v2959_v1 = vcombine.high %v1782_v21, %v1786_v44  ;;  %v2958_v41 = vcombine.low %v1782_v21, %v1786_v44 }
 0x242   : > { %v1444_v48 = vpop.permute.xlu1 %1443  ;;  %v3245_v18 = vrot.slane %v3231_v7, %v9991_v43  ;;  %v10769_v7 = vrot.slane %v2991_v17, %v10074_v15  ;;  %v10787_v17 = vrot.slane %v3278_v22, %v10074_v15 }
 0x243   : > { %v10751_v26 = vsel %vm15453_vm0, %v15820_v34, %v1444_v48  ;;  %v1440_v56 = vpop.permute.xlu0 %1439  ;;  %v2966_v48 = vrot.slane %v2958_v41, %v9991_v43  ;;  %v2973_v34 = vrot.slane %v2959_v1, %v9991_v43  ;;  %v10772_v41 = vrot.slane %v3006_v29, %v10074_v15 }
 0x244   : > { %15821 = vst [vmem:[#allocation69_spill] sm:$0xff] %v10751_v26  ;;  %v3247_v20 = vcombine.high %v10747_v16, %v10751_v26  ;;  %v1788_v54 = vsel %vm15453_vm0, %v15823_v38, %v1440_v56  ;;  %15826 = vst [vmem:[#allocation74_spill] sm:$0xff] %v10787_v17  ;;  %v10790_v29 = vrot.slane %v3007_v10, %v10074_v15 }
 0x245   : > { %v2974_v39 = vcombine.low %v1784_v6, %v1788_v54  ;;  %v2975_v25 = vcombine.high %v1784_v6, %v1788_v54 }
 0x246   : > { %v3261_v28 = vrot.slane %v3247_v20, %v9991_v43  ;;  %v1455_v21 = vpop.permute.xlu1 %1454 }
 0x247   : > { %v2982_v59 = vrot.slane %v2974_v39, %v9991_v43  ;;  %v2989_v19 = vrot.slane %v2975_v25, %v9991_v43  ;;  %v1451_v44 = vpop.permute.xlu0 %1450 }
 0x248   : > { %v3310_v30 = vcombine.low %v3245_v18, %v3261_v28  ;;  %v3311_v47 = vcombine.high %v3245_v18, %v3261_v28 }
 0x249   : > { %v3022_v38 = vcombine.low %v2966_v48, %v2982_v59  ;;  %v3023_v56 = vcombine.high %v2966_v48, %v2982_v59  ;;  %v3038_v6 = vcombine.low %v2973_v34, %v2989_v19  ;;  %v3039_v46 = vcombine.high %v2973_v34, %v2989_v19  ;;  %v15839_v34 = vld [vmem:[#allocation80_spill] sm:$0xff] }
 0x24a   : > { %v1466_v1 = vpop.permute.xlu1 %1465  ;;  %v10793_v18 = vrot.slane %v3310_v30, %v10074_v15  ;;  %v10796_v28 = vrot.slane %v3311_v47, %v10074_v15  ;;  %v15834_v47 = vld [vmem:[#allocation78_spill] sm:$0xff] }
 0x24b   : > { %v10775_v20 = vrot.slane %v3022_v38, %v10074_v15  ;;  %v10778_v25 = vrot.slane %v3023_v56, %v10074_v15  ;;  %v10781_v54 = vrot.slane %v3038_v6, %v10074_v15  ;;  %v10784_v39 = vrot.slane %v3039_v46, %v10074_v15  ;;  %v1462_v60 = vpop.permute.xlu0 %1461  ;;  %v15831_v46 = vld [vmem:[#allocation77_spill] sm:$0xff] }
 0x24c   : > { %15827 = vst [vmem:[#allocation71_spill] sm:$0xff] %v10793_v18  ;;  %15828 = vst [vmem:[#allocation75_spill] sm:$0xff] %v10796_v28  ;;  %v15829_v56 = vcombine.high %v10712_v31, %v10715_v42  ;;  %v10822_v22 = vsel %vm15453_vm0, %v15831_v46, %v1455_v21  ;;  %v1790_v38 = vsel %vm15453_vm0, %v15834_v47, %v1451_v44  ;;  %v15835_v47 = vld [vmem:[#allocation79_spill] sm:$0xff] }
 0x24d   : > { %15825 = vst [vmem:[#allocation70_spill] sm:$0xff] %v10775_v20  ;;  %v3055_v48 = vcombine.high %v10766_v52, %v10775_v20  ;;  %15832 = vst [vmem:[#allocation76_spill] sm:$0xff] %v10822_v22  ;;  %v15840_v20 = vld [vmem:[#allocation82_spill] sm:$0xff] }
 0x24e   : > { %v1477_v10 = vpop.permute.xlu1 %1476  ;;  %v10818_v6 = vrot.slane %v15829_v56, %v10074_v15  ;;  %v10845_v56 = vsel %vm15453_vm0, %v15835_v47, %v1466_v1 }
 0x24f   : > { %v10826_v30 = vsel %vm15453_vm0, %v9854_v14, %v1477_v10  ;;  %4030 = vrot.lane.b32.xlu0 %v3055_v48, %s9295_s16  ;;  %v1473_v19 = vpop.permute.xlu0 %1472  ;;  %15836 = vst [vmem:[#allocation78_spill] sm:$0xff] %v10845_v56  ;;  %v1792_v14 = vsel %vm15453_vm0, %v15839_v34, %v1462_v60 }
 0x250   : > { %15830 = vst [vmem:[#allocation72_spill] sm:$0xff] %v10818_v6  ;;  %15833 = vst [vmem:[#allocation77_spill] sm:$0xff] %v10826_v30  ;;  %v3335_v59 = vcombine.high %v10822_v22, %v10826_v30  ;;  %v1794_v31 = vsel %vm15453_vm0, %v9856_v11, %v1473_v19  ;;  %v15837_v11 = vld [vmem:[#allocation81_spill] sm:$0xff]  ;;  %v15845_v22 = vld [vmem:[#allocation84_spill] sm:$0xff] }
 0x251   : > { %v3063_v21 = vcombine.high %v1790_v38, %v1794_v31  ;;  %v3062_v46 = vcombine.low %v1790_v38, %v1794_v31 }
 0x252   : > { %v1488_v10 = vpop.permute.xlu1 %1487  ;;  %v10858_v1 = vrot.slane %v3335_v59, %v9991_v43 }
 0x253   : > { %v10849_v19 = vsel %vm15453_vm0, %v15837_v11, %v1488_v10  ;;  %v1484_v42 = vpop.permute.xlu0 %1483  ;;  %v3070_v10 = vrot.slane %v3062_v46, %v9991_v43  ;;  %v3077_v47 = vrot.slane %v3063_v21, %v9991_v43  ;;  %v15841_v46 = vld [vmem:[#allocation83_spill] sm:$0xff] }
 0x254   : > { %15838 = vst [vmem:[#allocation79_spill] sm:$0xff] %v10849_v19  ;;  %v3351_v48 = vcombine.high %v10845_v56, %v10849_v19  ;;  %v1796_v52 = vsel %vm15453_vm0, %v15840_v20, %v1484_v42  ;;  %v15847_v19 = vld [vmem:[#allocation85_spill] sm:$0xff] }
 0x255   : > { %v3078_v44 = vcombine.low %v1792_v14, %v1796_v52  ;;  %v3079_v28 = vcombine.high %v1792_v14, %v1796_v52 }
 0x256   : > { %v10861_v38 = vrot.slane %v3351_v48, %v9991_v43  ;;  %v1499_v31 = vpop.permute.xlu1 %1498 }
 0x257   : > { %v3086_v60 = vrot.slane %v3078_v44, %v9991_v43  ;;  %v3093_v34 = vrot.slane %v3079_v28, %v9991_v43  ;;  %v1495_v11 = vpop.permute.xlu0 %1494  ;;  %v10873_v21 = vsel %vm15453_vm0, %v15841_v46, %v1499_v31  ;;  %v15843_v44 = vld [vmem:[#allocation87_spill] sm:$0xff] }
 0x258   : > { %v3414_v20 = vcombine.low %v10858_v1, %v10861_v38  ;;  %v3415_v52 = vcombine.high %v10858_v1, %v10861_v38  ;;  %15842 = vst [vmem:[#allocation81_spill] sm:$0xff] %v10873_v21  ;;  %v1798_v30 = vsel %vm15453_vm0, %v15845_v22, %v1495_v11  ;;  %v15846_v38 = vld [vmem:[#allocation88_spill] sm:$0xff] }
 0x259   : > { %v3127_v59 = vcombine.high %v3070_v10, %v3086_v60  ;;  %v3142_v42 = vcombine.low %v3077_v47, %v3093_v34  ;;  %v3143_v14 = vcombine.high %v3077_v47, %v3093_v34  ;;  %v3126_v50 = vcombine.low %v3070_v10, %v3086_v60 }
 0x25a   : > { %v1510_v48 = vpop.permute.xlu1 %1509 }
 0x25b   : > { %v1506_v6 = vpop.permute.xlu0 %1505  ;;  %v10887_v31 = vsel %vm15453_vm0, %v15847_v19, %v1510_v48  ;;  %v10906_v60 = vrot.slane %v3126_v50, %v10074_v15 }
 0x25c   : > { %15848 = vst [vmem:[#allocation82_spill] sm:$0xff] %v10887_v31  ;;  %v1800_v22 = vsel %vm15453_vm0, %v15851_v55, %v1506_v6 }
 0x25d   : > { %15853 = vst [vmem:[#allocation87_spill] sm:$0xff] %v10906_v60 }
 0x25e   : > { %v1521_v18 = vpop.permute.xlu1 %1520 }
 0x25f   : > { %v10877_v28 = vsel %vm15453_vm0, %v15843_v44, %v1521_v18  ;;  %v1517_v17 = vpop.permute.xlu0 %1516 }
 0x260   : > { %15844 = vst [vmem:[#allocation80_spill] sm:$0xff] %v10877_v28  ;;  %v3367_v1 = vcombine.high %v10873_v21, %v10877_v28  ;;  %v1802_v47 = vsel %vm15453_vm0, %v15846_v38, %v1517_v17  ;;  %v15852_v21 = vld [vmem:[#allocation90_spill] sm:$0xff] }
 0x261   : > { %v3095_v34 = vcombine.high %v1798_v30, %v1802_v47  ;;  %v3094_v46 = vcombine.low %v1798_v30, %v1802_v47 }
 0x262   : > { %v1532_v56 = vpop.permute.xlu1 %1531  ;;  %v3381_v19 = vrot.slane %v3367_v1, %v9991_v43  ;;  %v10909_v1 = vrot.slane %v3127_v59, %v10074_v15  ;;  %v10927_v59 = vrot.slane %v3414_v20, %v10074_v15  ;;  %v15865_v20 = vld [vmem:[#allocation95_spill] sm:$0xff] }
 0x263   : > { %v10891_v18 = vsel %vm15453_vm0, %v15849_v53, %v1532_v56  ;;  %v1528_v44 = vpop.permute.xlu0 %1527  ;;  %v3102_v53 = vrot.slane %v3094_v46, %v9991_v43  ;;  %v3109_v56 = vrot.slane %v3095_v34, %v9991_v43  ;;  %v10912_v46 = vrot.slane %v3142_v42, %v10074_v15 }
 0x264   : > { %15850 = vst [vmem:[#allocation83_spill] sm:$0xff] %v10891_v18  ;;  %v3383_v11 = vcombine.high %v10887_v31, %v10891_v18  ;;  %v1804_v17 = vsel %vm15453_vm0, %v15852_v21, %v1528_v44  ;;  %15858 = vst [vmem:[#allocation86_spill] sm:$0xff] %v10927_v59  ;;  %v10930_v42 = vrot.slane %v3143_v14, %v10074_v15 }
 0x265   : > { %v3110_v38 = vcombine.low %v1800_v22, %v1804_v17  ;;  %v3111_v28 = vcombine.high %v1800_v22, %v1804_v17  ;;  %15854 = vst [vmem:[#allocation84_spill] sm:$0xff] %v10912_v46  ;;  %v15914_v46 = vld [vmem:[#allocation117_spill] sm:$0xff] }
 0x266   : > { %v3397_v30 = vrot.slane %v3383_v11, %v9991_v43  ;;  %v1543_v48 = vpop.permute.xlu1 %1542  ;;  %15859 = vst [vmem:[#allocation90_spill] sm:$0xff] %v10930_v42 }
 0x267   : > { %v3118_v55 = vrot.slane %v3110_v38, %v9991_v43  ;;  %v3125_v6 = vrot.slane %v3111_v28, %v9991_v43  ;;  %v1539_v47 = vpop.permute.xlu0 %1538 }
 0x268   : > { %v3446_v31 = vcombine.low %v3381_v19, %v3397_v30  ;;  %v3447_v18 = vcombine.high %v3381_v19, %v3397_v30 }
 0x269   : > { %v3158_v21 = vcombine.low %v3102_v53, %v3118_v55  ;;  %v3159_v44 = vcombine.high %v3102_v53, %v3118_v55  ;;  %v3174_v22 = vcombine.low %v3109_v56, %v3125_v6  ;;  %v3175_v10 = vcombine.high %v3109_v56, %v3125_v6 }
 0x26a   : > { %v1554_v34 = vpop.permute.xlu1 %1553  ;;  %v10933_v19 = vrot.slane %v3446_v31, %v10074_v15  ;;  %v10936_v30 = vrot.slane %v3447_v18, %v10074_v15  ;;  %v15869_v18 = vld [vmem:[#allocation97_spill] sm:$0xff] }
 0x26b   : > { %v10915_v11 = vrot.slane %v3158_v21, %v10074_v15  ;;  %v10918_v28 = vrot.slane %v3159_v44, %v10074_v15  ;;  %v10921_v17 = vrot.slane %v3174_v22, %v10074_v15  ;;  %v10924_v38 = vrot.slane %v3175_v10, %v10074_v15  ;;  %v1550_v50 = vpop.permute.xlu0 %1549  ;;  %v15863_v22 = vld [vmem:[#allocation91_spill] sm:$0xff] }
 0x26c   : > { %15860 = vst [vmem:[#allocation150_spill] sm:$0xff] %v10933_v19  ;;  %15861 = vst [vmem:[#allocation151_spill] sm:$0xff] %v10936_v30  ;;  %v10955_v44 = vrot.slane %v3415_v52, %v10074_v15  ;;  %v10959_v10 = vsel %vm15453_vm0, %v15863_v22, %v1543_v48 }
 0x26d   : > { %15855 = vst [vmem:[#allocation88_spill] sm:$0xff] %v10915_v11  ;;  %15856 = vst [vmem:[#allocation85_spill] sm:$0xff] %v10921_v17  ;;  %v3191_v53 = vcombine.high %v10906_v60, %v10915_v11 }
 0x26e   : > { %15857 = vst [vmem:[#allocation89_spill] sm:$0xff] %v10924_v38  ;;  %v1565_v14 = vpop.permute.xlu1 %1564  ;;  %15862 = vst [vmem:[#allocation152_spill] sm:$0xff] %v10955_v44  ;;  %v15873_v38 = vld [vmem:[#allocation96_spill] sm:$0xff] }
 0x26f   : > { %15864 = vst [vmem:[#allocation91_spill] sm:$0xff] %v10959_v10  ;;  %v10963_v55 = vsel %vm15453_vm0, %v15865_v20, %v1565_v14  ;;  %4032 = vrot.lane.b32.xlu1 %v3191_v53, %s9295_s16  ;;  %v1561_v31 = vpop.permute.xlu0 %1560  ;;  %v15867_v14 = vld [vmem:[#allocation93_spill] sm:$0xff] }
 0x270   : > { %15866 = vst [vmem:[#allocation95_spill] sm:$0xff] %v10963_v55  ;;  %v3743_v6 = vcombine.high %v10959_v10, %v10963_v55  ;;  %v10978_v53 = vsel %vm15453_vm0, %v15867_v14, %v1554_v34  ;;  %v15871_v34 = vld [vmem:[#allocation98_spill] sm:$0xff]  ;;  %v10998_v42 = vsel %vm15453_vm0, %v15873_v38, %v1561_v31  ;;  %v15874_v10 = vld [vmem:[#allocation99_spill] sm:$0xff]  ;;  %v15878_v55 = vld [vmem:[#allocation92_spill] sm:$0xff] }
 0x271   : > { %15868 = vst [vmem:[#allocation93_spill] sm:$0xff] %v10978_v53  ;;  %v15879_v31 = vld [vmem:[#allocation104_spill] sm:$0xff] }
 0x272   : > { %v1576_v22 = vpop.permute.xlu1 %1575  ;;  %v3757_v52 = vrot.slane %v3743_v6, %v9991_v43 }
 0x273   : > { %v10982_v56 = vsel %vm15453_vm0, %v15869_v18, %v1576_v22  ;;  %v1572_v11 = vpop.permute.xlu0 %1571  ;;  %v15872_v18 = vld [vmem:[#allocation94_spill] sm:$0xff] }
 0x274   : > { %15870 = vst [vmem:[#allocation97_spill] sm:$0xff] %v10982_v56  ;;  %v3759_v21 = vcombine.high %v10978_v53, %v10982_v56  ;;  %v10990_v14 = vsel %vm15453_vm0, %v15871_v34, %v1572_v11  ;;  %v10994_v22 = vsel %vm15453_vm0, %v15872_v18, %v1550_v50  ;;  %v11012_v50 = vsel %vm15453_vm0, %v15878_v55, %v1539_v47  ;;  %v15881_v56 = vld [vmem:[#allocation101_spill] sm:$0xff] }
 0x276   : > { %v3773_v48 = vrot.slane %v3759_v21, %v9991_v43  ;;  %v1587_v60 = vpop.permute.xlu1 %1586  ;;  %v3486_v21 = vcombine.low %v10994_v22, %v10990_v14 }
 0x277   : > { %v1583_v19 = vpop.permute.xlu0 %1582 }
 0x278   : > { %v3822_v59 = vcombine.low %v3757_v52, %v3773_v48  ;;  %v3823_v20 = vcombine.high %v3757_v52, %v3773_v48  ;;  %v11004_v52 = vsel %vm15453_vm0, %v15874_v10, %v1587_v60  ;;  %v15876_v48 = vld [vmem:[#allocation103_spill] sm:$0xff]  ;;  %v3470_v60 = vcombine.low %v11012_v50, %v10998_v42  ;;  %v15880_v10 = vld [vmem:[#allocation100_spill] sm:$0xff] }
 0x279   : > { %15875 = vst [vmem:[#allocation98_spill] sm:$0xff] %v11004_v52  ;;  %v11024_v53 = vsel %vm15453_vm0, %v15880_v10, %v1583_v19 }
 0x27a   : > { %v1598_v30 = vpop.permute.xlu1 %1597 }
 0x27b   : > { %v1594_v44 = vpop.permute.xlu0 %1593  ;;  %v11029_v47 = vsel %vm15453_vm0, %v15881_v56, %v1598_v30  ;;  %v3478_v30 = vrot.slane %v3470_v60, %v9991_v43 }
 0x27c   : > { %15882 = vst [vmem:[#allocation96_spill] sm:$0xff] %v11029_v47 }
 0x27e   : > { %v1609_v6 = vpop.permute.xlu1 %1608 }
 0x27f   : > { %v11008_v11 = vsel %vm15453_vm0, %v15876_v48, %v1609_v6  ;;  %v1605_v34 = vpop.permute.xlu0 %1604  ;;  %v3494_v48 = vrot.slane %v3486_v21, %v9991_v43  ;;  %v15886_v21 = vld [vmem:[#allocation106_spill] sm:$0xff] }
 0x280   : > { %15877 = vst [vmem:[#allocation94_spill] sm:$0xff] %v11008_v11  ;;  %v3775_v38 = vcombine.high %v11004_v52, %v11008_v11  ;;  %v11018_v18 = vsel %vm15453_vm0, %v15879_v31, %v1605_v34  ;;  %v15883_v52 = vld [vmem:[#allocation105_spill] sm:$0xff]  ;;  %v15885_v11 = vld [vmem:[#allocation102_spill] sm:$0xff] }
 0x281   : > { %v3502_v55 = vcombine.low %v11024_v53, %v11018_v18  ;;  %v11039_v57 = vsel %vm15453_vm0, %v15885_v11, %v1594_v44  ;;  %v3534_v26 = vcombine.low %v3478_v30, %v3494_v48 }
 0x282   : > { %v1620_v6 = vpop.permute.xlu1 %1619 }
 0x283   : > { %v11035_v34 = vsel %vm15453_vm0, %v15883_v52, %v1620_v6  ;;  %v1616_v31 = vpop.permute.xlu0 %1615  ;;  %v3789_v52 = vrot.slane %v3775_v38, %v9991_v43  ;;  %v3510_v44 = vrot.slane %v3502_v55, %v9991_v43  ;;  %v11055_v60 = vrot.slane %v3534_v26, %v10074_v15 }
 0x284   : > { %15884 = vst [vmem:[#allocation99_spill] sm:$0xff] %v11035_v34  ;;  %v3791_v19 = vcombine.high %v11029_v47, %v11035_v34  ;;  %v11045_v10 = vsel %vm15453_vm0, %v15886_v21, %v1616_v31 }
 0x285   : > { %v3518_v56 = vcombine.low %v11039_v57, %v11045_v10  ;;  %15887 = vst [vmem:[#allocation103_spill] sm:$0xff] %v11055_v60 }
 0x286   : > { %v3805_v6 = vrot.slane %v3791_v19, %v9991_v43  ;;  %v1631_v16 = vpop.permute.xlu1 %1630 }
 0x287   : > { %v3526_v11 = vrot.slane %v3518_v56, %v9991_v43  ;;  %v1627_v47 = vpop.permute.xlu0 %1626  ;;  %v11069_v56 = vrot.slane %v3822_v59, %v10074_v15 }
 0x288   : > { %v3854_v34 = vcombine.low %v3789_v52, %v3805_v6  ;;  %v3855_v35 = vcombine.high %v3789_v52, %v3805_v6  ;;  %v11074_v6 = vrot.slane %v3823_v20, %v10074_v15  ;;  %v15901_v20 = vcombine.low %v10097_v23, %v10105_v2 }
 0x289   : > { %v3566_v31 = vcombine.low %v3510_v44, %v3526_v11  ;;  %15891 = vst [vmem:[#allocation101_spill] sm:$0xff] %v11069_v56 }
 0x28a   : > { %v1642_v21 = vpop.permute.xlu1 %1641  ;;  %v11061_v19 = vrot.slane %v3854_v34, %v10074_v15  ;;  %v11064_v37 = vrot.slane %v3855_v35, %v10074_v15  ;;  %15892 = vst [vmem:[#allocation105_spill] sm:$0xff] %v11074_v6 }
 0x28b   : > { %v11058_v51 = vrot.slane %v3566_v31, %v10074_v15  ;;  %v1638_v38 = vpop.permute.xlu0 %1637  ;;  %v15893_v31 = vld [vmem:[#allocation107_spill] sm:$0xff] }
 0x28c   : > { %15889 = vst [vmem:[#allocation104_spill] sm:$0xff] %v11061_v19  ;;  %15890 = vst [vmem:[#allocation100_spill] sm:$0xff] %v11064_v37  ;;  %v11078_v34 = vsel %vm15453_vm0, %v15893_v31, %v1631_v16  ;;  %v3567_v19 = vcombine.high %v3510_v44, %v3526_v11  ;;  %v3535_v37 = vcombine.high %v3478_v30, %v3494_v48  ;;  %v15904_v48 = vld [vmem:[#allocation114_spill] sm:$0xff] }
 0x28d   : > { %15888 = vst [vmem:[#allocation92_spill] sm:$0xff] %v11058_v51  ;;  %v3599_v55 = vcombine.high %v11055_v60, %v11058_v51  ;;  %15894 = vst [vmem:[#allocation102_spill] sm:$0xff] %v11078_v34  ;;  %v15899_v51 = vld [vmem:[#allocation113_spill] sm:$0xff]  ;;  %v15903_v44 = vcombine.low %v10769_v7, %v10778_v25 }
 0x28e   : > { %v1653_v52 = vpop.permute.xlu1 %1652 }
 0x28f   : > { %v11082_v35 = vsel %vm15453_vm0, %v15895_v63, %v1653_v52  ;;  %4034 = vrot.lane.b32.xlu0 %v3599_v55, %s9295_s16  ;;  %v1649_v9 = vpop.permute.xlu0 %1648  ;;  %v15897_v52 = vld [vmem:[#allocation109_spill] sm:$0xff] }
 0x290   : > { %15896 = vst [vmem:[#allocation106_spill] sm:$0xff] %v11082_v35  ;;  %v3879_v59 = vcombine.high %v11078_v34, %v11082_v35  ;;  %v11097_v55 = vsel %vm15453_vm0, %v15897_v52, %v1642_v21  ;;  %v3549_v35 = vrot.slane %v3535_v37, %v10074_v15 }
 0x291   : > { %15898 = vst [vmem:[#allocation107_spill] sm:$0xff] %v11097_v55 }
 0x292   : > { %v1664_v31 = vpop.permute.xlu1 %1663  ;;  %v3893_v63 = vrot.slane %v3879_v59, %v9991_v43 }
 0x293   : > { %v11101_v60 = vsel %vm15453_vm0, %v15899_v51, %v1664_v31  ;;  %4054 = vrot.lane.b32.xlu0 %v15901_v20, %s9296_s17  ;;  %v1660_v26 = vpop.permute.xlu0 %1659  ;;  %v15902_v51 = vcombine.low %v10447_v62, %v10455_v13  ;;  %v3581_v20 = vrot.slane %v3567_v19, %v10074_v15 }
 0x294   : > { %15900 = vst [vmem:[#allocation111_spill] sm:$0xff] %v11101_v60  ;;  %v3895_v16 = vcombine.high %v11097_v55, %v11101_v60  ;;  %v11123_v30 = vsel %vm15453_vm0, %v15904_v48, %v1660_v26  ;;  %v15907_v55 = vld [vmem:[#allocation115_spill] sm:$0xff]  ;;  %v15911_v48 = vld [vmem:[#allocation108_spill] sm:$0xff] }
 0x295   : > { %v3600_v59 = vcombine.low %v3549_v35, %v3581_v20  ;;  %v15909_v60 = vld [vmem:[#allocation119_spill] sm:$0xff] }
 0x296   : > { %v3909_v21 = vrot.slane %v3895_v16, %v9991_v43  ;;  %v1675_v52 = vpop.permute.xlu1 %1674  ;;  %v15905_v16 = vld [vmem:[#allocation110_spill] sm:$0xff] }
 0x297   : > { %4058 = vrot.lane.b32.xlu0 %v15902_v51, %s9296_s17  ;;  %v1671_v31 = vpop.permute.xlu0 %1670  ;;  %v11127_v51 = vsel %vm15453_vm0, %v15905_v16, %v1638_v38  ;;  %v11146_v16 = vsel %vm15453_vm0, %v15911_v48, %v1627_v47 }
 0x298   : > { %v3958_v6 = vcombine.low %v3893_v63, %v3909_v21  ;;  %v3959_v56 = vcombine.high %v3893_v63, %v3909_v21  ;;  %v15906_v63 = vld [vmem:[#allocation112_spill] sm:$0xff]  ;;  %v3622_v21 = vcombine.low %v11127_v51, %v11123_v30 }
 0x299   : > { %v11131_v19 = vsel %vm15453_vm0, %v15906_v63, %v1649_v9  ;;  %v15912_v63 = vld [vmem:[#allocation120_spill] sm:$0xff] }
 0x29a   : > { %v1686_v34 = vpop.permute.xlu1 %1685 }
 0x29b   : > { %4062 = vrot.lane.b32.xlu0 %v15903_v44, %s9296_s17  ;;  %v1682_v11 = vpop.permute.xlu0 %1681  ;;  %v11137_v44 = vsel %vm15453_vm0, %v15907_v55, %v1675_v52  ;;  %v3606_v55 = vcombine.low %v11146_v16, %v11131_v19  ;;  %v15913_v52 = vld [vmem:[#allocation116_spill] sm:$0xff]  ;;  %v11163_v47 = vsel %vm15453_vm0, %v15914_v46, %v1686_v34  ;;  %v15920_v34 = vld [vmem:[#allocation122_spill] sm:$0xff] }
 0x29c   : > { %15908 = vst [vmem:[#allocation109_spill] sm:$0xff] %v11137_v44  ;;  %15915 = vst [vmem:[#allocation114_spill] sm:$0xff] %v11163_v47 }
 0x29e   : > { %v1697_v37 = vpop.permute.xlu1 %1696 }
 0x29f   : > { %v11141_v26 = vsel %vm15453_vm0, %v15909_v60, %v1697_v37  ;;  %4066 = vrot.lane.b32.xlu0 %v3600_v59, %s9296_s17  ;;  %v1693_v38 = vpop.permute.xlu0 %1692  ;;  %v11158_v60 = vsel %vm15453_vm0, %v15913_v52, %v1671_v31  ;;  %v3630_v37 = vrot.slane %v3622_v21, %v9991_v43  ;;  %v15918_v31 = vcombine.high %v10097_v23, %v10105_v2  ;;  %v15919_v52 = vld [vmem:[#allocation118_spill] sm:$0xff] }
 0x2a0   : > { %15910 = vst [vmem:[#allocation113_spill] sm:$0xff] %v11141_v26  ;;  %v3911_v9 = vcombine.high %v11137_v44, %v11141_v26  ;;  %v11152_v17 = vsel %vm15453_vm0, %v15912_v63, %v1693_v38  ;;  %v15916_v44 = vld [vmem:[#allocation121_spill] sm:$0xff]  ;;  %v11177_v21 = vsel %vm15453_vm0, %v15919_v52, %v1682_v11 }
 0x2a1   : > { %v3638_v48 = vcombine.low %v11158_v60, %v11152_v17 }
 0x2a2   : > { %v1708_v59 = vpop.permute.xlu1 %1707  ;;  %v3925_v23 = vrot.slane %v3911_v9, %v9991_v43 }
 0x2a3   : > { %v11169_v38 = vsel %vm15453_vm0, %v15916_v44, %v1708_v59  ;;  %4086 = vrot.lane.b32.xlu0 %v15918_v31, %s9297_s19  ;;  %v1704_v63 = vpop.permute.xlu0 %1703  ;;  %v3614_v44 = vrot.slane %v3606_v55, %v9991_v43  ;;  %v3646_v11 = vrot.slane %v3638_v48, %v9991_v43  ;;  %v15924_v48 = vcombine.high %v10769_v7, %v10778_v25 }
 0x2a4   : > { %15917 = vst [vmem:[#allocation110_spill] sm:$0xff] %v11169_v38  ;;  %v3927_v46 = vcombine.high %v11163_v47, %v11169_v38  ;;  %v11183_v26 = vsel %vm15453_vm0, %v15920_v34, %v1704_v63  ;;  %v15921_v47 = vcombine.high %v10447_v62, %v10455_v13  ;;  %v3519_v13 = vcombine.high %v11039_v57, %v11045_v10  ;;  %v16075_v57 = vld [vmem:[#allocation150_spill] sm:$0xff] }
 0x2a5   : > { %v3654_v59 = vcombine.low %v11177_v21, %v11183_v26  ;;  %v3670_v31 = vcombine.low %v3614_v44, %v3630_v37  ;;  %v3487_v25 = vcombine.high %v10994_v22, %v10990_v14  ;;  %v3471_v14 = vcombine.high %v11012_v50, %v10998_v42 }
 0x2a6   : > { %v3941_v2 = vrot.slane %v3927_v46, %v9991_v43  ;;  %vm8941_vm0 = vcmask 261120  }
 0x2a7   : > { %v3662_v52 = vrot.slane %v3654_v59, %v9991_v43  ;;  %4090 = vrot.lane.b32.xlu0 %v15921_v47, %s9297_s19  ;;  %v11197_v38 = vrot.slane %v3670_v31, %v10074_v15  ;;  %v3601_v47 = vcombine.high %v3549_v35, %v3581_v20  ;;  %v3503_v31 = vcombine.high %v11024_v53, %v11018_v18 }
 0x2a8   : > { %v3990_v63 = vcombine.low %v3925_v23, %v3941_v2  ;;  %v3991_v34 = vcombine.high %v3925_v23, %v3941_v2  ;;  %v11217_v23 = vrot.slane %v3958_v6, %v10074_v15  ;;  %v11220_v2 = vrot.slane %v3959_v56, %v10074_v15 }
 0x2a9   : > { %v3702_v55 = vcombine.low %v3646_v11, %v3662_v52  ;;  %15922 = vst [vmem:[#allocation112_spill] sm:$0xff] %v11197_v38  ;;  %v3533_v53 = vrot.slane %v3519_v13, %v9991_v43  ;;  %v3501_v22 = vrot.slane %v3487_v25, %v9991_v43  ;;  %v3517_v18 = vrot.slane %v3503_v31, %v9991_v43 }
 0x2aa   : > { %v11207_v46 = vrot.slane %v3990_v63, %v10074_v15  ;;  %v11210_v62 = vrot.slane %v3991_v34, %v10074_v15  ;;  %v15925_v35 = vcombine.low %v10123_v49, %v10108_v24  ;;  %v15926_v20 = vcombine.low %v10272_v27, %v10280_v12 }
 0x2ab   : > { %v11200_v9 = vrot.slane %v3702_v55, %v10074_v15  ;;  %4094 = vrot.lane.b32.xlu0 %v15924_v48, %s9297_s19  ;;  %v3485_v63 = vrot.slane %v3471_v14, %v9991_v43  ;;  %v3582_v42 = vcombine.low %v3517_v18, %v3533_v53  ;;  %v3703_v50 = vcombine.high %v3646_v11, %v3662_v52 }
 0x2ac   : > { %v3671_v55 = vcombine.high %v3614_v44, %v3630_v37  ;;  %v15927_v48 = vcombine.low %v10473_v33, %v10458_v5  ;;  %v15928_v13 = vcombine.low %v10615_v0, %v10621_v58  ;;  %v15929_v37 = vcombine.low %v10772_v41, %v10781_v54 }
 0x2ad   : > { %15923 = vst [vmem:[#allocation115_spill] sm:$0xff] %v11200_v9  ;;  %v3735_v59 = vcombine.high %v11197_v38, %v11200_v9  ;;  %v3550_v34 = vcombine.low %v3485_v63, %v3501_v22  ;;  %v15930_v44 = vcombine.low %v10909_v1, %v10918_v28  ;;  %v15931_v14 = vcombine.high %v10123_v49, %v10108_v24  ;;  %v16083_v9 = vld [vmem:[#allocation100_spill] sm:$0xff] }
 0x2ae   : > { %v3685_v11 = vrot.slane %v3671_v55, %v10074_v15  ;;  %v15935_v24 = vcombine.high %v10772_v41, %v10781_v54  ;;  %v15936_v49 = vcombine.high %v10909_v1, %v10918_v28  ;;  %v15937_v28 = vcombine.low %v10129_v4, %v10111_v8  ;;  %v15943_v55 = vld [vmem:[#allocation85_spill] sm:$0xff] }
 0x2af   : > { %4098 = vrot.lane.b32.xlu0 %v3601_v47, %s9297_s19  ;;  %4036 = vrot.lane.b32.xlu1 %v3735_v59, %s9295_s16  ;;  %v3590_v47 = vrot.slane %v3582_v42, %v10074_v15  ;;  %v3717_v59 = vrot.slane %v3703_v50, %v10074_v15  ;;  %v3558_v25 = vrot.slane %v3550_v34, %v10074_v15  ;;  %v15942_v34 = vld [vmem:[#allocation84_spill] sm:$0xff] }
 0x2b0   : > { %v15934_v42 = vcombine.high %v10615_v0, %v10621_v58  ;;  %v3639_v0 = vcombine.high %v11158_v60, %v11152_v17  ;;  %v3607_v58 = vcombine.high %v11146_v16, %v11131_v19  ;;  %v15938_v17 = vcombine.low %v10298_v32, %v10283_v3 }
 0x2b1   : > { %v3602_v52 = vcombine.low %v3558_v25, %v3590_v47  ;;  %v3736_v31 = vcombine.low %v3685_v11, %v3717_v59  ;;  %v15939_v60 = vcombine.low %v10479_v45, %v10461_v61 }
 0x2b2   : > { %v11315_v1 = vrot.slane %v3639_v0, %v9991_v43 }
 0x2b3   : > { %4118 = vrot.lane.b32.xlu0 %v15925_v35, %s9298_s20  ;;  %4056 = vrot.lane.b32.xlu1 %v15926_v20, %s9296_s17  ;;  %v15932_v35 = vcombine.high %v10272_v27, %v10280_v12  ;;  %v15933_v20 = vcombine.high %v10473_v33, %v10458_v5  ;;  %v3655_v27 = vcombine.high %v11177_v21, %v11183_v26 }
 0x2b4   : > { %v3603_v12 = vcombine.high %v3558_v25, %v3590_v47  ;;  %v3737_v5 = vcombine.high %v3685_v11, %v3717_v59  ;;  %v3623_v33 = vcombine.high %v11127_v51, %v11123_v30  ;;  %v3583_v30 = vcombine.high %v3517_v18, %v3533_v53  ;;  %v15945_v59 = vld [vmem:[#allocation131_spill] sm:$0xff]  ;;  %v15946_v25 = vld [vmem:[#allocation130_spill] sm:$0xff] }
 0x2b5   : > { %v11309_v41 = vrot.slane %v3655_v27, %v9991_v43  ;;  %v11326_v51 = vrot.slane %v3607_v58, %v9991_v43  ;;  %v3551_v26 = vcombine.high %v3485_v63, %v3501_v22  ;;  %v15940_v21 = vcombine.low %v10630_v36, %v10624_v40 }
 0x2b6   : > { %v11312_v54 = vrot.slane %v3623_v33, %v9991_v43  ;;  %v3597_v53 = vrot.slane %v3583_v30, %v10074_v15  ;;  %v15941_v63 = vcombine.low %v10790_v29, %v10784_v39  ;;  %v2158_v11 = vcombine.low %v15946_v25, %v15945_v59  ;;  %v15956_v33 = vld [vmem:[#allocation38_spill] sm:$0xff]  ;;  %v15967_v25 = vld [vmem:[#allocation65_spill] sm:$0xff] }
 0x2b7   : > { %4122 = vrot.lane.b32.xlu0 %v15927_v48, %s9298_s20  ;;  %4060 = vrot.lane.b32.xlu1 %v15928_v13, %s9296_s17  ;;  %v3718_v19 = vcombine.low %v11315_v1, %v11309_v41  ;;  %v3565_v50 = vrot.slane %v3551_v26, %v10074_v15  ;;  %v15944_v48 = vcombine.low %v15942_v34, %v15943_v55 }
 0x2b8   : > { %v3686_v16 = vcombine.low %v11326_v51, %v11312_v54  ;;  %v15962_v26 = vcombine.high %v10630_v36, %v10624_v40 }
 0x2b9   : > { %v3726_v18 = vrot.slane %v3718_v19, %v10074_v15  ;;  %v3604_v13 = vcombine.low %v3565_v50, %v3597_v53  ;;  %v15961_v19 = vcombine.high %v10479_v45, %v10461_v61  ;;  %v15966_v61 = vld [vmem:[#allocation68_spill] sm:$0xff] }
 0x2ba   : > { %v3694_v22 = vrot.slane %v3686_v16, %v10074_v15 }
 0x2bb   : > { %4126 = vrot.lane.b32.xlu0 %v15929_v37, %s9298_s20  ;;  %4064 = vrot.lane.b32.xlu1 %v15930_v44, %s9296_s17  ;;  %v15947_v37 = vld [vmem:[#allocation127_spill] sm:$0xff]  ;;  %v15948_v44 = vld [vmem:[#allocation126_spill] sm:$0xff] }
 0x2bc   : > { %v3738_v47 = vcombine.low %v3694_v22, %v3726_v18 }
 0x2bf   : > { %4130 = vrot.lane.b32.xlu0 %v3602_v52, %s9298_s20  ;;  %4068 = vrot.lane.b32.xlu1 %v3736_v31, %s9296_s17  ;;  %v2126_v52 = vcombine.low %v15948_v44, %v15947_v37  ;;  %v15949_v31 = vld [vmem:[#allocation129_spill] sm:$0xff]  ;;  %v15969_v44 = vld [vmem:[#allocation66_spill] sm:$0xff] }
 0x2c1   : > { %v11376_v58 = vrot.slane %v2126_v52, %v9991_v43  ;;  %v15970_v52 = vld [vmem:[#allocation67_spill] sm:$0xff] }
 0x2c3   : > { %4150 = vrot.lane.b32.xlu0 %v15931_v14, %s9299_s21  ;;  %4088 = vrot.lane.b32.xlu1 %v15932_v35, %s9297_s19  ;;  %v15950_v14 = vld [vmem:[#allocation128_spill] sm:$0xff] }
 0x2c4   : > { %v2142_v35 = vcombine.low %v15950_v14, %v15949_v31  ;;  %v3230_v31 = vcombine.low %v15970_v52, %v15969_v44  ;;  %v15971_v14 = vcombine.high %v10790_v29, %v10784_v39  ;;  %v15975_v39 = vld [vmem:[#allocation99_spill] sm:$0xff]  ;;  %v15976_v29 = vld [vmem:[#allocation96_spill] sm:$0xff]  ;;  %v15984_v52 = vld [vmem:[#allocation30_spill] sm:$0xff] }
 0x2c5   : > { %v15983_v44 = vld [vmem:[#allocation147_spill] sm:$0xff] }
 0x2c7   : > { %4154 = vrot.lane.b32.xlu0 %v15933_v20, %s9299_s21  ;;  %4092 = vrot.lane.b32.xlu1 %v15934_v42, %s9297_s19  ;;  %v15951_v20 = vcombine.high %v10129_v4, %v10111_v8  ;;  %v15952_v42 = vcombine.high %v10298_v32, %v10283_v3  ;;  %v11379_v8 = vrot.slane %v2142_v35, %v9991_v43  ;;  %v15957_v4 = vld [vmem:[#allocation37_spill] sm:$0xff]  ;;  %v15959_v3 = vld [vmem:[#allocation35_spill] sm:$0xff]  ;;  %v15960_v32 = vld [vmem:[#allocation34_spill] sm:$0xff] }
 0x2c8   : > { %v2686_v30 = vcombine.low %v15960_v32, %v15959_v3  ;;  %v15972_v35 = vcombine.high %v15942_v34, %v15943_v55  ;;  %v3739_v34 = vcombine.high %v3694_v22, %v3726_v18  ;;  %v11445_v3 = vrot.slane %v3230_v31, %v9991_v43  ;;  %v15977_v32 = vld [vmem:[#allocation97_spill] sm:$0xff] }
 0x2c9   : > { %v15985_v31 = vcombine.low %v15983_v44, %v15984_v52 }
 0x2ca   : > { %v11411_v36 = vrot.slane %v2686_v30, %v9991_v43  ;;  %v15978_v30 = vld [vmem:[#allocation93_spill] sm:$0xff] }
 0x2cb   : > { %4158 = vrot.lane.b32.xlu0 %v15935_v24, %s9299_s21  ;;  %4096 = vrot.lane.b32.xlu1 %v15936_v49, %s9297_s19  ;;  %v15953_v24 = vld [vmem:[#allocation124_spill] sm:$0xff]  ;;  %v15954_v49 = vld [vmem:[#allocation123_spill] sm:$0xff] }
 0x2cc   : > { %v2110_v27 = vcombine.low %v15954_v49, %v15953_v24  ;;  %v15973_v49 = vld [vmem:[#allocation62_spill] sm:$0xff] }
 0x2ce   : > { %v11394_v16 = vrot.slane %v2110_v27, %v9991_v43  ;;  %v15974_v27 = vld [vmem:[#allocation58_spill] sm:$0xff] }
 0x2cf   : > { %4162 = vrot.lane.b32.xlu0 %v3603_v12, %s9299_s21  ;;  %4100 = vrot.lane.b32.xlu1 %v3737_v5, %s9297_s19  ;;  %v11371_v12 = vrot.slane %v2158_v11, %v9991_v43  ;;  %v15955_v5 = vld [vmem:[#allocation39_spill] sm:$0xff]  ;;  %v15968_v11 = vld [vmem:[#allocation64_spill] sm:$0xff] }
 0x2d0   : > { %v2702_v0 = vcombine.low %v15956_v33, %v15955_v5  ;;  %v2174_v59 = vcombine.low %v11394_v16, %v11376_v58  ;;  %v3214_v37 = vcombine.low %v15968_v11, %v15967_v25  ;;  %v3198_v5 = vcombine.low %v15974_v27, %v15973_v49 }
 0x2d1   : > { %v3719_v27 = vcombine.high %v11315_v1, %v11309_v41 }
 0x2d2   : > { %v2182_v55 = vrot.slane %v2174_v59, %v10074_v15 }
 0x2d3   : > { %4182 = vrot.lane.b32.xlu0 %v15937_v28, %s9300_s22  ;;  %4120 = vrot.lane.b32.xlu1 %v15938_v17, %s9298_s20  ;;  %v15958_v28 = vld [vmem:[#allocation36_spill] sm:$0xff]  ;;  %v11502_v41 = vrot.slane %v3719_v27, %v10074_v15  ;;  %v15996_v27 = vld [vmem:[#allocation142_spill] sm:$0xff] }
 0x2d4   : > { %v2670_v17 = vcombine.low %v15958_v28, %v15957_v4  ;;  %v3605_v4 = vcombine.high %v3565_v50, %v3597_v53  ;;  %v11455_v50 = vrot.slane %v3198_v5, %v9991_v43 }
 0x2d6   : > { %v11408_v40 = vrot.slane %v2670_v17, %v9991_v43  ;;  %v11442_v17 = vrot.slane %v3214_v37, %v9991_v43  ;;  %v11473_v37 = vpop.permute.xlu0 %4022 }
 0x2d7   : > { %4186 = vrot.lane.b32.xlu0 %v15939_v60, %s9300_s22  ;;  %4124 = vrot.lane.b32.xlu1 %v15940_v21, %s9298_s20  ;;  %v2206_v60 = vcombine.low %v11379_v8, %v11371_v12  ;;  %v15963_v21 = vld [vmem:[#allocation33_spill] sm:$0xff] }
 0x2d8   : > { %v3262_v59 = vcombine.low %v11455_v50, %v11442_v17 }
 0x2da   : > { %v3270_v5 = vrot.slane %v3262_v59, %v10074_v15  ;;  %v11504_v1 = vpop.permute.xlu0 %4026  ;;  %v15995_v59 = vld [vmem:[#allocation143_spill] sm:$0xff] }
 0x2db   : > { %4190 = vrot.lane.b32.xlu0 %v15941_v63, %s9300_s22  ;;  %4128 = vrot.lane.b32.xlu1 %v15944_v48, %s9298_s20  ;;  %v15964_v63 = vld [vmem:[#allocation32_spill] sm:$0xff] }
 0x2dc   : > { %v2654_v48 = vcombine.low %v15964_v63, %v15963_v21  ;;  %v15981_v63 = vld [vmem:[#allocation95_spill] sm:$0xff] }
 0x2df   : > { %4194 = vrot.lane.b32.xlu0 %v3604_v13, %s9300_s22  ;;  %4132 = vrot.lane.b32.xlu1 %v3738_v47, %s9298_s20  ;;  %v11401_v13 = vrot.slane %v2702_v0, %v9991_v43  ;;  %v15965_v47 = vld [vmem:[#allocation69_spill] sm:$0xff]  ;;  %v3790_v0 = vcombine.low %v15976_v29, %v15975_v39  ;;  %v3687_v29 = vcombine.high %v11326_v51, %v11312_v54  ;;  %v15989_v51 = vld [vmem:[#allocation90_spill] sm:$0xff] }
 0x2e0   : > { %v3246_v45 = vcombine.low %v15966_v61, %v15965_v47 }
 0x2e1   : > { %v2750_v24 = vcombine.low %v11411_v36, %v11401_v13  ;;  %v11462_v61 = vrot.slane %v3790_v0, %v9991_v43  ;;  %v15986_v0 = vld [vmem:[#allocation59_spill] sm:$0xff]  ;;  %v11510_v54 = vrot.slane %v3687_v29, %v10074_v15 }
 0x2e2   : > { %v11434_v33 = vrot.slane %v3246_v45, %v9991_v43 }
 0x2e3   : > { %4214 = vrot.lane.b32.xlu0 %v15951_v20, %s9301_s23  ;;  %4152 = vrot.lane.b32.xlu1 %v15952_v42, %s9299_s21  ;;  %v2214_v20 = vrot.slane %v2206_v60, %v10074_v15  ;;  %v11427_v42 = vrot.slane %v2654_v48, %v9991_v43  ;;  %v15980_v60 = vld [vmem:[#allocation98_spill] sm:$0xff]  ;;  %v2758_v53 = vrot.slane %v2750_v24, %v10074_v15  ;;  %v15982_v48 = vld [vmem:[#allocation91_spill] sm:$0xff] }
 0x2e4   : > { %v3294_v22 = vcombine.low %v11445_v3, %v11434_v33  ;;  %v3742_v47 = vcombine.low %v15982_v48, %v15981_v63  ;;  %v15993_v63 = vld [vmem:[#allocation145_spill] sm:$0xff] }
 0x2e5   : > { %v2718_v28 = vcombine.low %v11427_v42, %v11408_v40  ;;  %v2238_v18 = vcombine.low %v2182_v55, %v2214_v20 }
 0x2e6   : > { %v11482_v24 = vrot.slane %v3742_v47, %v9991_v43  ;;  %v15994_v47 = vld [vmem:[#allocation144_spill] sm:$0xff] }
 0x2e7   : > { %4218 = vrot.lane.b32.xlu0 %v15961_v19, %s9301_s23  ;;  %4156 = vrot.lane.b32.xlu1 %v15962_v26, %s9299_s21  ;;  %v3758_v19 = vcombine.low %v15978_v30, %v15977_v32  ;;  %v15979_v26 = vld [vmem:[#allocation94_spill] sm:$0xff]  ;;  %v2726_v45 = vrot.slane %v2718_v28, %v10074_v15 }
 0x2e8   : > { %v3774_v21 = vcombine.low %v15980_v60, %v15979_v26  ;;  %v11517_v60 = vpop.permute.xlu0 %4030 }
 0x2e9   : > { %v11468_v25 = vrot.slane %v3758_v19, %v9991_v43  ;;  %v15990_v19 = vld [vmem:[#allocation89_spill] sm:$0xff] }
 0x2ea   : > { %v11471_v11 = vrot.slane %v3774_v21, %v9991_v43  ;;  %v15991_v26 = vcombine.low %v15989_v51, %v15990_v19 }
 0x2eb   : > { %4222 = vrot.lane.b32.xlu0 %v15971_v14, %s9301_s23  ;;  %4160 = vrot.lane.b32.xlu1 %v15972_v35, %s9299_s21  ;;  %v2782_v14 = vcombine.low %v2726_v45, %v2758_v53  ;;  %v3302_v35 = vrot.slane %v3294_v22, %v10074_v15  ;;  %v3806_v39 = vcombine.low %v11482_v24, %v11468_v25  ;;  %v15992_v22 = vld [vmem:[#allocation27_spill] sm:$0xff] }
 0x2ec   : > { %v3838_v49 = vcombine.low %v11471_v11, %v11462_v61  ;;  %v2294_v48 = vcombine.low %v15993_v63, %v15992_v22  ;;  %v16002_v22 = vld [vmem:[#allocation51_spill] sm:$0xff] }
 0x2ed   : > { %v3326_v32 = vcombine.low %v3270_v5, %v3302_v35  ;;  %v11507_v30 = vrot.slane %v3806_v39, %v10074_v15  ;;  %v15997_v39 = vld [vmem:[#allocation141_spill] sm:$0xff] }
 0x2ee   : > { %v11499_v28 = vrot.slane %v3838_v49, %v10074_v15  ;;  %v2239_v49 = vcombine.high %v2182_v55, %v2214_v20  ;;  %v2262_v29 = vcombine.low %v15997_v39, %v15996_v27  ;;  %v16001_v55 = vld [vmem:[#allocation53_spill] sm:$0xff]  ;;  %v16005_v27 = vld [vmem:[#allocation50_spill] sm:$0xff]  ;;  %v16006_v39 = vld [vmem:[#allocation52_spill] sm:$0xff] }
 0x2ef   : > { %4226 = vrot.lane.b32.xlu0 %v3605_v4, %s9301_s23  ;;  %4164 = vrot.lane.b32.xlu1 %v3739_v34, %s9299_s21  ;;  %v15987_v4 = vld [vmem:[#allocation56_spill] sm:$0xff]  ;;  %v2838_v63 = vcombine.low %v16002_v22, %v16001_v55  ;;  %v16010_v55 = vld [vmem:[#allocation83_spill] sm:$0xff]  ;;  %v16011_v22 = vld [vmem:[#allocation82_spill] sm:$0xff] }
 0x2f0   : > { %v15988_v34 = vcombine.low %v15986_v0, %v15987_v4  ;;  %v3870_v21 = vcombine.low %v11507_v30, %v11499_v28 }
 0x2f3   : > { %4246 = vrot.lane.b32.xlu0 %v2238_v18, %s9302_s24  ;;  %4184 = vrot.lane.b32.xlu1 %v15985_v31, %s9300_s22  ;;  %v3740_v18 = vcombine.low %v11510_v54, %v11502_v41  ;;  %v2278_v31 = vcombine.low %v15995_v59, %v15994_v47  ;;  %v2783_v47 = vcombine.high %v2726_v45, %v2758_v53  ;;  %v16008_v45 = vld [vmem:[#allocation47_spill] sm:$0xff] }
 0x2f4   : > { %v11555_v59 = vrot.slane %v2262_v29, %v9991_v43 }
 0x2f7   : > { %4250 = vrot.lane.b32.xlu0 %v2782_v14, %s9302_s24  ;;  %4188 = vrot.lane.b32.xlu1 %v15988_v34, %s9300_s22  ;;  %v2207_v34 = vcombine.high %v11379_v8, %v11371_v12  ;;  %v2175_v12 = vcombine.high %v11394_v16, %v11376_v58  ;;  %v11550_v8 = vrot.slane %v2278_v31, %v9991_v43  ;;  %v16009_v31 = vld [vmem:[#allocation46_spill] sm:$0xff] }
 0x2f8   : > { %v16007_v16 = vcombine.high %v15986_v0, %v15987_v4  ;;  %v2790_v29 = vcombine.low %v16009_v31, %v16008_v45  ;;  %v16015_v45 = vld [vmem:[#allocation81_spill] sm:$0xff] }
 0x2fb   : > { %4254 = vrot.lane.b32.xlu0 %v3326_v32, %s9302_s24  ;;  %4192 = vrot.lane.b32.xlu1 %v15991_v26, %s9300_s22  ;;  %v11536_v32 = vrot.slane %v2294_v48, %v9991_v43  ;;  %v15998_v26 = vcombine.high %v15983_v44, %v15984_v52  ;;  %v16003_v44 = vld [vmem:[#allocation49_spill] sm:$0xff]  ;;  %v16004_v52 = vld [vmem:[#allocation48_spill] sm:$0xff] }
 0x2fd   : > { %v2342_v58 = vcombine.low %v11550_v8, %v11536_v32 }
 0x2ff   : > { %4258 = vrot.lane.b32.xlu0 %v3870_v21, %s9302_s24  ;;  %4196 = vrot.lane.b32.xlu1 %v3740_v18, %s9300_s22  ;;  %v15999_v21 = vld [vmem:[#allocation140_spill] sm:$0xff]  ;;  %v16000_v18 = vld [vmem:[#allocation139_spill] sm:$0xff] }
 0x300   : > { %v2246_v20 = vcombine.low %v16000_v18, %v15999_v21  ;;  %v11562_v21 = vrot.slane %v2207_v34, %v10074_v15  ;;  %v11577_v18 = vrot.slane %v2838_v63, %v9991_v43  ;;  %v11580_v34 = vrot.slane %v2175_v12, %v10074_v15  ;;  %v16012_v63 = vld [vmem:[#allocation79_spill] sm:$0xff] }
 0x301   : > { %v11529_v14 = vpop.permute.xlu0 %4034  ;;  %v11597_v12 = vrot.slane %v2342_v58, %v10074_v15 }
 0x302   : > { %v11572_v53 = vrot.slane %v2246_v20, %v9991_v43 }
 0x303   : > { %4278 = vrot.lane.b32.xlu0 %v2239_v49, %s9303_s25  ;;  %4216 = vrot.lane.b32.xlu1 %v15998_v26, %s9301_s23  ;;  %v2806_v49 = vcombine.low %v16004_v52, %v16003_v44  ;;  %v2822_v26 = vcombine.low %v16006_v39, %v16005_v27  ;;  %v3327_v52 = vcombine.high %v3270_v5, %v3302_v35  ;;  %v16013_v27 = vld [vmem:[#allocation78_spill] sm:$0xff] }
 0x304   : > { %v2310_v0 = vcombine.low %v11572_v53, %v11555_v59  ;;  %v3350_v39 = vcombine.low %v16013_v27, %v16012_v63  ;;  %v16016_v35 = vcombine.high %v15989_v51, %v15990_v19  ;;  %v2240_v5 = vcombine.low %v11580_v34, %v11562_v21  ;;  %v16019_v51 = vld [vmem:[#allocation110_spill] sm:$0xff] }
 0x305   : > { %v11552_v48 = vpop.permute.xlu0 %4054  ;;  %v11589_v4 = vrot.slane %v2806_v49, %v9991_v43  ;;  %v11592_v20 = vrot.slane %v2822_v26, %v9991_v43  ;;  %v2751_v49 = vcombine.high %v11411_v36, %v11401_v13  ;;  %v11611_v26 = vrot.slane %v2790_v29, %v9991_v43  ;;  %v16020_v19 = vld [vmem:[#allocation114_spill] sm:$0xff] }
 0x306   : > { %v3926_v27 = vcombine.low %v16020_v19, %v16019_v51  ;;  %v3871_v13 = vcombine.high %v11507_v30, %v11499_v28  ;;  %v3741_v36 = vcombine.high %v11510_v54, %v11502_v41  ;;  %v11629_v29 = vrot.slane %v2310_v0, %v10074_v15  ;;  %v16022_v28 = vld [vmem:[#allocation107_spill] sm:$0xff]  ;;  %v16023_v51 = vld [vmem:[#allocation113_spill] sm:$0xff] }
 0x307   : > { %4282 = vrot.lane.b32.xlu0 %v2783_v47, %s9303_s25  ;;  %4220 = vrot.lane.b32.xlu1 %v16007_v16, %s9301_s23  ;;  %v3382_v47 = vcombine.low %v16011_v22, %v16010_v55  ;;  %v16014_v16 = vld [vmem:[#allocation80_spill] sm:$0xff]  ;;  %v2886_v58 = vcombine.low %v11592_v20, %v11577_v18  ;;  %v16017_v55 = vld [vmem:[#allocation77_spill] sm:$0xff]  ;;  %v3295_v0 = vcombine.high %v11445_v3, %v11434_v33 }
 0x308   : > { %v3366_v31 = vcombine.low %v16015_v45, %v16014_v16  ;;  %v16018_v22 = vld [vmem:[#allocation76_spill] sm:$0xff]  ;;  %v2719_v45 = vcombine.high %v11427_v42, %v11408_v40  ;;  %v16024_v41 = vld [vmem:[#allocation109_spill] sm:$0xff]  ;;  %v2765_v40 = vrot.slane %v2751_v49, %v10074_v15  ;;  %v3263_v3 = vcombine.high %v11455_v50, %v11442_v17 }
 0x309   : > { %v11584_v44 = vpop.permute.xlu0 %4058  ;;  %v11618_v63 = vrot.slane %v3382_v47, %v9991_v43  ;;  %v2854_v47 = vcombine.low %v11611_v26, %v11589_v4  ;;  %v3910_v54 = vcombine.low %v16024_v41, %v16023_v51  ;;  %v2894_v42 = vrot.slane %v2886_v58, %v10074_v15 }
 0x30a   : > { %v2733_v58 = vrot.slane %v2719_v45, %v10074_v15  ;;  %v3309_v45 = vrot.slane %v3295_v0, %v10074_v15  ;;  %v3807_v0 = vcombine.high %v11482_v24, %v11468_v25 }
 0x30b   : > { %4286 = vrot.lane.b32.xlu0 %v3327_v52, %s9303_s25  ;;  %4224 = vrot.lane.b32.xlu1 %v16016_v35, %s9301_s23  ;;  %v3334_v52 = vcombine.low %v16018_v22, %v16017_v55  ;;  %v11636_v35 = vrot.slane %v3350_v39, %v9991_v43  ;;  %v11639_v55 = vrot.slane %v3366_v31, %v9991_v43  ;;  %v16021_v22 = vld [vmem:[#allocation111_spill] sm:$0xff] }
 0x30c   : > { %v3894_v30 = vcombine.low %v16022_v28, %v16021_v22  ;;  %v2374_v39 = vcombine.low %v11629_v29, %v11597_v12  ;;  %v16025_v22 = vld [vmem:[#allocation106_spill] sm:$0xff]  ;;  %v2862_v33 = vrot.slane %v2854_v47, %v10074_v15  ;;  %v11675_v41 = vrot.slane %v3910_v54, %v9991_v43 }
 0x30d   : > { %v11622_v16 = vpop.permute.xlu0 %4062  ;;  %v11654_v31 = vrot.slane %v3334_v52, %v9991_v43  ;;  %v3430_v19 = vcombine.low %v11639_v55, %v11618_v63  ;;  %v2784_v47 = vcombine.low %v2733_v58, %v2765_v40  ;;  %v3821_v6 = vrot.slane %v3807_v0, %v10074_v15 }
 0x30e   : > { %v11672_v51 = vrot.slane %v3894_v30, %v9991_v43  ;;  %v2918_v17 = vcombine.low %v2862_v33, %v2894_v42  ;;  %v3839_v30 = vcombine.high %v11471_v11, %v11462_v61  ;;  %v2241_v0 = vcombine.high %v11580_v34, %v11562_v21 }
 0x30f   : > { %4290 = vrot.lane.b32.xlu0 %v3871_v13, %s9303_s25  ;;  %4228 = vrot.lane.b32.xlu1 %v3741_v36, %s9301_s23  ;;  %v16026_v13 = vld [vmem:[#allocation102_spill] sm:$0xff]  ;;  %v11661_v36 = vrot.slane %v3926_v27, %v9991_v43  ;;  %v3398_v52 = vcombine.low %v11654_v31, %v11636_v35  ;;  %v11677_v27 = vpop.permute.xlu1 %4024  ;;  %v3438_v50 = vrot.slane %v3430_v19, %v10074_v15 }
 0x310   : > { %v3878_v28 = vcombine.low %v16026_v13, %v16025_v22  ;;  %16027 = vst [vmem:[#allocation119_spill] sm:$0xff] %v11677_v27  ;;  %v3853_v61 = vrot.slane %v3839_v30, %v10074_v15  ;;  %v2343_v21 = vcombine.high %v11550_v8, %v11536_v32  ;;  %v16128_v27 = vld [vmem:[#allocation7_spill] sm:$0xff] }
 0x311   : > { %v11663_v49 = vpop.permute.xlu0 %4066  ;;  %v3974_v54 = vcombine.low %v11675_v41, %v11661_v36 }
 0x312   : > { %v11686_v22 = vrot.slane %v3878_v28, %v9991_v43  ;;  %v3873_v8 = vcombine.high %v3821_v6, %v3853_v61  ;;  %v16077_v43 = vld [vmem:[#allocation72_spill] sm:$0xff] }
 0x313   : > { %4310 = vrot.lane.b32.xlu0 %v2240_v5, %s9304_s26  ;;  %4248 = vrot.lane.b32.xlu1 %v2374_v39, %s9302_s24  ;;  %v3277_v5 = vrot.slane %v3263_v3, %v10074_v15  ;;  %v3406_v39 = vrot.slane %v3398_v52, %v10074_v15  ;;  %v3982_v11 = vrot.slane %v3974_v54, %v10074_v15  ;;  %v11702_v28 = vpop.permute.xlu1 %4028 }
 0x314   : > { %v3942_v19 = vcombine.low %v11686_v22, %v11672_v51  ;;  %16028 = vst [vmem:[#allocation108_spill] sm:$0xff] %v11702_v28 }
 0x315   : > { %v11690_v13 = vpop.permute.xlu0 %4086  ;;  %v3328_v3 = vcombine.low %v3277_v5, %v3309_v45  ;;  %v3462_v52 = vcombine.low %v3406_v39, %v3438_v50 }
 0x316   : > { %v3950_v25 = vrot.slane %v3942_v19, %v10074_v15  ;;  %v2375_v19 = vcombine.high %v11629_v29, %v11597_v12  ;;  %v3329_v29 = vcombine.high %v3277_v5, %v3309_v45 }
 0x317   : > { %4314 = vrot.lane.b32.xlu0 %v2784_v47, %s9304_s26  ;;  %4252 = vrot.lane.b32.xlu1 %v2918_v17, %s9302_s24  ;;  %v11710_v24 = vpop.permute.xlu1 %4032  ;;  %v3872_v17 = vcombine.low %v3821_v6, %v3853_v61 }
 0x318   : > { %16029 = vst [vmem:[#allocation120_spill] sm:$0xff] %v11710_v24  ;;  %v4006_v30 = vcombine.low %v3950_v25, %v3982_v11 }
 0x319   : > { %v11704_v7 = vpop.permute.xlu0 %4090 }
 0x31b   : > { %4318 = vrot.lane.b32.xlu0 %v3328_v3, %s9304_s26  ;;  %4256 = vrot.lane.b32.xlu1 %v3462_v52, %s9302_s24 }
 0x31d   : > { %v11712_v47 = vpop.permute.xlu0 %4094 }
 0x31f   : > { %4322 = vrot.lane.b32.xlu0 %v3872_v17, %s9304_s26  ;;  %4260 = vrot.lane.b32.xlu1 %v4006_v30, %s9302_s24  ;;  %v2785_v17 = vcombine.high %v2733_v58, %v2765_v40  ;;  %v2919_v30 = vcombine.high %v2862_v33, %v2894_v42  ;;  %v2357_v40 = vrot.slane %v2343_v21, %v10074_v15  ;;  %v16040_v21 = vld [vmem:[#allocation42_spill] sm:$0xff] }
 0x320   : > { %v2887_v42 = vcombine.high %v11592_v20, %v11577_v18  ;;  %v4007_v33 = vcombine.high %v3950_v25, %v3982_v11  ;;  %v3431_v18 = vcombine.high %v11639_v55, %v11618_v63  ;;  %v3975_v55 = vcombine.high %v11675_v41, %v11661_v36 }
 0x321   : > { %v11716_v54 = vpop.permute.xlu1 %4036  ;;  %v11718_v56 = vpop.permute.xlu0 %4098 }
 0x322   : > { %16030 = vst [vmem:[#allocation116_spill] sm:$0xff] %v11716_v54  ;;  %v3445_v63 = vrot.slane %v3431_v18, %v10074_v15 }
 0x323   : > { %4342 = vrot.lane.b32.xlu0 %v2241_v0, %s9305_s27  ;;  %4280 = vrot.lane.b32.xlu1 %v2375_v19, %s9303_s25  ;;  %v3463_v0 = vcombine.high %v3406_v39, %v3438_v50  ;;  %v2311_v19 = vcombine.high %v11572_v53, %v11555_v59  ;;  %v2855_v59 = vcombine.high %v11611_v26, %v11589_v4  ;;  %v16035_v4 = vld [vmem:[#allocation133_spill] sm:$0xff] }
 0x324   : > { %v2901_v53 = vrot.slane %v2887_v42, %v10074_v15  ;;  %v3399_v39 = vcombine.high %v11654_v31, %v11636_v35  ;;  %v16036_v26 = vld [vmem:[#allocation137_spill] sm:$0xff]  ;;  %v3943_v31 = vcombine.high %v11686_v22, %v11672_v51 }
 0x325   : > { %v11726_v3 = vpop.permute.xlu1 %4056  ;;  %v11728_v52 = vpop.permute.xlu0 %4118  ;;  %v2325_v45 = vrot.slane %v2311_v19, %v10074_v15  ;;  %v2869_v5 = vrot.slane %v2855_v59, %v10074_v15  ;;  %v16037_v61 = vcombine.low %v16035_v4, %v16036_v26 }
 0x326   : > { %16031 = vst [vmem:[#allocation117_spill] sm:$0xff] %v11726_v3  ;;  %v3413_v35 = vrot.slane %v3399_v39, %v10074_v15  ;;  %v3957_v42 = vrot.slane %v3943_v31, %v10074_v15  ;;  %v16048_v39 = vld [vmem:[#allocation104_spill] sm:$0xff] }
 0x327   : > { %4346 = vrot.lane.b32.xlu0 %v2785_v17, %s9305_s27  ;;  %4284 = vrot.lane.b32.xlu1 %v2919_v30, %s9303_s25  ;;  %v2376_v6 = vcombine.low %v2325_v45, %v2357_v40  ;;  %v2920_v17 = vcombine.low %v2869_v5, %v2901_v53  ;;  %v16039_v30 = vld [vmem:[#allocation40_spill] sm:$0xff]  ;;  %v2377_v31 = vcombine.high %v2325_v45, %v2357_v40 }
 0x328   : > { %v3464_v19 = vcombine.low %v3413_v35, %v3445_v63 }
 0x329   : > { %v11734_v34 = vpop.permute.xlu1 %4060  ;;  %v11736_v12 = vpop.permute.xlu0 %4122 }
 0x32a   : > { %16032 = vst [vmem:[#allocation121_spill] sm:$0xff] %v11734_v34 }
 0x32b   : > { %4350 = vrot.lane.b32.xlu0 %v3329_v29, %s9305_s27  ;;  %4288 = vrot.lane.b32.xlu1 %v3463_v0, %s9303_s25  ;;  %v16041_v29 = vcombine.low %v16039_v30, %v16040_v21  ;;  %v3989_v0 = vrot.slane %v3975_v55, %v10074_v15 }
 0x32d   : > { %v11745_v58 = vpop.permute.xlu1 %4064  ;;  %v11747_v32 = vpop.permute.xlu0 %4126  ;;  %v4008_v18 = vcombine.low %v3957_v42, %v3989_v0 }
 0x32e   : > { %16033 = vst [vmem:[#allocation118_spill] sm:$0xff] %v11745_v58 }
 0x32f   : > { %4354 = vrot.lane.b32.xlu0 %v3873_v8, %s9305_s27  ;;  %4292 = vrot.lane.b32.xlu1 %v4007_v33, %s9303_s25  ;;  %v16043_v8 = vld [vmem:[#allocation74_spill] sm:$0xff]  ;;  %v16044_v33 = vld [vmem:[#allocation71_spill] sm:$0xff] }
 0x330   : > { %v16045_v51 = vcombine.low %v16043_v8, %v16044_v33 }
 0x331   : > { %v11757_v20 = vpop.permute.xlu1 %4068  ;;  %v11759_v50 = vpop.permute.xlu0 %4130 }
 0x332   : > { %16034 = vst [vmem:[#allocation122_spill] sm:$0xff] %v11757_v20 }
 0x333   : > { %4374 = vrot.lane.b32.xlu0 %v16037_v61, %s9306_s28  ;;  %4312 = vrot.lane.b32.xlu1 %v2376_v6, %s9304_s26  ;;  %v16047_v6 = vld [vmem:[#allocation101_spill] sm:$0xff] }
 0x334   : > { %v16049_v61 = vcombine.low %v16047_v6, %v16048_v39 }
 0x335   : > { %v11772_v11 = vpop.permute.xlu1 %4088  ;;  %v11774_v25 = vpop.permute.xlu0 %4150 }
 0x336   : > { %16038 = vst [vmem:[#allocation84_spill] sm:$0xff] %v11772_v11 }
 0x337   : > { %4378 = vrot.lane.b32.xlu0 %v16041_v29, %s9306_s28  ;;  %4316 = vrot.lane.b32.xlu1 %v2920_v17, %s9304_s26  ;;  %v16051_v29 = vcombine.high %v16035_v4, %v16036_v26  ;;  %v16055_v4 = vcombine.high %v16043_v8, %v16044_v33  ;;  %v4009_v26 = vcombine.high %v3957_v42, %v3989_v0  ;;  %v16061_v8 = vld [vmem:[#allocation148_spill] sm:$0xff]  ;;  %v16064_v0 = vld [vmem:[#allocation138_spill] sm:$0xff] }
 0x339   : > { %v11785_v36 = vpop.permute.xlu1 %4092  ;;  %v11787_v41 = vpop.permute.xlu0 %4154 }
 0x33a   : > { %16042 = vst [vmem:[#allocation85_spill] sm:$0xff] %v11785_v36 }
 0x33b   : > { %4382 = vrot.lane.b32.xlu0 %v16045_v51, %s9306_s28  ;;  %4320 = vrot.lane.b32.xlu1 %v3464_v19, %s9304_s26 }
 0x33d   : > { %v11795_v22 = vpop.permute.xlu1 %4096  ;;  %v11797_v59 = vpop.permute.xlu0 %4158 }
 0x33e   : > { %16046 = vst [vmem:[#allocation131_spill] sm:$0xff] %v11795_v22 }
 0x33f   : > { %4386 = vrot.lane.b32.xlu0 %v16049_v61, %s9306_s28  ;;  %4324 = vrot.lane.b32.xlu1 %v4008_v18, %s9304_s26  ;;  %v2921_v61 = vcombine.high %v2869_v5, %v2901_v53  ;;  %v16053_v18 = vcombine.high %v16039_v30, %v16040_v21  ;;  %v16057_v30 = vcombine.high %v16047_v6, %v16048_v39  ;;  %v16060_v21 = vld [vmem:[#allocation28_spill] sm:$0xff]  ;;  %v16067_v6 = vld [vmem:[#allocation61_spill] sm:$0xff] }
 0x340   : > { %v16062_v33 = vcombine.low %v16060_v21, %v16061_v8  ;;  %v16068_v39 = vld [vmem:[#allocation60_spill] sm:$0xff] }
 0x341   : > { %v11804_v55 = vpop.permute.xlu1 %4100  ;;  %v11806_v17 = vpop.permute.xlu0 %4162 }
 0x342   : > { %16050 = vst [vmem:[#allocation130_spill] sm:$0xff] %v11804_v55 }
 0x343   : > { %4344 = vrot.lane.b32.xlu1 %v2377_v31, %s9305_s27  ;;  %4406 = vrot.lane.b32.xlu0 %v16051_v29, %s9307_s29  ;;  %v3465_v31 = vcombine.high %v3413_v35, %v3445_v63  ;;  %v16063_v29 = vld [vmem:[#allocation136_spill] sm:$0xff] }
 0x344   : > { %v16065_v42 = vcombine.low %v16063_v29, %v16064_v0 }
 0x345   : > { %v11813_v19 = vpop.permute.xlu1 %4120  ;;  %v11815_v51 = vpop.permute.xlu0 %4182 }
 0x346   : > { %16052 = vst [vmem:[#allocation127_spill] sm:$0xff] %v11813_v19 }
 0x347   : > { %4348 = vrot.lane.b32.xlu1 %v2921_v61, %s9305_s27  ;;  %4410 = vrot.lane.b32.xlu0 %v16053_v18, %s9307_s29 }
 0x349   : > { %v11822_v40 = vpop.permute.xlu1 %4124  ;;  %v11824_v45 = vpop.permute.xlu0 %4186 }
 0x34a   : > { %16054 = vst [vmem:[#allocation126_spill] sm:$0xff] %v11822_v40  ;;  %v16116_v40 = vld [vmem:[#allocation16_spill] sm:$0xff] }
 0x34b   : > { %4352 = vrot.lane.b32.xlu1 %v3465_v31, %s9305_s27  ;;  %4414 = vrot.lane.b32.xlu0 %v16055_v4, %s9307_s29  ;;  %v16069_v31 = vcombine.low %v16067_v6, %v16068_v39  ;;  %v16070_v4 = vld [vmem:[#allocation45_spill] sm:$0xff] }
 0x34d   : > { %v11831_v53 = vpop.permute.xlu1 %4128  ;;  %v11833_v5 = vpop.permute.xlu0 %4190 }
 0x34e   : > { %16056 = vst [vmem:[#allocation129_spill] sm:$0xff] %v11831_v53  ;;  %v16082_v53 = vld [vmem:[#allocation105_spill] sm:$0xff] }
 0x34f   : > { %4356 = vrot.lane.b32.xlu1 %v4009_v26, %s9305_s27  ;;  %4418 = vrot.lane.b32.xlu0 %v16057_v30, %s9307_s29  ;;  %v16071_v26 = vld [vmem:[#allocation43_spill] sm:$0xff]  ;;  %v16084_v38 = vcombine.low %v16082_v53, %v16083_v9 }
 0x350   : > { %v16072_v30 = vcombine.low %v16070_v4, %v16071_v26 }
 0x351   : > { %v11840_v63 = vpop.permute.xlu1 %4132  ;;  %v11842_v35 = vpop.permute.xlu0 %4194 }
 0x352   : > { %16058 = vst [vmem:[#allocation128_spill] sm:$0xff] %v11840_v63  ;;  %16059 = vst [vmem:[#allocation124_spill] sm:$0xff] %v11842_v35  ;;  %v16078_v63 = vld [vmem:[#allocation75_spill] sm:$0xff] }
 0x353   : > { %4376 = vrot.lane.b32.xlu1 %v16062_v33, %s9306_s28  ;;  %4438 = vrot.lane.b32.xlu0 %v16065_v42, %s9308_s30  ;;  %v16074_v42 = vld [vmem:[#allocation86_spill] sm:$0xff]  ;;  %v16079_v55 = vcombine.low %v16077_v43, %v16078_v63 }
 0x354   : > { %v16076_v15 = vcombine.low %v16074_v42, %v16075_v57 }
 0x355   : > { %v11852_v61 = vpop.permute.xlu1 %4152  ;;  %v11854_v18 = vpop.permute.xlu0 %4214 }
 0x356   : > { %16066 = vst [vmem:[#allocation123_spill] sm:$0xff] %v11852_v61 }
 0x357   : > { %4380 = vrot.lane.b32.xlu1 %v16069_v31, %s9306_s28  ;;  %4442 = vrot.lane.b32.xlu0 %v16072_v30, %s9308_s30  ;;  %v16081_v30 = vcombine.low %v11217_v23, %v11207_v46 }
 0x359   : > { %v11864_v33 = vpop.permute.xlu1 %4156  ;;  %v11866_v10 = vpop.permute.xlu0 %4218 }
 0x35a   : > { %16073 = vst [vmem:[#allocation39_spill] sm:$0xff] %v11864_v33 }
 0x35b   : > { %4384 = vrot.lane.b32.xlu1 %v16076_v15, %s9306_s28  ;;  %4446 = vrot.lane.b32.xlu0 %v16079_v55, %s9308_s30  ;;  %v16087_v55 = vcombine.high %v16060_v21, %v16061_v8  ;;  %v16091_v21 = vcombine.high %v16070_v4, %v16071_v26  ;;  %v16092_v8 = vld [vmem:[#allocation5_spill] sm:$0xff] }
 0x35d   : > { %v11876_v31 = vpop.permute.xlu1 %4160  ;;  %v11878_v20 = vpop.permute.xlu0 %4222 }
 0x35e   : > { %16080 = vst [vmem:[#allocation38_spill] sm:$0xff] %v11876_v31  ;;  %v16088_v31 = vcombine.high %v16063_v29, %v16064_v0  ;;  %v16095_v0 = vcombine.high %v16074_v42, %v16075_v57  ;;  %v16099_v57 = vcombine.high %v16082_v53, %v16083_v9  ;;  %v16100_v42 = vld [vmem:[#allocation10_spill] sm:$0xff]  ;;  %v16108_v9 = vld [vmem:[#allocation63_spill] sm:$0xff]  ;;  %v16109_v53 = vld [vmem:[#allocation57_spill] sm:$0xff] }
 0x35f   : > { %4388 = vrot.lane.b32.xlu1 %v16081_v30, %s9306_s28  ;;  %4450 = vrot.lane.b32.xlu0 %v16084_v38, %s9308_s30  ;;  %v16090_v38 = vcombine.high %v16067_v6, %v16068_v39  ;;  %v16096_v6 = vcombine.high %v16077_v43, %v16078_v63  ;;  %v16103_v63 = vld [vmem:[#allocation146_spill] sm:$0xff] }
 0x361   : > { %v11888_v15 = vpop.permute.xlu1 %4164  ;;  %v11890_v54 = vpop.permute.xlu0 %4226 }
 0x362   : > { %16085 = vst [vmem:[#allocation37_spill] sm:$0xff] %v11888_v15  ;;  %16086 = vst [vmem:[#allocation36_spill] sm:$0xff] %v11890_v54 }
 0x363   : > { %4408 = vrot.lane.b32.xlu1 %v16087_v55, %s9307_s29  ;;  %4470 = vrot.lane.b32.xlu0 %v16088_v31, %s9309_s2  ;;  %v16093_v55 = vld [vmem:[#allocation6_spill] sm:$0xff]  ;;  %v16098_v31 = vcombine.high %v11217_v23, %v11207_v46 }
 0x364   : > { %v269_v15 = vadd.f32 %v16093_v55, %v16092_v8  ;;  %v16111_v8 = vld [vmem:[#allocation15_spill] sm:$0xff] }
 0x365   : > { %v11900_v30 = vpop.permute.xlu1 %4184  ;;  %v11902_v22 = vpop.permute.xlu0 %4246 }
 0x366   : > { %16089 = vst [vmem:[#allocation35_spill] sm:$0xff] %v11900_v30  ;;  %v277_v39 = vmul.f32 0.5, %v269_v15  ;;  %v16104_v15 = vld [vmem:[#allocation149_spill] sm:$0xff] }
 0x367   : > { %4412 = vrot.lane.b32.xlu1 %v16090_v38, %s9307_s29  ;;  %4474 = vrot.lane.b32.xlu0 %v16091_v21, %s9309_s2 }
 0x368   : > { %v4632_v38 = vrot.slane %v277_v39, %v16100_v42  ;;  %v4654_v55 = vrot.slane %v277_v39, %v16111_v8 }
 0x369   : > { %v11914_v33 = vpop.permute.xlu1 %4188  ;;  %v11916_v29 = vpop.permute.xlu0 %4250 }
 0x36a   : > { %16094 = vst [vmem:[#allocation34_spill] sm:$0xff] %v11914_v33  ;;  %v16114_v33 = vld [vmem:[#allocation151_spill] sm:$0xff] }
 0x36b   : > { %4416 = vrot.lane.b32.xlu1 %v16095_v0, %s9307_s29  ;;  %4478 = vrot.lane.b32.xlu0 %v16096_v6, %s9309_s2  ;;  %v16105_v0 = vcombine.low %v16103_v63, %v16104_v15  ;;  %v16106_v6 = vld [vmem:[#allocation9_spill] sm:$0xff] }
 0x36c   : > { %v4643_v46 = vrot.slane %v277_v39, %v16106_v6 }
 0x36d   : > { %v11926_v4 = vpop.permute.xlu1 %4192  ;;  %v11928_v26 = vpop.permute.xlu0 %4254 }
 0x36e   : > { %16097 = vst [vmem:[#allocation33_spill] sm:$0xff] %v11926_v4 }
 0x36f   : > { %4420 = vrot.lane.b32.xlu1 %v16098_v31, %s9307_s29  ;;  %4482 = vrot.lane.b32.xlu0 %v16099_v57, %s9309_s2  ;;  %v16110_v57 = vcombine.low %v16108_v9, %v16109_v53 }
 0x371   : > { %v11939_v21 = vpop.permute.xlu1 %4196  ;;  %v11941_v43 = vpop.permute.xlu0 %4258 }
 0x372   : > { %16101 = vst [vmem:[#allocation32_spill] sm:$0xff] %v11939_v21  ;;  %16102 = vst [vmem:[#allocation69_spill] sm:$0xff] %v11941_v43 }
 0x373   : > { %4440 = vrot.lane.b32.xlu1 %v16105_v0, %s9308_s30  ;;  %4634 = vbcast.lane.b32.xlu0 %v4632_v38, 256  ;;  %v16113_v0 = vld [vmem:[#allocation152_spill] sm:$0xff] }
 0x374   : > { %v16115_v58 = vcombine.low %v16113_v0, %v16114_v33 }
 0x375   : > { %v11948_v23 = vpop.permute.xlu1 %4216  ;;  %v11950_v31 = vpop.permute.xlu0 %4278 }
 0x376   : > { %16107 = vst [vmem:[#allocation68_spill] sm:$0xff] %v11948_v23  ;;  %v4665_v23 = vrot.slane %v277_v39, %v16116_v40 }
 0x377   : > { %4444 = vrot.lane.b32.xlu1 %v16110_v57, %s9308_s30  ;;  %4645 = vbcast.lane.b32.xlu0 %v4643_v46, 256  ;;  %v16119_v57 = vcombine.low %v11220_v2, %v11210_v62 }
 0x379   : > { %v11957_v21 = vpop.permute.xlu1 %4220  ;;  %v11959_v4 = vpop.permute.xlu0 %4282 }
 0x37a   : > { %16112 = vst [vmem:[#allocation65_spill] sm:$0xff] %v11957_v21  ;;  %v16120_v21 = vld [vmem:[#allocation19_spill] sm:$0xff] }
 0x37b   : > { %4448 = vrot.lane.b32.xlu1 %v16115_v58, %s9308_s30  ;;  %4656 = vbcast.lane.b32.xlu0 %v4654_v55, 256  ;;  %v4676_v30 = vrot.slane %v277_v39, %v16120_v21  ;;  %v16123_v58 = vcombine.high %v16103_v63, %v16104_v15 }
 0x37d   : > { %v11966_v36 = vpop.permute.xlu1 %4224  ;;  %v11968_v24 = vpop.permute.xlu0 %4286 }
 0x37e   : > { %16117 = vst [vmem:[#allocation64_spill] sm:$0xff] %v11966_v36  ;;  %16118 = vst [vmem:[#allocation66_spill] sm:$0xff] %v11968_v24  ;;  %v16124_v36 = vld [vmem:[#allocation20_spill] sm:$0xff] }
 0x37f   : > { %4452 = vrot.lane.b32.xlu1 %v16119_v57, %s9308_s30  ;;  %4667 = vbcast.lane.b32.xlu0 %v4665_v23, 256  ;;  %v4687_v28 = vrot.slane %v277_v39, %v16124_v36  ;;  %v16126_v57 = vcombine.high %v16108_v9, %v16109_v53 }
 0x381   : > { %v11975_v34 = vpop.permute.xlu1 %4228  ;;  %v11977_v61 = vpop.permute.xlu0 %4290 }
 0x382   : > { %16121 = vst [vmem:[#allocation67_spill] sm:$0xff] %v11975_v34  ;;  %16122 = vst [vmem:[#allocation62_spill] sm:$0xff] %v11977_v61  ;;  %v16127_v34 = vld [vmem:[#allocation21_spill] sm:$0xff]  ;;  %v16129_v61 = vld [vmem:[#allocation8_spill] sm:$0xff] }
 0x383   : > { %4472 = vrot.lane.b32.xlu1 %v16123_v58, %s9309_s2  ;;  %4678 = vbcast.lane.b32.xlu0 %v4676_v30, 256  ;;  %v4698_v3 = vrot.slane %v277_v39, %v16127_v34  ;;  %v270_v43 = vadd.f32 %v16129_v61, %v16128_v27  ;;  %v16131_v58 = vcombine.high %v16113_v0, %v16114_v33 }
 0x384   : > { %v16135_v27 = vcombine.high %v11220_v2, %v11210_v62 }
 0x385   : > { %v11984_v19 = vpop.permute.xlu1 %4248  ;;  %v11986_v11 = vpop.permute.xlu0 %4310  ;;  %v278_v9 = vmul.f32 0.5, %v270_v43 }
 0x386   : > { %16125 = vst [vmem:[#allocation58_spill] sm:$0xff] %v11984_v19  ;;  %v16132_v19 = vld [vmem:[#allocation22_spill] sm:$0xff] }
 0x387   : > { %4476 = vrot.lane.b32.xlu1 %v16126_v57, %s9309_s2  ;;  %4689 = vbcast.lane.b32.xlu0 %v4687_v28, 256  ;;  %v4709_v54 = vrot.slane %v277_v39, %v16132_v19  ;;  %v4720_v61 = vrot.slane %v278_v9, %v16100_v42  ;;  %v4731_v39 = vrot.slane %v278_v9, %v16106_v6 }
 0x388   : > { %v4742_v62 = vrot.slane %v278_v9, %v16111_v8 }
 0x389   : > { %v11995_v63 = vpop.permute.xlu1 %4252  ;;  %v11997_v15 = vpop.permute.xlu0 %4314 }
 0x38a   : > { %16130 = vst [vmem:[#allocation99_spill] sm:$0xff] %v11995_v63 }
 0x38b   : > { %4480 = vrot.lane.b32.xlu1 %v16131_v58, %s9309_s2  ;;  %4700 = vbcast.lane.b32.xlu0 %v4698_v3, 256  ;;  %v4753_v58 = vrot.slane %v278_v9, %v16116_v40 }
 0x38d   : > { %v12004_v53 = vpop.permute.xlu1 %4256  ;;  %v12006_v57 = vpop.permute.xlu0 %4318 }
 0x38e   : > { %16133 = vst [vmem:[#allocation96_spill] sm:$0xff] %v12004_v53  ;;  %16134 = vst [vmem:[#allocation97_spill] sm:$0xff] %v12006_v57  ;;  %v4764_v53 = vrot.slane %v278_v9, %v16120_v21 }
 0x38f   : > { %4484 = vrot.lane.b32.xlu1 %v16135_v27, %s9309_s2  ;;  %4711 = vbcast.lane.b32.xlu0 %v4709_v54, 256 }
 0x391   : > { %v12013_v63 = vpop.permute.xlu1 %4260  ;;  %v12015_v33 = vpop.permute.xlu0 %4322 }
 0x392   : > { %16136 = vst [vmem:[#allocation93_spill] sm:$0xff] %v12013_v63  ;;  %16137 = vst [vmem:[#allocation94_spill] sm:$0xff] %v12015_v33 }
 0x393   : > { %4638 = vbcast.lane.b32.xlu1 %v4632_v38, 264  ;;  %4722 = vbcast.lane.b32.xlu0 %v4720_v61, 256 }
 0x395   : > { %v12018_v43 = vpop.permute.xlu1 %4280  ;;  %v12020_v0 = vpop.permute.xlu0 %4342 }
 0x396   : > { %16138 = vst [vmem:[#allocation98_spill] sm:$0xff] %v12018_v43 }
 0x397   : > { %4649 = vbcast.lane.b32.xlu1 %v4643_v46, 264  ;;  %4733 = vbcast.lane.b32.xlu0 %v4731_v39, 256 }
 0x399   : > { %v12023_v2 = vpop.permute.xlu1 %4284  ;;  %v12025_v27 = vpop.permute.xlu0 %4346 }
 0x39a   : > { %16139 = vst [vmem:[#allocation95_spill] sm:$0xff] %v12023_v2  ;;  %v4775_v2 = vrot.slane %v278_v9, %v16124_v36 }
 0x39b   : > { %4660 = vbcast.lane.b32.xlu1 %v4654_v55, 264  ;;  %4744 = vbcast.lane.b32.xlu0 %v4742_v62, 256 }
 0x39d   : > { %v12028_v38 = vpop.permute.xlu1 %4288  ;;  %v12030_v63 = vpop.permute.xlu0 %4350 }
 0x39e   : > { %16140 = vst [vmem:[#allocation91_spill] sm:$0xff] %v12028_v38  ;;  %16141 = vst [vmem:[#allocation147_spill] sm:$0xff] %v12030_v63  ;;  %v4786_v38 = vrot.slane %v278_v9, %v16127_v34  ;;  %v16146_v63 = vld [vmem:[#allocation12_spill] sm:$0xff] }
 0x39f   : > { %4671 = vbcast.lane.b32.xlu1 %v4665_v23, 264  ;;  %4755 = vbcast.lane.b32.xlu0 %v4753_v58, 256  ;;  %v16145_v23 = vld [vmem:[#allocation11_spill] sm:$0xff] }
 0x3a0   : > { %v271_v57 = vadd.f32 %v16146_v63, %v16145_v23 }
 0x3a1   : > { %v12033_v46 = vpop.permute.xlu1 %4292  ;;  %v12035_v43 = vpop.permute.xlu0 %4354 }
 0x3a2   : > { %16142 = vst [vmem:[#allocation30_spill] sm:$0xff] %v12033_v46  ;;  %16143 = vst [vmem:[#allocation59_spill] sm:$0xff] %v12035_v43  ;;  %v279_v43 = vmul.f32 0.5, %v271_v57 }
 0x3a3   : > { %4682 = vbcast.lane.b32.xlu1 %v4676_v30, 264  ;;  %4766 = vbcast.lane.b32.xlu0 %v4764_v53, 256  ;;  %v12050_v30 = vrot.slane %v278_v9, %v16132_v19 }
 0x3a5   : > { %v12038_v55 = vpop.permute.xlu1 %4312  ;;  %v12040_v33 = vpop.permute.xlu0 %4374 }
 0x3a6   : > { %16144 = vst [vmem:[#allocation56_spill] sm:$0xff] %v12038_v55 }
 0x3a7   : > { %4693 = vbcast.lane.b32.xlu1 %v4687_v28, 264  ;;  %4777 = vbcast.lane.b32.xlu0 %v4775_v2, 256  ;;  %v12058_v28 = vrot.slane %v279_v43, %v16100_v42 }
 0x3a9   : > { %v12045_v35 = vpop.permute.xlu1 %4316  ;;  %v12047_v46 = vpop.permute.xlu0 %4378 }
 0x3aa   : > { %16147 = vst [vmem:[#allocation90_spill] sm:$0xff] %v12045_v35 }
 0x3ab   : > { %4704 = vbcast.lane.b32.xlu1 %v4698_v3, 264  ;;  %4788 = vbcast.lane.b32.xlu0 %v4786_v38, 256  ;;  %v12066_v3 = vrot.slane %v279_v43, %v16106_v6 }
 0x3ad   : > { %v12052_v55 = vpop.permute.xlu1 %4320  ;;  %v12054_v24 = vpop.permute.xlu0 %4382 }
 0x3ae   : > { %16148 = vst [vmem:[#allocation89_spill] sm:$0xff] %v12052_v55 }
 0x3af   : > { %4715 = vbcast.lane.b32.xlu1 %v4709_v54, 264  ;;  %4799 = vbcast.lane.b32.xlu0 %v12050_v30, 256  ;;  %v12074_v54 = vrot.slane %v279_v43, %v16111_v8 }
 0x3b1   : > { %v12060_v23 = vpop.permute.xlu1 %4324  ;;  %v12062_v63 = vpop.permute.xlu0 %4386 }
 0x3b2   : > { %16149 = vst [vmem:[#allocation27_spill] sm:$0xff] %v12060_v23  ;;  %16150 = vst [vmem:[#allocation145_spill] sm:$0xff] %v12062_v63 }
 0x3b3   : > { %4726 = vbcast.lane.b32.xlu1 %v4720_v61, 264  ;;  %4810 = vbcast.lane.b32.xlu0 %v12058_v28, 256  ;;  %v12082_v61 = vrot.slane %v279_v43, %v16116_v40 }
 0x3b5   : > { %v12068_v9 = vpop.permute.xlu1 %4344  ;;  %v12070_v57 = vpop.permute.xlu0 %4406  ;;  %16153 = vst [vmem:[#allocation142_spill] sm:$0xff] %v12082_v61 }
 0x3b6   : > { %16151 = vst [vmem:[#allocation144_spill] sm:$0xff] %v12068_v9 }
 0x3b7   : > { %4737 = vbcast.lane.b32.xlu1 %v4731_v39, 264  ;;  %4821 = vbcast.lane.b32.xlu0 %v12066_v3, 256  ;;  %v12090_v39 = vrot.slane %v279_v43, %v16120_v21  ;;  %v16164_v21 = vld [vmem:[#allocation135_spill] sm:$0xff] }
 0x3b9   : > { %v12076_v55 = vpop.permute.xlu1 %4348  ;;  %v12078_v23 = vpop.permute.xlu0 %4410  ;;  %16156 = vst [vmem:[#allocation139_spill] sm:$0xff] %v12090_v39 }
 0x3ba   : > { %16152 = vst [vmem:[#allocation143_spill] sm:$0xff] %v12076_v55 }
 0x3bb   : > { %4748 = vbcast.lane.b32.xlu1 %v4742_v62, 264  ;;  %4832 = vbcast.lane.b32.xlu0 %v12074_v54, 256  ;;  %v12098_v62 = vrot.slane %v279_v43, %v16124_v36  ;;  %v16163_v36 = vld [vmem:[#allocation134_spill] sm:$0xff] }
 0x3bd   : > { %v12084_v35 = vpop.permute.xlu1 %4352  ;;  %v12086_v9 = vpop.permute.xlu0 %4414  ;;  %16159 = vst [vmem:[#allocation49_spill] sm:$0xff] %v12098_v62 }
 0x3be   : > { %16154 = vst [vmem:[#allocation141_spill] sm:$0xff] %v12084_v35  ;;  %16155 = vst [vmem:[#allocation140_spill] sm:$0xff] %v12086_v9 }
 0x3bf   : > { %4759 = vbcast.lane.b32.xlu1 %v4753_v58, 264  ;;  %4843 = vbcast.lane.b32.xlu0 %v12082_v61, 256  ;;  %v16165_v61 = vcombine.low %v16163_v36, %v16164_v21  ;;  %v16169_v21 = vld [vmem:[#allocation44_spill] sm:$0xff] }
 0x3c1   : > { %v12092_v55 = vpop.permute.xlu1 %4356  ;;  %v12094_v63 = vpop.permute.xlu0 %4418 }
 0x3c2   : > { %16157 = vst [vmem:[#allocation53_spill] sm:$0xff] %v12092_v55  ;;  %16158 = vst [vmem:[#allocation51_spill] sm:$0xff] %v12094_v63  ;;  %v12107_v55 = vrot.slane %v279_v43, %v16127_v34 }
 0x3c3   : > { %4770 = vbcast.lane.b32.xlu1 %v4764_v53, 264  ;;  %4854 = vbcast.lane.b32.xlu0 %v12090_v39, 256  ;;  %v16161_v53 = vld [vmem:[#allocation13_spill] sm:$0xff]  ;;  %v16162_v39 = vld [vmem:[#allocation14_spill] sm:$0xff] }
 0x3c4   : > { %v272_v63 = vadd.f32 %v16162_v39, %v16161_v53 }
 0x3c5   : > { %v12100_v35 = vpop.permute.xlu1 %4376  ;;  %v12102_v58 = vpop.permute.xlu0 %4438 }
 0x3c6   : > { %16160 = vst [vmem:[#allocation48_spill] sm:$0xff] %v12100_v35  ;;  %v4495_v35 = vsel %vm4494_vm1, %v16165_v61, %v11473_v37  ;;  %v12136_v36 = vmul.f32 0.5, %v272_v63  ;;  %v16175_v63 = vld [vmem:[#allocation92_spill] sm:$0xff] }
 0x3c7   : > { %4781 = vbcast.lane.b32.xlu1 %v4775_v2, 264  ;;  %4865 = vbcast.lane.b32.xlu0 %v12098_v62, 256  ;;  %v4504_v9 = vsel %vm4503_vm2, %v4495_v35, %v11552_v48  ;;  %v12134_v48 = vrot.slane %v279_v43, %v16132_v19  ;;  %v16168_v35 = vld [vmem:[#allocation41_spill] sm:$0xff]  ;;  %v16174_v43 = vld [vmem:[#allocation103_spill] sm:$0xff] }
 0x3c8   : > { %v4513_v53 = vsel %vm4512_vm3, %v4504_v9, %v11690_v13  ;;  %v16170_v61 = vcombine.low %v16168_v35, %v16169_v21  ;;  %v16171_v9 = vld [vmem:[#allocation73_spill] sm:$0xff] }
 0x3c9   : > { %v12118_v2 = vpop.permute.xlu1 %4380  ;;  %v12120_v62 = vpop.permute.xlu0 %4442  ;;  %v4522_v37 = vsel %vm4521_vm4, %v4513_v53, %v11728_v52  ;;  %v16172_v52 = vld [vmem:[#allocation70_spill] sm:$0xff] }
 0x3ca   : > { %16166 = vst [vmem:[#allocation50_spill] sm:$0xff] %v12118_v2  ;;  %v4497_v13 = vsel %vm4494_vm1, %v16170_v61, %v11504_v1  ;;  %v16173_v53 = vcombine.low %v16171_v9, %v16172_v52  ;;  %v16176_v2 = vcombine.low %v16174_v43, %v16175_v63  ;;  %v16178_v9 = vld [vmem:[#allocation124_spill] sm:$0xff] }
 0x3cb   : > { %4792 = vbcast.lane.b32.xlu1 %v4786_v38, 264  ;;  %4876 = vbcast.lane.b32.xlu0 %v12107_v55, 256  ;;  %v4531_v38 = vsel %vm4530_vm5, %v4522_v37, %v11774_v25  ;;  %v4506_v35 = vsel %vm4503_vm2, %v4497_v13, %v11584_v44 }
 0x3cc   : > { %v4499_v39 = vsel %vm4494_vm1, %v16173_v53, %v11517_v60  ;;  %v4501_v19 = vsel %vm4494_vm1, %v16176_v2, %v11529_v14  ;;  %v4540_v1 = vsel %vm4539_vm6, %v4531_v38, %v11815_v51  ;;  %v4515_v14 = vsel %vm4512_vm3, %v4506_v35, %v11704_v7  ;;  %v16180_v35 = vld [vmem:[#allocation36_spill] sm:$0xff] }
 0x3cd   : > { %v12159_v21 = vpop.permute.xlu1 %4384  ;;  %v12161_v60 = vpop.permute.xlu0 %4446  ;;  %v4508_v25 = vsel %vm4503_vm2, %v4499_v39, %v11622_v16  ;;  %v4549_v44 = vsel %vm4548_vm7, %v4540_v1, %v11854_v18  ;;  %v4524_v51 = vsel %vm4521_vm4, %v4515_v14, %v11736_v12  ;;  %v12183_v16 = vrot.slane %v12136_v36, %v16100_v42  ;;  %v16181_v1 = vld [vmem:[#allocation147_spill] sm:$0xff]  ;;  %v16182_v14 = vld [vmem:[#allocation69_spill] sm:$0xff] }
 0x3ce   : > { %v4558_v2 = vsel %vm4557_vm8, %v4549_v44, %v11902_v22  ;;  %v4510_v7 = vsel %vm4503_vm2, %v4501_v19, %v11663_v49  ;;  %v4533_v18 = vsel %vm4530_vm5, %v4524_v51, %v11787_v41  ;;  %v4517_v22 = vsel %vm4512_vm3, %v4508_v25, %v11712_v47 }
 0x3cf   : > { %4803 = vbcast.lane.b32.xlu1 %v12050_v30, 264  ;;  %4887 = vbcast.lane.b32.xlu0 %v12134_v48, 256  ;;  %v4567_v12 = vsel %vm4566_vm9, %v4558_v2, %v11950_v31  ;;  %v4542_v30 = vsel %vm4539_vm6, %v4533_v18, %v11824_v45  ;;  %v4526_v41 = vsel %vm4521_vm4, %v4517_v22, %v11747_v32  ;;  %v16183_v2 = vld [vmem:[#allocation62_spill] sm:$0xff]  ;;  %v16184_v18 = vld [vmem:[#allocation140_spill] sm:$0xff] }
 0x3d0   : > { %v4576_v39 = vsel %vm4575_vm10, %v4567_v12, %v11986_v11  ;;  %v4551_v19 = vsel %vm4548_vm7, %v4542_v30, %v11866_v10  ;;  %v12216_v32 = vrot.slane %v12136_v36, %v16106_v6  ;;  %v4535_v10 = vsel %vm4530_vm5, %v4526_v41, %v11797_v59  ;;  %v16185_v22 = vld [vmem:[#allocation94_spill] sm:$0xff]  ;;  %v16186_v41 = vld [vmem:[#allocation59_spill] sm:$0xff] }
 0x3d1   : > { %v12197_v37 = vpop.permute.xlu1 %4388  ;;  %v12199_v49 = vpop.permute.xlu0 %4450  ;;  %v4585_v47 = vsel %vm4584_vm11, %v4576_v39, %v12020_v0  ;;  %v4560_v45 = vsel %vm4557_vm8, %v4551_v19, %v11916_v29  ;;  %v4544_v0 = vsel %vm4539_vm6, %v4535_v10, %v11833_v5  ;;  %v16188_v10 = vld [vmem:[#allocation142_spill] sm:$0xff] }
 0x3d2   : > { %v4594_v11 = vsel %vm15473_vm12, %v4585_v47, %v12040_v33  ;;  %v4569_v31 = vsel %vm4566_vm9, %v4560_v45, %v11959_v4  ;;  %v4519_v33 = vsel %vm4512_vm3, %v4510_v7, %v11718_v56  ;;  %v4553_v13 = vsel %vm4548_vm7, %v4544_v0, %v11878_v20  ;;  %v16187_v45 = vld [vmem:[#allocation145_spill] sm:$0xff] }
 0x3d3   : > { %4814 = vbcast.lane.b32.xlu1 %v12058_v28, 264  ;;  %4898 = vbcast.lane.b32.xlu0 %v12183_v16, 256  ;;  %v4603_v29 = vsel %vm15464_vm13, %v4594_v11, %v12070_v57  ;;  %v4578_v59 = vsel %vm4575_vm10, %v4569_v31, %v11997_v15  ;;  %v4528_v61 = vsel %vm4521_vm4, %v4519_v33, %v11759_v50  ;;  %v16189_v31 = vld [vmem:[#allocation19_spill] sm:$0xff] }
 0x3d4   : > { %v4612_v4 = vsel %vm15455_vm14, %v4603_v29, %v12102_v58  ;;  %v4587_v56 = vsel %vm4584_vm11, %v4578_v59, %v12025_v27  ;;  %v4562_v15 = vsel %vm4557_vm8, %v4553_v13, %v11928_v26  ;;  %v12256_v20 = vrot.slane %v12136_v36, %v16111_v8  ;;  %v16177_v27 = vld [vmem:[#allocation66_spill] sm:$0xff]  ;;  %v16190_v29 = vld [vmem:[#allocation51_spill] sm:$0xff]  ;;  %v16192_v13 = vld [vmem:[#allocation20_spill] sm:$0xff] }
 0x3d5   : > { %v12237_v28 = vpop.permute.xlu1 %4408  ;;  %v4471_v57 = vpop.permute.xlu0 %4470  ;;  %v4596_v58 = vsel %vm15473_vm12, %v4587_v56, %v12047_v46  ;;  %v4537_v50 = vsel %vm4530_vm5, %v4528_v61, %v11806_v17  ;;  %v4571_v26 = vsel %vm4566_vm9, %v4562_v15, %v16177_v27  ;;  %v16191_v61 = vld [vmem:[#allocation139_spill] sm:$0xff]  ;;  %v12325_v56 = vrot.slane %v12136_v36, %v16192_v13  ;;  %v16195_v27 = vld [vmem:[#allocation18_spill] sm:$0xff] }
 0x3d6   : > { %v4621_v5 = vsel %vm15454_vm15, %v4612_v4, %v4471_v57  ;;  %v4605_v46 = vsel %vm15464_vm13, %v4596_v58, %v12078_v23  ;;  %v4546_v52 = vsel %vm4539_vm6, %v4537_v50, %v16178_v9  ;;  %v16193_v58 = vld [vmem:[#allocation49_spill] sm:$0xff] }
 0x3d7   : > { %8942 = vst.msk [vmem:[%s12227_s12] sm:$0xff] %vm8941_vm0, %v4621_v5  ;;  %4825 = vbcast.lane.b32.xlu1 %v12066_v3, 264  ;;  %4909 = vbcast.lane.b32.xlu0 %v12216_v32, 256  ;;  %v16179_v3 = vld [vmem:[#allocation97_spill] sm:$0xff]  ;;  %v4614_v38 = vsel %vm15455_vm14, %v4605_v46, %v12120_v62  ;;  %v4555_v17 = vsel %vm4548_vm7, %v4546_v52, %v16180_v35  ;;  %v16196_v46 = vld [vmem:[#allocation119_spill] sm:$0xff] }
 0x3d8   : > { %v4580_v53 = vsel %vm4575_vm10, %v4571_v26, %v16179_v3  ;;  %v4564_v44 = vsel %vm4557_vm8, %v4555_v17, %v16182_v14  ;;  %v12287_v62 = vrot.slane %v12136_v36, %v16116_v40  ;;  %v16194_v50 = vld [vmem:[#allocation17_spill] sm:$0xff]  ;;  %v16198_v52 = vld [vmem:[#allocation31_spill] sm:$0xff] }
 0x3d9   : > { %v12270_v43 = vpop.permute.xlu1 %4412  ;;  %v4475_v63 = vpop.permute.xlu0 %4474  ;;  %v4589_v25 = vsel %vm4584_vm11, %v4580_v53, %v16181_v1  ;;  %v4573_v7 = vsel %vm4566_vm9, %v4564_v44, %v16183_v2  ;;  %v273_v26 = vadd.f32 %v16195_v27, %v16194_v50  ;;  %v16197_v9 = vld [vmem:[#allocation29_spill] sm:$0xff]  ;;  %v16201_v1 = vld [vmem:[#allocation84_spill] sm:$0xff]  ;;  %v16203_v44 = vld [vmem:[#allocation22_spill] sm:$0xff] }
 0x3da   : > { %v4623_v23 = vsel %vm15454_vm15, %v4614_v38, %v4475_v63  ;;  %v4598_v51 = vsel %vm15473_vm12, %v4589_v25, %v12054_v24  ;;  %v4582_v30 = vsel %vm4575_vm10, %v4573_v7, %v16185_v22  ;;  %v16199_v3 = vcombine.low %v16197_v9, %v16198_v52  ;;  %v16200_v38 = vld [vmem:[#allocation117_spill] sm:$0xff]  ;;  %v16204_v7 = vld [vmem:[#allocation108_spill] sm:$0xff]  ;;  %v16218_v9 = vld [vmem:[#allocation58_spill] sm:$0xff] }
 0x3db   : > { %8944 = vst.msk [vmem:[%s12227_s12 + $0x10] sm:$0xff] %vm8941_vm0, %v4623_v23  ;;  %4836 = vbcast.lane.b32.xlu1 %v12074_v54, 264  ;;  %4920 = vbcast.lane.b32.xlu0 %v12256_v20, 256  ;;  %v4607_v12 = vsel %vm15464_vm13, %v4598_v51, %v16184_v18  ;;  %v4591_v19 = vsel %vm4584_vm11, %v4582_v30, %v16186_v41  ;;  %v16202_v23 = vld [vmem:[#allocation127_spill] sm:$0xff]  ;;  %v12358_v2 = vmul.f32 0.5, %v273_v26  ;;  %v16205_v18 = vld [vmem:[#allocation54_spill] sm:$0xff] }
 0x3dc   : > { %v4616_v24 = vsel %vm15455_vm14, %v4607_v12, %v12161_v60  ;;  %v4600_v11 = vsel %vm15473_vm12, %v4591_v19, %v16187_v45  ;;  %v12310_v60 = vrot.slane %v12136_v36, %v16189_v31  ;;  %v4496_v53 = vsel %vm4494_vm1, %v16199_v3, %v16196_v46  ;;  %v16206_v12 = vld [vmem:[#allocation55_spill] sm:$0xff]  ;;  %v16209_v41 = vld [vmem:[#allocation121_spill] sm:$0xff]  ;;  %v16217_v26 = vld [vmem:[#allocation126_spill] sm:$0xff] }
 0x3dd   : > { %v12297_v54 = vpop.permute.xlu1 %4416  ;;  %v4479_v39 = vpop.permute.xlu0 %4478  ;;  %v4609_v33 = vsel %vm15464_vm13, %v4600_v11, %v16190_v29  ;;  %v4505_v63 = vsel %vm4503_vm2, %v4496_v53, %v16200_v38  ;;  %v12356_v51 = vrot.slane %v12136_v36, %v16203_v44  ;;  %v16207_v22 = vcombine.low %v16205_v18, %v16206_v12  ;;  %v16210_v19 = vld [vmem:[#allocation35_spill] sm:$0xff]  ;;  %v16211_v11 = vld [vmem:[#allocation120_spill] sm:$0xff]  ;;  %v16219_v53 = vld [vmem:[#allocation118_spill] sm:$0xff] }
 0x3de   : > { %v4625_v47 = vsel %vm15454_vm15, %v4616_v24, %v4479_v39  ;;  %v4618_v0 = vsel %vm15455_vm14, %v4609_v33, %v12199_v49  ;;  %v12333_v49 = vrot.slane %v12136_v36, %v16127_v34  ;;  %v4514_v25 = vsel %vm4512_vm3, %v4505_v63, %v16201_v1  ;;  %v16208_v24 = vld [vmem:[#allocation123_spill] sm:$0xff]  ;;  %v16213_v29 = vld [vmem:[#allocation88_spill] sm:$0xff]  ;;  %v16223_v18 = vld [vmem:[#allocation34_spill] sm:$0xff] }
 0x3df   : > { %8946 = vst.msk [vmem:[%s12227_s12 + $0x20] sm:$0xff] %vm8941_vm0, %v4625_v47  ;;  %4847 = vbcast.lane.b32.xlu1 %v16188_v10, 264  ;;  %4931 = vbcast.lane.b32.xlu0 %v12287_v62, 256  ;;  %v4523_v14 = vsel %vm4521_vm4, %v4514_v25, %v16202_v23  ;;  %v4498_v30 = vsel %vm4494_vm1, %v16207_v22, %v16204_v7  ;;  %v16212_v10 = vld [vmem:[#allocation87_spill] sm:$0xff]  ;;  %v16221_v25 = vld [vmem:[#allocation98_spill] sm:$0xff]  ;;  %v16224_v12 = vld [vmem:[#allocation56_spill] sm:$0xff] }
 0x3e0   : > { %v4532_v39 = vsel %vm4530_vm5, %v4523_v14, %v16208_v24  ;;  %v16214_v33 = vcombine.low %v16212_v10, %v16213_v29  ;;  %v12392_v3 = vrot.slane %v12358_v2, %v16100_v42  ;;  %v16220_v63 = vld [vmem:[#allocation39_spill] sm:$0xff]  ;;  %v16230_v29 = vld [vmem:[#allocation65_spill] sm:$0xff] }
 0x3e1   : > { %v12316_v59 = vpop.permute.xlu1 %4420  ;;  %v4483_v4 = vpop.permute.xlu0 %4482  ;;  %v4541_v47 = vsel %vm4539_vm6, %v4532_v39, %v16210_v19  ;;  %v16222_v14 = vld [vmem:[#allocation131_spill] sm:$0xff]  ;;  %v16225_v39 = vld [vmem:[#allocation116_spill] sm:$0xff] }
 0x3e2   : > { %v4627_v57 = vsel %vm15454_vm15, %v4618_v0, %v4483_v4  ;;  %v4500_v0 = vsel %vm4494_vm1, %v16214_v33, %v16211_v11  ;;  %v16215_v4 = vld [vmem:[#allocation85_spill] sm:$0xff] }
 0x3e3   : > { %8948 = vst.msk [vmem:[%s12227_s12 + $0x30] sm:$0xff] %vm8941_vm0, %v4627_v57  ;;  %4858 = vbcast.lane.b32.xlu1 %v16191_v61, 264  ;;  %4942 = vbcast.lane.b32.xlu0 %v12310_v60, 256  ;;  %v16216_v61 = vld [vmem:[#allocation68_spill] sm:$0xff]  ;;  %v4509_v38 = vsel %vm4503_vm2, %v4500_v0, %v16219_v53  ;;  %v16229_v11 = vld [vmem:[#allocation129_spill] sm:$0xff]  ;;  %v16235_v53 = vld [vmem:[#allocation38_spill] sm:$0xff] }
 0x3e4   : > { %v4518_v7 = vsel %vm4512_vm3, %v4509_v38, %v16222_v14  ;;  %v16231_v0 = vld [vmem:[#allocation144_spill] sm:$0xff]  ;;  %v16238_v14 = vld [vmem:[#allocation33_spill] sm:$0xff] }
 0x3e5   : > { %v4441_v5 = vpop.permute.xlu1 %4440  ;;  %v12327_v15 = vpop.permute.xlu0 %4634  ;;  %v4527_v10 = vsel %vm4521_vm4, %v4518_v7, %v16229_v11 }
 0x3e6   : > { %v4536_v38 = vsel %vm4530_vm5, %v4527_v10, %v16235_v53 }
 0x3e7   : > { %4869 = vbcast.lane.b32.xlu1 %v16193_v58, 264  ;;  %4953 = vbcast.lane.b32.xlu0 %v12325_v56, 256  ;;  %v4550_v58 = vsel %vm4548_vm7, %v4541_v47, %v16216_v61  ;;  %v4545_v7 = vsel %vm4539_vm6, %v4536_v38, %v16238_v14  ;;  %v16250_v14 = vld [vmem:[#allocation141_spill] sm:$0xff] }
 0x3e8   : > { %v4559_v52 = vsel %vm4557_vm8, %v4550_v58, %v16218_v9  ;;  %v16233_v58 = vld [vmem:[#allocation48_spill] sm:$0xff]  ;;  %v16234_v9 = vld [vmem:[#allocation122_spill] sm:$0xff] }
 0x3e9   : > { %v12344_v35 = vpop.permute.xlu1 %4444  ;;  %v12346_v17 = vpop.permute.xlu0 %4645  ;;  %v4568_v23 = vsel %vm4566_vm9, %v4559_v52, %v16221_v25 }
 0x3ea   : > { %v4577_v22 = vsel %vm4575_vm10, %v4568_v23, %v16224_v12 }
 0x3eb   : > { %4880 = vbcast.lane.b32.xlu1 %v12107_v55, 264  ;;  %4964 = vbcast.lane.b32.xlu0 %v12333_v49, 256  ;;  %v4507_v55 = vsel %vm4503_vm2, %v4498_v30, %v16209_v41  ;;  %v16226_v41 = vld [vmem:[#allocation112_spill] sm:$0xff] }
 0x3ec   : > { %v4516_v57 = vsel %vm4512_vm3, %v4507_v55, %v16215_v4  ;;  %v16227_v55 = vld [vmem:[#allocation115_spill] sm:$0xff]  ;;  %v4586_v4 = vsel %vm4584_vm11, %v4577_v22, %v16231_v0  ;;  %v16244_v0 = vld [vmem:[#allocation50_spill] sm:$0xff] }
 0x3ed   : > { %v12371_v45 = vpop.permute.xlu1 %4448  ;;  %v12373_v36 = vpop.permute.xlu0 %4656  ;;  %v4525_v46 = vsel %vm4521_vm4, %v4516_v57, %v16217_v26  ;;  %v16228_v19 = vcombine.low %v16226_v41, %v16227_v55  ;;  %v16232_v57 = vld [vmem:[#allocation99_spill] sm:$0xff]  ;;  %v4595_v26 = vsel %vm15473_vm12, %v4586_v4, %v16233_v58  ;;  %v16240_v41 = vld [vmem:[#allocation128_spill] sm:$0xff]  ;;  %v12465_v4 = vrot.slane %v12358_v2, %v16111_v8 }
 0x3ee   : > { %v4534_v1 = vsel %vm4530_vm5, %v4525_v46, %v16220_v63  ;;  %v12429_v46 = vrot.slane %v12358_v2, %v16106_v6  ;;  %v16236_v63 = vld [vmem:[#allocation95_spill] sm:$0xff]  ;;  %v4604_v25 = vsel %vm15464_vm13, %v4595_v26, %v12237_v28 }
 0x3ef   : > { %4891 = vbcast.lane.b32.xlu1 %v12134_v48, 264  ;;  %4975 = vbcast.lane.b32.xlu0 %v12356_v51, 256  ;;  %v4543_v48 = vsel %vm4539_vm6, %v4534_v1, %v16223_v18  ;;  %v4502_v47 = vsel %vm4494_vm1, %v16228_v19, %v16225_v39  ;;  %v16239_v18 = vld [vmem:[#allocation90_spill] sm:$0xff]  ;;  %v4613_v12 = vsel %vm15455_vm14, %v4604_v25, %v4441_v5  ;;  %v16241_v19 = vld [vmem:[#allocation64_spill] sm:$0xff]  ;;  %v16246_v58 = vld [vmem:[#allocation91_spill] sm:$0xff] }
 0x3f0   : > { %v4552_v33 = vsel %vm4548_vm7, %v4543_v48, %v16230_v29  ;;  %v4511_v52 = vsel %vm4503_vm2, %v4502_v47, %v16234_v9  ;;  %v4554_v28 = vsel %vm4548_vm7, %v4545_v7, %v16241_v19  ;;  %v16242_v47 = vld [vmem:[#allocation143_spill] sm:$0xff]  ;;  %v16243_v29 = vld [vmem:[#allocation96_spill] sm:$0xff] }
 0x3f1   : > { %v12406_v30 = vpop.permute.xlu1 %4452  ;;  %v12408_v24 = vpop.permute.xlu0 %4667  ;;  %v4561_v61 = vsel %vm4557_vm8, %v4552_v33, %v16232_v57  ;;  %v4563_v33 = vsel %vm4557_vm8, %v4554_v28, %v16243_v29  ;;  %v16245_v57 = vld [vmem:[#allocation37_spill] sm:$0xff]  ;;  %v16253_v19 = vld [vmem:[#allocation27_spill] sm:$0xff] }
 0x3f2   : > { %v4570_v1 = vsel %vm4566_vm9, %v4561_v61, %v16236_v63  ;;  %v4572_v26 = vsel %vm4566_vm9, %v4563_v33, %v16246_v58 }
 0x3f3   : > { %4902 = vbcast.lane.b32.xlu1 %v12183_v16, 264  ;;  %4986 = vbcast.lane.b32.xlu0 %v12392_v3, 256  ;;  %v16237_v16 = vld [vmem:[#allocation130_spill] sm:$0xff]  ;;  %v4579_v48 = vsel %vm4575_vm10, %v4570_v1, %v16239_v18  ;;  %v16251_v18 = vld [vmem:[#allocation93_spill] sm:$0xff] }
 0x3f4   : > { %v4520_v23 = vsel %vm4512_vm3, %v4511_v52, %v16237_v16  ;;  %v4588_v11 = vsel %vm4584_vm11, %v4579_v48, %v16242_v47  ;;  %v16247_v52 = vld [vmem:[#allocation32_spill] sm:$0xff]  ;;  %v16249_v16 = vld [vmem:[#allocation67_spill] sm:$0xff] }
 0x3f5   : > { %v4473_v22 = vpop.permute.xlu1 %4472  ;;  %v12446_v39 = vpop.permute.xlu0 %4678  ;;  %v4529_v55 = vsel %vm4521_vm4, %v4520_v23, %v16240_v41  ;;  %v4597_v5 = vsel %vm15473_vm12, %v4588_v11, %v16244_v0  ;;  %v16254_v11 = vld [vmem:[#allocation53_spill] sm:$0xff] }
 0x3f6   : > { %v4622_v10 = vsel %vm15454_vm15, %v4613_v12, %v4473_v22  ;;  %v4538_v61 = vsel %vm4530_vm5, %v4529_v55, %v16245_v57  ;;  %v4606_v9 = vsel %vm15464_vm13, %v4597_v5, %v12270_v43  ;;  %v16252_v22 = vld [vmem:[#allocation30_spill] sm:$0xff] }
 0x3f7   : > { %8943 = vst.msk [vmem:[%s12227_s12 + $0x8] sm:$0xff] %vm8941_vm0, %v4622_v10  ;;  %4913 = vbcast.lane.b32.xlu1 %v12216_v32, 264  ;;  %4997 = vbcast.lane.b32.xlu0 %v12429_v46, 256  ;;  %v4547_v53 = vsel %vm4539_vm6, %v4538_v61, %v16247_v52  ;;  %v16248_v32 = vld [vmem:[#allocation89_spill] sm:$0xff]  ;;  %v4615_v63 = vsel %vm15455_vm14, %v4606_v9, %v12344_v35 }
 0x3f8   : > { %v4581_v38 = vsel %vm4575_vm10, %v4572_v26, %v16248_v32  ;;  %v4556_v23 = vsel %vm4548_vm7, %v4547_v53, %v16249_v16  ;;  %v5017_v35 = vrot.slane %v12358_v2, %v16116_v40  ;;  %v16257_v26 = vld [vmem:[#allocation24_spill] sm:$0xff]  ;;  %v5061_v53 = vrot.slane %v12358_v2, %v16203_v44 }
 0x3f9   : > { %v4477_v1 = vpop.permute.xlu1 %4476  ;;  %v12479_v25 = vpop.permute.xlu0 %4689  ;;  %v4590_v7 = vsel %vm4584_vm11, %v4581_v38, %v16250_v14  ;;  %v4565_v48 = vsel %vm4557_vm8, %v4556_v23, %v16251_v18 }
 0x3fa   : > { %v4624_v43 = vsel %vm15454_vm15, %v4615_v63, %v4477_v1  ;;  %v4599_v12 = vsel %vm15473_vm12, %v4590_v7, %v12159_v21  ;;  %v4574_v41 = vsel %vm4566_vm9, %v4565_v48, %v16252_v22 }
 0x3fb   : > { %8945 = vst.msk [vmem:[%s12227_s12 + $0x18] sm:$0xff] %vm8941_vm0, %v4624_v43  ;;  %4924 = vbcast.lane.b32.xlu1 %v12256_v20, 264  ;;  %5008 = vbcast.lane.b32.xlu0 %v12465_v4, 256  ;;  %v4608_v55 = vsel %vm15464_vm13, %v4599_v12, %v12297_v54  ;;  %v4583_v28 = vsel %vm4575_vm10, %v4574_v41, %v16253_v19  ;;  %v16267_v19 = vld [vmem:[#allocation26_spill] sm:$0xff] }
 0x3fc   : > { %v4617_v21 = vsel %vm15455_vm14, %v4608_v55, %v12371_v45  ;;  %v4592_v10 = vsel %vm4584_vm11, %v4583_v28, %v16254_v11  ;;  %v5028_v54 = vrot.slane %v12358_v2, %v16189_v31 }
 0x3fd   : > { %v4481_v47 = vpop.permute.xlu1 %4480  ;;  %v12504_v20 = vpop.permute.xlu0 %4700  ;;  %v4601_v33 = vsel %vm15473_vm12, %v4592_v10, %v12197_v37  ;;  %v5039_v37 = vrot.slane %v12358_v2, %v16192_v13 }
 0x3fe   : > { %v4626_v29 = vsel %vm15454_vm15, %v4617_v21, %v4481_v47  ;;  %v4610_v45 = vsel %vm15464_vm13, %v4601_v33, %v12316_v59  ;;  %v5050_v59 = vrot.slane %v12358_v2, %v16127_v34 }
 0x3ff   : > { %8947 = vst.msk [vmem:[%s12227_s12 + $0x28] sm:$0xff] %vm8941_vm0, %v4626_v29  ;;  %4935 = vbcast.lane.b32.xlu1 %v12287_v62, 264  ;;  %5019 = vbcast.lane.b32.xlu0 %v5017_v35, 256  ;;  %v4619_v0 = vsel %vm15455_vm14, %v4610_v45, %v12406_v30  ;;  %v16256_v30 = vld [vmem:[#allocation23_spill] sm:$0xff] }
 0x400   : > { %v274_v9 = vadd.f32 %v16257_v26, %v16256_v30 }
 0x401   : > { %v4485_v5 = vpop.permute.xlu1 %4484  ;;  %v12520_v57 = vpop.permute.xlu0 %4711 }
 0x402   : > { %v4628_v61 = vsel %vm15454_vm15, %v4619_v0, %v4485_v5  ;;  %v282_v32 = vmul.f32 0.5, %v274_v9 }
 0x403   : > { %8949 = vst.msk [vmem:[%s12227_s12 + $0x38] sm:$0xff] %vm8941_vm0, %v4628_v61  ;;  %4946 = vbcast.lane.b32.xlu1 %v12310_v60, 264  ;;  %5030 = vbcast.lane.b32.xlu0 %v5028_v54, 256  ;;  %vm16363_vm0 = vcmask 7168  }
 0x404   : > { %v5072_v63 = vrot.slane %v282_v32, %v16100_v42  ;;  %v5127_v22 = vrot.slane %v282_v32, %v16192_v13  ;;  %v5138_v55 = vrot.slane %v282_v32, %v16127_v34  ;;  %v5149_v11 = vrot.slane %v282_v32, %v16203_v44  ;;  %vm16364_vm15 = vmmov %vm16363_vm0 }
 0x405   : > { %v12528_v62 = vpop.permute.xlu1 %4638  ;;  %v12530_v58 = vpop.permute.xlu0 %4722  ;;  %vm16366_vm14 = vmmov %vm16363_vm0 }
 0x406   : > { %16255 = vst [vmem:[#allocation52_spill] sm:$0xff] %v12528_v62  ;;  %vm16454_vm13 = vmmov %vm16363_vm0 }
 0x407   : > { %4957 = vbcast.lane.b32.xlu1 %v12325_v56, 264  ;;  %5041 = vbcast.lane.b32.xlu0 %v5039_v37, 256  ;;  %vm16486_vm12 = vmmov %vm16363_vm0 }
 0x409   : > { %v12537_v52 = vpop.permute.xlu1 %4649  ;;  %v12539_v60 = vpop.permute.xlu0 %4733 }
 0x40a   : > { %16258 = vst [vmem:[#allocation47_spill] sm:$0xff] %v12537_v52 }
 0x40b   : > { %4968 = vbcast.lane.b32.xlu1 %v12333_v49, 264  ;;  %5052 = vbcast.lane.b32.xlu0 %v5050_v59, 256  ;;  %v5083_v49 = vrot.slane %v282_v32, %v16106_v6 }
 0x40d   : > { %v12544_v38 = vpop.permute.xlu1 %4660  ;;  %v12546_v56 = vpop.permute.xlu0 %4744 }
 0x40e   : > { %16259 = vst [vmem:[#allocation46_spill] sm:$0xff] %v12544_v38 }
 0x40f   : > { %4979 = vbcast.lane.b32.xlu1 %v12356_v51, 264  ;;  %5063 = vbcast.lane.b32.xlu0 %v5061_v53, 256  ;;  %v5094_v51 = vrot.slane %v282_v32, %v16111_v8 }
 0x411   : > { %v12550_v1 = vpop.permute.xlu1 %4671  ;;  %v12552_v16 = vpop.permute.xlu0 %4755 }
 0x412   : > { %16260 = vst [vmem:[#allocation83_spill] sm:$0xff] %v12550_v1 }
 0x413   : > { %4990 = vbcast.lane.b32.xlu1 %v12392_v3, 264  ;;  %5074 = vbcast.lane.b32.xlu0 %v5072_v63, 256  ;;  %v5105_v3 = vrot.slane %v282_v32, %v16116_v40 }
 0x415   : > { %v12556_v2 = vpop.permute.xlu1 %4682  ;;  %v12558_v23 = vpop.permute.xlu0 %4766 }
 0x416   : > { %16261 = vst [vmem:[#allocation82_spill] sm:$0xff] %v12556_v2 }
 0x417   : > { %5001 = vbcast.lane.b32.xlu1 %v12429_v46, 264  ;;  %5085 = vbcast.lane.b32.xlu0 %v5083_v49, 256  ;;  %v5116_v46 = vrot.slane %v282_v32, %v16189_v31 }
 0x419   : > { %v12562_v14 = vpop.permute.xlu1 %4693  ;;  %v12564_v7 = vpop.permute.xlu0 %4777 }
 0x41a   : > { %16262 = vst [vmem:[#allocation79_spill] sm:$0xff] %v12562_v14 }
 0x41b   : > { %5012 = vbcast.lane.b32.xlu1 %v12465_v4, 264  ;;  %5096 = vbcast.lane.b32.xlu0 %v5094_v51, 256 }
 0x41d   : > { %v12568_v43 = vpop.permute.xlu1 %4704  ;;  %v12570_v18 = vpop.permute.xlu0 %4788 }
 0x41e   : > { %16263 = vst [vmem:[#allocation78_spill] sm:$0xff] %v12568_v43 }
 0x41f   : > { %5023 = vbcast.lane.b32.xlu1 %v5017_v35, 264  ;;  %5107 = vbcast.lane.b32.xlu0 %v5105_v3, 256  ;;  %v16266_v35 = vld [vmem:[#allocation25_spill] sm:$0xff] }
 0x420   : > { %v275_v28 = vadd.f32 %v16267_v19, %v16266_v35 }
 0x421   : > { %v12573_v48 = vpop.permute.xlu1 %4715  ;;  %v12575_v12 = vpop.permute.xlu0 %4799 }
 0x422   : > { %16264 = vst [vmem:[#allocation80_spill] sm:$0xff] %v12573_v48  ;;  %v283_v10 = vmul.f32 0.5, %v275_v28 }
 0x423   : > { %5034 = vbcast.lane.b32.xlu1 %v5028_v54, 264  ;;  %5118 = vbcast.lane.b32.xlu0 %v5116_v46, 256 }
 0x424   : > { %v5160_v54 = vrot.slane %v283_v10, %v16100_v42  ;;  %v5171_v5 = vrot.slane %v283_v10, %v16106_v6  ;;  %v5193_v32 = vrot.slane %v283_v10, %v16116_v40 }
 0x425   : > { %v12578_v4 = vpop.permute.xlu1 %4726  ;;  %v12580_v41 = vpop.permute.xlu0 %4810 }
 0x426   : > { %16265 = vst [vmem:[#allocation81_spill] sm:$0xff] %v12578_v4 }
 0x427   : > { %5045 = vbcast.lane.b32.xlu1 %v5039_v37, 264  ;;  %5129 = vbcast.lane.b32.xlu0 %v5127_v22, 256 }
 0x429   : > { %v12585_v21 = vpop.permute.xlu1 %4737  ;;  %v12587_v47 = vpop.permute.xlu0 %4821 }
 0x42a   : > { %16268 = vst [vmem:[#allocation77_spill] sm:$0xff] %v12585_v21  ;;  %v9207_v21 = vld [vmem:[%s9390_s15 + $0xd8] sm:$0xff] }
 0x42b   : > { %5056 = vbcast.lane.b32.xlu1 %v5050_v59, 264  ;;  %5140 = vbcast.lane.b32.xlu0 %v5138_v55, 256  ;;  %v5182_v59 = vrot.slane %v283_v10, %v16111_v8 }
 0x42d   : > { %v12590_v29 = vpop.permute.xlu1 %4748  ;;  %v12592_v33 = vpop.permute.xlu0 %4832 }
 0x42e   : > { %16269 = vst [vmem:[#allocation76_spill] sm:$0xff] %v12590_v29  ;;  %v9206_v29 = vld [vmem:[%s9390_s15 + $0xc8] sm:$0xff] }
 0x42f   : > { %5067 = vbcast.lane.b32.xlu1 %v5061_v53, 264  ;;  %5151 = vbcast.lane.b32.xlu0 %v5149_v11, 256 }
 0x431   : > { %v12595_v45 = vpop.permute.xlu1 %4759  ;;  %v12597_v0 = vpop.permute.xlu0 %4843 }
 0x432   : > { %16270 = vst [vmem:[#allocation110_spill] sm:$0xff] %v12595_v45  ;;  %v9208_v45 = vld [vmem:[%s9390_s15 + $0xe8] sm:$0xff] }
 0x433   : > { %5078 = vbcast.lane.b32.xlu1 %v5072_v63, 264  ;;  %5162 = vbcast.lane.b32.xlu0 %v5160_v54, 256 }
 0x435   : > { %v12600_v61 = vpop.permute.xlu1 %4770  ;;  %v12602_v37 = vpop.permute.xlu0 %4854 }
 0x436   : > { %16271 = vst [vmem:[#allocation114_spill] sm:$0xff] %v12600_v61 }
 0x437   : > { %5089 = vbcast.lane.b32.xlu1 %v5083_v49, 264  ;;  %5173 = vbcast.lane.b32.xlu0 %v5171_v5, 256  ;;  %v5204_v49 = vrot.slane %v283_v10, %v16189_v31 }
 0x439   : > { %v12605_v9 = vpop.permute.xlu1 %4781  ;;  %v12607_v53 = vpop.permute.xlu0 %4865 }
 0x43a   : > { %16272 = vst [vmem:[#allocation111_spill] sm:$0xff] %v12605_v9  ;;  %v12622_v9 = vsub.f32 %v9206_v29, %v9207_v21  ;;  %v5237_v21 = vrot.slane %v283_v10, %v16203_v44 }
 0x43b   : > { %5100 = vbcast.lane.b32.xlu1 %v5094_v51, 264  ;;  %5184 = vbcast.lane.b32.xlu0 %v5182_v59, 256  ;;  %v5215_v51 = vrot.slane %v283_v10, %v16192_v13 }
 0x43d   : > { %v12610_v63 = vpop.permute.xlu1 %4792  ;;  %v12612_v28 = vpop.permute.xlu0 %4876 }
 0x43e   : > { %16273 = vst [vmem:[#allocation107_spill] sm:$0xff] %v12610_v63  ;;  %v9209_v63 = vld [vmem:[%s9390_s15 + $0xf8] sm:$0xff] }
 0x43f   : > { %5111 = vbcast.lane.b32.xlu1 %v5105_v3, 264  ;;  %5195 = vbcast.lane.b32.xlu0 %v5193_v32, 256  ;;  %v12626_v62 = vsub.f32 %v9208_v45, %v9209_v63 }
 0x441   : > { %v12615_v4 = vpop.permute.xlu1 %4803  ;;  %v12617_v61 = vpop.permute.xlu0 %4887 }
 0x442   : > { %16274 = vst [vmem:[#allocation113_spill] sm:$0xff] %v12615_v4  ;;  %v5226_v4 = vrot.slane %v283_v10, %v16127_v34 }
 0x443   : > { %5122 = vbcast.lane.b32.xlu1 %v5116_v46, 264  ;;  %5206 = vbcast.lane.b32.xlu0 %v5204_v49, 256  ;;  %v276_v46 = vadd.f32 %v12626_v62, %v12622_v9 }
 0x445   : > { %v12628_v3 = vpop.permute.xlu1 %4814  ;;  %v12630_v2 = vpop.permute.xlu0 %4898  ;;  %v284_v29 = vmul.f32 0.5, %v276_v46 }
 0x446   : > { %16275 = vst [vmem:[#allocation109_spill] sm:$0xff] %v12628_v3 }
 0x447   : > { %5133 = vbcast.lane.b32.xlu1 %v5127_v22, 264  ;;  %5217 = vbcast.lane.b32.xlu0 %v5215_v51, 256  ;;  %v5248_v22 = vrot.slane %v284_v29, %v16100_v42  ;;  %v5270_v46 = vrot.slane %v284_v29, %v16111_v8 }
 0x449   : > { %v12635_v38 = vpop.permute.xlu1 %4825  ;;  %v12637_v52 = vpop.permute.xlu0 %4909 }
 0x44a   : > { %16276 = vst [vmem:[#allocation106_spill] sm:$0xff] %v12635_v38 }
 0x44b   : > { %5144 = vbcast.lane.b32.xlu1 %v5138_v55, 264  ;;  %5228 = vbcast.lane.b32.xlu0 %v5226_v4, 256  ;;  %v5259_v55 = vrot.slane %v284_v29, %v16106_v6 }
 0x44d   : > { %v12640_v45 = vpop.permute.xlu1 %4836  ;;  %v12642_v63 = vpop.permute.xlu0 %4920 }
 0x44e   : > { %16277 = vst [vmem:[#allocation102_spill] sm:$0xff] %v12640_v45 }
 0x44f   : > { %5155 = vbcast.lane.b32.xlu1 %v5149_v11, 264  ;;  %5239 = vbcast.lane.b32.xlu0 %v5237_v21, 256 }
 0x451   : > { %v12645_v3 = vpop.permute.xlu1 %4847  ;;  %v12647_v43 = vpop.permute.xlu0 %4931 }
 0x452   : > { %16278 = vst [vmem:[#allocation133_spill] sm:$0xff] %v12645_v3  ;;  %16279 = vst [vmem:[#allocation137_spill] sm:$0xff] %v12647_v43  ;;  %v5281_v3 = vrot.slane %v284_v29, %v16116_v40 }
 0x453   : > { %5166 = vbcast.lane.b32.xlu1 %v5160_v54, 264  ;;  %5250 = vbcast.lane.b32.xlu0 %v5248_v22, 256 }
 0x455   : > { %v12650_v38 = vpop.permute.xlu1 %4858  ;;  %v12652_v10 = vpop.permute.xlu0 %4942 }
 0x456   : > { %16280 = vst [vmem:[#allocation40_spill] sm:$0xff] %v12650_v38  ;;  %16281 = vst [vmem:[#allocation42_spill] sm:$0xff] %v12652_v10  ;;  %v5292_v38 = vrot.slane %v284_v29, %v16189_v31 }
 0x457   : > { %5177 = vbcast.lane.b32.xlu1 %v5171_v5, 264  ;;  %5261 = vbcast.lane.b32.xlu0 %v5259_v55, 256 }
 0x459   : > { %v12655_v11 = vpop.permute.xlu1 %4869  ;;  %v12657_v45 = vpop.permute.xlu0 %4953 }
 0x45a   : > { %16282 = vst [vmem:[#allocation74_spill] sm:$0xff] %v12655_v11  ;;  %16283 = vst [vmem:[#allocation71_spill] sm:$0xff] %v12657_v45  ;;  %v5303_v11 = vrot.slane %v284_v29, %v16192_v13  ;;  %v16291_v45 = vld [vmem:[#allocation5_spill] sm:$0xff] }
 0x45b   : > { %5188 = vbcast.lane.b32.xlu1 %v5182_v59, 264  ;;  %5272 = vbcast.lane.b32.xlu0 %v5270_v46, 256 }
 0x45d   : > { %v12660_v54 = vpop.permute.xlu1 %4880  ;;  %v12662_v14 = vpop.permute.xlu0 %4964 }
 0x45e   : > { %16284 = vst [vmem:[#allocation101_spill] sm:$0xff] %v12660_v54  ;;  %16285 = vst [vmem:[#allocation104_spill] sm:$0xff] %v12662_v14  ;;  %v5314_v54 = vrot.slane %v284_v29, %v16127_v34 }
 0x45f   : > { %5199 = vbcast.lane.b32.xlu1 %v5193_v32, 264  ;;  %5283 = vbcast.lane.b32.xlu0 %v5281_v3, 256  ;;  %v16290_v32 = vld [vmem:[#allocation6_spill] sm:$0xff] }
 0x460   : > { %v285_v14 = vsub.f32 %v16291_v45, %v16290_v32 }
 0x461   : > { %v12665_v5 = vpop.permute.xlu1 %4891  ;;  %v12667_v1 = vpop.permute.xlu0 %4975 }
 0x462   : > { %16286 = vst [vmem:[#allocation28_spill] sm:$0xff] %v12665_v5  ;;  %16287 = vst [vmem:[#allocation148_spill] sm:$0xff] %v12667_v1  ;;  %v293_v1 = vmul.f32 0.5, %v285_v14 }
 0x463   : > { %5210 = vbcast.lane.b32.xlu1 %v5204_v49, 264  ;;  %5294 = vbcast.lane.b32.xlu0 %v5292_v38, 256  ;;  %v5325_v49 = vrot.slane %v284_v29, %v16203_v44 }
 0x464   : > { %v5358_v14 = vrot.slane %v293_v1, %v16111_v8 }
 0x465   : > { %v12670_v59 = vpop.permute.xlu1 %4902  ;;  %v12672_v48 = vpop.permute.xlu0 %4986 }
 0x466   : > { %16288 = vst [vmem:[#allocation136_spill] sm:$0xff] %v12670_v59  ;;  %16289 = vst [vmem:[#allocation138_spill] sm:$0xff] %v12672_v48 }
 0x467   : > { %5221 = vbcast.lane.b32.xlu1 %v5215_v51, 264  ;;  %5305 = vbcast.lane.b32.xlu0 %v5303_v11, 256  ;;  %v5336_v51 = vrot.slane %v293_v1, %v16100_v42 }
 0x469   : > { %v12677_v10 = vpop.permute.xlu1 %4913  ;;  %v12679_v5 = vpop.permute.xlu0 %4997 }
 0x46a   : > { %16292 = vst [vmem:[#allocation61_spill] sm:$0xff] %v12677_v10  ;;  %16293 = vst [vmem:[#allocation60_spill] sm:$0xff] %v12679_v5  ;;  %v5369_v10 = vrot.slane %v293_v1, %v16116_v40 }
 0x46b   : > { %5232 = vbcast.lane.b32.xlu1 %v5226_v4, 264  ;;  %5316 = vbcast.lane.b32.xlu0 %v5314_v54, 256  ;;  %v5347_v4 = vrot.slane %v293_v1, %v16106_v6 }
 0x46d   : > { %v12682_v43 = vpop.permute.xlu1 %4924  ;;  %v12684_v59 = vpop.permute.xlu0 %5008 }
 0x46e   : > { %16294 = vst [vmem:[#allocation45_spill] sm:$0xff] %v12682_v43  ;;  %16295 = vst [vmem:[#allocation43_spill] sm:$0xff] %v12684_v59 }
 0x46f   : > { %5243 = vbcast.lane.b32.xlu1 %v5237_v21, 264  ;;  %5327 = vbcast.lane.b32.xlu0 %v5325_v49, 256 }
 0x471   : > { %v12687_v48 = vpop.permute.xlu1 %4935  ;;  %v12689_v45 = vpop.permute.xlu0 %5019 }
 0x472   : > { %16296 = vst [vmem:[#allocation86_spill] sm:$0xff] %v12687_v48  ;;  %16297 = vst [vmem:[#allocation150_spill] sm:$0xff] %v12689_v45 }
 0x473   : > { %5254 = vbcast.lane.b32.xlu1 %v5248_v22, 264  ;;  %5338 = vbcast.lane.b32.xlu0 %v5336_v51, 256 }
 0x475   : > { %v12692_v32 = vpop.permute.xlu1 %4946  ;;  %v12694_v29 = vpop.permute.xlu0 %5030 }
 0x476   : > { %16298 = vst [vmem:[#allocation72_spill] sm:$0xff] %v12692_v32  ;;  %16299 = vst [vmem:[#allocation75_spill] sm:$0xff] %v12694_v29  ;;  %v5380_v32 = vrot.slane %v293_v1, %v16189_v31 }
 0x477   : > { %5265 = vbcast.lane.b32.xlu1 %v5259_v55, 264  ;;  %5349 = vbcast.lane.b32.xlu0 %v5347_v4, 256 }
 0x479   : > { %v12697_v21 = vpop.permute.xlu1 %4957  ;;  %v12699_v43 = vpop.permute.xlu0 %5041 }
 0x47a   : > { %16300 = vst [vmem:[#allocation105_spill] sm:$0xff] %v12697_v21  ;;  %16301 = vst [vmem:[#allocation100_spill] sm:$0xff] %v12699_v43  ;;  %v5391_v21 = vrot.slane %v293_v1, %v16192_v13 }
 0x47b   : > { %5276 = vbcast.lane.b32.xlu1 %v5270_v46, 264  ;;  %5360 = vbcast.lane.b32.xlu0 %v5358_v14, 256 }
 0x47d   : > { %v12702_v22 = vpop.permute.xlu1 %4968  ;;  %v12704_v48 = vpop.permute.xlu0 %5052 }
 0x47e   : > { %16302 = vst [vmem:[#allocation10_spill] sm:$0xff] %v12702_v22  ;;  %16303 = vst [vmem:[#allocation146_spill] sm:$0xff] %v12704_v48  ;;  %v5402_v22 = vrot.slane %v293_v1, %v16127_v34  ;;  %v16309_v48 = vld [vmem:[#allocation7_spill] sm:$0xff] }
 0x47f   : > { %5287 = vbcast.lane.b32.xlu1 %v5281_v3, 264  ;;  %5371 = vbcast.lane.b32.xlu0 %v5369_v10, 256  ;;  %v16308_v3 = vld [vmem:[#allocation8_spill] sm:$0xff] }
 0x480   : > { %v286_v45 = vsub.f32 %v16309_v48, %v16308_v3 }
 0x481   : > { %v12707_v55 = vpop.permute.xlu1 %4979  ;;  %v12709_v29 = vpop.permute.xlu0 %5063 }
 0x482   : > { %16304 = vst [vmem:[#allocation149_spill] sm:$0xff] %v12707_v55  ;;  %16305 = vst [vmem:[#allocation9_spill] sm:$0xff] %v12709_v29  ;;  %v294_v29 = vmul.f32 0.5, %v286_v45 }
 0x483   : > { %5298 = vbcast.lane.b32.xlu1 %v5292_v38, 264  ;;  %5382 = vbcast.lane.b32.xlu0 %v5380_v32, 256  ;;  %v5413_v38 = vrot.slane %v293_v1, %v16203_v44 }
 0x484   : > { %v5446_v45 = vrot.slane %v294_v29, %v16111_v8 }
 0x485   : > { %v12712_v46 = vpop.permute.xlu1 %4990  ;;  %v12714_v43 = vpop.permute.xlu0 %5074 }
 0x486   : > { %16306 = vst [vmem:[#allocation63_spill] sm:$0xff] %v12712_v46  ;;  %16307 = vst [vmem:[#allocation57_spill] sm:$0xff] %v12714_v43 }
 0x487   : > { %5309 = vbcast.lane.b32.xlu1 %v5303_v11, 264  ;;  %5393 = vbcast.lane.b32.xlu0 %v5391_v21, 256  ;;  %v5424_v11 = vrot.slane %v294_v29, %v16100_v42 }
 0x489   : > { %v12719_v5 = vpop.permute.xlu1 %5001  ;;  %v12721_v55 = vpop.permute.xlu0 %5085 }
 0x48a   : > { %16310 = vst [vmem:[#allocation15_spill] sm:$0xff] %v12719_v5  ;;  %16311 = vst [vmem:[#allocation152_spill] sm:$0xff] %v12721_v55 }
 0x48b   : > { %5320 = vbcast.lane.b32.xlu1 %v5314_v54, 264  ;;  %5404 = vbcast.lane.b32.xlu0 %v5402_v22, 256  ;;  %v5435_v54 = vrot.slane %v294_v29, %v16106_v6 }
 0x48d   : > { %v12724_v59 = vpop.permute.xlu1 %5012  ;;  %v12726_v46 = vpop.permute.xlu0 %5096 }
 0x48e   : > { %16312 = vst [vmem:[#allocation151_spill] sm:$0xff] %v12724_v59  ;;  %16313 = vst [vmem:[#allocation16_spill] sm:$0xff] %v12726_v46 }
 0x48f   : > { %5331 = vbcast.lane.b32.xlu1 %v5325_v49, 264  ;;  %5415 = vbcast.lane.b32.xlu0 %v5413_v38, 256 }
 0x491   : > { %v12729_v43 = vpop.permute.xlu1 %5023  ;;  %v12731_v48 = vpop.permute.xlu0 %5107 }
 0x492   : > { %16314 = vst [vmem:[#allocation21_spill] sm:$0xff] %v12729_v43  ;;  %16315 = vst [vmem:[#allocation134_spill] sm:$0xff] %v12731_v48  ;;  %v5457_v48 = vrot.slane %v294_v29, %v16116_v40 }
 0x493   : > { %5342 = vbcast.lane.b32.xlu1 %v5336_v51, 264  ;;  %5426 = vbcast.lane.b32.xlu0 %v5424_v11, 256 }
 0x495   : > { %v12734_v3 = vpop.permute.xlu1 %5034  ;;  %v12736_v1 = vpop.permute.xlu0 %5118 }
 0x496   : > { %16316 = vst [vmem:[#allocation135_spill] sm:$0xff] %v12734_v3  ;;  %16317 = vst [vmem:[#allocation41_spill] sm:$0xff] %v12736_v1  ;;  %v5468_v1 = vrot.slane %v294_v29, %v16189_v31 }
 0x497   : > { %5353 = vbcast.lane.b32.xlu1 %v5347_v4, 264  ;;  %5437 = vbcast.lane.b32.xlu0 %v5435_v54, 256 }
 0x499   : > { %v12739_v49 = vpop.permute.xlu1 %5045  ;;  %v12741_v55 = vpop.permute.xlu0 %5129 }
 0x49a   : > { %16318 = vst [vmem:[#allocation44_spill] sm:$0xff] %v12739_v49  ;;  %16319 = vst [vmem:[#allocation73_spill] sm:$0xff] %v12741_v55  ;;  %v5479_v55 = vrot.slane %v294_v29, %v16192_v13 }
 0x49b   : > { %5364 = vbcast.lane.b32.xlu1 %v5358_v14, 264  ;;  %5448 = vbcast.lane.b32.xlu0 %v5446_v45, 256 }
 0x49d   : > { %v12744_v51 = vpop.permute.xlu1 %5056  ;;  %v12746_v43 = vpop.permute.xlu0 %5140 }
 0x49e   : > { %16320 = vst [vmem:[#allocation70_spill] sm:$0xff] %v12744_v51  ;;  %16321 = vst [vmem:[#allocation103_spill] sm:$0xff] %v12746_v43  ;;  %v5490_v43 = vrot.slane %v294_v29, %v16127_v34  ;;  %v16327_v51 = vld [vmem:[#allocation11_spill] sm:$0xff] }
 0x49f   : > { %5375 = vbcast.lane.b32.xlu1 %v5369_v10, 264  ;;  %5459 = vbcast.lane.b32.xlu0 %v5457_v48, 256  ;;  %v16326_v10 = vld [vmem:[#allocation12_spill] sm:$0xff] }
 0x4a0   : > { %v287_v5 = vsub.f32 %v16327_v51, %v16326_v10 }
 0x4a1   : > { %v12749_v4 = vpop.permute.xlu1 %5067  ;;  %v12751_v3 = vpop.permute.xlu0 %5151 }
 0x4a2   : > { %16322 = vst [vmem:[#allocation92_spill] sm:$0xff] %v12749_v4  ;;  %16323 = vst [vmem:[#allocation66_spill] sm:$0xff] %v12751_v3  ;;  %v295_v3 = vmul.f32 0.5, %v287_v5 }
 0x4a3   : > { %5386 = vbcast.lane.b32.xlu1 %v5380_v32, 264  ;;  %5470 = vbcast.lane.b32.xlu0 %v5468_v1, 256  ;;  %v5501_v32 = vrot.slane %v294_v29, %v16203_v44 }
 0x4a4   : > { %v5534_v5 = vrot.slane %v295_v3, %v16111_v8 }
 0x4a5   : > { %v12754_v14 = vpop.permute.xlu1 %5078  ;;  %v12756_v49 = vpop.permute.xlu0 %5162 }
 0x4a6   : > { %16324 = vst [vmem:[#allocation124_spill] sm:$0xff] %v12754_v14  ;;  %16325 = vst [vmem:[#allocation97_spill] sm:$0xff] %v12756_v49 }
 0x4a7   : > { %5397 = vbcast.lane.b32.xlu1 %v5391_v21, 264  ;;  %5481 = vbcast.lane.b32.xlu0 %v5479_v55, 256  ;;  %v5512_v21 = vrot.slane %v295_v3, %v16100_v42 }
 0x4a9   : > { %v12761_v46 = vpop.permute.xlu1 %5089  ;;  %v12763_v4 = vpop.permute.xlu0 %5173 }
 0x4aa   : > { %16328 = vst [vmem:[#allocation36_spill] sm:$0xff] %v12761_v46  ;;  %16329 = vst [vmem:[#allocation147_spill] sm:$0xff] %v12763_v4  ;;  %v5545_v4 = vrot.slane %v295_v3, %v16116_v40 }
 0x4ab   : > { %5408 = vbcast.lane.b32.xlu1 %v5402_v22, 264  ;;  %5492 = vbcast.lane.b32.xlu0 %v5490_v43, 256  ;;  %v5523_v22 = vrot.slane %v295_v3, %v16106_v6 }
 0x4ad   : > { %v12766_v59 = vpop.permute.xlu1 %5100  ;;  %v12768_v14 = vpop.permute.xlu0 %5184 }
 0x4ae   : > { %16330 = vst [vmem:[#allocation69_spill] sm:$0xff] %v12766_v59  ;;  %16331 = vst [vmem:[#allocation62_spill] sm:$0xff] %v12768_v14 }
 0x4af   : > { %5419 = vbcast.lane.b32.xlu1 %v5413_v38, 264  ;;  %5503 = vbcast.lane.b32.xlu0 %v5501_v32, 256 }
 0x4b1   : > { %v12771_v49 = vpop.permute.xlu1 %5111  ;;  %v12773_v51 = vpop.permute.xlu0 %5195 }
 0x4b2   : > { %16332 = vst [vmem:[#allocation140_spill] sm:$0xff] %v12771_v49  ;;  %16333 = vst [vmem:[#allocation94_spill] sm:$0xff] %v12773_v51 }
 0x4b3   : > { %5430 = vbcast.lane.b32.xlu1 %v5424_v11, 264  ;;  %5514 = vbcast.lane.b32.xlu0 %v5512_v21, 256 }
 0x4b5   : > { %v12776_v10 = vpop.permute.xlu1 %5122  ;;  %v12778_v29 = vpop.permute.xlu0 %5206 }
 0x4b6   : > { %16334 = vst [vmem:[#allocation59_spill] sm:$0xff] %v12776_v10  ;;  %16335 = vst [vmem:[#allocation145_spill] sm:$0xff] %v12778_v29  ;;  %v5556_v29 = vrot.slane %v295_v3, %v16189_v31 }
 0x4b7   : > { %5441 = vbcast.lane.b32.xlu1 %v5435_v54, 264  ;;  %5525 = vbcast.lane.b32.xlu0 %v5523_v22, 256 }
 0x4b9   : > { %v12781_v38 = vpop.permute.xlu1 %5133  ;;  %v12783_v14 = vpop.permute.xlu0 %5217 }
 0x4ba   : > { %16336 = vst [vmem:[#allocation142_spill] sm:$0xff] %v12781_v38  ;;  %16337 = vst [vmem:[#allocation19_spill] sm:$0xff] %v12783_v14  ;;  %v5567_v14 = vrot.slane %v295_v3, %v16192_v13 }
 0x4bb   : > { %5452 = vbcast.lane.b32.xlu1 %v5446_v45, 264  ;;  %5536 = vbcast.lane.b32.xlu0 %v5534_v5, 256 }
 0x4bd   : > { %v12786_v11 = vpop.permute.xlu1 %5144  ;;  %v12788_v51 = vpop.permute.xlu0 %5228 }
 0x4be   : > { %16338 = vst [vmem:[#allocation51_spill] sm:$0xff] %v12786_v11  ;;  %16339 = vst [vmem:[#allocation139_spill] sm:$0xff] %v12788_v51  ;;  %v5578_v51 = vrot.slane %v295_v3, %v16127_v34  ;;  %v16345_v11 = vld [vmem:[#allocation13_spill] sm:$0xff] }
 0x4bf   : > { %5463 = vbcast.lane.b32.xlu1 %v5457_v48, 264  ;;  %5547 = vbcast.lane.b32.xlu0 %v5545_v4, 256  ;;  %v16344_v48 = vld [vmem:[#allocation14_spill] sm:$0xff] }
 0x4c0   : > { %v288_v49 = vsub.f32 %v16345_v11, %v16344_v48 }
 0x4c1   : > { %v12791_v54 = vpop.permute.xlu1 %5155  ;;  %v12793_v10 = vpop.permute.xlu0 %5239 }
 0x4c2   : > { %16340 = vst [vmem:[#allocation20_spill] sm:$0xff] %v12791_v54  ;;  %16341 = vst [vmem:[#allocation49_spill] sm:$0xff] %v12793_v10  ;;  %v296_v10 = vmul.f32 0.5, %v288_v49 }
 0x4c3   : > { %5474 = vbcast.lane.b32.xlu1 %v5468_v1, 264  ;;  %5558 = vbcast.lane.b32.xlu0 %v5556_v29, 256  ;;  %v5589_v1 = vrot.slane %v295_v3, %v16203_v44 }
 0x4c4   : > { %v5622_v49 = vrot.slane %v296_v10, %v16111_v8 }
 0x4c5   : > { %v12796_v45 = vpop.permute.xlu1 %5166  ;;  %v12798_v38 = vpop.permute.xlu0 %5250 }
 0x4c6   : > { %16342 = vst [vmem:[#allocation17_spill] sm:$0xff] %v12796_v45  ;;  %16343 = vst [vmem:[#allocation18_spill] sm:$0xff] %v12798_v38 }
 0x4c7   : > { %5485 = vbcast.lane.b32.xlu1 %v5479_v55, 264  ;;  %5569 = vbcast.lane.b32.xlu0 %v5567_v14, 256  ;;  %v5600_v55 = vrot.slane %v296_v10, %v16100_v42 }
 0x4c9   : > { %v12803_v46 = vpop.permute.xlu1 %5177  ;;  %v12805_v54 = vpop.permute.xlu0 %5261 }
 0x4ca   : > { %16346 = vst [vmem:[#allocation119_spill] sm:$0xff] %v12803_v46  ;;  %16347 = vst [vmem:[#allocation29_spill] sm:$0xff] %v12805_v54  ;;  %v12828_v54 = vrot.slane %v296_v10, %v16116_v40 }
 0x4cb   : > { %5496 = vbcast.lane.b32.xlu1 %v5490_v43, 264  ;;  %5580 = vbcast.lane.b32.xlu0 %v5578_v51, 256  ;;  %v5611_v43 = vrot.slane %v296_v10, %v16106_v6 }
 0x4cd   : > { %v12808_v59 = vpop.permute.xlu1 %5188  ;;  %v12810_v45 = vpop.permute.xlu0 %5272 }
 0x4ce   : > { %16348 = vst [vmem:[#allocation31_spill] sm:$0xff] %v12808_v59  ;;  %16349 = vst [vmem:[#allocation117_spill] sm:$0xff] %v12810_v45 }
 0x4cf   : > { %5507 = vbcast.lane.b32.xlu1 %v5501_v32, 264  ;;  %5591 = vbcast.lane.b32.xlu0 %v5589_v1, 256 }
 0x4d1   : > { %v12813_v38 = vpop.permute.xlu1 %5199  ;;  %v12815_v11 = vpop.permute.xlu0 %5283 }
 0x4d2   : > { %16350 = vst [vmem:[#allocation84_spill] sm:$0xff] %v12813_v38  ;;  %16351 = vst [vmem:[#allocation127_spill] sm:$0xff] %v12815_v11 }
 0x4d3   : > { %5518 = vbcast.lane.b32.xlu1 %v5512_v21, 264  ;;  %5602 = vbcast.lane.b32.xlu0 %v5600_v55, 256 }
 0x4d5   : > { %v12818_v48 = vpop.permute.xlu1 %5210  ;;  %v12820_v3 = vpop.permute.xlu0 %5294 }
 0x4d6   : > { %16352 = vst [vmem:[#allocation22_spill] sm:$0xff] %v12818_v48  ;;  %16353 = vst [vmem:[#allocation108_spill] sm:$0xff] %v12820_v3 }
 0x4d7   : > { %5529 = vbcast.lane.b32.xlu1 %v5523_v22, 264  ;;  %5613 = vbcast.lane.b32.xlu0 %v5611_v43, 256  ;;  %v12836_v22 = vrot.slane %v296_v10, %v16189_v31 }
 0x4d9   : > { %v12823_v32 = vpop.permute.xlu1 %5221  ;;  %v12825_v45 = vpop.permute.xlu0 %5305 }
 0x4da   : > { %16354 = vst [vmem:[#allocation54_spill] sm:$0xff] %v12823_v32  ;;  %16355 = vst [vmem:[#allocation55_spill] sm:$0xff] %v12825_v45 }
 0x4db   : > { %5540 = vbcast.lane.b32.xlu1 %v5534_v5, 264  ;;  %5624 = vbcast.lane.b32.xlu0 %v5622_v49, 256  ;;  %v12844_v5 = vrot.slane %v296_v10, %v16192_v13 }
 0x4dd   : > { %v12830_v21 = vpop.permute.xlu1 %5232  ;;  %v12832_v11 = vpop.permute.xlu0 %5316 }
 0x4de   : > { %16356 = vst [vmem:[#allocation123_spill] sm:$0xff] %v12830_v21  ;;  %16357 = vst [vmem:[#allocation121_spill] sm:$0xff] %v12832_v11 }
 0x4df   : > { %5551 = vbcast.lane.b32.xlu1 %v5545_v4, 264  ;;  %5635 = vbcast.lane.b32.xlu0 %v12828_v54, 256  ;;  %v12850_v4 = vrot.slane %v296_v10, %v16127_v34 }
 0x4e1   : > { %v12838_v3 = vpop.permute.xlu1 %5243  ;;  %v12840_v32 = vpop.permute.xlu0 %5327 }
 0x4e2   : > { %16358 = vst [vmem:[#allocation35_spill] sm:$0xff] %v12838_v3  ;;  %16359 = vst [vmem:[#allocation120_spill] sm:$0xff] %v12840_v32  ;;  %v289_v3 = vsub.f32 %v16194_v50, %v16195_v27  ;;  %v12858_v32 = vrot.slane %v296_v10, %v16203_v44 }
 0x4e3   : > { %5562 = vbcast.lane.b32.xlu1 %v5556_v29, 264  ;;  %5646 = vbcast.lane.b32.xlu0 %v12836_v22, 256 }
 0x4e5   : > { %v12846_v45 = vpop.permute.xlu1 %5254  ;;  %v5339_v21 = vpop.permute.xlu0 %5338 }
 0x4e6   : > { %16360 = vst [vmem:[#allocation87_spill] sm:$0xff] %v12846_v45  ;;  %v12860_v45 = vmul.f32 0.5, %v289_v3  ;;  %v6037_v38 = vsel %vm16363_vm0, %v12327_v15, %v5339_v21 }
 0x4e7   : > { %5573 = vbcast.lane.b32.xlu1 %v5567_v14, 264  ;;  %5657 = vbcast.lane.b32.xlu0 %v12844_v5, 256 }
 0x4e9   : > { %v12854_v11 = vpop.permute.xlu1 %5265  ;;  %v5350_v29 = vpop.permute.xlu0 %5349 }
 0x4ea   : > { %16361 = vst [vmem:[#allocation88_spill] sm:$0xff] %v12854_v11 }
 0x4eb   : > { %5584 = vbcast.lane.b32.xlu1 %v5578_v51, 264  ;;  %5668 = vbcast.lane.b32.xlu0 %v12850_v4, 256  ;;  %v12871_v51 = vrot.slane %v12860_v45, %v16100_v42 }
 0x4ed   : > { %v12862_v14 = vpop.permute.xlu1 %5276  ;;  %v5361_v48 = vpop.permute.xlu0 %5360 }
 0x4ee   : > { %16362 = vst [vmem:[#allocation85_spill] sm:$0xff] %v12862_v14  ;;  %v6041_v50 = vsel %vm16364_vm15, %v12373_v36, %v5361_v48  ;;  %v6039_v14 = vsel %vm16366_vm14, %v12346_v17, %v5350_v29  ;;  %v16367_v48 = vld [vmem:[#allocation125_spill] sm:$0xff]  ;;  %vm16371_vm14 = vmmov %vm16363_vm0 }
 0x4ef   : > { %v6166_v27 = vcombine.high %v6037_v38, %v6041_v50  ;;  %5595 = vbcast.lane.b32.xlu1 %v5589_v1, 264  ;;  %5679 = vbcast.lane.b32.xlu0 %v12858_v32, 256  ;;  %v6165_v10 = vcombine.low %v6037_v38, %v6041_v50  ;;  %v12882_v1 = vrot.slane %v12860_v45, %v16106_v6  ;;  %vm16372_vm15 = vmmov %vm16363_vm0 }
 0x4f1   : > { %v12873_v3 = vpop.permute.xlu1 %5287  ;;  %v5372_v11 = vpop.permute.xlu0 %5371  ;;  %v6173_v38 = vrot.slane %v6165_v10, %v16367_v48  ;;  %v6180_v50 = vrot.slane %v6166_v27, %v16367_v48 }
 0x4f2   : > { %16365 = vst [vmem:[#allocation68_spill] sm:$0xff] %v12873_v3  ;;  %v6043_v15 = vsel %vm16363_vm0, %v12408_v24, %v5372_v11 }
 0x4f3   : > { %v6181_v21 = vcombine.low %v6039_v14, %v6043_v15  ;;  %v6182_v36 = vcombine.high %v6039_v14, %v6043_v15  ;;  %5606 = vbcast.lane.b32.xlu1 %v5600_v55, 264  ;;  %5690 = vbcast.lane.b32.xlu0 %v12871_v51, 256  ;;  %v12893_v15 = vrot.slane %v12860_v45, %v16111_v8 }
 0x4f5   : > { %v6189_v3 = vrot.slane %v6181_v21, %v16367_v48  ;;  %v6196_v17 = vrot.slane %v6182_v36, %v16367_v48  ;;  %v12888_v29 = vpop.permute.xlu1 %5298  ;;  %v5383_v24 = vpop.permute.xlu0 %5382  ;;  %v12900_v21 = vrot.slane %v12860_v45, %v16116_v40 }
 0x4f6   : > { %16368 = vst [vmem:[#allocation126_spill] sm:$0xff] %v12888_v29 }
 0x4f7   : > { %v6230_v11 = vcombine.high %v6173_v38, %v6189_v3  ;;  %v6245_v14 = vcombine.low %v6180_v50, %v6196_v17  ;;  %v6246_v55 = vcombine.high %v6180_v50, %v6196_v17  ;;  %5617 = vbcast.lane.b32.xlu1 %v5611_v43, 264  ;;  %5701 = vbcast.lane.b32.xlu0 %v12882_v1, 256 }
 0x4f8   : > { %v6045_v43 = vsel %vm16371_vm14, %v12446_v39, %v5383_v24  ;;  %vm16374_vm14 = vmmov %vm16363_vm0 }
 0x4f9   : > { %v12895_v10 = vpop.permute.xlu1 %5309  ;;  %v5394_v27 = vpop.permute.xlu0 %5393 }
 0x4fa   : > { %16369 = vst [vmem:[#allocation58_spill] sm:$0xff] %v12895_v10  ;;  %v6047_v59 = vsel %vm16363_vm0, %v12479_v25, %v5394_v27 }
 0x4fb   : > { %5628 = vbcast.lane.b32.xlu1 %v5622_v49, 264  ;;  %5712 = vbcast.lane.b32.xlu0 %v12893_v15, 256  ;;  %v12912_v49 = vrot.slane %v12860_v45, %v16189_v31 }
 0x4fd   : > { %v12902_v36 = vpop.permute.xlu1 %5320  ;;  %v5405_v50 = vpop.permute.xlu0 %5404 }
 0x4fe   : > { %16370 = vst [vmem:[#allocation118_spill] sm:$0xff] %v12902_v36  ;;  %v6049_v17 = vsel %vm16372_vm15, %v12504_v20, %v5405_v50  ;;  %v12924_v50 = vrot.slane %v12860_v45, %v16192_v13  ;;  %vm16381_vm15 = vmmov %vm16363_vm0 }
 0x4ff   : > { %v6198_v29 = vcombine.high %v6045_v43, %v6049_v17  ;;  %5639 = vbcast.lane.b32.xlu1 %v12828_v54, 264  ;;  %5723 = vbcast.lane.b32.xlu0 %v12900_v21, 256  ;;  %v6197_v10 = vcombine.low %v6045_v43, %v6049_v17  ;;  %v6229_v54 = vcombine.low %v6173_v38, %v6189_v3 }
 0x501   : > { %v12914_v46 = vpop.permute.xlu1 %5331  ;;  %v5416_v36 = vpop.permute.xlu0 %5415  ;;  %v6205_v43 = vrot.slane %v6197_v10, %v16367_v48  ;;  %v6212_v17 = vrot.slane %v6198_v29, %v16367_v48 }
 0x502   : > { %16373 = vst [vmem:[#allocation39_spill] sm:$0xff] %v12914_v46  ;;  %v6051_v39 = vsel %vm16374_vm14, %v12520_v57, %v5416_v36  ;;  %v16376_v46 = vld [vmem:[#allocation132_spill] sm:$0xff]  ;;  %vm16383_vm14 = vmmov %vm16363_vm0 }
 0x503   : > { %v6213_v20 = vcombine.low %v6047_v59, %v6051_v39  ;;  %v6214_v24 = vcombine.high %v6047_v59, %v6051_v39  ;;  %5650 = vbcast.lane.b32.xlu1 %v12836_v22, 264  ;;  %5734 = vbcast.lane.b32.xlu0 %v12912_v49, 256  ;;  %v290_v22 = vsub.f32 %v16256_v30, %v16257_v26 }
 0x504   : > { %v12936_v10 = vrot.slane %v6229_v54, %v16376_v46  ;;  %v12939_v29 = vrot.slane %v6230_v11, %v16376_v46 }
 0x505   : > { %v6221_v25 = vrot.slane %v6213_v20, %v16367_v48  ;;  %v6228_v27 = vrot.slane %v6214_v24, %v16367_v48  ;;  %v12930_v57 = vpop.permute.xlu1 %5342  ;;  %v5427_v59 = vpop.permute.xlu0 %5426  ;;  %v12944_v20 = vrot.slane %v12860_v45, %v16127_v34 }
 0x506   : > { %16375 = vst [vmem:[#allocation98_spill] sm:$0xff] %v12930_v57  ;;  %16377 = vst [vmem:[#allocation131_spill] sm:$0xff] %v12936_v10 }
 0x507   : > { %v6261_v3 = vcombine.low %v6205_v43, %v6221_v25  ;;  %v6262_v38 = vcombine.high %v6205_v43, %v6221_v25  ;;  %v6277_v36 = vcombine.low %v6212_v17, %v6228_v27  ;;  %v6278_v39 = vcombine.high %v6212_v17, %v6228_v27  ;;  %5661 = vbcast.lane.b32.xlu1 %v12844_v5, 264 }
 0x508   : > { %5745 = vbcast.lane.b32.xlu0 %v12924_v50, 256  ;;  %v12961_v43 = vrot.slane %v6245_v14, %v16376_v46  ;;  %v12964_v17 = vrot.slane %v6246_v55, %v16376_v46  ;;  %v12968_v25 = vrot.slane %v12860_v45, %v16203_v44  ;;  %v12971_v27 = vmul.f32 0.5, %v290_v22 }
 0x509   : > { %v12947_v30 = vrot.slane %v6261_v3, %v16376_v46  ;;  %v12950_v26 = vrot.slane %v6262_v38, %v16376_v46  ;;  %v12953_v5 = vrot.slane %v6277_v36, %v16376_v46  ;;  %v12956_v24 = vrot.slane %v6278_v39, %v16376_v46  ;;  %v12958_v11 = vpop.permute.xlu1 %5353  ;;  %v5438_v54 = vpop.permute.xlu0 %5437 }
 0x50a   : > { %16379 = vst [vmem:[#allocation56_spill] sm:$0xff] %v12958_v11  ;;  %v6053_v14 = vsel %vm16381_vm15, %v12530_v58, %v5427_v59  ;;  %v6055_v55 = vsel %vm16383_vm14, %v12539_v60, %v5438_v54  ;;  %vm16384_vm15 = vmmov %vm16363_vm0 }
 0x50b   : > { %16378 = vst [vmem:[#allocation34_spill] sm:$0xff] %v12947_v30  ;;  %5672 = vbcast.lane.b32.xlu1 %v12850_v4, 264  ;;  %v12998_v4 = vrot.slane %v12971_v27, %v16100_v42  ;;  %vm16388_vm14 = vmmov %vm16363_vm0 }
 0x50c   : > { %5756 = vbcast.lane.b32.xlu0 %v12944_v20, 256 }
 0x50d   : > { %v12988_v36 = vpop.permute.xlu1 %5364  ;;  %v5449_v39 = vpop.permute.xlu0 %5448 }
 0x50e   : > { %16380 = vst [vmem:[#allocation116_spill] sm:$0xff] %v12988_v36  ;;  %v6057_v38 = vsel %vm16363_vm0, %v12546_v56, %v5449_v39 }
 0x50f   : > { %v6302_v3 = vcombine.high %v6053_v14, %v6057_v38  ;;  %5683 = vbcast.lane.b32.xlu1 %v12858_v32, 264  ;;  %v6301_v57 = vcombine.low %v6053_v14, %v6057_v38  ;;  %v13010_v32 = vrot.slane %v12971_v27, %v16106_v6 }
 0x510   : > { %5767 = vbcast.lane.b32.xlu0 %v12968_v25, 256 }
 0x511   : > { %v13000_v45 = vpop.permute.xlu1 %5375  ;;  %v5460_v22 = vpop.permute.xlu0 %5459  ;;  %v6309_v54 = vrot.slane %v6301_v57, %v16367_v48  ;;  %v13030_v57 = vrot.slane %v12971_v27, %v16116_v40 }
 0x512   : > { %16382 = vst [vmem:[#allocation112_spill] sm:$0xff] %v13000_v45  ;;  %v6059_v58 = vsel %vm16384_vm15, %v12552_v16, %v5460_v22  ;;  %v6316_v16 = vrot.slane %v6302_v3, %v16367_v48  ;;  %vm16390_vm15 = vmmov %vm16363_vm0 }
 0x513   : > { %v6317_v56 = vcombine.low %v6055_v55, %v6059_v58  ;;  %v6318_v59 = vcombine.high %v6055_v55, %v6059_v58  ;;  %5694 = vbcast.lane.b32.xlu1 %v12871_v51, 264  ;;  %v13022_v55 = vrot.slane %v12971_v27, %v16111_v8 }
 0x514   : > { %5778 = vbcast.lane.b32.xlu0 %v12998_v4, 256 }
 0x515   : > { %v6325_v39 = vrot.slane %v6317_v56, %v16367_v48  ;;  %v6332_v36 = vrot.slane %v6318_v59, %v16367_v48  ;;  %v13014_v11 = vpop.permute.xlu1 %5386  ;;  %v5471_v60 = vpop.permute.xlu0 %5470 }
 0x516   : > { %16385 = vst [vmem:[#allocation115_spill] sm:$0xff] %v13014_v11 }
 0x517   : > { %5705 = vbcast.lane.b32.xlu1 %v12882_v1, 264  ;;  %v6366_v51 = vcombine.high %v6309_v54, %v6325_v39  ;;  %v6381_v38 = vcombine.low %v6316_v16, %v6332_v36  ;;  %v6382_v14 = vcombine.high %v6316_v16, %v6332_v36  ;;  %v6061_v36 = vsel %vm16363_vm0, %v12558_v23, %v5471_v60 }
 0x518   : > { %5789 = vbcast.lane.b32.xlu0 %v13010_v32, 256 }
 0x519   : > { %v13024_v22 = vpop.permute.xlu1 %5397  ;;  %v5482_v58 = vpop.permute.xlu0 %5481 }
 0x51a   : > { %16386 = vst [vmem:[#allocation129_spill] sm:$0xff] %v13024_v22 }
 0x51b   : > { %5716 = vbcast.lane.b32.xlu1 %v12893_v15, 264  ;;  %v13042_v15 = vrot.slane %v12971_v27, %v16189_v31 }
 0x51c   : > { %5800 = vbcast.lane.b32.xlu0 %v13022_v55, 256 }
 0x51d   : > { %v13032_v1 = vpop.permute.xlu1 %5408  ;;  %v5493_v3 = vpop.permute.xlu0 %5492 }
 0x51e   : > { %16387 = vst [vmem:[#allocation65_spill] sm:$0xff] %v13032_v1  ;;  %v6065_v56 = vsel %vm16388_vm14, %v12570_v18, %v5493_v3  ;;  %v6063_v1 = vsel %vm16390_vm15, %v12564_v7, %v5482_v58  ;;  %v6365_v3 = vcombine.low %v6309_v54, %v6325_v39  ;;  %v291_v39 = vsub.f32 %v16266_v35, %v16267_v19  ;;  %vm16398_vm14 = vmmov %vm16363_vm0 }
 0x51f   : > { %v6334_v59 = vcombine.high %v6061_v36, %v6065_v56  ;;  %5727 = vbcast.lane.b32.xlu1 %v12900_v21, 264  ;;  %v6333_v22 = vcombine.low %v6061_v36, %v6065_v56  ;;  %v13054_v21 = vrot.slane %v12971_v27, %v16192_v13  ;;  %vm16399_vm15 = vmmov %vm16363_vm0 }
 0x520   : > { %5811 = vbcast.lane.b32.xlu0 %v13030_v57, 256 }
 0x521   : > { %v13044_v16 = vpop.permute.xlu1 %5419  ;;  %v5504_v11 = vpop.permute.xlu0 %5503 }
 0x522   : > { %16389 = vst [vmem:[#allocation144_spill] sm:$0xff] %v13044_v16  ;;  %v6067_v23 = vsel %vm16363_vm0, %v12575_v12, %v5504_v11  ;;  %v6341_v12 = vrot.slane %v6333_v22, %v16367_v48  ;;  %v6348_v11 = vrot.slane %v6334_v59, %v16367_v48  ;;  %v13074_v22 = vrot.slane %v6366_v51, %v16376_v46 }
 0x523   : > { %v6349_v18 = vcombine.low %v6063_v1, %v6067_v23  ;;  %v6350_v60 = vcombine.high %v6063_v1, %v6067_v23  ;;  %5738 = vbcast.lane.b32.xlu1 %v12912_v49, 264  ;;  %v13065_v49 = vrot.slane %v12971_v27, %v16127_v34  ;;  %v13071_v23 = vrot.slane %v6365_v3, %v16376_v46 }
 0x524   : > { %5822 = vbcast.lane.b32.xlu0 %v13042_v15, 256  ;;  %v13094_v51 = vrot.slane %v6382_v14, %v16376_v46  ;;  %v13102_v3 = vmul.f32 0.5, %v291_v39 }
 0x525   : > { %v6357_v45 = vrot.slane %v6349_v18, %v16367_v48  ;;  %v6364_v16 = vrot.slane %v6350_v60, %v16367_v48  ;;  %v13058_v7 = vpop.permute.xlu1 %5430  ;;  %v5515_v58 = vpop.permute.xlu0 %5514  ;;  %16392 = vst [vmem:[#allocation48_spill] sm:$0xff] %v13071_v23  ;;  %v13099_v60 = vrot.slane %v12971_v27, %v16203_v44 }
 0x526   : > { %16391 = vst [vmem:[#allocation99_spill] sm:$0xff] %v13058_v7  ;;  %16396 = vst [vmem:[#allocation130_spill] sm:$0xff] %v13094_v51 }
 0x527   : > { %5749 = vbcast.lane.b32.xlu1 %v12924_v50, 264  ;;  %v6397_v54 = vcombine.low %v6341_v12, %v6357_v45  ;;  %v6398_v1 = vcombine.high %v6341_v12, %v6357_v45  ;;  %v6413_v36 = vcombine.low %v6348_v11, %v6364_v16  ;;  %v6414_v56 = vcombine.high %v6348_v11, %v6364_v16 }
 0x528   : > { %5833 = vbcast.lane.b32.xlu0 %v13054_v21, 256  ;;  %v13091_v16 = vrot.slane %v6381_v38, %v16376_v46 }
 0x529   : > { %v13076_v50 = vpop.permute.xlu1 %5441  ;;  %v5526_v59 = vpop.permute.xlu0 %5525  ;;  %v13079_v18 = vrot.slane %v6397_v54, %v16376_v46  ;;  %v13082_v35 = vrot.slane %v6398_v1, %v16376_v46  ;;  %v13085_v19 = vrot.slane %v6413_v36, %v16376_v46  ;;  %v13088_v45 = vrot.slane %v6414_v56, %v16376_v46 }
 0x52a   : > { %16393 = vst [vmem:[#allocation122_spill] sm:$0xff] %v13076_v50  ;;  %v6069_v36 = vsel %vm16398_vm14, %v12580_v41, %v5515_v58  ;;  %v13128_v54 = vrot.slane %v13102_v3, %v16100_v42  ;;  %v6071_v1 = vsel %vm16363_vm0, %v12587_v47, %v5526_v59  ;;  %vm16401_vm14 = vmmov %vm16363_vm0 }
 0x52b   : > { %16394 = vst [vmem:[#allocation38_spill] sm:$0xff] %v13079_v18  ;;  %16395 = vst [vmem:[#allocation95_spill] sm:$0xff] %v13088_v45  ;;  %5760 = vbcast.lane.b32.xlu1 %v12944_v20, 264 }
 0x52c   : > { %5844 = vbcast.lane.b32.xlu0 %v13065_v49, 256 }
 0x52d   : > { %v13110_v11 = vpop.permute.xlu1 %5452  ;;  %v5537_v20 = vpop.permute.xlu0 %5536 }
 0x52e   : > { %16397 = vst [vmem:[#allocation33_spill] sm:$0xff] %v13110_v11  ;;  %v6073_v56 = vsel %vm16399_vm15, %v12592_v33, %v5537_v20  ;;  %vm16405_vm15 = vmmov %vm16363_vm0 }
 0x52f   : > { %v6710_v14 = vcombine.high %v6069_v36, %v6073_v56  ;;  %5771 = vbcast.lane.b32.xlu1 %v12968_v25, 264  ;;  %v6709_v38 = vcombine.low %v6069_v36, %v6073_v56  ;;  %v13140_v25 = vrot.slane %v13102_v3, %v16106_v6  ;;  %v13152_v36 = vrot.slane %v13102_v3, %v16111_v8 }
 0x530   : > { %5855 = vbcast.lane.b32.xlu0 %v13099_v60, 256 }
 0x531   : > { %v13130_v27 = vpop.permute.xlu1 %5463  ;;  %v5548_v39 = vpop.permute.xlu0 %5547  ;;  %v6717_v59 = vrot.slane %v6709_v38, %v16367_v48  ;;  %v13160_v38 = vrot.slane %v13102_v3, %v16116_v40 }
 0x532   : > { %16400 = vst [vmem:[#allocation90_spill] sm:$0xff] %v13130_v27  ;;  %v6075_v41 = vsel %vm16401_vm14, %v12597_v0, %v5548_v39  ;;  %v6724_v0 = vrot.slane %v6710_v14, %v16367_v48  ;;  %vm16407_vm14 = vmmov %vm16363_vm0 }
 0x533   : > { %v6725_v33 = vcombine.low %v6071_v1, %v6075_v41  ;;  %v6726_v58 = vcombine.high %v6071_v1, %v6075_v41  ;;  %5782 = vbcast.lane.b32.xlu1 %v12998_v4, 264 }
 0x534   : > { %5866 = vbcast.lane.b32.xlu0 %v13128_v54, 256 }
 0x535   : > { %v6733_v20 = vrot.slane %v6725_v33, %v16367_v48  ;;  %v6740_v12 = vrot.slane %v6726_v58, %v16367_v48  ;;  %v13144_v7 = vpop.permute.xlu1 %5474  ;;  %v5559_v47 = vpop.permute.xlu0 %5558 }
 0x536   : > { %16402 = vst [vmem:[#allocation128_spill] sm:$0xff] %v13144_v7  ;;  %v6077_v14 = vsel %vm16405_vm15, %v12602_v37, %v5559_v47  ;;  %vm16408_vm15 = vmmov %vm16363_vm0 }
 0x537   : > { %5793 = vbcast.lane.b32.xlu1 %v13010_v32, 264  ;;  %v6774_v4 = vcombine.high %v6717_v59, %v6733_v20  ;;  %v6789_v39 = vcombine.low %v6724_v0, %v6740_v12  ;;  %v6790_v1 = vcombine.high %v6724_v0, %v6740_v12 }
 0x538   : > { %5877 = vbcast.lane.b32.xlu0 %v13140_v25, 256 }
 0x539   : > { %v13154_v56 = vpop.permute.xlu1 %5485  ;;  %v5570_v41 = vpop.permute.xlu0 %5569 }
 0x53a   : > { %16403 = vst [vmem:[#allocation64_spill] sm:$0xff] %v13154_v56  ;;  %v6079_v11 = vsel %vm16407_vm14, %v12607_v53, %v5570_v41  ;;  %vm16414_vm14 = vmmov %vm16363_vm0 }
 0x53b   : > { %5804 = vbcast.lane.b32.xlu1 %v13022_v55, 264  ;;  %v13172_v55 = vrot.slane %v13102_v3, %v16189_v31 }
 0x53c   : > { %5888 = vbcast.lane.b32.xlu0 %v13152_v36, 256 }
 0x53d   : > { %v13162_v32 = vpop.permute.xlu1 %5496  ;;  %v5581_v12 = vpop.permute.xlu0 %5580 }
 0x53e   : > { %16404 = vst [vmem:[#allocation143_spill] sm:$0xff] %v13162_v32  ;;  %v6081_v33 = vsel %vm16363_vm0, %v12612_v28, %v5581_v12  ;;  %v6773_v12 = vcombine.low %v6717_v59, %v6733_v20 }
 0x53f   : > { %v6742_v58 = vcombine.high %v6077_v14, %v6081_v33  ;;  %5815 = vbcast.lane.b32.xlu1 %v13030_v57, 264  ;;  %v6741_v50 = vcombine.low %v6077_v14, %v6081_v33  ;;  %v13184_v57 = vrot.slane %v13102_v3, %v16192_v13 }
 0x540   : > { %5899 = vbcast.lane.b32.xlu0 %v13160_v38, 256 }
 0x541   : > { %v13174_v0 = vpop.permute.xlu1 %5507  ;;  %v5592_v7 = vpop.permute.xlu0 %5591 }
 0x542   : > { %16406 = vst [vmem:[#allocation96_spill] sm:$0xff] %v13174_v0  ;;  %v6083_v37 = vsel %vm16408_vm15, %v12617_v61, %v5592_v7  ;;  %v6749_v61 = vrot.slane %v6741_v50, %v16367_v48  ;;  %v6756_v7 = vrot.slane %v6742_v58, %v16367_v48  ;;  %v13204_v50 = vrot.slane %v6774_v4, %v16376_v46  ;;  %vm16416_vm15 = vmmov %vm16363_vm0  ;;  %v16426_v0 = vld [vmem:[#allocation71_spill] sm:$0xff] }
 0x543   : > { %v6757_v28 = vcombine.low %v6079_v11, %v6083_v37  ;;  %v6758_v47 = vcombine.high %v6079_v11, %v6083_v37  ;;  %5826 = vbcast.lane.b32.xlu1 %v13042_v15, 264  ;;  %v13195_v15 = vrot.slane %v13102_v3, %v16127_v34  ;;  %v292_v11 = vsub.f32 %v12622_v9, %v12626_v62 }
 0x544   : > { %5910 = vbcast.lane.b32.xlu0 %v13172_v55, 256  ;;  %v13201_v37 = vrot.slane %v6773_v12, %v16376_v46  ;;  %v13224_v4 = vrot.slane %v6790_v1, %v16376_v46 }
 0x545   : > { %v6765_v32 = vrot.slane %v6757_v28, %v16367_v48  ;;  %v6772_v56 = vrot.slane %v6758_v47, %v16367_v48  ;;  %v13188_v53 = vpop.permute.xlu1 %5518  ;;  %v5603_v41 = vpop.permute.xlu0 %5602  ;;  %v13229_v47 = vrot.slane %v13102_v3, %v16203_v44  ;;  %v13232_v12 = vmul.f32 0.5, %v292_v11 }
 0x546   : > { %16409 = vst [vmem:[#allocation50_spill] sm:$0xff] %v13188_v53  ;;  %16410 = vst [vmem:[#allocation37_spill] sm:$0xff] %v13201_v37 }
 0x547   : > { %5837 = vbcast.lane.b32.xlu1 %v13054_v21, 264  ;;  %v6805_v20 = vcombine.low %v6749_v61, %v6765_v32  ;;  %v6806_v59 = vcombine.high %v6749_v61, %v6765_v32  ;;  %v6821_v14 = vcombine.low %v6756_v7, %v6772_v56  ;;  %v6822_v33 = vcombine.high %v6756_v7, %v6772_v56 }
 0x548   : > { %5921 = vbcast.lane.b32.xlu0 %v13184_v57, 256  ;;  %v13221_v32 = vrot.slane %v6789_v39, %v16376_v46 }
 0x549   : > { %v13206_v21 = vpop.permute.xlu1 %5529  ;;  %v5614_v58 = vpop.permute.xlu0 %5613  ;;  %v13209_v28 = vrot.slane %v6805_v20, %v16376_v46  ;;  %v13212_v62 = vrot.slane %v6806_v59, %v16376_v46  ;;  %v13215_v9 = vrot.slane %v6821_v14, %v16376_v46  ;;  %v13218_v56 = vrot.slane %v6822_v33, %v16376_v46 }
 0x54a   : > { %16411 = vst [vmem:[#allocation91_spill] sm:$0xff] %v13206_v21  ;;  %v6085_v14 = vsel %vm16363_vm0, %v12630_v2, %v5603_v41  ;;  %v13258_v20 = vrot.slane %v13232_v12, %v16100_v42  ;;  %v6087_v59 = vsel %vm16416_vm15, %v12637_v52, %v5614_v58  ;;  %v16417_v2 = vld [vmem:[#allocation137_spill] sm:$0xff]  ;;  %v13270_v42 = vrot.slane %v13232_v12, %v16106_v6  ;;  %vm16424_vm15 = vmmov %vm16363_vm0 }
 0x54b   : > { %16412 = vst [vmem:[#allocation32_spill] sm:$0xff] %v13209_v28  ;;  %5848 = vbcast.lane.b32.xlu1 %v13065_v49, 264  ;;  %v13282_v6 = vrot.slane %v13232_v12, %v16111_v8 }
 0x54c   : > { %5932 = vbcast.lane.b32.xlu0 %v13195_v15, 256 }
 0x54d   : > { %v13240_v7 = vpop.permute.xlu1 %5540  ;;  %v5625_v49 = vpop.permute.xlu0 %5624 }
 0x54e   : > { %16413 = vst [vmem:[#allocation89_spill] sm:$0xff] %v13240_v7  ;;  %v6089_v33 = vsel %vm16414_vm14, %v12642_v63, %v5625_v49  ;;  %vm16422_vm14 = vmmov %vm16363_vm0 }
 0x54f   : > { %v6846_v1 = vcombine.high %v6085_v14, %v6089_v33  ;;  %5859 = vbcast.lane.b32.xlu1 %v13099_v60, 264  ;;  %v6845_v39 = vcombine.low %v6085_v14, %v6089_v33 }
 0x550   : > { %5943 = vbcast.lane.b32.xlu0 %v13229_v47, 256 }
 0x551   : > { %v13260_v3 = vpop.permute.xlu1 %5551  ;;  %v5636_v11 = vpop.permute.xlu0 %5635  ;;  %v6853_v58 = vrot.slane %v6845_v39, %v16367_v48  ;;  %v13290_v39 = vrot.slane %v13232_v12, %v16116_v40 }
 0x552   : > { %16415 = vst [vmem:[#allocation67_spill] sm:$0xff] %v13260_v3  ;;  %v6091_v41 = vsel %vm16363_vm0, %v16417_v2, %v5636_v11  ;;  %v6860_v11 = vrot.slane %v6846_v1, %v16367_v48  ;;  %v16421_v1 = vld [vmem:[#allocation42_spill] sm:$0xff]  ;;  %v16550_v3 = vld [vmem:[#allocation31_spill] sm:$0xff] }
 0x553   : > { %v6861_v63 = vcombine.low %v6087_v59, %v6091_v41  ;;  %v6862_v49 = vcombine.high %v6087_v59, %v6091_v41  ;;  %5870 = vbcast.lane.b32.xlu1 %v13128_v54, 264 }
 0x554   : > { %5954 = vbcast.lane.b32.xlu0 %v13258_v20, 256 }
 0x555   : > { %v6869_v60 = vrot.slane %v6861_v63, %v16367_v48  ;;  %v6876_v61 = vrot.slane %v6862_v49, %v16367_v48  ;;  %v13274_v27 = vpop.permute.xlu1 %5562  ;;  %v5647_v52 = vpop.permute.xlu0 %5646  ;;  %v16423_v63 = vld [vmem:[#allocation104_spill] sm:$0xff] }
 0x556   : > { %16418 = vst [vmem:[#allocation141_spill] sm:$0xff] %v13274_v27  ;;  %v6093_v41 = vsel %vm16422_vm14, %v16421_v1, %v5647_v52  ;;  %v16427_v52 = vld [vmem:[#allocation148_spill] sm:$0xff]  ;;  %vm16428_vm14 = vmmov %vm16363_vm0 }
 0x557   : > { %5881 = vbcast.lane.b32.xlu1 %v13140_v25, 264  ;;  %v6910_v54 = vcombine.high %v6853_v58, %v6869_v60  ;;  %v6925_v59 = vcombine.low %v6860_v11, %v6876_v61  ;;  %v6926_v14 = vcombine.high %v6860_v11, %v6876_v61 }
 0x558   : > { %5965 = vbcast.lane.b32.xlu0 %v13270_v42, 256 }
 0x559   : > { %v13284_v33 = vpop.permute.xlu1 %5573  ;;  %v5658_v2 = vpop.permute.xlu0 %5657 }
 0x55a   : > { %16419 = vst [vmem:[#allocation93_spill] sm:$0xff] %v13284_v33  ;;  %v6095_v45 = vsel %vm16363_vm0, %v16426_v0, %v5658_v2 }
 0x55b   : > { %5892 = vbcast.lane.b32.xlu1 %v13152_v36, 264  ;;  %v13302_v36 = vrot.slane %v13232_v12, %v16189_v31  ;;  %v13314_v31 = vrot.slane %v13232_v12, %v16192_v13 }
 0x55c   : > { %5976 = vbcast.lane.b32.xlu0 %v13282_v6, 256 }
 0x55d   : > { %v13292_v25 = vpop.permute.xlu1 %5584  ;;  %v5669_v61 = vpop.permute.xlu0 %5668 }
 0x55e   : > { %16420 = vst [vmem:[#allocation30_spill] sm:$0xff] %v13292_v25  ;;  %v6097_v8 = vsel %vm16424_vm15, %v16423_v63, %v5669_v61  ;;  %vm16437_vm15 = vmmov %vm16363_vm0 }
 0x55f   : > { %v6878_v49 = vcombine.high %v6093_v41, %v6097_v8  ;;  %5903 = vbcast.lane.b32.xlu1 %v13160_v38, 264  ;;  %v6877_v51 = vcombine.low %v6093_v41, %v6097_v8  ;;  %v6909_v38 = vcombine.low %v6853_v58, %v6869_v60 }
 0x560   : > { %5987 = vbcast.lane.b32.xlu0 %v13290_v39, 256 }
 0x561   : > { %v13304_v40 = vpop.permute.xlu1 %5595  ;;  %v5680_v11 = vpop.permute.xlu0 %5679  ;;  %v6885_v41 = vrot.slane %v6877_v51, %v16367_v48 }
 0x562   : > { %16425 = vst [vmem:[#allocation27_spill] sm:$0xff] %v13304_v40  ;;  %v6099_v1 = vsel %vm16428_vm14, %v16427_v52, %v5680_v11  ;;  %v13329_v11 = vrot.slane %v6909_v38, %v16376_v46  ;;  %v13332_v52 = vrot.slane %v6910_v54, %v16376_v46  ;;  %v13352_v54 = vrot.slane %v6926_v14, %v16376_v46  ;;  %vm16441_vm14 = vmmov %vm16363_vm0 }
 0x563   : > { %v6893_v61 = vcombine.low %v6095_v45, %v6099_v1  ;;  %v6894_v63 = vcombine.high %v6095_v45, %v6099_v1  ;;  %5914 = vbcast.lane.b32.xlu1 %v13172_v55, 264  ;;  %v6892_v45 = vrot.slane %v6878_v49, %v16367_v48  ;;  %v13325_v55 = vrot.slane %v13232_v12, %v16127_v34 }
 0x564   : > { %5998 = vbcast.lane.b32.xlu0 %v13302_v36, 256  ;;  %16430 = vst [vmem:[#allocation23_spill] sm:$0xff] %v13329_v11  ;;  %v13349_v1 = vrot.slane %v6925_v59, %v16376_v46  ;;  %16434 = vst [vmem:[#allocation6_spill] sm:$0xff] %v13352_v54  ;;  %v16488_v54 = vld [vmem:[#allocation92_spill] sm:$0xff] }
 0x565   : > { %v6901_v53 = vrot.slane %v6893_v61, %v16367_v48  ;;  %v6908_v27 = vrot.slane %v6894_v63, %v16367_v48  ;;  %v13318_v0 = vpop.permute.xlu1 %5606  ;;  %v5691_v2 = vpop.permute.xlu0 %5690  ;;  %v13358_v61 = vrot.slane %v13232_v12, %v16203_v44  ;;  %v6294_v44 = vcombine.high %v12936_v10, %v12947_v30  ;;  %v16440_v12 = vld [vmem:[#allocation60_spill] sm:$0xff] }
 0x566   : > { %16429 = vst [vmem:[#allocation53_spill] sm:$0xff] %v13318_v0  ;;  %v16442_v0 = vld [vmem:[#allocation150_spill] sm:$0xff]  ;;  %v16451_v30 = vld [vmem:[#allocation100_spill] sm:$0xff] }
 0x567   : > { %5925 = vbcast.lane.b32.xlu1 %v13184_v57, 264  ;;  %v6941_v13 = vcombine.low %v6885_v41, %v6901_v53  ;;  %v6942_v8 = vcombine.high %v6885_v41, %v6901_v53  ;;  %v6957_v60 = vcombine.low %v6892_v45, %v6908_v27  ;;  %v6958_v58 = vcombine.high %v6892_v45, %v6908_v27 }
 0x568   : > { %6009 = vbcast.lane.b32.xlu0 %v13314_v31, 256 }
 0x569   : > { %v13334_v51 = vpop.permute.xlu1 %5617  ;;  %v13337_v57 = vrot.slane %v6941_v13, %v16376_v46  ;;  %v13340_v34 = vrot.slane %v6942_v8, %v16376_v46  ;;  %v13343_v53 = vrot.slane %v6957_v60, %v16376_v46  ;;  %v13346_v27 = vrot.slane %v6958_v58, %v16376_v46  ;;  %v5702_v49 = vpop.permute.xlu0 %5701  ;;  %v16436_v13 = vld [vmem:[#allocation138_spill] sm:$0xff]  ;;  %v16438_v60 = vld [vmem:[#allocation43_spill] sm:$0xff] }
 0x56a   : > { %16431 = vst [vmem:[#allocation24_spill] sm:$0xff] %v13334_v51  ;;  %v6101_v8 = vsel %vm16437_vm15, %v16436_v13, %v5691_v2  ;;  %v6103_v63 = vsel %vm16441_vm14, %v16440_v12, %v5702_v49  ;;  %vm16443_vm15 = vmmov %vm16363_vm0 }
 0x56b   : > { %16432 = vst [vmem:[#allocation25_spill] sm:$0xff] %v13337_v57  ;;  %16433 = vst [vmem:[#allocation26_spill] sm:$0xff] %v13346_v27  ;;  %5936 = vbcast.lane.b32.xlu1 %v13195_v15, 264  ;;  %v16485_v27 = vld [vmem:[#allocation44_spill] sm:$0xff] }
 0x56c   : > { %6020 = vbcast.lane.b32.xlu0 %v13325_v55, 256  ;;  %vm16449_vm14 = vmmov %vm16363_vm0 }
 0x56d   : > { %v13366_v41 = vpop.permute.xlu1 %5628  ;;  %v5713_v45 = vpop.permute.xlu0 %5712 }
 0x56e   : > { %16435 = vst [vmem:[#allocation5_spill] sm:$0xff] %v13366_v41  ;;  %v6105_v58 = vsel %vm16363_vm0, %v16438_v60, %v5713_v45 }
 0x56f   : > { %5947 = vbcast.lane.b32.xlu1 %v13229_v47, 264  ;;  %v7254_v59 = vcombine.high %v6101_v8, %v6105_v58  ;;  %v7253_v14 = vcombine.low %v6101_v8, %v6105_v58  ;;  %v6838_v8 = vcombine.high %v13201_v37, %v13209_v28  ;;  %v16447_v28 = vld [vmem:[#allocation75_spill] sm:$0xff] }
 0x570   : > { %6031 = vbcast.lane.b32.xlu0 %v13358_v61, 256 }
 0x571   : > { %v13382_v15 = vpop.permute.xlu1 %5639  ;;  %v5724_v38 = vpop.permute.xlu0 %5723  ;;  %v7261_v60 = vrot.slane %v7253_v14, %v16367_v48  ;;  %v7268_v58 = vrot.slane %v7254_v59, %v16367_v48 }
 0x572   : > { %16439 = vst [vmem:[#allocation8_spill] sm:$0xff] %v13382_v15  ;;  %v6107_v2 = vsel %vm16443_vm15, %v16442_v0, %v5724_v38  ;;  %vm16452_vm15 = vmmov %vm16363_vm0  ;;  %v16481_v15 = vld [vmem:[#allocation41_spill] sm:$0xff] }
 0x573   : > { %5958 = vbcast.lane.b32.xlu1 %v13258_v20, 264  ;;  %v7269_v45 = vcombine.low %v6103_v63, %v6107_v2  ;;  %v7270_v47 = vcombine.high %v6103_v63, %v6107_v2 }
 0x574   : > { %8349 = vrot.lane.b32.xlu0 %v6294_v44, %s9295_s16 }
 0x575   : > { %v13392_v13 = vpop.permute.xlu1 %5650  ;;  %v7277_v49 = vrot.slane %v7269_v45, %v16367_v48  ;;  %v7284_v12 = vrot.slane %v7270_v47, %v16367_v48  ;;  %v5735_v0 = vpop.permute.xlu0 %5734  ;;  %v16448_v47 = vld [vmem:[#allocation146_spill] sm:$0xff] }
 0x576   : > { %16444 = vst [vmem:[#allocation7_spill] sm:$0xff] %v13392_v13  ;;  %v6109_v45 = vsel %vm16363_vm0, %v16447_v28, %v5735_v0 }
 0x577   : > { %5969 = vbcast.lane.b32.xlu1 %v13270_v42, 264  ;;  %v7318_v20 = vcombine.high %v7261_v60, %v7277_v49  ;;  %v7333_v63 = vcombine.low %v7268_v58, %v7284_v12  ;;  %v7334_v38 = vcombine.high %v7268_v58, %v7284_v12  ;;  %v7317_v0 = vcombine.low %v7261_v60, %v7277_v49 }
 0x578   : > { %8353 = vrot.lane.b32.xlu0 %v6838_v8, %s9295_s16 }
 0x579   : > { %v13402_v44 = vpop.permute.xlu1 %5661 }
 0x57a   : > { %16445 = vst [vmem:[#allocation12_spill] sm:$0xff] %v13402_v44  ;;  %v5746_v2 = vpop.permute.xlu0 %5745 }
 0x57b   : > { %5980 = vbcast.lane.b32.xlu1 %v13282_v6, 264  ;;  %v6111_v10 = vsel %vm16452_vm15, %v16451_v30, %v5746_v2  ;;  %v16453_v6 = vld [vmem:[#allocation9_spill] sm:$0xff]  ;;  %vm16466_vm15 = vmmov %vm16363_vm0 }
 0x57d   : > { %v13405_v14 = vpop.permute.xlu1 %5672 }
 0x57e   : > { %16446 = vst [vmem:[#allocation11_spill] sm:$0xff] %v13405_v14  ;;  %v5757_v59 = vpop.permute.xlu0 %5756 }
 0x57f   : > { %v6113_v37 = vsel %vm16449_vm14, %v16448_v47, %v5757_v59  ;;  %5991 = vbcast.lane.b32.xlu1 %v13290_v39, 264  ;;  %vm16464_vm14 = vmmov %vm16363_vm0 }
 0x580   : > { %v7286_v42 = vcombine.high %v6109_v45, %v6113_v37  ;;  %v7285_v8 = vcombine.low %v6109_v45, %v6113_v37 }
 0x581   : > { %v13412_v58 = vpop.permute.xlu1 %5683 }
 0x582   : > { %16450 = vst [vmem:[#allocation14_spill] sm:$0xff] %v13412_v58  ;;  %v5768_v12 = vpop.permute.xlu0 %5767  ;;  %v7293_v59 = vrot.slane %v7285_v8, %v16367_v48  ;;  %v7300_v39 = vrot.slane %v7286_v42, %v16367_v48 }
 0x583   : > { %v6115_v13 = vsel %vm16454_vm13, %v16453_v6, %v5768_v12  ;;  %6002 = vbcast.lane.b32.xlu1 %v13302_v36, 264  ;;  %v13425_v36 = vrot.slane %v7317_v0, %v16376_v46  ;;  %vm16459_vm13 = vmmov %vm16363_vm0  ;;  %v16465_v0 = vld [vmem:[#allocation16_spill] sm:$0xff] }
 0x584   : > { %v7301_v41 = vcombine.low %v6111_v10, %v6115_v13  ;;  %v7302_v28 = vcombine.high %v6111_v10, %v6115_v13  ;;  %v13428_v10 = vrot.slane %v7318_v20, %v16376_v46  ;;  %v13431_v13 = vrot.slane %v7333_v63, %v16376_v46 }
 0x585   : > { %v5695_v51 = vpop.permute.xlu1 %5694  ;;  %16455 = vst [vmem:[#allocation13_spill] sm:$0xff] %v13425_v36  ;;  %v13446_v20 = vrot.slane %v7334_v38, %v16376_v46 }
 0x586   : > { %v7309_v47 = vrot.slane %v7301_v41, %v16367_v48  ;;  %v7316_v37 = vrot.slane %v7302_v28, %v16367_v48  ;;  %v5779_v45 = vpop.permute.xlu0 %5778 }
 0x587   : > { %6013 = vbcast.lane.b32.xlu1 %v13314_v31, 264 }
 0x588   : > { %v7349_v30 = vcombine.low %v7293_v59, %v7309_v47  ;;  %v7350_v2 = vcombine.high %v7293_v59, %v7309_v47  ;;  %v7365_v12 = vcombine.low %v7300_v39, %v7316_v37  ;;  %v7366_v6 = vcombine.high %v7300_v39, %v7316_v37  ;;  %v16463_v59 = vld [vmem:[#allocation57_spill] sm:$0xff] }
 0x589   : > { %v5706_v60 = vpop.permute.xlu1 %5705  ;;  %v6117_v38 = vsel %vm16464_vm14, %v16463_v59, %v5779_v45  ;;  %vm16473_vm14 = vmmov %vm16363_vm0 }
 0x58a   : > { %v13434_v41 = vrot.slane %v7349_v30, %v16376_v46  ;;  %v13437_v49 = vrot.slane %v7350_v2, %v16376_v46  ;;  %v13440_v31 = vrot.slane %v7365_v12, %v16376_v46  ;;  %v13443_v42 = vrot.slane %v7366_v6, %v16376_v46  ;;  %v5790_v8 = vpop.permute.xlu0 %5789  ;;  %v16458_v30 = vld [vmem:[#allocation63_spill] sm:$0xff] }
 0x58b   : > { %6024 = vbcast.lane.b32.xlu1 %v13325_v55, 264  ;;  %v13467_v2 = vsel %vm16459_vm13, %v16458_v30, %v5695_v51  ;;  %v16461_v12 = vld [vmem:[#allocation151_spill] sm:$0xff]  ;;  %vm16468_vm13 = vmmov %vm16363_vm0 }
 0x58c   : > { %16456 = vst [vmem:[#allocation125_spill] sm:$0xff] %v13434_v41  ;;  %16457 = vst [vmem:[#allocation132_spill] sm:$0xff] %v13443_v42  ;;  %v7382_v63 = vcombine.high %v13425_v36, %v13434_v41  ;;  %v16470_v41 = vld [vmem:[#allocation21_spill] sm:$0xff]  ;;  %v16472_v36 = vld [vmem:[#allocation152_spill] sm:$0xff] }
 0x58d   : > { %v5717_v39 = vpop.permute.xlu1 %5716  ;;  %16460 = vst [vmem:[#allocation137_spill] sm:$0xff] %v13467_v2 }
 0x58e   : > { %v13471_v6 = vsel %vm16363_vm0, %v16461_v12, %v5717_v39  ;;  %8357 = vrot.lane.b32.xlu0 %v7382_v63, %s9295_s16  ;;  %v5801_v47 = vpop.permute.xlu0 %5800  ;;  %v6430_v39 = vcombine.high %v13071_v23, %v13079_v18  ;;  %v16467_v12 = vld [vmem:[#allocation15_spill] sm:$0xff] }
 0x58f   : > { %16462 = vst [vmem:[#allocation42_spill] sm:$0xff] %v13471_v6  ;;  %v7526_v55 = vcombine.high %v13467_v2, %v13471_v6  ;;  %v6121_v37 = vsel %vm16466_vm15, %v16465_v0, %v5801_v47  ;;  %6035 = vbcast.lane.b32.xlu1 %v13358_v61, 264  ;;  %v13485_v63 = vsel %vm16468_vm13, %v16467_v12, %v5706_v60  ;;  %v16474_v47 = vld [vmem:[#allocation134_spill] sm:$0xff]  ;;  %vm16475_vm15 = vmmov %vm16363_vm0  ;;  %v16491_v2 = vld [vmem:[#allocation73_spill] sm:$0xff] }
 0x590   : > { %v7390_v51 = vcombine.high %v6117_v38, %v6121_v37  ;;  %16469 = vst [vmem:[#allocation104_spill] sm:$0xff] %v13485_v63  ;;  %v7389_v28 = vcombine.low %v6117_v38, %v6121_v37  ;;  %v6119_v0 = vsel %vm16473_vm14, %v16472_v36, %v5790_v8  ;;  %v6974_v36 = vcombine.high %v13329_v11, %v13337_v57  ;;  %vm16477_vm13 = vmmov %vm16363_vm0  ;;  %v16492_v6 = vld [vmem:[#allocation66_spill] sm:$0xff] }
 0x591   : > { %v5728_v30 = vpop.permute.xlu1 %5727  ;;  %v13499_v38 = vrot.slane %v7526_v55, %v16367_v48  ;;  %vm16482_vm14 = vmmov %vm16363_vm0 }
 0x592   : > { %v13489_v45 = vsel %vm16363_vm0, %v16470_v41, %v5728_v30  ;;  %v5812_v59 = vpop.permute.xlu0 %5811  ;;  %v7397_v8 = vrot.slane %v7389_v28, %v16367_v48  ;;  %v7404_v30 = vrot.slane %v7390_v51, %v16367_v48  ;;  %v16476_v51 = vld [vmem:[#allocation135_spill] sm:$0xff] }
 0x593   : > { %16471 = vst [vmem:[#allocation71_spill] sm:$0xff] %v13489_v45  ;;  %v7542_v61 = vcombine.high %v13485_v63, %v13489_v45  ;;  %v6123_v14 = vsel %vm16475_vm15, %v16474_v47, %v5812_v59  ;;  %8351 = vrot.lane.b32.xlu1 %v6430_v39, %s9295_s16  ;;  %vm16484_vm15 = vmmov %vm16363_vm0 }
 0x594   : > { %v7405_v18 = vcombine.low %v6119_v0, %v6123_v14  ;;  %v7406_v60 = vcombine.high %v6119_v0, %v6123_v14 }
 0x595   : > { %v13502_v41 = vrot.slane %v7542_v61, %v16367_v48  ;;  %v5739_v37 = vpop.permute.xlu1 %5738 }
 0x596   : > { %v7413_v12 = vrot.slane %v7405_v18, %v16367_v48  ;;  %v7420_v39 = vrot.slane %v7406_v60, %v16367_v48  ;;  %v5823_v59 = vpop.permute.xlu0 %5822  ;;  %v13517_v18 = vsel %vm16477_vm13, %v16476_v51, %v5739_v37  ;;  %v16479_v60 = vld [vmem:[#allocation70_spill] sm:$0xff]  ;;  %vm16489_vm13 = vmmov %vm16363_vm0 }
 0x597   : > { %v7605_v14 = vcombine.low %v13499_v38, %v13502_v41  ;;  %v7606_v55 = vcombine.high %v13499_v38, %v13502_v41  ;;  %8355 = vrot.lane.b32.xlu1 %v6974_v36, %s9295_s16  ;;  %16478 = vst [vmem:[#allocation148_spill] sm:$0xff] %v13517_v18  ;;  %v6125_v38 = vsel %vm16482_vm14, %v16481_v15, %v5823_v59  ;;  %v16483_v36 = vld [vmem:[#allocation103_spill] sm:$0xff]  ;;  %vm16493_vm14 = vmmov %vm16363_vm0 }
 0x598   : > { %v7454_v0 = vcombine.high %v7397_v8, %v7413_v12  ;;  %v7469_v61 = vcombine.low %v7404_v30, %v7420_v39  ;;  %v7470_v47 = vcombine.high %v7404_v30, %v7420_v39 }
 0x599   : > { %v5750_v57 = vpop.permute.xlu1 %5749 }
 0x59a   : > { %v5834_v28 = vpop.permute.xlu0 %5833  ;;  %v13531_v37 = vsel %vm16486_vm12, %v16485_v27, %v5750_v57  ;;  %vm16505_vm12 = vmmov %vm16363_vm0 }
 0x59b   : > { %16487 = vst [vmem:[#allocation43_spill] sm:$0xff] %v13531_v37  ;;  %v6127_v15 = vsel %vm16363_vm0, %v16491_v2, %v5834_v28 }
 0x59d   : > { %v5761_v11 = vpop.permute.xlu1 %5760 }
 0x59e   : > { %v13521_v23 = vsel %vm16363_vm0, %v16479_v60, %v5761_v11  ;;  %v5845_v44 = vpop.permute.xlu0 %5844 }
 0x59f   : > { %16480 = vst [vmem:[#allocation138_spill] sm:$0xff] %v13521_v23  ;;  %v7558_v41 = vcombine.high %v13517_v18, %v13521_v23  ;;  %v6129_v30 = vsel %vm16484_vm15, %v16483_v36, %v5845_v44  ;;  %v7453_v23 = vcombine.low %v7397_v8, %v7413_v12  ;;  %vm16508_vm15 = vmmov %vm16363_vm0 }
 0x5a0   : > { %v7422_v39 = vcombine.high %v6125_v38, %v6129_v30  ;;  %v7421_v51 = vcombine.low %v6125_v38, %v6129_v30 }
 0x5a1   : > { %v5772_v58 = vpop.permute.xlu1 %5771  ;;  %v7572_v57 = vrot.slane %v7558_v41, %v16367_v48  ;;  %v13550_v12 = vrot.slane %v7453_v23, %v16376_v46  ;;  %v13553_v41 = vrot.slane %v7454_v0, %v16376_v46  ;;  %v13571_v0 = vrot.slane %v7605_v14, %v16376_v46  ;;  %v16507_v14 = vld [vmem:[#allocation69_spill] sm:$0xff] }
 0x5a2   : > { %v13535_v11 = vsel %vm16489_vm13, %v16488_v54, %v5772_v58  ;;  %v5856_v60 = vpop.permute.xlu0 %5855  ;;  %v7429_v54 = vrot.slane %v7421_v51, %v16367_v48  ;;  %v7436_v58 = vrot.slane %v7422_v39, %v16367_v48  ;;  %v13556_v51 = vrot.slane %v7469_v61, %v16376_v46  ;;  %vm16511_vm13 = vmmov %vm16363_vm0 }
 0x5a3   : > { %16490 = vst [vmem:[#allocation60_spill] sm:$0xff] %v13535_v11  ;;  %v7574_v59 = vcombine.high %v13531_v37, %v13535_v11  ;;  %v6131_v44 = vsel %vm16493_vm14, %v16492_v6, %v5856_v60  ;;  %16494 = vst [vmem:[#allocation150_spill] sm:$0xff] %v13550_v12  ;;  %v13574_v61 = vrot.slane %v7470_v47, %v16376_v46 }
 0x5a4   : > { %v7437_v36 = vcombine.low %v6127_v15, %v6131_v44  ;;  %v7438_v18 = vcombine.high %v6127_v15, %v6131_v44  ;;  %16495 = vst [vmem:[#allocation75_spill] sm:$0xff] %v13556_v51  ;;  %16499 = vst [vmem:[#allocation63_spill] sm:$0xff] %v13571_v0 }
 0x5a5   : > { %v7588_v27 = vrot.slane %v7574_v59, %v16367_v48  ;;  %v5783_v38 = vpop.permute.xlu1 %5782  ;;  %16500 = vst [vmem:[#allocation151_spill] sm:$0xff] %v13574_v61  ;;  %vm16516_vm14 = vmmov %vm16363_vm0  ;;  %v16532_v61 = vld [vmem:[#allocation142_spill] sm:$0xff] }
 0x5a6   : > { %v7445_v2 = vrot.slane %v7437_v36, %v16367_v48  ;;  %v7452_v28 = vrot.slane %v7438_v18, %v16367_v48  ;;  %v5867_v30 = vpop.permute.xlu0 %5866 }
 0x5a7   : > { %v7637_v63 = vcombine.low %v7572_v57, %v7588_v27  ;;  %v7638_v45 = vcombine.high %v7572_v57, %v7588_v27 }
 0x5a8   : > { %v7485_v6 = vcombine.low %v7429_v54, %v7445_v2  ;;  %v7486_v60 = vcombine.high %v7429_v54, %v7445_v2  ;;  %v7501_v15 = vcombine.low %v7436_v58, %v7452_v28  ;;  %v7502_v8 = vcombine.high %v7436_v58, %v7452_v28 }
 0x5a9   : > { %v5794_v39 = vpop.permute.xlu1 %5793  ;;  %v13577_v57 = vrot.slane %v7637_v63, %v16376_v46  ;;  %v13580_v27 = vrot.slane %v7638_v45, %v16376_v46  ;;  %v16513_v45 = vld [vmem:[#allocation140_spill] sm:$0xff] }
 0x5aa   : > { %v13559_v59 = vrot.slane %v7485_v6, %v16376_v46  ;;  %v13562_v18 = vrot.slane %v7486_v60, %v16376_v46  ;;  %v13565_v44 = vrot.slane %v7501_v15, %v16376_v46  ;;  %v13568_v36 = vrot.slane %v7502_v8, %v16376_v46  ;;  %v5878_v23 = vpop.permute.xlu0 %5877  ;;  %v16504_v15 = vld [vmem:[#allocation124_spill] sm:$0xff] }
 0x5ab   : > { %16501 = vst [vmem:[#allocation57_spill] sm:$0xff] %v13577_v57  ;;  %16502 = vst [vmem:[#allocation16_spill] sm:$0xff] %v13580_v27  ;;  %v13599_v60 = vrot.slane %v7606_v55, %v16376_v46  ;;  %v13603_v8 = vsel %vm16505_vm12, %v16504_v15, %v5783_v38 }
 0x5ac   : > { %16496 = vst [vmem:[#allocation146_spill] sm:$0xff] %v13559_v59  ;;  %16497 = vst [vmem:[#allocation100_spill] sm:$0xff] %v13565_v44  ;;  %v7518_v54 = vcombine.high %v13550_v12, %v13559_v59 }
 0x5ad   : > { %16498 = vst [vmem:[#allocation9_spill] sm:$0xff] %v13568_v36  ;;  %v5805_v47 = vpop.permute.xlu1 %5804  ;;  %16503 = vst [vmem:[#allocation15_spill] sm:$0xff] %v13599_v60 }
 0x5ae   : > { %16506 = vst [vmem:[#allocation21_spill] sm:$0xff] %v13603_v8  ;;  %v13607_v2 = vsel %vm16508_vm15, %v16507_v14, %v5805_v47  ;;  %8359 = vrot.lane.b32.xlu1 %v7518_v54, %s9295_s16  ;;  %v5889_v63 = vpop.permute.xlu0 %5888  ;;  %v16510_v47 = vld [vmem:[#allocation36_spill] sm:$0xff]  ;;  %vm16518_vm12 = vmmov %vm16363_vm0 }
 0x5af   : > { %16509 = vst [vmem:[#allocation152_spill] sm:$0xff] %v13607_v2  ;;  %v7662_v28 = vcombine.high %v13603_v8, %v13607_v2  ;;  %v13622_v54 = vsel %vm16511_vm13, %v16510_v47, %v5794_v39  ;;  %v16515_v39 = vld [vmem:[#allocation94_spill] sm:$0xff]  ;;  %vm16520_vm15 = vmmov %vm16363_vm0 }
 0x5b0   : > { %16512 = vst [vmem:[#allocation134_spill] sm:$0xff] %v13622_v54  ;;  %v16519_v8 = vld [vmem:[#allocation62_spill] sm:$0xff]  ;;  %vm16522_vm13 = vmmov %vm16363_vm0 }
 0x5b1   : > { %v5816_v15 = vpop.permute.xlu1 %5815  ;;  %v7676_v55 = vrot.slane %v7662_v28, %v16367_v48  ;;  %v13642_v2 = vsel %vm16520_vm15, %v16519_v8, %v5889_v63  ;;  %v16528_v8 = vld [vmem:[#allocation139_spill] sm:$0xff]  ;;  %vm16531_vm15 = vmmov %vm16363_vm0 }
 0x5b2   : > { %v13626_v58 = vsel %vm16363_vm0, %v16513_v45, %v5816_v15  ;;  %v5900_v59 = vpop.permute.xlu0 %5899  ;;  %v16517_v45 = vld [vmem:[#allocation147_spill] sm:$0xff] }
 0x5b3   : > { %16514 = vst [vmem:[#allocation135_spill] sm:$0xff] %v13626_v58  ;;  %v7678_v6 = vcombine.high %v13622_v54, %v13626_v58  ;;  %v13634_v47 = vsel %vm16516_vm14, %v16515_v39, %v5900_v59  ;;  %v13638_v15 = vsel %vm16518_vm12, %v16517_v45, %v5878_v23  ;;  %v16521_v54 = vld [vmem:[#allocation59_spill] sm:$0xff]  ;;  %v16526_v58 = vld [vmem:[#allocation97_spill] sm:$0xff]  ;;  %vm16527_vm14 = vmmov %vm16363_vm0 }
 0x5b4   : > { %v13656_v23 = vsel %vm16527_vm14, %v16526_v58, %v5867_v30  ;;  %vm16529_vm12 = vmmov %vm16363_vm0 }
 0x5b5   : > { %v7692_v38 = vrot.slane %v7678_v6, %v16367_v48  ;;  %v5827_v12 = vpop.permute.xlu1 %5826  ;;  %v7813_v6 = vcombine.low %v13638_v15, %v13634_v47  ;;  %vm16538_vm14 = vmmov %vm16363_vm0 }
 0x5b6   : > { %v5911_v57 = vpop.permute.xlu0 %5910 }
 0x5b7   : > { %v7741_v0 = vcombine.low %v7676_v55, %v7692_v38  ;;  %v7742_v14 = vcombine.high %v7676_v55, %v7692_v38  ;;  %v13648_v55 = vsel %vm16522_vm13, %v16521_v54, %v5827_v12  ;;  %v16524_v38 = vld [vmem:[#allocation51_spill] sm:$0xff]  ;;  %v7797_v12 = vcombine.low %v13656_v23, %v13642_v2  ;;  %v16530_v54 = vld [vmem:[#allocation145_spill] sm:$0xff]  ;;  %vm16533_vm13 = vmmov %vm16363_vm0 }
 0x5b8   : > { %16523 = vst [vmem:[#allocation70_spill] sm:$0xff] %v13648_v55  ;;  %v13668_v36 = vsel %vm16531_vm15, %v16530_v54, %v5911_v57  ;;  %vm16548_vm15 = vmmov %vm16363_vm0 }
 0x5b9   : > { %v5838_v27 = vpop.permute.xlu1 %5837 }
 0x5ba   : > { %v5922_v60 = vpop.permute.xlu0 %5921  ;;  %v13673_v30 = vsel %vm16533_vm13, %v16532_v61, %v5838_v27  ;;  %v7805_v61 = vrot.slane %v7797_v12, %v16367_v48  ;;  %vm16551_vm13 = vmmov %vm16363_vm0 }
 0x5bb   : > { %16534 = vst [vmem:[#allocation103_spill] sm:$0xff] %v13673_v30 }
 0x5bd   : > { %v5849_v28 = vpop.permute.xlu1 %5848 }
 0x5be   : > { %v13652_v59 = vsel %vm16363_vm0, %v16524_v38, %v5849_v28  ;;  %v5933_v39 = vpop.permute.xlu0 %5932  ;;  %v7821_v38 = vrot.slane %v7813_v6, %v16367_v48  ;;  %v16539_v6 = vld [vmem:[#allocation49_spill] sm:$0xff] }
 0x5bf   : > { %16525 = vst [vmem:[#allocation41_spill] sm:$0xff] %v13652_v59  ;;  %v7694_v63 = vcombine.high %v13648_v55, %v13652_v59  ;;  %v13662_v45 = vsel %vm16529_vm12, %v16528_v8, %v5933_v39  ;;  %v16535_v55 = vld [vmem:[#allocation20_spill] sm:$0xff]  ;;  %v16537_v59 = vld [vmem:[#allocation19_spill] sm:$0xff]  ;;  %vm16540_vm12 = vmmov %vm16363_vm0 }
 0x5c0   : > { %v7829_v58 = vcombine.low %v13668_v36, %v13662_v45  ;;  %v13683_v37 = vsel %vm16538_vm14, %v16537_v59, %v5922_v60  ;;  %v7861_v7 = vcombine.low %v7805_v61, %v7821_v38  ;;  %vm16556_vm14 = vmmov %vm16363_vm0 }
 0x5c1   : > { %v5860_v28 = vpop.permute.xlu1 %5859 }
 0x5c2   : > { %v13679_v39 = vsel %vm16363_vm0, %v16535_v55, %v5860_v28  ;;  %v5944_v8 = vpop.permute.xlu0 %5943  ;;  %v7708_v55 = vrot.slane %v7694_v63, %v16367_v48  ;;  %v7837_v60 = vrot.slane %v7829_v58, %v16367_v48  ;;  %v13699_v12 = vrot.slane %v7861_v7, %v16376_v46 }
 0x5c3   : > { %16536 = vst [vmem:[#allocation44_spill] sm:$0xff] %v13679_v39  ;;  %v7710_v57 = vcombine.high %v13673_v30, %v13679_v39  ;;  %v13689_v54 = vsel %vm16540_vm12, %v16539_v6, %v5944_v8  ;;  %v16558_v7 = vcombine.low %v12939_v29, %v12950_v26  ;;  %vm16562_vm12 = vmmov %vm16363_vm0 }
 0x5c4   : > { %v7845_v27 = vcombine.low %v13683_v37, %v13689_v54  ;;  %16541 = vst [vmem:[#allocation92_spill] sm:$0xff] %v13699_v12 }
 0x5c5   : > { %v7724_v28 = vrot.slane %v7710_v57, %v16367_v48  ;;  %v5871_v11 = vpop.permute.xlu1 %5870 }
 0x5c6   : > { %v7853_v59 = vrot.slane %v7845_v27, %v16367_v48  ;;  %v5955_v30 = vpop.permute.xlu0 %5954  ;;  %v13713_v27 = vrot.slane %v7741_v0, %v16376_v46 }
 0x5c7   : > { %v7773_v39 = vcombine.low %v7708_v55, %v7724_v28  ;;  %v7774_v21 = vcombine.high %v7708_v55, %v7724_v28  ;;  %v13718_v28 = vrot.slane %v7742_v14, %v16376_v46 }
 0x5c8   : > { %v7893_v8 = vcombine.low %v7837_v60, %v7853_v59  ;;  %16545 = vst [vmem:[#allocation69_spill] sm:$0xff] %v13713_v27 }
 0x5c9   : > { %v5882_v6 = vpop.permute.xlu1 %5881  ;;  %v13705_v57 = vrot.slane %v7773_v39, %v16376_v46  ;;  %v13708_v33 = vrot.slane %v7774_v21, %v16376_v46  ;;  %16546 = vst [vmem:[#allocation36_spill] sm:$0xff] %v13718_v28 }
 0x5ca   : > { %v13702_v25 = vrot.slane %v7893_v8, %v16376_v46  ;;  %v5966_v63 = vpop.permute.xlu0 %5965  ;;  %v16547_v8 = vld [vmem:[#allocation17_spill] sm:$0xff] }
 0x5cb   : > { %16543 = vst [vmem:[#allocation66_spill] sm:$0xff] %v13705_v57  ;;  %16544 = vst [vmem:[#allocation124_spill] sm:$0xff] %v13708_v33  ;;  %v13722_v39 = vsel %vm16548_vm15, %v16547_v8, %v5871_v11  ;;  %v7894_v57 = vcombine.high %v7837_v60, %v7853_v59  ;;  %v7862_v33 = vcombine.high %v7805_v61, %v7821_v38  ;;  %v16561_v61 = vld [vmem:[#allocation127_spill] sm:$0xff] }
 0x5cc   : > { %16542 = vst [vmem:[#allocation73_spill] sm:$0xff] %v13702_v25  ;;  %v7926_v58 = vcombine.high %v13699_v12, %v13702_v25  ;;  %16549 = vst [vmem:[#allocation140_spill] sm:$0xff] %v13722_v39  ;;  %v16555_v25 = vld [vmem:[#allocation84_spill] sm:$0xff] }
 0x5cd   : > { %v5893_v55 = vpop.permute.xlu1 %5892  ;;  %v7908_v27 = vrot.slane %v7894_v57, %v16376_v46  ;;  %v7876_v59 = vrot.slane %v7862_v33, %v16376_v46  ;;  %vm16564_vm15 = vmmov %vm16363_vm0 }
 0x5ce   : > { %v13726_v21 = vsel %vm16551_vm13, %v16550_v3, %v5893_v55  ;;  %8361 = vrot.lane.b32.xlu0 %v7926_v58, %s9295_s16  ;;  %v5977_v40 = vpop.permute.xlu0 %5976  ;;  %v16553_v55 = vld [vmem:[#allocation119_spill] sm:$0xff]  ;;  %vm16566_vm13 = vmmov %vm16363_vm0 }
 0x5cf   : > { %16552 = vst [vmem:[#allocation94_spill] sm:$0xff] %v13726_v21  ;;  %v8070_v0 = vcombine.high %v13722_v39, %v13726_v21  ;;  %v13741_v58 = vsel %vm16363_vm0, %v16553_v55, %v5882_v6  ;;  %v16563_v39 = vld [vmem:[#allocation29_spill] sm:$0xff] }
 0x5d0   : > { %16554 = vst [vmem:[#allocation147_spill] sm:$0xff] %v13741_v58  ;;  %v13775_v21 = vsel %vm16564_vm15, %v16563_v39, %v5966_v63  ;;  %v16572_v39 = vld [vmem:[#allocation18_spill] sm:$0xff]  ;;  %vm16575_vm15 = vmmov %vm16363_vm0 }
 0x5d1   : > { %v5904_v8 = vpop.permute.xlu1 %5903  ;;  %v13754_v3 = vrot.slane %v8070_v0, %v16367_v48  ;;  %v16560_v0 = vcombine.low %v13428_v10, %v13437_v49 }
 0x5d2   : > { %v13745_v12 = vsel %vm16556_vm14, %v16555_v25, %v5904_v8  ;;  %8381 = vrot.lane.b32.xlu0 %v16558_v7, %s9296_s17  ;;  %v5988_v14 = vpop.permute.xlu0 %5987  ;;  %v16559_v25 = vcombine.low %v13204_v50, %v13212_v62  ;;  %vm16570_vm14 = vmmov %vm16363_vm0 }
 0x5d3   : > { %16557 = vst [vmem:[#allocation62_spill] sm:$0xff] %v13745_v12  ;;  %v8086_v11 = vcombine.high %v13741_v58, %v13745_v12  ;;  %v16567_v58 = vld [vmem:[#allocation22_spill] sm:$0xff]  ;;  %v16569_v12 = vld [vmem:[#allocation123_spill] sm:$0xff] }
 0x5d5   : > { %v8100_v6 = vrot.slane %v8086_v11, %v16367_v48  ;;  %v5915_v55 = vpop.permute.xlu1 %5914  ;;  %v13771_v11 = vsel %vm16562_vm12, %v16561_v61, %v5988_v14  ;;  %vm16573_vm12 = vmmov %vm16363_vm0 }
 0x5d6   : > { %8385 = vrot.lane.b32.xlu0 %v16559_v25, %s9296_s17  ;;  %v5999_v8 = vpop.permute.xlu0 %5998  ;;  %v7927_v25 = vcombine.low %v7876_v59, %v7908_v27  ;;  %v13794_v61 = vsel %vm16573_vm12, %v16572_v39, %v5955_v30  ;;  %v16578_v30 = vld [vmem:[#allocation54_spill] sm:$0xff]  ;;  %vm16585_vm12 = vmmov %vm16363_vm0 }
 0x5d7   : > { %v8149_v7 = vcombine.low %v13754_v3, %v8100_v6  ;;  %v8150_v28 = vcombine.high %v13754_v3, %v8100_v6  ;;  %v16565_v3 = vld [vmem:[#allocation117_spill] sm:$0xff]  ;;  %v7949_v6 = vcombine.low %v13775_v21, %v13771_v11 }
 0x5d8   : > { %v13779_v57 = vsel %vm16566_vm13, %v16565_v3, %v5977_v40  ;;  %v16574_v3 = vld [vmem:[#allocation121_spill] sm:$0xff]  ;;  %vm16577_vm13 = vmmov %vm16363_vm0 }
 0x5d9   : > { %v5926_v60 = vpop.permute.xlu1 %5925 }
 0x5da   : > { %8389 = vrot.lane.b32.xlu0 %v16560_v0, %s9296_s17  ;;  %v6010_v38 = vpop.permute.xlu0 %6009  ;;  %v13785_v0 = vsel %vm16363_vm0, %v16567_v58, %v5915_v55  ;;  %v7933_v58 = vcombine.low %v13794_v61, %v13779_v57  ;;  %v16576_v55 = vld [vmem:[#allocation108_spill] sm:$0xff]  ;;  %v13813_v39 = vsel %vm16363_vm0, %v16578_v30, %v5926_v60 }
 0x5db   : > { %16568 = vst [vmem:[#allocation59_spill] sm:$0xff] %v13785_v0  ;;  %16579 = vst [vmem:[#allocation97_spill] sm:$0xff] %v13813_v39  ;;  %v16586_v30 = vld [vmem:[#allocation120_spill] sm:$0xff] }
 0x5dd   : > { %v5937_v33 = vpop.permute.xlu1 %5936 }
 0x5de   : > { %v13789_v14 = vsel %vm16570_vm14, %v16569_v12, %v5937_v33  ;;  %8393 = vrot.lane.b32.xlu0 %v7927_v25, %s9296_s17  ;;  %v6021_v63 = vpop.permute.xlu0 %6020  ;;  %v13806_v12 = vsel %vm16577_vm13, %v16576_v55, %v5999_v8  ;;  %v13809_v33 = vrot.slane %v7949_v6, %v16367_v48  ;;  %vm16581_vm14 = vmmov %vm16363_vm0  ;;  %v16583_v8 = vcombine.high %v12939_v29, %v12950_v26 }
 0x5df   : > { %16571 = vst [vmem:[#allocation51_spill] sm:$0xff] %v13789_v14  ;;  %v8102_v40 = vcombine.high %v13785_v0, %v13789_v14  ;;  %v13800_v44 = vsel %vm16575_vm15, %v16574_v3, %v6021_v63  ;;  %v16580_v63 = vld [vmem:[#allocation35_spill] sm:$0xff]  ;;  %vm16587_vm15 = vmmov %vm16363_vm0 }
 0x5e0   : > { %v7965_v0 = vcombine.low %v13806_v12, %v13800_v44  ;;  %v16584_v14 = vld [vmem:[#allocation55_spill] sm:$0xff]  ;;  %vm16597_vm13 = vmmov %vm16363_vm0 }
 0x5e1   : > { %v5948_v25 = vpop.permute.xlu1 %5947  ;;  %v13827_v6 = vsel %vm16585_vm12, %v16584_v14, %v6010_v38  ;;  %v8116_v29 = vrot.slane %v8102_v40, %v16367_v48  ;;  %vm16602_vm12 = vmmov %vm16363_vm0 }
 0x5e2   : > { %v13819_v3 = vsel %vm16581_vm14, %v16580_v63, %v5948_v25  ;;  %8413 = vrot.lane.b32.xlu0 %v16583_v8, %s9297_s19  ;;  %v6032_v55 = vpop.permute.xlu0 %6031  ;;  %v13836_v25 = vrot.slane %v7933_v58, %v16367_v48  ;;  %v7973_v14 = vrot.slane %v7965_v0, %v16367_v48  ;;  %v16588_v58 = vcombine.high %v13204_v50, %v13212_v62  ;;  %vm16600_vm14 = vmmov %vm16363_vm0 }
 0x5e3   : > { %16582 = vst [vmem:[#allocation139_spill] sm:$0xff] %v13819_v3  ;;  %v8118_v60 = vcombine.high %v13813_v39, %v13819_v3  ;;  %v13833_v51 = vsel %vm16587_vm15, %v16586_v30, %v6032_v55  ;;  %v16591_v0 = vcombine.high %v13428_v10, %v13437_v49  ;;  %v7846_v50 = vcombine.high %v13683_v37, %v13689_v54  ;;  %v16596_v54 = vld [vmem:[#allocation87_spill] sm:$0xff]  ;;  %vm16610_vm15 = vmmov %vm16363_vm0 }
 0x5e4   : > { %v7981_v63 = vcombine.low %v13827_v6, %v13833_v51  ;;  %v7997_v38 = vcombine.low %v13836_v25, %v13809_v33  ;;  %v7830_v10 = vcombine.high %v13668_v36, %v13662_v45  ;;  %v13875_v49 = vrot.slane %v8149_v7, %v16376_v46 }
 0x5e5   : > { %v8132_v26 = vrot.slane %v8118_v60, %v16367_v48  ;;  %v5959_v8 = vpop.permute.xlu1 %5958 }
 0x5e6   : > { %v7989_v39 = vrot.slane %v7981_v63, %v16367_v48  ;;  %8417 = vrot.lane.b32.xlu0 %v16588_v58, %s9297_s19  ;;  %v13851_v40 = vrot.slane %v7997_v38, %v16376_v46  ;;  %16594 = vst [vmem:[#allocation49_spill] sm:$0xff] %v13875_v49  ;;  %v13878_v38 = vrot.slane %v8150_v28, %v16376_v46 }
 0x5e7   : > { %v8181_v55 = vcombine.low %v8116_v29, %v8132_v26  ;;  %v8182_v30 = vcombine.high %v8116_v29, %v8132_v26  ;;  %v7928_v29 = vcombine.high %v7876_v59, %v7908_v27  ;;  %v13882_v58 = vsel %vm16597_vm13, %v16596_v54, %v5959_v8  ;;  %v16598_v27 = vld [vmem:[#allocation85_spill] sm:$0xff]  ;;  %vm16612_vm13 = vmmov %vm16363_vm0 }
 0x5e8   : > { %v8029_v3 = vcombine.low %v7973_v14, %v7989_v39  ;;  %16589 = vst [vmem:[#allocation145_spill] sm:$0xff] %v13851_v40  ;;  %16595 = vst [vmem:[#allocation17_spill] sm:$0xff] %v13878_v38  ;;  %v13899_v28 = vrot.slane %v7846_v50, %v16367_v48 }
 0x5e9   : > { %v5970_v42 = vpop.permute.xlu1 %5969  ;;  %v13861_v63 = vrot.slane %v8181_v55, %v16376_v46  ;;  %v13866_v62 = vrot.slane %v8182_v30, %v16376_v46  ;;  %v13911_v30 = vrot.slane %v7830_v10, %v16367_v48 }
 0x5ea   : > { %v13854_v60 = vrot.slane %v8029_v3, %v16376_v46  ;;  %8421 = vrot.lane.b32.xlu0 %v16591_v0, %s9297_s19  ;;  %v7814_v3 = vcombine.high %v13638_v15, %v13634_v47  ;;  %v7798_v47 = vcombine.high %v13656_v23, %v13642_v2  ;;  %v16599_v0 = vld [vmem:[#allocation88_spill] sm:$0xff] }
 0x5eb   : > { %16592 = vst [vmem:[#allocation20_spill] sm:$0xff] %v13861_v63  ;;  %16593 = vst [vmem:[#allocation19_spill] sm:$0xff] %v13866_v62  ;;  %v13915_v50 = vsel %vm16600_vm14, %v16599_v0, %v5970_v42  ;;  %v7909_v54 = vcombine.low %v13911_v30, %v13899_v28  ;;  %v16614_v62 = vld [vmem:[#allocation39_spill] sm:$0xff] }
 0x5ec   : > { %16590 = vst [vmem:[#allocation142_spill] sm:$0xff] %v13854_v60  ;;  %v8062_v26 = vcombine.high %v13851_v40, %v13854_v60  ;;  %v13908_v2 = vrot.slane %v7814_v3, %v16367_v48  ;;  %v16604_v3 = vcombine.low %v13074_v22, %v13082_v35  ;;  %v13932_v42 = vrot.slane %v7798_v47, %v16367_v48  ;;  %vm16615_vm14 = vmmov %vm16363_vm0 }
 0x5ed   : > { %v5981_v37 = vpop.permute.xlu1 %5980  ;;  %v16605_v47 = vcombine.low %v13221_v32, %v13215_v9 }
 0x5ee   : > { %v13886_v59 = vsel %vm16363_vm0, %v16598_v27, %v5981_v37  ;;  %8425 = vrot.lane.b32.xlu0 %v7928_v29, %s9297_s19  ;;  %8363 = vrot.lane.b32.xlu1 %v8062_v26, %s9295_s16  ;;  %v16601_v29 = vld [vmem:[#allocation68_spill] sm:$0xff]  ;;  %v16603_v37 = vcombine.low %v12961_v43, %v12953_v5  ;;  %v8030_v27 = vcombine.high %v7973_v14, %v7989_v39 }
 0x5ef   : > { %v8206_v15 = vcombine.high %v13882_v58, %v13886_v59  ;;  %v16606_v39 = vcombine.low %v13332_v52, %v13340_v34 }
 0x5f0   : > { %v8044_v55 = vrot.slane %v8030_v27, %v16376_v46 }
 0x5f1   : > { %v5992_v23 = vpop.permute.xlu1 %5991 }
 0x5f2   : > { %v13919_v26 = vsel %vm16602_vm12, %v16601_v29, %v5992_v23  ;;  %8445 = vrot.lane.b32.xlu0 %v16603_v37, %s9298_s20  ;;  %8383 = vrot.lane.b32.xlu1 %v16604_v3, %s9296_s17  ;;  %v8220_v23 = vrot.slane %v8206_v15, %v16367_v48  ;;  %v7877_v37 = vcombine.low %v13932_v42, %v13908_v2  ;;  %vm16637_vm12 = vmmov %vm16363_vm0 }
 0x5f3   : > { %v8222_v10 = vcombine.high %v13915_v50, %v13919_v26  ;;  %v7998_v3 = vcombine.high %v13836_v25, %v13809_v33  ;;  %v16607_v25 = vcombine.low %v13431_v13, %v13440_v31 }
 0x5f4   : > { %v7885_v7 = vrot.slane %v7877_v37, %v16376_v46  ;;  %v16611_v37 = vld [vmem:[#allocation118_spill] sm:$0xff] }
 0x5f5   : > { %v8236_v0 = vrot.slane %v8222_v10, %v16367_v48  ;;  %v6003_v29 = vpop.permute.xlu1 %6002  ;;  %v7917_v10 = vrot.slane %v7909_v54, %v16376_v46  ;;  %v8012_v33 = vrot.slane %v7998_v3, %v16376_v46 }
 0x5f6   : > { %8449 = vrot.lane.b32.xlu0 %v16605_v47, %s9298_s20  ;;  %8387 = vrot.lane.b32.xlu1 %v16606_v39, %s9296_s17  ;;  %v16608_v47 = vcombine.low %v13553_v41, %v13562_v18  ;;  %v16609_v39 = vld [vmem:[#allocation126_spill] sm:$0xff] }
 0x5f7   : > { %v8285_v14 = vcombine.low %v8220_v23, %v8236_v0  ;;  %v8286_v15 = vcombine.high %v8220_v23, %v8236_v0  ;;  %v7929_v23 = vcombine.low %v7885_v7, %v7917_v10  ;;  %v8063_v0 = vcombine.low %v8012_v33, %v8044_v55 }
 0x5f8   : > { %v13964_v27 = vsel %vm16610_vm15, %v16609_v39, %v6003_v29  ;;  %vm16640_vm15 = vmmov %vm16363_vm0 }
 0x5f9   : > { %v6014_v8 = vpop.permute.xlu1 %6013 }
 0x5fa   : > { %8453 = vrot.lane.b32.xlu0 %v16607_v25, %s9298_s20  ;;  %8391 = vrot.lane.b32.xlu1 %v16608_v47, %s9296_s17  ;;  %v16613_v47 = vld [vmem:[#allocation58_spill] sm:$0xff] }
 0x5fb   : > { %v13976_v45 = vsel %vm16363_vm0, %v16613_v47, %v6014_v8  ;;  %v8064_v47 = vcombine.high %v8012_v33, %v8044_v55  ;;  %v16628_v33 = vcombine.low %v13224_v4, %v13218_v56 }
 0x5fd   : > { %v6025_v54 = vpop.permute.xlu1 %6024 }
 0x5fe   : > { %v13968_v3 = vsel %vm16612_vm13, %v16611_v37, %v6025_v54  ;;  %8457 = vrot.lane.b32.xlu0 %v7929_v23, %s9298_s20  ;;  %8395 = vrot.lane.b32.xlu1 %v8063_v0, %s9296_s17  ;;  %v16616_v54 = vcombine.high %v12961_v43, %v12953_v5  ;;  %v16617_v23 = vcombine.high %v13074_v22, %v13082_v35  ;;  %vm16643_vm13 = vmmov %vm16363_vm0 }
 0x5ff   : > { %v8238_v25 = vcombine.high %v13964_v27, %v13968_v3  ;;  %v16619_v5 = vcombine.high %v13332_v52, %v13340_v34  ;;  %v14009_v37 = vrot.slane %v8285_v14, %v16376_v46  ;;  %v7982_v52 = vcombine.high %v13827_v6, %v13833_v51  ;;  %v16684_v14 = vld [vmem:[#allocation50_spill] sm:$0xff] }
 0x600   : > { %v7930_v34 = vcombine.high %v7885_v7, %v7917_v10  ;;  %v7966_v51 = vcombine.high %v13806_v12, %v13800_v44  ;;  %v16626_v44 = vcombine.low %v12964_v17, %v12956_v24  ;;  %v7878_v12 = vcombine.high %v13932_v42, %v13908_v2 }
 0x601   : > { %v6036_v36 = vpop.permute.xlu1 %6035  ;;  %v8252_v8 = vrot.slane %v8238_v25, %v16367_v48  ;;  %16622 = vst [vmem:[#allocation84_spill] sm:$0xff] %v14009_v37  ;;  %v14012_v25 = vrot.slane %v8286_v15, %v16376_v46  ;;  %v14041_v6 = vrot.slane %v7982_v52, %v16367_v48  ;;  %v16638_v52 = vld [vmem:[#allocation112_spill] sm:$0xff] }
 0x602   : > { %v13980_v29 = vsel %vm16615_vm14, %v16614_v62, %v6036_v36  ;;  %8477 = vrot.lane.b32.xlu0 %v16616_v54, %s9299_s21  ;;  %8415 = vrot.lane.b32.xlu1 %v16617_v23, %s9297_s19  ;;  %v16618_v62 = vcombine.high %v13221_v32, %v13215_v9  ;;  %v16624_v9 = vcombine.high %v13431_v13, %v13440_v31  ;;  %v16630_v23 = vld [vmem:[#allocation132_spill] sm:$0xff]  ;;  %vm16648_vm14 = vmmov %vm16363_vm0  ;;  %v16668_v31 = vld [vmem:[#allocation101_spill] sm:$0xff] }
 0x603   : > { %v8254_v0 = vcombine.high %v13976_v45, %v13980_v29  ;;  %16623 = vst [vmem:[#allocation127_spill] sm:$0xff] %v14012_v25  ;;  %v16625_v32 = vcombine.high %v13553_v41, %v13562_v18  ;;  %v7950_v41 = vcombine.high %v13775_v21, %v13771_v11  ;;  %v7934_v18 = vcombine.high %v13794_v61, %v13779_v57  ;;  %v16695_v37 = vld [vmem:[#allocation148_spill] sm:$0xff] }
 0x604   : > { %v14047_v55 = vrot.slane %v7966_v51, %v16367_v48  ;;  %v16627_v21 = vcombine.low %v13091_v16, %v13085_v19  ;;  %v7910_v11 = vcombine.high %v13911_v30, %v13899_v28  ;;  %v16629_v28 = vcombine.low %v13349_v1, %v13343_v53  ;;  %v16642_v51 = vld [vmem:[#allocation79_spill] sm:$0xff] }
 0x605   : > { %v8268_v39 = vrot.slane %v8254_v0, %v16367_v48  ;;  %v14044_v7 = vrot.slane %v7950_v41, %v16367_v48  ;;  %v14060_v57 = vrot.slane %v7934_v18, %v16367_v48  ;;  %v14083_v2 = vrot.slane %v7878_v12, %v16376_v46  ;;  %v16641_v41 = vld [vmem:[#allocation129_spill] sm:$0xff]  ;;  %v16646_v12 = vld [vmem:[#allocation56_spill] sm:$0xff] }
 0x606   : > { %8481 = vrot.lane.b32.xlu0 %v16618_v62, %s9299_s21  ;;  %8419 = vrot.lane.b32.xlu1 %v16619_v5, %s9297_s19  ;;  %v8045_v61 = vcombine.low %v14047_v55, %v14041_v6  ;;  %v14077_v30 = vrot.slane %v7910_v11, %v16376_v46  ;;  %v16631_v0 = vcombine.low %v13446_v20, %v16630_v23  ;;  %v16635_v5 = vld [vmem:[#allocation144_spill] sm:$0xff] }
 0x607   : > { %v8317_v43 = vcombine.low %v8252_v8, %v8268_v39  ;;  %v8318_v22 = vcombine.high %v8252_v8, %v8268_v39  ;;  %v8013_v10 = vcombine.low %v14060_v57, %v14044_v7  ;;  %v16632_v8 = vld [vmem:[#allocation75_spill] sm:$0xff]  ;;  %v16633_v39 = vld [vmem:[#allocation100_spill] sm:$0xff]  ;;  %v14113_v18 = vsel %vm16643_vm13, %v16642_v51, %v16641_v41  ;;  %vm16657_vm13 = vmmov %vm16363_vm0 }
 0x608   : > { %v14080_v54 = vrot.slane %v8045_v61, %v16376_v46  ;;  %v16634_v62 = vcombine.low %v16632_v8, %v16633_v39  ;;  %v16658_v41 = vld [vmem:[#allocation98_spill] sm:$0xff]  ;;  %v16659_v51 = vld [vmem:[#allocation52_spill] sm:$0xff]  ;;  %v8014_v63 = vcombine.high %v14060_v57, %v14044_v7  ;;  %v16721_v7 = vld [vmem:[#allocation113_spill] sm:$0xff] }
 0x609   : > { %v14003_v35 = vrot.slane %v8317_v43, %v16376_v46  ;;  %v14006_v36 = vrot.slane %v8318_v22, %v16376_v46  ;;  %v14086_v42 = vrot.slane %v8013_v10, %v16376_v46  ;;  %v16636_v43 = vld [vmem:[#allocation80_spill] sm:$0xff]  ;;  %v16647_v10 = vld [vmem:[#allocation47_spill] sm:$0xff] }
 0x60a   : > { %8485 = vrot.lane.b32.xlu0 %v16624_v9, %s9299_s21  ;;  %8423 = vrot.lane.b32.xlu1 %v16625_v32, %s9297_s19  ;;  %v14099_v22 = vsel %vm16637_vm12, %v16636_v43, %v16635_v5  ;;  %v7931_v9 = vcombine.low %v14083_v2, %v14077_v30  ;;  %vm16651_vm12 = vmmov %vm16363_vm0  ;;  %v16652_v5 = vld [vmem:[#allocation115_spill] sm:$0xff]  ;;  %v16653_v43 = vld [vmem:[#allocation82_spill] sm:$0xff] }
 0x60b   : > { %16620 = vst [vmem:[#allocation31_spill] sm:$0xff] %v14003_v35  ;;  %16621 = vst [vmem:[#allocation119_spill] sm:$0xff] %v14006_v36  ;;  %v8065_v32 = vcombine.low %v14086_v42, %v14080_v54  ;;  %v6485_v61 = vcombine.low %v14113_v18, %v14099_v22  ;;  %v16690_v36 = vld [vmem:[#allocation60_spill] sm:$0xff]  ;;  %v16694_v35 = vld [vmem:[#allocation138_spill] sm:$0xff] }
 0x60c   : > { %v7557_v38 = vcombine.low %v16695_v37, %v16694_v35  ;;  %v16698_v35 = vld [vmem:[#allocation42_spill] sm:$0xff]  ;;  %v16699_v37 = vld [vmem:[#allocation137_spill] sm:$0xff] }
 0x60e   : > { %8489 = vrot.lane.b32.xlu0 %v7930_v34, %s9299_s21  ;;  %8427 = vrot.lane.b32.xlu1 %v8064_v47, %s9297_s19  ;;  %v16639_v34 = vld [vmem:[#allocation83_spill] sm:$0xff] }
 0x60f   : > { %v14108_v47 = vsel %vm16640_vm15, %v16639_v34, %v16638_v52  ;;  %vm16654_vm15 = vmmov %vm16363_vm0 }
 0x610   : > { %v14137_v52 = vsel %vm16654_vm15, %v16653_v43, %v16652_v5  ;;  %v16664_v5 = vld [vmem:[#allocation93_spill] sm:$0xff]  ;;  %v16665_v43 = vld [vmem:[#allocation74_spill] sm:$0xff]  ;;  %vm16669_vm15 = vmmov %vm16363_vm0 }
 0x612   : > { %8509 = vrot.lane.b32.xlu0 %v16626_v44, %s9300_s22  ;;  %8447 = vrot.lane.b32.xlu1 %v16627_v21, %s9298_s20  ;;  %v16644_v44 = vld [vmem:[#allocation65_spill] sm:$0xff]  ;;  %v16645_v21 = vld [vmem:[#allocation78_spill] sm:$0xff] }
 0x613   : > { %v14118_v11 = vsel %vm16363_vm0, %v16645_v21, %v16644_v44  ;;  %v14147_v44 = vsel %vm16363_vm0, %v16659_v51, %v16658_v41  ;;  %v16671_v51 = vcombine.high %v12964_v17, %v12956_v24  ;;  %v16677_v24 = vld [vmem:[#allocation89_spill] sm:$0xff]  ;;  %v16678_v17 = vld [vmem:[#allocation102_spill] sm:$0xff] }
 0x616   : > { %8513 = vrot.lane.b32.xlu0 %v16628_v33, %s9300_s22  ;;  %8451 = vrot.lane.b32.xlu1 %v16629_v28, %s9298_s20  ;;  %v14127_v33 = vsel %vm16648_vm14, %v16647_v10, %v16646_v12  ;;  %v16649_v28 = vld [vmem:[#allocation116_spill] sm:$0xff]  ;;  %v6469_v12 = vcombine.low %v14137_v52, %v14118_v11  ;;  %v16660_v10 = vld [vmem:[#allocation67_spill] sm:$0xff]  ;;  %vm16662_vm14 = vmmov %vm16363_vm0 }
 0x617   : > { %v6453_v21 = vcombine.low %v14127_v33, %v14108_v47 }
 0x618   : > { %v14202_v15 = vrot.slane %v6469_v12, %v16367_v48 }
 0x61a   : > { %8517 = vrot.lane.b32.xlu0 %v16631_v0, %s9300_s22  ;;  %8455 = vrot.lane.b32.xlu1 %v16634_v62, %s9298_s20  ;;  %v16650_v0 = vld [vmem:[#allocation46_spill] sm:$0xff] }
 0x61b   : > { %v14132_v62 = vsel %vm16651_vm12, %v16650_v0, %v16649_v28  ;;  %v16661_v28 = vld [vmem:[#allocation133_spill] sm:$0xff]  ;;  %vm16666_vm12 = vmmov %vm16363_vm0 }
 0x61c   : > { %v14156_v0 = vsel %vm16662_vm14, %v16661_v28, %v16660_v10  ;;  %v16672_v10 = vcombine.high %v13091_v16, %v13085_v19  ;;  %v6437_v28 = vcombine.low %v14147_v44, %v14132_v62  ;;  %v16680_v19 = vld [vmem:[#allocation141_spill] sm:$0xff]  ;;  %v16681_v16 = vld [vmem:[#allocation40_spill] sm:$0xff]  ;;  %vm16682_vm14 = vmmov %vm16363_vm0 }
 0x61d   : > { %16663 = vst [vmem:[#allocation29_spill] sm:$0xff] %v14156_v0 }
 0x61e   : > { %8521 = vrot.lane.b32.xlu0 %v7931_v9, %s9300_s22  ;;  %8459 = vrot.lane.b32.xlu1 %v8065_v32, %s9298_s20  ;;  %v16655_v9 = vld [vmem:[#allocation27_spill] sm:$0xff]  ;;  %v16656_v32 = vld [vmem:[#allocation28_spill] sm:$0xff]  ;;  %v14222_v12 = vrot.slane %v6437_v28, %v16367_v48 }
 0x61f   : > { %v14142_v34 = vsel %vm16657_vm13, %v16656_v32, %v16655_v9  ;;  %v14161_v9 = vsel %vm16666_vm12, %v16665_v43, %v16664_v5  ;;  %v16667_v32 = vld [vmem:[#allocation30_spill] sm:$0xff]  ;;  %v14179_v5 = vrot.slane %v6485_v61, %v16367_v48  ;;  %v16673_v43 = vld [vmem:[#allocation91_spill] sm:$0xff]  ;;  %vm16675_vm13 = vmmov %vm16363_vm0  ;;  %v14199_v61 = vrot.slane %v6453_v21, %v16367_v48 }
 0x620   : > { %v14166_v41 = vsel %vm16669_vm15, %v16668_v31, %v16667_v32  ;;  %v7029_v31 = vcombine.low %v14161_v9, %v14142_v34  ;;  %v16674_v32 = vld [vmem:[#allocation106_spill] sm:$0xff]  ;;  %vm16686_vm12 = vmmov %vm16363_vm0  ;;  %v16689_v21 = vcombine.high %v13349_v1, %v13343_v53  ;;  %v16692_v28 = vld [vmem:[#allocation71_spill] sm:$0xff] }
 0x621   : > { %16670 = vst [vmem:[#allocation117_spill] sm:$0xff] %v14166_v41  ;;  %v14186_v13 = vsel %vm16675_vm13, %v16674_v32, %v16673_v43  ;;  %vm16722_vm15 = vmmov %vm16363_vm0 }
 0x622   : > { %8541 = vrot.lane.b32.xlu0 %v16671_v51, %s9301_s23  ;;  %8479 = vrot.lane.b32.xlu1 %v16672_v10, %s9299_s21  ;;  %16676 = vst [vmem:[#allocation22_spill] sm:$0xff] %v14186_v13  ;;  %v14191_v51 = vsel %vm16363_vm0, %v16678_v17, %v16677_v24  ;;  %v14196_v10 = vsel %vm16682_vm14, %v16681_v16, %v16680_v19  ;;  %v16685_v24 = vld [vmem:[#allocation109_spill] sm:$0xff]  ;;  %vm16729_vm13 = vmmov %vm16363_vm0 }
 0x623   : > { %16679 = vst [vmem:[#allocation123_spill] sm:$0xff] %v14191_v51  ;;  %16683 = vst [vmem:[#allocation18_spill] sm:$0xff] %v14196_v10  ;;  %v6997_v43 = vcombine.low %v14186_v13, %v14156_v0  ;;  %v7013_v32 = vcombine.low %v14196_v10, %v14166_v41  ;;  %v14211_v17 = vsel %vm16686_vm12, %v16685_v24, %v16684_v14  ;;  %v16734_v10 = vld [vmem:[#allocation143_spill] sm:$0xff]  ;;  %v16740_v0 = vld [vmem:[#allocation77_spill] sm:$0xff] }
 0x624   : > { %16687 = vst [vmem:[#allocation121_spill] sm:$0xff] %v14211_v17  ;;  %v16688_v19 = vcombine.high %v13224_v4, %v13218_v56  ;;  %v6533_v16 = vcombine.low %v14202_v15, %v14179_v5  ;;  %v6981_v14 = vcombine.low %v14211_v17, %v14191_v51  ;;  %v14229_v24 = vrot.slane %v7029_v31, %v16367_v48  ;;  %v16691_v56 = vld [vmem:[#allocation43_spill] sm:$0xff]  ;;  %v16720_v17 = vld [vmem:[#allocation96_spill] sm:$0xff]  ;;  %v16727_v51 = vld [vmem:[#allocation90_spill] sm:$0xff] }
 0x625   : > { %v7573_v4 = vcombine.low %v16691_v56, %v16690_v36  ;;  %v14236_v53 = vrot.slane %v6997_v43, %v16367_v48  ;;  %v14239_v1 = vrot.slane %v7013_v32, %v16367_v48  ;;  %v16696_v31 = vcombine.high %v13446_v20, %v16630_v23  ;;  %v16700_v23 = vld [vmem:[#allocation139_spill] sm:$0xff]  ;;  %vm16736_vm14 = vmmov %vm16363_vm0 }
 0x626   : > { %8545 = vrot.lane.b32.xlu0 %v16688_v19, %s9301_s23  ;;  %8483 = vrot.lane.b32.xlu1 %v16689_v21, %s9299_s21  ;;  %v6501_v19 = vcombine.low %v14222_v12, %v14199_v61  ;;  %v16693_v21 = vld [vmem:[#allocation104_spill] sm:$0xff]  ;;  %v16697_v36 = vcombine.high %v16632_v8, %v16633_v39  ;;  %v14254_v43 = vrot.slane %v6533_v16, %v16376_v46  ;;  %vm16741_vm12 = vmmov %vm16363_vm0 }
 0x627   : > { %v7541_v25 = vcombine.low %v16693_v21, %v16692_v28  ;;  %v14257_v32 = vrot.slane %v6981_v14, %v16367_v48  ;;  %v7077_v56 = vcombine.low %v14239_v1, %v14229_v24  ;;  %v7525_v28 = vcombine.low %v16699_v37, %v16698_v35  ;;  %v16701_v21 = vld [vmem:[#allocation97_spill] sm:$0xff]  ;;  %v16702_v35 = vld [vmem:[#allocation62_spill] sm:$0xff]  ;;  %v16703_v37 = vld [vmem:[#allocation147_spill] sm:$0xff] }
 0x628   : > { %v14264_v20 = vrot.slane %v7573_v4, %v16367_v48  ;;  %v7932_v8 = vcombine.high %v14083_v2, %v14077_v30  ;;  %v8066_v39 = vcombine.high %v14086_v42, %v14080_v54  ;;  %v14273_v16 = vrot.slane %v6501_v19, %v16376_v46  ;;  %v16705_v30 = vld [vmem:[#allocation59_spill] sm:$0xff]  ;;  %v16706_v19 = vld [vmem:[#allocation94_spill] sm:$0xff] }
 0x629   : > { %v7045_v14 = vcombine.low %v14257_v32, %v14236_v53  ;;  %v14281_v4 = vrot.slane %v7557_v38, %v16367_v48  ;;  %v14290_v54 = vrot.slane %v7077_v56, %v16376_v46  ;;  %v14295_v42 = vrot.slane %v7525_v28, %v16367_v48 }
 0x62a   : > { %8549 = vrot.lane.b32.xlu0 %v16696_v31, %s9301_s23  ;;  %8487 = vrot.lane.b32.xlu1 %v16697_v36, %s9299_s21  ;;  %v8117_v31 = vcombine.low %v16701_v21, %v16700_v23  ;;  %v14278_v36 = vrot.slane %v7541_v25, %v16367_v48  ;;  %v8085_v23 = vcombine.low %v16703_v37, %v16702_v35  ;;  %v16704_v21 = vld [vmem:[#allocation51_spill] sm:$0xff]  ;;  %v16707_v35 = vld [vmem:[#allocation140_spill] sm:$0xff] }
 0x62b   : > { %v8101_v2 = vcombine.low %v16705_v30, %v16704_v21  ;;  %v6565_v25 = vcombine.low %v14273_v16, %v14254_v43  ;;  %v7621_v38 = vcombine.low %v14281_v4, %v14264_v20  ;;  %v8069_v37 = vcombine.low %v16707_v35, %v16706_v19  ;;  %v14315_v30 = vpop.permute.xlu0 %8349  ;;  %v16712_v19 = vld [vmem:[#allocation130_spill] sm:$0xff] }
 0x62c   : > { %v14302_v21 = vrot.slane %v8117_v31, %v16367_v48  ;;  %v7589_v56 = vcombine.low %v14295_v42, %v14278_v36  ;;  %16711 = vst [vmem:[#allocation55_spill] sm:$0xff] %v14315_v30  ;;  %v16713_v31 = vld [vmem:[#allocation95_spill] sm:$0xff]  ;;  %v14359_v57 = vsel %vm16722_vm15, %v16721_v7, %v16720_v17  ;;  %v16731_v17 = vld [vmem:[#allocation64_spill] sm:$0xff]  ;;  %vm16745_vm15 = vmmov %vm16363_vm0 }
 0x62d   : > { %v14313_v28 = vrot.slane %v8101_v2, %v16367_v48  ;;  %v16714_v35 = vcombine.low %v16712_v19, %v16713_v31  ;;  %v14325_v60 = vrot.slane %v7621_v38, %v16376_v46  ;;  %v16716_v38 = vld [vmem:[#allocation6_spill] sm:$0xff]  ;;  %16723 = vst [vmem:[#allocation85_spill] sm:$0xff] %v14359_v57  ;;  %v16732_v7 = vld [vmem:[#allocation111_spill] sm:$0xff] }
 0x62e   : > { %8553 = vrot.lane.b32.xlu0 %v7932_v8, %s9301_s23  ;;  %8491 = vrot.lane.b32.xlu1 %v8066_v39, %s9299_s21  ;;  %16708 = vst [vmem:[#allocation108_spill] sm:$0xff] %v14302_v21  ;;  %v14305_v8 = vrot.slane %v7045_v14, %v16376_v46  ;;  %v14310_v39 = vrot.slane %v8085_v23, %v16367_v48 }
 0x62f   : > { %16710 = vst [vmem:[#allocation35_spill] sm:$0xff] %v14313_v28  ;;  %v14328_v23 = vrot.slane %v8069_v37, %v16367_v48  ;;  %v8165_v2 = vcombine.low %v14313_v28, %v14302_v21  ;;  %v14335_v40 = vrot.slane %v7589_v56, %v16376_v46  ;;  %v16717_v37 = vld [vmem:[#allocation26_spill] sm:$0xff]  ;;  %v16744_v28 = vld [vmem:[#allocation76_spill] sm:$0xff] }
 0x630   : > { %16709 = vst [vmem:[#allocation54_spill] sm:$0xff] %v14310_v39  ;;  %v7109_v14 = vcombine.low %v14305_v8, %v14290_v54  ;;  %v16718_v49 = vcombine.low %v16716_v38, %v16717_v37 }
 0x631   : > { %16715 = vst [vmem:[#allocation120_spill] sm:$0xff] %v14328_v23  ;;  %v14347_v30 = vrot.slane %v8165_v2, %v16376_v46  ;;  %v7653_v56 = vcombine.low %v14335_v40, %v14325_v60  ;;  %v16724_v2 = vld [vmem:[#allocation151_spill] sm:$0xff] }
 0x632   : > { %8573 = vrot.lane.b32.xlu0 %v6565_v25, %s9302_s24  ;;  %8511 = vrot.lane.b32.xlu1 %v16714_v35, %s9300_s22  ;;  %v8046_v25 = vcombine.high %v14047_v55, %v14041_v6  ;;  %v8133_v35 = vcombine.low %v14328_v23, %v14310_v39  ;;  %v14352_v55 = vpop.permute.xlu0 %8353  ;;  %v16728_v23 = vld [vmem:[#allocation110_spill] sm:$0xff] }
 0x633   : > { %16719 = vst [vmem:[#allocation87_spill] sm:$0xff] %v14352_v55  ;;  %v14375_v39 = vsel %vm16729_vm13, %v16728_v23, %v16727_v51  ;;  %v16739_v23 = vld [vmem:[#allocation122_spill] sm:$0xff]  ;;  %vm16748_vm13 = vmmov %vm16363_vm0 }
 0x634   : > { %v14350_v6 = vrot.slane %v8046_v25, %v16376_v46  ;;  %v16725_v25 = vld [vmem:[#allocation9_spill] sm:$0xff]  ;;  %16730 = vst [vmem:[#allocation88_spill] sm:$0xff] %v14375_v39 }
 0x635   : > { %v16726_v55 = vcombine.low %v16724_v2, %v16725_v25 }
 0x636   : > { %8577 = vrot.lane.b32.xlu0 %v7109_v14, %s9302_s24  ;;  %8515 = vrot.lane.b32.xlu1 %v16718_v49, %s9300_s22  ;;  %v14362_v14 = vrot.slane %v8133_v35, %v16376_v46  ;;  %v14365_v49 = vrot.slane %v8014_v63, %v16376_v46  ;;  %v14380_v35 = vsel %vm16363_vm0, %v16732_v7, %v16731_v17  ;;  %v16735_v63 = vld [vmem:[#allocation107_spill] sm:$0xff]  ;;  %v16743_v7 = vld [vmem:[#allocation33_spill] sm:$0xff] }
 0x637   : > { %16733 = vst [vmem:[#allocation68_spill] sm:$0xff] %v14380_v35  ;;  %v14385_v41 = vsel %vm16736_vm14, %v16735_v63, %v16734_v10  ;;  %v6621_v51 = vcombine.low %v14380_v35, %v14359_v57  ;;  %v14398_v17 = vsel %vm16741_vm12, %v16740_v0, %v16739_v23  ;;  %v14403_v10 = vsel %vm16745_vm15, %v16744_v28, %v16743_v7  ;;  %v16746_v63 = vld [vmem:[#allocation128_spill] sm:$0xff]  ;;  %v16750_v28 = vld [vmem:[#allocation99_spill] sm:$0xff]  ;;  %v16751_v7 = vld [vmem:[#allocation81_spill] sm:$0xff] }
 0x638   : > { %16737 = vst [vmem:[#allocation126_spill] sm:$0xff] %v14385_v41  ;;  %v8067_v13 = vcombine.low %v14365_v49, %v14350_v6  ;;  %16742 = vst [vmem:[#allocation58_spill] sm:$0xff] %v14398_v17  ;;  %v6534_v35 = vcombine.high %v14202_v15, %v14179_v5  ;;  %v6589_v0 = vcombine.low %v14398_v17, %v14375_v39 }
 0x639   : > { %v14421_v57 = vsel %vm16363_vm0, %v16751_v7, %v16750_v28  ;;  %vm16755_vm14 = vmmov %vm16363_vm0  ;;  %v6566_v15 = vcombine.high %v14273_v16, %v14254_v43  ;;  %v6502_v5 = vcombine.high %v14222_v12, %v14199_v61  ;;  %v16757_v28 = vld [vmem:[#allocation8_spill] sm:$0xff]  ;;  %v16758_v7 = vld [vmem:[#allocation86_spill] sm:$0xff]  ;;  %v16768_v12 = vcombine.high %v16712_v19, %v16713_v31 }
 0x63a   : > { %8581 = vrot.lane.b32.xlu0 %v7653_v56, %s9302_s24  ;;  %8519 = vrot.lane.b32.xlu1 %v16726_v55, %s9300_s22  ;;  %v14387_v56 = vpop.permute.xlu0 %8357  ;;  %v8197_v55 = vcombine.low %v14362_v14, %v14347_v30  ;;  %16752 = vst [vmem:[#allocation132_spill] sm:$0xff] %v14421_v57  ;;  %vm16759_vm12 = vmmov %vm16363_vm0  ;;  %v16764_v43 = vld [vmem:[#allocation11_spill] sm:$0xff]  ;;  %v16765_v16 = vld [vmem:[#allocation10_spill] sm:$0xff] }
 0x63b   : > { %16738 = vst [vmem:[#allocation118_spill] sm:$0xff] %v14387_v56  ;;  %v16747_v56 = vld [vmem:[#allocation114_spill] sm:$0xff]  ;;  %v14442_v17 = vsel %vm16759_vm12, %v16758_v7, %v16757_v28  ;;  %vm16762_vm15 = vmmov %vm16363_vm0  ;;  %v14463_v28 = vrot.slane %v6589_v0, %v16367_v48  ;;  %v16773_v19 = vld [vmem:[#allocation45_spill] sm:$0xff] }
 0x63c   : > { %v14408_v21 = vsel %vm16748_vm13, %v16747_v56, %v16746_v63  ;;  %v16753_v56 = vld [vmem:[#allocation14_spill] sm:$0xff]  ;;  %v16754_v63 = vld [vmem:[#allocation149_spill] sm:$0xff]  ;;  %vm16766_vm13 = vmmov %vm16363_vm0 }
 0x63d   : > { %16749 = vst [vmem:[#allocation39_spill] sm:$0xff] %v14408_v21  ;;  %v6605_v23 = vcombine.low %v14408_v21, %v14385_v41  ;;  %v6573_v21 = vcombine.low %v14421_v57, %v14403_v10  ;;  %v14437_v41 = vrot.slane %v6621_v51, %v16367_v48  ;;  %v14452_v61 = vsel %vm16766_vm13, %v16765_v16, %v16764_v43  ;;  %v16770_v43 = vld [vmem:[#allocation61_spill] sm:$0xff]  ;;  %vm16778_vm12 = vmmov %vm16363_vm0 }
 0x63e   : > { %8585 = vrot.lane.b32.xlu0 %v8197_v55, %s9302_s24  ;;  %8523 = vrot.lane.b32.xlu1 %v8067_v13, %s9300_s22  ;;  %v14426_v55 = vsel %vm16755_vm14, %v16754_v63, %v16753_v56  ;;  %v16760_v56 = vld [vmem:[#allocation12_spill] sm:$0xff]  ;;  %v16761_v63 = vld [vmem:[#allocation105_spill] sm:$0xff]  ;;  %16767 = vst [vmem:[#allocation144_spill] sm:$0xff] %v14452_v61  ;;  %v14460_v51 = vrot.slane %v6534_v35, %v16376_v46  ;;  %vm16774_vm14 = vmmov %vm16363_vm0 }
 0x63f   : > { %16756 = vst [vmem:[#allocation75_spill] sm:$0xff] %v14426_v55  ;;  %v14447_v39 = vsel %vm16762_vm15, %v16761_v63, %v16760_v56  ;;  %v14466_v7 = vrot.slane %v6605_v23, %v16367_v48  ;;  %v16769_v63 = vld [vmem:[#allocation24_spill] sm:$0xff]  ;;  %v16772_v16 = vld [vmem:[#allocation5_spill] sm:$0xff]  ;;  %v16776_v35 = vld [vmem:[#allocation7_spill] sm:$0xff] }
 0x640   : > { %v14428_v13 = vpop.permute.xlu0 %8361  ;;  %16763 = vst [vmem:[#allocation100_spill] sm:$0xff] %v14447_v39  ;;  %v7165_v56 = vcombine.low %v14447_v39, %v14426_v55  ;;  %v14478_v31 = vsel %vm16774_vm14, %v16773_v19, %v16772_v16  ;;  %v7110_v39 = vcombine.high %v14305_v8, %v14290_v54  ;;  %v14490_v55 = vrot.slane %v6502_v5, %v16376_v46  ;;  %vm16782_vm15 = vmmov %vm16363_vm0 }
 0x641   : > { %16775 = vst [vmem:[#allocation112_spill] sm:$0xff] %v14478_v31  ;;  %v14497_v16 = vrot.slane %v6573_v21, %v16367_v48  ;;  %v6669_v19 = vcombine.low %v14466_v7, %v14437_v41  ;;  %v16784_v54 = vcombine.high %v16716_v38, %v16717_v37  ;;  %v7078_v8 = vcombine.high %v14239_v1, %v14229_v24 }
 0x642   : > { %8605 = vrot.lane.b32.xlu0 %v6566_v15, %s9303_s25  ;;  %8543 = vrot.lane.b32.xlu1 %v16768_v12, %s9301_s23  ;;  %v14473_v15 = vsel %vm16363_vm0, %v16770_v43, %v16769_v63  ;;  %v16777_v12 = vld [vmem:[#allocation72_spill] sm:$0xff]  ;;  %v14516_v5 = vrot.slane %v7165_v56, %v16367_v48  ;;  %v6567_v38 = vcombine.low %v14490_v55, %v14460_v51  ;;  %v16787_v56 = vld [vmem:[#allocation135_spill] sm:$0xff] }
 0x643   : > { %16771 = vst [vmem:[#allocation80_spill] sm:$0xff] %v14473_v15  ;;  %v14483_v0 = vsel %vm16778_vm12, %v16777_v12, %v16776_v35  ;;  %v7133_v63 = vcombine.low %v14473_v15, %v14442_v17  ;;  %v16780_v35 = vld [vmem:[#allocation53_spill] sm:$0xff]  ;;  %v16781_v12 = vld [vmem:[#allocation136_spill] sm:$0xff]  ;;  %v7046_v24 = vcombine.high %v14257_v32, %v14236_v53  ;;  %v16791_v53 = vcombine.high %v16724_v2, %v16725_v25 }
 0x644   : > { %16779 = vst [vmem:[#allocation83_spill] sm:$0xff] %v14483_v0  ;;  %v14485_v23 = vpop.permute.xlu0 %8381  ;;  %v7149_v43 = vcombine.low %v14483_v0, %v14452_v61  ;;  %v14504_v57 = vsel %vm16782_vm15, %v16781_v12, %v16780_v35  ;;  %v6637_v35 = vcombine.low %v14497_v16, %v14463_v28  ;;  %v16785_v12 = vld [vmem:[#allocation44_spill] sm:$0xff]  ;;  %v16786_v0 = vld [vmem:[#allocation103_spill] sm:$0xff]  ;;  %v14547_v32 = vrot.slane %v7078_v8, %v16376_v46 }
 0x645   : > { %16783 = vst [vmem:[#allocation129_spill] sm:$0xff] %v14504_v57  ;;  %v7117_v21 = vcombine.low %v14504_v57, %v14478_v31  ;;  %v14529_v1 = vrot.slane %v7133_v63, %v16367_v48  ;;  %v14537_v31 = vrot.slane %v6669_v19, %v16376_v46  ;;  %v7654_v19 = vcombine.high %v14335_v40, %v14325_v60 }
 0x646   : > { %8609 = vrot.lane.b32.xlu0 %v7110_v39, %s9303_s25  ;;  %8547 = vrot.lane.b32.xlu1 %v16784_v54, %s9301_s23  ;;  %v7709_v39 = vcombine.low %v16786_v0, %v16785_v12  ;;  %v14532_v37 = vrot.slane %v7149_v43, %v16367_v48  ;;  %v16788_v54 = vld [vmem:[#allocation134_spill] sm:$0xff]  ;;  %v16789_v0 = vld [vmem:[#allocation41_spill] sm:$0xff]  ;;  %v8253_v2 = vcombine.low %v13976_v45, %v13980_v29 }
 0x647   : > { %v7677_v57 = vcombine.low %v16788_v54, %v16787_v56  ;;  %v16790_v12 = vld [vmem:[#allocation70_spill] sm:$0xff]  ;;  %v14550_v63 = vrot.slane %v7117_v21, %v16367_v48  ;;  %v16792_v56 = vld [vmem:[#allocation152_spill] sm:$0xff]  ;;  %v16793_v54 = vld [vmem:[#allocation21_spill] sm:$0xff]  ;;  %v8068_v8 = vcombine.high %v14365_v49, %v14350_v6  ;;  %v14568_v21 = vrot.slane %v6637_v35, %v16376_v46 }
 0x648   : > { %v14522_v61 = vpop.permute.xlu0 %8385  ;;  %v7693_v15 = vcombine.low %v16790_v12, %v16789_v0  ;;  %v7213_v43 = vcombine.low %v14532_v37, %v14516_v5  ;;  %v14559_v0 = vrot.slane %v7709_v39, %v16367_v48  ;;  %v14571_v12 = vrot.slane %v7046_v24, %v16376_v46 }
 0x649   : > { %v7181_v40 = vcombine.low %v14550_v63, %v14529_v1  ;;  %v14576_v60 = vrot.slane %v7677_v57, %v16367_v48  ;;  %v8221_v45 = vcombine.low %v13915_v50, %v13919_v26  ;;  %v8237_v29 = vcombine.low %v13964_v27, %v13968_v3 }
 0x64a   : > { %8637 = vrot.lane.b32.xlu0 %v6567_v38, %s9304_s26  ;;  %8551 = vrot.lane.b32.xlu1 %v16791_v53, %s9301_s23  ;;  %v7661_v38 = vcombine.low %v16793_v54, %v16792_v56  ;;  %v14579_v39 = vrot.slane %v7693_v15, %v16367_v48  ;;  %v14588_v6 = vrot.slane %v7213_v43, %v16376_v46 }
 0x64b   : > { %v7111_v57 = vcombine.low %v14571_v12, %v14547_v32  ;;  %v6701_v49 = vcombine.low %v14568_v21, %v14537_v31  ;;  %v8205_v26 = vcombine.low %v13882_v58, %v13886_v59  ;;  %v14602_v27 = vrot.slane %v8253_v2, %v16367_v48 }
 0x64c   : > { %v14563_v25 = vpop.permute.xlu0 %8389  ;;  %v14595_v15 = vrot.slane %v7661_v38, %v16367_v48  ;;  %v7757_v50 = vcombine.low %v14579_v39, %v14559_v0  ;;  %v14607_v35 = vrot.slane %v7181_v40, %v16376_v46  ;;  %v14612_v53 = vrot.slane %v8221_v45, %v16367_v48 }
 0x64d   : > { %v14615_v43 = vrot.slane %v8237_v29, %v16367_v48  ;;  %v6486_v58 = vcombine.high %v14113_v18, %v14099_v22  ;;  %v6568_v59 = vcombine.high %v14490_v55, %v14460_v51  ;;  %v7622_v54 = vcombine.high %v14281_v4, %v14264_v20 }
 0x64e   : > { %8613 = vrot.lane.b32.xlu0 %v7654_v19, %s9303_s25  ;;  %8555 = vrot.lane.b32.xlu1 %v8068_v8, %s9301_s23  ;;  %v7725_v24 = vcombine.low %v14595_v15, %v14576_v60  ;;  %v14617_v19 = vpop.permute.xlu1 %8351  ;;  %v7245_v56 = vcombine.low %v14607_v35, %v14588_v6  ;;  %v14630_v38 = vrot.slane %v7757_v50, %v16376_v46 }
 0x64f   : > { %v14633_v2 = vrot.slane %v8205_v26, %v16367_v48  ;;  %v8301_v8 = vcombine.low %v14615_v43, %v14602_v27  ;;  %v6454_v22 = vcombine.high %v14127_v33, %v14108_v47  ;;  %v6470_v18 = vcombine.high %v14137_v52, %v14118_v11 }
 0x650   : > { %v14604_v3 = vpop.permute.xlu0 %8393  ;;  %v7590_v20 = vcombine.high %v14295_v42, %v14278_v36  ;;  %v14646_v4 = vrot.slane %v7725_v24, %v16376_v46  ;;  %v6438_v51 = vcombine.high %v14147_v44, %v14132_v62  ;;  %v14655_v47 = vrot.slane %v6486_v58, %v16367_v48 }
 0x651   : > { %v8269_v55 = vcombine.low %v14633_v2, %v14612_v53  ;;  %v14658_v11 = vrot.slane %v7622_v54, %v16376_v46  ;;  %v14661_v33 = vrot.slane %v8301_v8, %v16376_v46  ;;  %v8198_v42 = vcombine.high %v14362_v14, %v14347_v30  ;;  %v16795_v8 = vld [vmem:[#allocation108_spill] sm:$0xff] }
 0x652   : > { %8641 = vrot.lane.b32.xlu0 %v7111_v57, %s9304_s26  ;;  %8575 = vrot.lane.b32.xlu1 %v6701_v49, %s9302_s24  ;;  %v14663_v52 = vpop.permute.xlu1 %8355  ;;  %v7789_v45 = vcombine.low %v14646_v4, %v14630_v38  ;;  %v14672_v62 = vrot.slane %v6454_v22, %v16367_v48  ;;  %v14675_v44 = vrot.slane %v6470_v18, %v16367_v48  ;;  %v16796_v22 = vld [vmem:[#allocation35_spill] sm:$0xff] }
 0x653   : > { %v14678_v29 = vrot.slane %v7590_v20, %v16376_v46  ;;  %v14681_v57 = vrot.slane %v8269_v55, %v16376_v46  ;;  %v14686_v30 = vrot.slane %v6438_v51, %v16367_v48  ;;  %v7030_v54 = vcombine.high %v14161_v9, %v14142_v34  ;;  %v16798_v34 = vld [vmem:[#allocation22_spill] sm:$0xff] }
 0x654   : > { %v14637_v40 = vpop.permute.xlu0 %8413  ;;  %v6549_v14 = vcombine.low %v14675_v44, %v14655_v47  ;;  %v8166_v18 = vcombine.high %v16796_v22, %v16795_v8  ;;  %v7112_v51 = vcombine.high %v14571_v12, %v14547_v32  ;;  %v16801_v8 = vld [vmem:[#allocation54_spill] sm:$0xff]  ;;  %v16802_v22 = vld [vmem:[#allocation120_spill] sm:$0xff] }
 0x655   : > { %v7655_v26 = vcombine.low %v14678_v29, %v14658_v11  ;;  %v8333_v24 = vcombine.low %v14681_v57, %v14661_v33  ;;  %v6517_v58 = vcombine.low %v14686_v30, %v14672_v62  ;;  %v14736_v12 = vrot.slane %v7030_v54, %v16367_v48 }
 0x656   : > { %8669 = vrot.lane.b32.xlu0 %v6568_v59, %s9305_s27  ;;  %8579 = vrot.lane.b32.xlu1 %v7245_v56, %s9302_s24  ;;  %v14690_v49 = vpop.permute.xlu1 %8359  ;;  %v14703_v59 = vrot.slane %v6549_v14, %v16376_v46  ;;  %v6670_v56 = vcombine.high %v14466_v7, %v14437_v41  ;;  %v6638_v41 = vcombine.high %v14497_v16, %v14463_v28  ;;  %v16797_v7 = vld [vmem:[#allocation29_spill] sm:$0xff] }
 0x657   : > { %16794 = vst [vmem:[#allocation79_spill] sm:$0xff] %v14690_v49  ;;  %v6998_v9 = vcombine.high %v16798_v34, %v16797_v7  ;;  %v16799_v14 = vld [vmem:[#allocation117_spill] sm:$0xff]  ;;  %v8134_v49 = vcombine.high %v16802_v22, %v16801_v8  ;;  %v7182_v8 = vcombine.high %v14550_v63, %v14529_v1 }
 0x658   : > { %v14665_v36 = vpop.permute.xlu0 %8417  ;;  %v16804_v28 = vld [vmem:[#allocation121_spill] sm:$0xff] }
 0x659   : > { %v14753_v54 = vrot.slane %v8134_v49, %v16376_v46  ;;  %v14790_v63 = vrot.slane %v7182_v8, %v16376_v46  ;;  %v16811_v8 = vld [vmem:[#allocation34_spill] sm:$0xff] }
 0x65a   : > { %8617 = vrot.lane.b32.xlu0 %v8198_v42, %s9303_s25  ;;  %8583 = vrot.lane.b32.xlu1 %v7789_v45, %s9302_s24  ;;  %v6702_v42 = vcombine.high %v14568_v21, %v14537_v31  ;;  %v14718_v45 = vrot.slane %v6517_v58, %v16376_v46  ;;  %v6684_v31 = vrot.slane %v6670_v56, %v16376_v46  ;;  %v16803_v21 = vld [vmem:[#allocation123_spill] sm:$0xff] }
 0x65b   : > { %v6982_v16 = vcombine.high %v16804_v28, %v16803_v21  ;;  %v14739_v58 = vrot.slane %v8166_v18, %v16376_v46  ;;  %v6652_v56 = vrot.slane %v6638_v41, %v16376_v46  ;;  %v7656_v21 = vcombine.high %v14678_v29, %v14658_v11 }
 0x65c   : > { %v14692_v50 = vpop.permute.xlu0 %8421  ;;  %v6569_v32 = vcombine.low %v14718_v45, %v14703_v59  ;;  %v7790_v28 = vcombine.high %v14646_v4, %v14630_v38 }
 0x65d   : > { %v6703_v18 = vcombine.low %v6652_v56, %v6684_v31  ;;  %v8199_v49 = vcombine.low %v14753_v54, %v14739_v58 }
 0x65e   : > { %8645 = vrot.lane.b32.xlu0 %v7655_v26, %s9304_s26  ;;  %8587 = vrot.lane.b32.xlu1 %v8333_v24, %s9302_s24  ;;  %v16800_v26 = vld [vmem:[#allocation18_spill] sm:$0xff] }
 0x65f   : > { %v7014_v24 = vcombine.high %v16800_v26, %v16799_v14  ;;  %v14758_v26 = vrot.slane %v6982_v16, %v16367_v48  ;;  %v16806_v16 = vld [vmem:[#allocation92_spill] sm:$0xff] }
 0x660   : > { %v14711_v20 = vpop.permute.xlu1 %8363  ;;  %v8426_v55 = vpop.permute.xlu0 %8425 }
 0x661   : > { %v14750_v14 = vrot.slane %v7014_v24, %v16367_v48 }
 0x662   : > { %8673 = vrot.lane.b32.xlu0 %v7112_v51, %s9305_s27  ;;  %8607 = vrot.lane.b32.xlu1 %v6702_v42, %s9303_s25  ;;  %v7246_v51 = vcombine.high %v14607_v35, %v14588_v6  ;;  %v14747_v42 = vrot.slane %v6998_v9, %v16367_v48  ;;  %v7214_v35 = vcombine.high %v14532_v37, %v14516_v5 }
 0x663   : > { %v7093_v6 = vcombine.low %v14750_v14, %v14736_v12 }
 0x664   : > { %v14741_v7 = vpop.permute.xlu1 %8383  ;;  %v8446_v34 = vpop.permute.xlu0 %8445  ;;  %v7061_v24 = vcombine.low %v14758_v26, %v14747_v42  ;;  %v14778_v5 = vrot.slane %v7214_v35, %v16376_v46 }
 0x665   : > { %v14775_v22 = vrot.slane %v7093_v6, %v16376_v46 }
 0x666   : > { %8701 = vrot.lane.b32.xlu0 %v6569_v32, %s9306_s28  ;;  %8611 = vrot.lane.b32.xlu1 %v7246_v51, %s9303_s25  ;;  %v14787_v1 = vrot.slane %v7061_v24, %v16376_v46  ;;  %v16807_v51 = vld [vmem:[#allocation73_spill] sm:$0xff]  ;;  %v16809_v24 = vld [vmem:[#allocation55_spill] sm:$0xff] }
 0x668   : > { %v14764_v41 = vpop.permute.xlu1 %8387  ;;  %v8450_v9 = vpop.permute.xlu0 %8449  ;;  %v7113_v35 = vcombine.low %v14787_v1, %v14775_v22 }
 0x66a   : > { %8649 = vrot.lane.b32.xlu0 %v8199_v49, %s9304_s26  ;;  %8639 = vrot.lane.b32.xlu1 %v6703_v18, %s9304_s26  ;;  %v16808_v18 = vcombine.low %v16806_v16, %v16807_v51  ;;  %v7247_v49 = vcombine.low %v14790_v63, %v14778_v5  ;;  %v16814_v51 = vld [vmem:[#allocation68_spill] sm:$0xff] }
 0x66c   : > { %v14780_v37 = vpop.permute.xlu1 %8391  ;;  %v8454_v32 = vpop.permute.xlu0 %8453  ;;  %v8827_v6 = vsel %vm4494_vm1, %v16808_v18, %v14428_v13  ;;  %v16810_v13 = vld [vmem:[#allocation131_spill] sm:$0xff] }
 0x66d   : > { %16805 = vst [vmem:[#allocation65_spill] sm:$0xff] %v14780_v37  ;;  %v8835_v11 = vsel %vm4503_vm2, %v8827_v6, %v14604_v3 }
 0x66e   : > { %8677 = vrot.lane.b32.xlu0 %v7656_v21, %s9305_s27  ;;  %8615 = vrot.lane.b32.xlu1 %v7790_v28, %s9303_s25  ;;  %v8843_v38 = vsel %vm4512_vm3, %v8835_v11, %v8426_v55  ;;  %v16812_v21 = vcombine.low %v16810_v13, %v16811_v8  ;;  %v16813_v55 = vld [vmem:[#allocation85_spill] sm:$0xff]  ;;  %v7758_v11 = vcombine.high %v14579_v39, %v14559_v0 }
 0x66f   : > { %v6622_v18 = vcombine.high %v16814_v51, %v16813_v55  ;;  %v16819_v51 = vld [vmem:[#allocation87_spill] sm:$0xff] }
 0x670   : > { %v14802_v4 = vpop.permute.xlu1 %8395  ;;  %v8458_v29 = vpop.permute.xlu0 %8457  ;;  %v8821_v28 = vsel %vm4494_vm1, %v16812_v21, %v16809_v24  ;;  %v16817_v21 = vld [vmem:[#allocation126_spill] sm:$0xff] }
 0x671   : > { %v8851_v16 = vsel %vm4521_vm4, %v8843_v38, %v8458_v29  ;;  %v8829_v3 = vsel %vm4503_vm2, %v8821_v28, %v14485_v23  ;;  %v6570_v23 = vcombine.high %v14718_v45, %v14703_v59  ;;  %v6704_v29 = vcombine.high %v6652_v56, %v6684_v31  ;;  %v16818_v28 = vld [vmem:[#allocation39_spill] sm:$0xff]  ;;  %v16823_v45 = vld [vmem:[#allocation132_spill] sm:$0xff] }
 0x672   : > { %8705 = vrot.lane.b32.xlu0 %v7113_v35, %s9306_s28  ;;  %8643 = vrot.lane.b32.xlu1 %v7247_v49, %s9304_s26  ;;  %v8837_v6 = vsel %vm4512_vm3, %v8829_v3, %v14637_v40  ;;  %v16815_v35 = vld [vmem:[#allocation88_spill] sm:$0xff]  ;;  %v16816_v49 = vld [vmem:[#allocation58_spill] sm:$0xff]  ;;  %v6606_v55 = vcombine.high %v16818_v28, %v16817_v21  ;;  %v16820_v40 = vld [vmem:[#allocation37_spill] sm:$0xff]  ;;  %v6574_v31 = vcombine.high %v16823_v45, %v14403_v10 }
 0x673   : > { %v8845_v24 = vsel %vm4521_vm4, %v8837_v6, %v8446_v34  ;;  %v6590_v8 = vcombine.high %v16816_v49, %v16815_v35  ;;  %v16821_v3 = vld [vmem:[#allocation32_spill] sm:$0xff]  ;;  %v7726_v34 = vcombine.high %v14595_v15, %v14576_v60  ;;  %v14848_v56 = vrot.slane %v6622_v18, %v16367_v48 }
 0x674   : > { %v14825_v13 = vpop.permute.xlu1 %8415  ;;  %v8478_v38 = vpop.permute.xlu0 %8477  ;;  %v16822_v37 = vcombine.low %v16820_v40, %v16821_v3  ;;  %v14853_v6 = vrot.slane %v7758_v11, %v16376_v46  ;;  %v8334_v10 = vcombine.high %v14681_v57, %v14661_v33  ;;  %v16825_v11 = vld [vmem:[#allocation13_spill] sm:$0xff]  ;;  %v6550_v57 = vcombine.high %v14675_v44, %v14655_v47  ;;  %v16828_v40 = vld [vmem:[#allocation63_spill] sm:$0xff] }
 0x675   : > { %v8853_v39 = vsel %vm4530_vm5, %v8845_v24, %v8478_v38  ;;  %v8200_v24 = vcombine.high %v14753_v54, %v14739_v58  ;;  %v14863_v18 = vrot.slane %v6590_v8, %v16367_v48  ;;  %v14866_v38 = vrot.slane %v6606_v55, %v16367_v48  ;;  %v16829_v3 = vld [vmem:[#allocation57_spill] sm:$0xff] }
 0x676   : > { %v8823_v0 = vsel %vm4494_vm1, %v16822_v37, %v16819_v51  ;;  %8733 = vrot.lane.b32.xlu0 %v6570_v23, %s9307_s29  ;;  %8671 = vrot.lane.b32.xlu1 %v6704_v29, %s9305_s27  ;;  %v16826_v23 = vld [vmem:[#allocation125_spill] sm:$0xff]  ;;  %v14875_v49 = vrot.slane %v7726_v34, %v16376_v46  ;;  %v14884_v58 = vrot.slane %v6574_v31, %v16367_v48  ;;  %v16831_v34 = vld [vmem:[#allocation75_spill] sm:$0xff] }
 0x677   : > { %v8831_v59 = vsel %vm4503_vm2, %v8823_v0, %v14522_v61  ;;  %v16827_v29 = vcombine.low %v16825_v11, %v16826_v23  ;;  %v6685_v54 = vcombine.low %v14866_v38, %v14848_v56  ;;  %v6518_v47 = vcombine.high %v14686_v30, %v14672_v62  ;;  %v16832_v62 = vld [vmem:[#allocation100_spill] sm:$0xff] }
 0x678   : > { %v8839_v37 = vsel %vm4512_vm3, %v8831_v59, %v14665_v36  ;;  %v14856_v15 = vpop.permute.xlu1 %8419  ;;  %v8482_v61 = vpop.permute.xlu0 %8481  ;;  %v16824_v36 = vld [vmem:[#allocation118_spill] sm:$0xff]  ;;  %v7791_v55 = vcombine.low %v14875_v49, %v14853_v6  ;;  %v6653_v44 = vcombine.low %v14884_v58, %v14863_v18  ;;  %v7166_v30 = vcombine.high %v16832_v62, %v16831_v34 }
 0x679   : > { %v8847_v60 = vsel %vm4521_vm4, %v8839_v37, %v8450_v9  ;;  %v8825_v9 = vsel %vm4494_vm1, %v16827_v29, %v16824_v36  ;;  %v14909_v0 = vrot.slane %v6685_v54, %v16376_v46  ;;  %v8302_v59 = vcombine.high %v14615_v43, %v14602_v27  ;;  %v16833_v36 = vld [vmem:[#allocation80_spill] sm:$0xff]  ;;  %v16835_v43 = vld [vmem:[#allocation83_spill] sm:$0xff] }
 0x67a   : > { %v8855_v35 = vsel %vm4530_vm5, %v8847_v60, %v8482_v61  ;;  %v8833_v33 = vsel %vm4503_vm2, %v8825_v9, %v14563_v25  ;;  %8681 = vrot.lane.b32.xlu0 %v8200_v24, %s9305_s27  ;;  %8619 = vrot.lane.b32.xlu1 %v8334_v10, %s9303_s25  ;;  %v7248_v37 = vcombine.high %v14790_v63, %v14778_v5  ;;  %v16834_v27 = vld [vmem:[#allocation144_spill] sm:$0xff]  ;;  %v16837_v63 = vld [vmem:[#allocation129_spill] sm:$0xff] }
 0x67b   : > { %v8841_v8 = vsel %vm4512_vm3, %v8833_v33, %v14692_v50  ;;  %v16830_v50 = vcombine.low %v16828_v40, %v16829_v3  ;;  %v7114_v60 = vcombine.high %v14787_v1, %v14775_v22  ;;  %v14920_v61 = vrot.slane %v6518_v47, %v16376_v46  ;;  %v16836_v1 = vld [vmem:[#allocation112_spill] sm:$0xff] }
 0x67c   : > { %v8849_v21 = vsel %vm4521_vm4, %v8841_v8, %v8454_v32  ;;  %v14891_v28 = vpop.permute.xlu1 %8423  ;;  %v8486_v25 = vpop.permute.xlu0 %8485  ;;  %v14906_v32 = vrot.slane %v6550_v57, %v16376_v46  ;;  %v14923_v24 = vrot.slane %v6653_v44, %v16376_v46  ;;  %v7134_v11 = vcombine.high %v16833_v36, %v14442_v17  ;;  %v16841_v36 = vld [vmem:[#allocation145_spill] sm:$0xff] }
 0x67d   : > { %v8857_v51 = vsel %vm4530_vm5, %v8849_v21, %v8486_v25  ;;  %v7150_v23 = vcombine.high %v16835_v43, %v16834_v27  ;;  %v8270_v5 = vcombine.high %v14633_v2, %v14612_v53  ;;  %v7118_v29 = vcombine.high %v16837_v63, %v16836_v1  ;;  %v16846_v63 = vld [vmem:[#allocation38_spill] sm:$0xff] }
 0x67e   : > { %8709 = vrot.lane.b32.xlu0 %v16830_v50, %s9306_s28  ;;  %8647 = vrot.lane.b32.xlu1 %v7791_v55, %s9304_s26  ;;  %v6571_v22 = vcombine.low %v14920_v61, %v14906_v32  ;;  %v14942_v17 = vrot.slane %v8302_v59, %v16376_v46  ;;  %v6705_v53 = vcombine.low %v14923_v24, %v14909_v0 }
 0x67f   : > { %v14948_v57 = vrot.slane %v7134_v11, %v16367_v48  ;;  %v14951_v54 = vrot.slane %v7150_v23, %v16367_v48  ;;  %v8284_v8 = vrot.slane %v8270_v5, %v16376_v46  ;;  %v7094_v21 = vcombine.high %v14750_v14, %v14736_v12  ;;  %v16839_v12 = vld [vmem:[#allocation20_spill] sm:$0xff]  ;;  %v16842_v11 = vld [vmem:[#allocation142_spill] sm:$0xff] }
 0x680   : > { %v8428_v45 = vpop.permute.xlu1 %8427  ;;  %v8490_v31 = vpop.permute.xlu0 %8489  ;;  %v14959_v25 = vrot.slane %v7118_v29, %v16367_v48  ;;  %v7062_v34 = vcombine.high %v14758_v26, %v14747_v42  ;;  %v7792_v42 = vcombine.high %v14875_v49, %v14853_v6  ;;  %v16843_v27 = vcombine.low %v16841_v36, %v16842_v11 }
 0x681   : > { %v8859_v10 = vsel %vm4530_vm5, %v8851_v16, %v8490_v31  ;;  %v14939_v16 = vrot.slane %v7166_v30, %v16367_v48  ;;  %v8335_v44 = vcombine.low %v8284_v8, %v14942_v17  ;;  %v16838_v48 = vld [vmem:[#allocation49_spill] sm:$0xff]  ;;  %v14975_v30 = vrot.slane %v7094_v21, %v16376_v46 }
 0x682   : > { %8675 = vrot.lane.b32.xlu1 %v7248_v37, %s9305_s27  ;;  %8737 = vrot.lane.b32.xlu0 %v7114_v60, %s9307_s29  ;;  %v7197_v62 = vcombine.low %v14959_v25, %v14948_v57  ;;  %v16840_v14 = vcombine.low %v16838_v48, %v16839_v12  ;;  %v7076_v37 = vrot.slane %v7062_v34, %v16376_v46 }
 0x683   : > { %v8828_v43 = vsel %vm4494_vm1, %v16843_v27, %v14711_v20  ;;  %v16844_v23 = vcombine.high %v16828_v40, %v16829_v3  ;;  %v16845_v20 = vld [vmem:[#allocation48_spill] sm:$0xff]  ;;  %v16855_v27 = vld [vmem:[#allocation65_spill] sm:$0xff] }
 0x684   : > { %v8448_v9 = vpop.permute.xlu1 %8447  ;;  %v8510_v33 = vpop.permute.xlu0 %8509  ;;  %v7205_v60 = vrot.slane %v7197_v62, %v16376_v46  ;;  %v8836_v6 = vsel %vm4503_vm2, %v8828_v43, %v14802_v4  ;;  %v7115_v1 = vcombine.low %v7076_v37, %v14975_v30  ;;  %v16847_v29 = vcombine.low %v16845_v20, %v16846_v63 }
 0x685   : > { %v8861_v2 = vsel %vm4539_vm6, %v8853_v39, %v8510_v33  ;;  %v7229_v39 = vcombine.low %v14951_v54, %v14939_v16  ;;  %v8844_v49 = vsel %vm4512_vm3, %v8836_v6, %v8428_v45 }
 0x686   : > { %8703 = vrot.lane.b32.xlu1 %v6705_v53, %s9306_s28  ;;  %8765 = vrot.lane.b32.xlu0 %v6571_v22, %s9308_s30  ;;  %v8822_v33 = vsel %vm4494_vm1, %v16847_v29, %v14617_v19  ;;  %v6706_v19 = vcombine.high %v14923_v24, %v14909_v0 }
 0x687   : > { %v14978_v59 = vrot.slane %v7229_v39, %v16376_v46  ;;  %v8830_v4 = vsel %vm4503_vm2, %v8822_v33, %v14741_v7  ;;  %v16849_v7 = vld [vmem:[#allocation25_spill] sm:$0xff] }
 0x688   : > { %v8452_v55 = vpop.permute.xlu1 %8451  ;;  %v8514_v47 = vpop.permute.xlu0 %8513  ;;  %v8838_v45 = vsel %vm4512_vm3, %v8830_v4, %v14825_v13 }
 0x689   : > { %v8863_v50 = vsel %vm4539_vm6, %v8855_v35, %v8514_v47  ;;  %v7249_v22 = vcombine.low %v7205_v60, %v14978_v59  ;;  %v8846_v53 = vsel %vm4521_vm4, %v8838_v45, %v8448_v9  ;;  %v16848_v47 = vld [vmem:[#allocation23_spill] sm:$0xff]  ;;  %v7250_v20 = vcombine.high %v7205_v60, %v14978_v59 }
 0x68a   : > { %8651 = vrot.lane.b32.xlu1 %v8335_v44, %s9304_s26  ;;  %8713 = vrot.lane.b32.xlu0 %v16840_v14, %s9306_s28  ;;  %v16850_v44 = vcombine.low %v16848_v47, %v16849_v7  ;;  %v16851_v14 = vld [vmem:[#allocation79_spill] sm:$0xff]  ;;  %v7230_v60 = vcombine.high %v14951_v54, %v14939_v16 }
 0x68b   : > { %v16864_v59 = vld [vmem:[#allocation19_spill] sm:$0xff] }
 0x68c   : > { %v8456_v35 = vpop.permute.xlu1 %8455  ;;  %v8518_v31 = vpop.permute.xlu0 %8517  ;;  %v8824_v34 = vsel %vm4494_vm1, %v16850_v44, %v14663_v52  ;;  %v8336_v52 = vcombine.high %v8284_v8, %v14942_v17  ;;  %v6686_v8 = vcombine.high %v14866_v38, %v14848_v56  ;;  %v16867_v47 = vld [vmem:[#allocation31_spill] sm:$0xff]  ;;  %v7244_v16 = vrot.slane %v7230_v60, %v16376_v46 }
 0x68d   : > { %v8865_v26 = vsel %vm4539_vm6, %v8857_v51, %v8518_v31  ;;  %v8832_v9 = vsel %vm4503_vm2, %v8824_v34, %v14764_v41  ;;  %v16852_v31 = vld [vmem:[#allocation150_spill] sm:$0xff] }
 0x68e   : > { %8679 = vrot.lane.b32.xlu1 %v7792_v42, %s9305_s27  ;;  %8741 = vrot.lane.b32.xlu0 %v16844_v23, %s9307_s29  ;;  %v16853_v42 = vld [vmem:[#allocation146_spill] sm:$0xff]  ;;  %v6700_v38 = vrot.slane %v6686_v8, %v16376_v46 }
 0x690   : > { %v8460_v51 = vpop.permute.xlu1 %8459  ;;  %v8522_v5 = vpop.permute.xlu0 %8521 }
 0x691   : > { %v8852_v40 = vsel %vm4521_vm4, %v8844_v49, %v8460_v51  ;;  %v8867_v3 = vsel %vm4539_vm6, %v8859_v10, %v8522_v5  ;;  %v6572_v10 = vcombine.high %v14920_v61, %v14906_v32  ;;  %v8840_v32 = vsel %vm4512_vm3, %v8832_v9, %v14856_v15 }
 0x692   : > { %8707 = vrot.lane.b32.xlu1 %v7249_v22, %s9306_s28  ;;  %8769 = vrot.lane.b32.xlu0 %v7115_v1, %s9308_s30  ;;  %v8848_v0 = vsel %vm4521_vm4, %v8840_v32, %v8452_v55  ;;  %v16856_v15 = vcombine.high %v16838_v48, %v16839_v12  ;;  %v6654_v51 = vcombine.high %v14884_v58, %v14863_v18  ;;  %v16857_v48 = vld [vmem:[#allocation69_spill] sm:$0xff]  ;;  %v16858_v12 = vld [vmem:[#allocation66_spill] sm:$0xff]  ;;  %v16861_v22 = vld [vmem:[#allocation16_spill] sm:$0xff] }
 0x693   : > { %v16859_v5 = vcombine.low %v16857_v48, %v16858_v12 }
 0x694   : > { %v8480_v21 = vpop.permute.xlu1 %8479  ;;  %v8542_v39 = vpop.permute.xlu0 %8541  ;;  %v6668_v63 = vrot.slane %v6654_v51, %v16376_v46 }
 0x695   : > { %v8854_v62 = vsel %vm4530_vm5, %v8846_v53, %v8480_v21  ;;  %v8869_v13 = vsel %vm4548_vm7, %v8861_v2, %v8542_v39  ;;  %v16854_v2 = vcombine.low %v16852_v31, %v16853_v42 }
 0x696   : > { %8735 = vrot.lane.b32.xlu1 %v6706_v19, %s9307_s29  ;;  %8797 = vrot.lane.b32.xlu0 %v6572_v10, %s9309_s2  ;;  %v6707_v4 = vcombine.low %v6668_v63, %v6700_v38  ;;  %v7198_v19 = vcombine.high %v14959_v25, %v14948_v57  ;;  %v16866_v10 = vld [vmem:[#allocation84_spill] sm:$0xff]  ;;  %v16870_v25 = vcombine.high %v16857_v48, %v16858_v12 }
 0x697   : > { %v8826_v36 = vsel %vm4494_vm1, %v16854_v2, %v16851_v14  ;;  %v16868_v7 = vcombine.low %v16866_v10, %v16867_v47  ;;  %v6708_v31 = vcombine.high %v6668_v63, %v6700_v38  ;;  %vm16881_vm1 = vcmask 195584  }
 0x698   : > { %v8484_v61 = vpop.permute.xlu1 %8483  ;;  %v8546_v24 = vpop.permute.xlu0 %8545  ;;  %v8834_v43 = vsel %vm4503_vm2, %v8826_v36, %v16855_v27  ;;  %v7212_v57 = vrot.slane %v7198_v19, %v16376_v46  ;;  %vm16882_vm2 = vcmask 211968   ;;  %vm16893_vm12 = vmmov %vm16881_vm1 }
 0x699   : > { %v8856_v41 = vsel %vm4530_vm5, %v8848_v0, %v8484_v61  ;;  %v8871_v11 = vsel %vm4548_vm7, %v8863_v50, %v8546_v24  ;;  %v8842_v17 = vsel %vm4512_vm3, %v8834_v43, %v14891_v28  ;;  %v16860_v28 = vld [vmem:[#allocation15_spill] sm:$0xff]  ;;  %v16872_v43 = vcombine.high %v16866_v10, %v16867_v47  ;;  %vm16890_vm13 = vmmov %vm16882_vm2 }
 0x69a   : > { %8683 = vrot.lane.b32.xlu1 %v8336_v52, %s9305_s27  ;;  %8745 = vrot.lane.b32.xlu0 %v16856_v15, %s9307_s29  ;;  %v8850_v55 = vsel %vm4521_vm4, %v8842_v17, %v8456_v35  ;;  %v16862_v56 = vcombine.low %v16860_v28, %v16861_v22  ;;  %v16869_v44 = vcombine.high %v16860_v28, %v16861_v22  ;;  %vm16883_vm3 = vcmask 228352   ;;  %vm16894_vm15 = vmmov %vm16882_vm2 }
 0x69b   : > { %v7251_v61 = vcombine.low %v7212_v57, %v7244_v16  ;;  %v7252_v48 = vcombine.high %v7212_v57, %v7244_v16  ;;  %vm16884_vm4 = vcmask 244736   ;;  %vm16891_vm0 = vmmov %vm16883_vm3 }
 0x69c   : > { %v8488_v23 = vpop.permute.xlu1 %8487  ;;  %v8550_v50 = vpop.permute.xlu0 %8549  ;;  %vm16892_vm14 = vmmov %vm16884_vm4 }
 0x69d   : > { %v8858_v6 = vsel %vm4530_vm5, %v8850_v55, %v8488_v23  ;;  %v8873_v49 = vsel %vm4548_vm7, %v8865_v26, %v8550_v50  ;;  %v7116_v26 = vcombine.high %v7076_v37, %v14975_v30  ;;  %v16863_v30 = vld [vmem:[#allocation17_spill] sm:$0xff]  ;;  %v16873_v23 = vld [vmem:[#allocation36_spill] sm:$0xff] }
 0x69e   : > { %8711 = vrot.lane.b32.xlu1 %v16859_v5, %s9306_s28  ;;  %8773 = vrot.lane.b32.xlu0 %v16862_v56, %s9308_s30  ;;  %v16865_v37 = vcombine.low %v16863_v30, %v16864_v59  ;;  %v16871_v9 = vcombine.high %v16863_v30, %v16864_v59  ;;  %v16874_v50 = vld [vmem:[#allocation124_spill] sm:$0xff] }
 0x69f   : > { %v16879_v63 = vcombine.high %v16873_v23, %v16874_v50 }
 0x6a0   : > { %v8492_v35 = vpop.permute.xlu1 %8491  ;;  %v8554_v1 = vpop.permute.xlu0 %8553 }
 0x6a1   : > { %v8860_v18 = vsel %vm4530_vm5, %v8852_v40, %v8492_v35  ;;  %v8875_v58 = vsel %vm4548_vm7, %v8867_v3, %v8554_v1  ;;  %v16876_v35 = vld [vmem:[#allocation127_spill] sm:$0xff]  ;;  %vm16885_vm5 = vmmov %vm16881_vm1 }
 0x6a2   : > { %8739 = vrot.lane.b32.xlu1 %v7250_v20, %s9307_s29  ;;  %8801 = vrot.lane.b32.xlu0 %v7116_v26, %s9309_s2  ;;  %v16877_v1 = vld [vmem:[#allocation119_spill] sm:$0xff] }
 0x6a3   : > { %v16878_v20 = vcombine.low %v16876_v35, %v16877_v1 }
 0x6a4   : > { %v8512_v29 = vpop.permute.xlu1 %8511  ;;  %v8574_v33 = vpop.permute.xlu0 %8573 }
 0x6a5   : > { %v8862_v45 = vsel %vm4539_vm6, %v8854_v62, %v8512_v29  ;;  %v8877_v53 = vsel %vm4557_vm8, %v8869_v13, %v8574_v33 }
 0x6a6   : > { %8767 = vrot.lane.b32.xlu1 %v6707_v4, %s9308_s30  ;;  %8777 = vrot.lane.b32.xlu0 %v16865_v37, %s9308_s30 }
 0x6a8   : > { %v8516_v40 = vpop.permute.xlu1 %8515  ;;  %v8578_v3 = vpop.permute.xlu0 %8577 }
 0x6a9   : > { %v8864_v21 = vsel %vm4539_vm6, %v8856_v41, %v8516_v40  ;;  %v8879_v39 = vsel %vm4557_vm8, %v8871_v11, %v8578_v3 }
 0x6aa   : > { %8715 = vrot.lane.b32.xlu1 %v16868_v7, %s9306_s28  ;;  %8805 = vrot.lane.b32.xlu0 %v16869_v44, %s9309_s2 }
 0x6ac   : > { %v8520_v54 = vpop.permute.xlu1 %8519  ;;  %v8582_v34 = vpop.permute.xlu0 %8581 }
 0x6ad   : > { %v8866_v62 = vsel %vm4539_vm6, %v8858_v6, %v8520_v54  ;;  %v8881_v13 = vsel %vm4557_vm8, %v8873_v49, %v8582_v34  ;;  %v16875_v6 = vcombine.low %v16873_v23, %v16874_v50 }
 0x6ae   : > { %8743 = vrot.lane.b32.xlu1 %v16870_v25, %s9307_s29  ;;  %8809 = vrot.lane.b32.xlu0 %v16871_v9, %s9309_s2 }
 0x6b0   : > { %v8524_v32 = vpop.permute.xlu1 %8523  ;;  %v8586_v0 = vpop.permute.xlu0 %8585 }
 0x6b1   : > { %v8868_v24 = vsel %vm4539_vm6, %v8860_v18, %v8524_v32  ;;  %v8883_v52 = vsel %vm4557_vm8, %v8875_v58, %v8586_v0  ;;  %vm16886_vm6 = vmmov %vm16882_vm2 }
 0x6b2   : > { %8771 = vrot.lane.b32.xlu1 %v7251_v61, %s9308_s30 }
 0x6b4   : > { %v8544_v46 = vpop.permute.xlu1 %8543  ;;  %v8606_v14 = vpop.permute.xlu0 %8605 }
 0x6b5   : > { %v8870_v42 = vsel %vm4548_vm7, %v8862_v45, %v8544_v46  ;;  %v8885_v2 = vsel %vm4566_vm9, %v8877_v53, %v8606_v14  ;;  %v16880_v53 = vcombine.high %v16876_v35, %v16877_v1 }
 0x6b6   : > { %8799 = vrot.lane.b32.xlu1 %v6708_v31, %s9309_s2 }
 0x6b8   : > { %v8548_v36 = vpop.permute.xlu1 %8547  ;;  %v8610_v41 = vpop.permute.xlu0 %8609 }
 0x6b9   : > { %v8872_v11 = vsel %vm4548_vm7, %v8864_v21, %v8548_v36  ;;  %v8887_v27 = vsel %vm4566_vm9, %v8879_v39, %v8610_v41 }
 0x6ba   : > { %8747 = vrot.lane.b32.xlu1 %v16872_v43, %s9307_s29 }
 0x6bc   : > { %v8552_v15 = vpop.permute.xlu1 %8551  ;;  %v8638_v17 = vpop.permute.xlu0 %8637 }
 0x6bd   : > { %v8874_v8 = vsel %vm4548_vm7, %v8866_v62, %v8552_v15  ;;  %v8893_v55 = vsel %vm4575_vm10, %v8885_v2, %v8638_v17 }
 0x6be   : > { %8775 = vrot.lane.b32.xlu1 %v16875_v6, %s9308_s30 }
 0x6c0   : > { %v8556_v49 = vpop.permute.xlu1 %8555  ;;  %v8614_v51 = vpop.permute.xlu0 %8613 }
 0x6c1   : > { %v8876_v12 = vsel %vm4548_vm7, %v8868_v24, %v8556_v49  ;;  %v8889_v5 = vsel %vm4566_vm9, %v8881_v13, %v8614_v51  ;;  %vm16887_vm7 = vmmov %vm16883_vm3 }
 0x6c2   : > { %8803 = vrot.lane.b32.xlu1 %v7252_v48, %s9309_s2 }
 0x6c4   : > { %v8576_v28 = vpop.permute.xlu1 %8575  ;;  %v8642_v22 = vpop.permute.xlu0 %8641 }
 0x6c5   : > { %v8878_v56 = vsel %vm4557_vm8, %v8870_v42, %v8576_v28  ;;  %v8895_v38 = vsel %vm4575_vm10, %v8887_v27, %v8642_v22 }
 0x6c6   : > { %8779 = vrot.lane.b32.xlu1 %v16878_v20, %s9308_s30 }
 0x6c8   : > { %v8580_v26 = vpop.permute.xlu1 %8579  ;;  %v8670_v18 = vpop.permute.xlu0 %8669 }
 0x6c9   : > { %v8880_v58 = vsel %vm4557_vm8, %v8872_v11, %v8580_v26  ;;  %v8901_v17 = vsel %vm4584_vm11, %v8893_v55, %v8670_v18 }
 0x6ca   : > { %8807 = vrot.lane.b32.xlu1 %v16879_v63, %s9309_s2 }
 0x6cc   : > { %v8584_v29 = vpop.permute.xlu1 %8583  ;;  %v8618_v33 = vpop.permute.xlu0 %8617 }
 0x6cd   : > { %v8882_v4 = vsel %vm4557_vm8, %v8874_v8, %v8584_v29  ;;  %v15139_v45 = vsel %vm4566_vm9, %v8883_v52, %v8618_v33 }
 0x6ce   : > { %8811 = vrot.lane.b32.xlu1 %v16880_v53, %s9309_s2 }
 0x6d0   : > { %v8588_v30 = vpop.permute.xlu1 %8587  ;;  %v8646_v59 = vpop.permute.xlu0 %8645 }
 0x6d1   : > { %v8884_v37 = vsel %vm4557_vm8, %v8876_v12, %v8588_v30  ;;  %v8897_v60 = vsel %vm4575_vm10, %v8889_v5, %v8646_v59  ;;  %vm16888_vm8 = vmmov %vm16884_vm4 }
 0x6d4   : > { %v8608_v40 = vpop.permute.xlu1 %8607  ;;  %v8674_v3 = vpop.permute.xlu0 %8673 }
 0x6d5   : > { %v8886_v21 = vsel %vm4566_vm9, %v8878_v56, %v8608_v40  ;;  %v8903_v22 = vsel %vm4584_vm11, %v8895_v38, %v8674_v3 }
 0x6d8   : > { %v8612_v39 = vpop.permute.xlu1 %8611  ;;  %v8702_v19 = vpop.permute.xlu0 %8701 }
 0x6d9   : > { %v8888_v10 = vsel %vm4566_vm9, %v8880_v58, %v8612_v39  ;;  %v8909_v8 = vsel %vm16881_vm1, %v8901_v17, %v8702_v19 }
 0x6dc   : > { %v8640_v47 = vpop.permute.xlu1 %8639  ;;  %v8650_v7 = vpop.permute.xlu0 %8649 }
 0x6dd   : > { %v15150_v44 = vsel %vm4575_vm10, %v8886_v21, %v8640_v47  ;;  %v8899_v33 = vsel %vm4575_vm10, %v15139_v45, %v8650_v7 }
 0x6e0   : > { %v8616_v16 = vpop.permute.xlu1 %8615  ;;  %v8678_v54 = vpop.permute.xlu0 %8677 }
 0x6e1   : > { %v8890_v34 = vsel %vm4566_vm9, %v8882_v4, %v8616_v16  ;;  %v8905_v63 = vsel %vm4584_vm11, %v8897_v60, %v8678_v54 }
 0x6e4   : > { %v8644_v62 = vpop.permute.xlu1 %8643  ;;  %v8706_v13 = vpop.permute.xlu0 %8705 }
 0x6e5   : > { %v15154_v57 = vsel %vm4575_vm10, %v8888_v10, %v8644_v62  ;;  %v8911_v55 = vsel %vm16885_vm5, %v8903_v22, %v8706_v13 }
 0x6e8   : > { %v8672_v25 = vpop.permute.xlu1 %8671  ;;  %v8734_v9 = vpop.permute.xlu0 %8733 }
 0x6e9   : > { %v8917_v23 = vsel %vm16882_vm2, %v8909_v8, %v8734_v9  ;;  %vm16896_vm2 = vmmov %vm16884_vm4  ;;  %v8902_v10 = vsel %vm4584_vm11, %v15150_v44, %v8672_v25 }
 0x6ec   : > { %v8620_v32 = vpop.permute.xlu1 %8619  ;;  %v8682_v0 = vpop.permute.xlu0 %8681 }
 0x6ed   : > { %v15157_v61 = vsel %vm4566_vm9, %v8884_v37, %v8620_v32  ;;  %vm16889_vm9 = vmmov %vm16881_vm1  ;;  %v8907_v59 = vsel %vm4584_vm11, %v8899_v33, %v8682_v0 }
 0x6ee   : > { %vm16895_vm1 = vmmov %vm16891_vm0 }
 0x6f0   : > { %v8648_v24 = vpop.permute.xlu1 %8647  ;;  %v8710_v52 = vpop.permute.xlu0 %8709 }
 0x6f1   : > { %v15160_v46 = vsel %vm4575_vm10, %v8890_v34, %v8648_v24  ;;  %v8913_v29 = vsel %vm16889_vm9, %v8905_v63, %v8710_v52  ;;  %vm16903_vm9 = vmmov %vm16891_vm0 }
 0x6f4   : > { %v8676_v14 = vpop.permute.xlu1 %8675  ;;  %v8738_v31 = vpop.permute.xlu0 %8737 }
 0x6f5   : > { %v8919_v56 = vsel %vm16886_vm6, %v8911_v55, %v8738_v31  ;;  %v8904_v9 = vsel %vm4584_vm11, %v15154_v57, %v8676_v14 }
 0x6f8   : > { %v8704_v42 = vpop.permute.xlu1 %8703  ;;  %v8766_v2 = vpop.permute.xlu0 %8765 }
 0x6f9   : > { %v8925_v50 = vsel %vm16883_vm3, %v8917_v23, %v8766_v2  ;;  %vm16897_vm3 = vmmov %vm16885_vm5 }
 0x6fa   : > { %v8910_v47 = vsel %vm16897_vm3, %v8902_v10, %v8704_v42  ;;  %vm16899_vm5 = vmmov %vm16891_vm0 }
 0x6fc   : > { %v15162_v36 = vpop.permute.xlu1 %8651  ;;  %v8714_v41 = vpop.permute.xlu0 %8713 }
 0x6fd   : > { %v8915_v40 = vsel %vm16893_vm12, %v8907_v59, %v8714_v41  ;;  %v8900_v14 = vsel %vm4575_vm10, %v15157_v61, %v15162_v36  ;;  %vm16907_vm12 = vmmov %vm16895_vm1 }
 0x700   : > { %v15164_v11 = vpop.permute.xlu1 %8679  ;;  %v8742_v27 = vpop.permute.xlu0 %8741 }
 0x701   : > { %v8921_v38 = vsel %vm16890_vm13, %v8913_v29, %v8742_v27  ;;  %vm16904_vm13 = vmmov %vm16896_vm2  ;;  %v8906_v31 = vsel %vm4584_vm11, %v15160_v46, %v15164_v11 }
 0x704   : > { %v8708_v43 = vpop.permute.xlu1 %8707  ;;  %v8770_v15 = vpop.permute.xlu0 %8769 }
 0x705   : > { %v8927_v35 = vsel %vm16887_vm7, %v8919_v56, %v8770_v15  ;;  %vm16901_vm7 = vmmov %vm16897_vm3 }
 0x706   : > { %v8912_v32 = vsel %vm16901_vm7, %v8904_v9, %v8708_v43 }
 0x708   : > { %v8736_v6 = vpop.permute.xlu1 %8735  ;;  %v8798_v49 = vpop.permute.xlu0 %8797 }
 0x709   : > { %v8933_v51 = vsel %vm16884_vm4, %v8925_v50, %v8798_v49  ;;  %vm16898_vm4 = vmmov %vm16886_vm6 }
 0x70a   : > { %8958 = vrot.lane.b32.xlu0 %v8933_v51, %s9310_s14  ;;  %v8918_v7 = vsel %vm16898_vm4, %v8910_v47, %v8736_v6  ;;  %vm16900_vm6 = vmmov %vm16896_vm2 }
 0x70b   : > { %vm16912_vm10 = vmmov %vm16900_vm6 }
 0x70c   : > { %v8684_v48 = vpop.permute.xlu1 %8683  ;;  %v8746_v12 = vpop.permute.xlu0 %8745 }
 0x70d   : > { %v8923_v60 = vsel %vm16894_vm15, %v8915_v40, %v8746_v12  ;;  %v8908_v27 = vsel %vm4584_vm11, %v8900_v14, %v8684_v48  ;;  %vm16908_vm15 = vmmov %vm16896_vm2  ;;  %vm8982_vm11 = vcmask 523520  }
 0x710   : > { %v8712_v5 = vpop.permute.xlu1 %8711  ;;  %v8774_v28 = vpop.permute.xlu0 %8773 }
 0x711   : > { %v8929_v4 = vsel %vm16891_vm0, %v8921_v38, %v8774_v28  ;;  %vm16905_vm0 = vmmov %vm16897_vm3 }
 0x712   : > { %v8914_v42 = vsel %vm16905_vm0, %v8906_v31, %v8712_v5  ;;  %vm16911_vm3 = vmmov %vm16899_vm5 }
 0x714   : > { %v8740_v1 = vpop.permute.xlu1 %8739  ;;  %v8802_v20 = vpop.permute.xlu0 %8801 }
 0x715   : > { %v8935_v26 = vsel %vm16888_vm8, %v8927_v35, %v8802_v20  ;;  %vm16902_vm8 = vmmov %vm16898_vm4 }
 0x716   : > { %8962 = vrot.lane.b32.xlu0 %v8935_v26, %s9310_s14  ;;  %v8920_v44 = vsel %vm16902_vm8, %v8912_v32, %v8740_v1 }
 0x718   : > { %v8768_v18 = vpop.permute.xlu1 %8767  ;;  %v8778_v58 = vpop.permute.xlu0 %8777 }
 0x719   : > { %v8931_v3 = vsel %vm16895_vm1, %v8923_v60, %v8778_v58  ;;  %v8926_v16 = vsel %vm16899_vm5, %v8918_v7, %v8768_v18  ;;  %vm16909_vm1 = vmmov %vm16905_vm0 }
 0x71c   : > { %v8716_v53 = vpop.permute.xlu1 %8715  ;;  %v8806_v30 = vpop.permute.xlu0 %8805 }
 0x71d   : > { %v8937_v37 = vsel %vm16892_vm14, %v8929_v4, %v8806_v30  ;;  %vm16906_vm14 = vmmov %vm16898_vm4  ;;  %v8916_v46 = vsel %vm16909_vm1, %v8908_v27, %v8716_v53 }
 0x71e   : > { %8966 = vrot.lane.b32.xlu0 %v8937_v37, %s9310_s14 }
 0x720   : > { %v8744_v21 = vpop.permute.xlu1 %8743  ;;  %v8810_v39 = vpop.permute.xlu0 %8809 }
 0x721   : > { %v8939_v45 = vsel %vm16896_vm2, %v8931_v3, %v8810_v39  ;;  %v8922_v57 = vsel %vm16906_vm14, %v8914_v42, %v8744_v21  ;;  %vm16910_vm2 = vmmov %vm16898_vm4 }
 0x722   : > { %8970 = vrot.lane.b32.xlu0 %v8939_v45, %s9310_s14 }
 0x724   : > { %v8772_v19 = vpop.permute.xlu1 %8771 }
 0x725   : > { %v8928_v25 = vsel %vm16903_vm9, %v8920_v44, %v8772_v19 }
 0x728   : > { %v8800_v54 = vpop.permute.xlu1 %8799 }
 0x729   : > { %v8934_v34 = vsel %vm16900_vm6, %v8926_v16, %v8800_v54 }
 0x72a   : > { %8960 = vrot.lane.b32.xlu1 %v8934_v34, %s9310_s14 }
 0x72c   : > { %v8748_v62 = vpop.permute.xlu1 %8747 }
 0x72d   : > { %v8924_v11 = vsel %vm16910_vm2, %v8916_v46, %v8748_v62 }
 0x730   : > { %v8776_v13 = vpop.permute.xlu1 %8775 }
 0x731   : > { %v8930_v2 = vsel %vm16907_vm12, %v8922_v57, %v8776_v13 }
 0x734   : > { %v8804_v0 = vpop.permute.xlu1 %8803 }
 0x735   : > { %v8936_v24 = vsel %vm16904_vm13, %v8928_v25, %v8804_v0 }
 0x736   : > { %8964 = vrot.lane.b32.xlu1 %v8936_v24, %s9310_s14 }
 0x738   : > { %v8780_v52 = vpop.permute.xlu1 %8779 }
 0x739   : > { %v8932_v15 = vsel %vm16911_vm3, %v8924_v11, %v8780_v52 }
 0x73c   : > { %v8808_v41 = vpop.permute.xlu1 %8807 }
 0x73d   : > { %v8938_v43 = vsel %vm16908_vm15, %v8930_v2, %v8808_v41 }
 0x73e   : > { %8968 = vrot.lane.b32.xlu1 %v8938_v43, %s9310_s14 }
 0x740   : > { %v8812_v61 = vpop.permute.xlu1 %8811 }
 0x741   : > { %v8940_v36 = vsel %vm16912_vm10, %v8932_v15, %v8812_v61 }
 0x742   : > { %8972 = vrot.lane.b32.xlu1 %v8940_v36, %s9310_s14 }
 0x77c   : > { %v8959_v17 = vpop.permute.xlu0 %8958 }
 0x77d   : > { %8983 = vst.msk [vmem:[%s12227_s12] sm:$0xff] %vm8982_vm11, %v8959_v17 }
 0x788   : > { %v8963_v8 = vpop.permute.xlu0 %8962 }
 0x789   : > { %8985 = vst.msk [vmem:[%s12227_s12 + $0x10] sm:$0xff] %vm8982_vm11, %v8963_v8 }
 0x790   : > { %v8967_v23 = vpop.permute.xlu0 %8966 }
 0x791   : > { %8987 = vst.msk [vmem:[%s12227_s12 + $0x20] sm:$0xff] %vm8982_vm11, %v8967_v23 }
 0x794   : > { %v8971_v50 = vpop.permute.xlu0 %8970 }
 0x795   : > { %8989 = vst.msk [vmem:[%s12227_s12 + $0x30] sm:$0xff] %vm8982_vm11, %v8971_v50 }
 0x79c   : > { %v8961_v6 = vpop.permute.xlu1 %8960 }
 0x79d   : > { %8984 = vst.msk [vmem:[%s12227_s12 + $0x8] sm:$0xff] %vm8982_vm11, %v8961_v6 }
 0x7a8   : > { %v8965_v49 = vpop.permute.xlu1 %8964 }
 0x7a9   : > { %8986 = vst.msk [vmem:[%s12227_s12 + $0x18] sm:$0xff] %vm8982_vm11, %v8965_v49 }
 0x7b0   : > { %v8969_v51 = vpop.permute.xlu1 %8968 }
 0x7b1   : > { %8988 = vst.msk [vmem:[%s12227_s12 + $0x28] sm:$0xff] %vm8982_vm11, %v8969_v51 }
 0x7b4   : > { %v8973_v48 = vpop.permute.xlu1 %8972 }
 0x7b5   : > { %8990 = vst.msk [vmem:[%s12227_s12 + $0x38] sm:$0xff] %vm8982_vm11, %v8973_v48 }
 0x7b6 PF: > { %s14_s11 = sadd.s32 1, %s9288_s11   ;;  %s16913_s6 = smov %s9272_s7 }
 0x7b7   : > { %p11_p8 = scmp.ge.s32.totalorder %s14_s11, 4   ;;  %s16914_s7 = smov %s9276_s8 }
 0x7b8   : > { %s16915_s8 = smov %s9370_s18  ;;  %s16916_s9 = smov %s9284_s10 }
 0x7b9   : > { %s16917_s10 = smov %s16919_s13  ;;  %13 = sbr.rel (!%p11_p8) target bundleno = 4 (0x4), region = 67 }
 0x7be   :  { %9024 = vsyncpa [#allocation3], 1 }
 0x7bf   :  { %9026 = vsyncpa [#allocation3 + $0x1], 1 }

// kernel: _phases_forward.1
= control target key start
LH: loop header
LB: loop body
LE: loop exit
PB: predicated region body
PF: predicated region fallthrough
CT: control target
= control target key end

     0   :  { %6 = vsyncpa [#allocation3], 0  ;;  %s849_s0 = inlined_call_operand.hbm [shape: f32[8,4,16,16], index: 0, kind: input, shape index: {}]   ;;  %s850_s1 = inlined_call_operand.vmem [shape: f32[8,4,16,16], index: 1, kind: output, shape index: {}]  }
   0x1   :  { %8 = vsyncpa [#allocation3 + $0x1], 0  ;;  %s651_s6 = smov 0   ;;  %s653_s7 = smov 0  }
   0x2   :  { %s655_s8 = smov 0   ;;  %s657_s9 = smov 0  }
   0x3   :  { %s659_s10 = smov 0   ;;  %s661_s11 = smov 0  }
   0x4 LB: > { %s435_s12 = sadd.s32 4294967295, %s636_s11   ;;  %s26_s13 = sadd.s32 1, %s632_s10  ;;  %s636_s11 = sphi %s661_s11, %s14_s11   ;;  %s632_s10 = sphi %s659_s10, %s858_s10   ;;  %s628_s9 = sphi %s657_s9, %s857_s9   ;;  %s624_s8 = sphi %s655_s8, %s856_s8   ;;  %s620_s7 = sphi %s653_s7, %s855_s7   ;;  %s616_s6 = sphi %s651_s6, %s854_s6  }
   0x5   : > { %p28_p0 = scmp.ge.s32.totalorder %s26_s13, 2  ;;  %s35_s14 = sadd.s32 1, %s624_s8 }
   0x6   : > { %p42_p1 = scmp.ne.s32.totalorder %s624_s8, %s620_s7  ;;  %p43_p2 = scmp.eq.s32.totalorder %s636_s11, 0 }
   0x7   : > { %s860_s13 = smov (%p28_p0, %s26_s13), 0  ;;  %p48_p4 = scmp.ne.s32.totalorder %s620_s7, %s616_s6 }
   0x8   : > { %p687_p3 = por %p43_p2, %p42_p1  ;;  %s30_s16 = ssub.s32 %s632_s10, %s860_s13 }
   0x9   : > { %p49_p5 = scmp.eq.s32.totalorder %s435_s12, 0  ;;  %p33_p6 = scmp.eq.s32.totalorder %s30_s16, 0 }
   0xa   : > { %p507_p8 = scmp.lt.s32.totalorder %s636_s11, 2  ;;  %s100_s19 = sand.u32 1, %s624_s8  }
   0xb   : > { %p694_p7 = por %p49_p5, %p48_p4  ;;  %s499_s20 = sshll.u32 %s632_s10, 12 }
   0xc   : > { %s700_s18 = scalar_select %p33_p6, %s624_s8, %s35_s14  }
   0xd   : > { %s439_s21 = sshll.u32 %s100_s19, 8  ;;  %s113_s24 = scalar_lea.hbm %s849_s0, %s499_s20 }
   0xe   : > { %s104_s25 = scalar_lea.vmem [#allocation2], %s439_s21  ;;  %p709_p9 = pnand %p507_p8, %p687_p3 }
   0xf   : > { %s114_s26 = sshll.u32 %s104_s25, 4  ;;  %s101_s28 = scalar_lea.sflag [#allocation3], %s100_s19  ;;  %s115_s26 = int_to_ptr.vmem [resolvable:$true] %s114_s26 }
  0x10   : > { %p560_p10 = pneg %p709_p9  ;;  %s571_s29 = scalar_lea.vmem %s115_s26, 4096 }
  0x11   : > { %p572_p11 = scmp.ne.s32.totalorder %s115_s26, %s571_s29  ;;  %s638_s30 = smov [#allocation2]  }
  0x12   : > { %s576_s2 = sshll.u32 %s638_s30, 4  ;;  %s577_s2 = int_to_ptr.vmem [resolvable:$false] %s576_s2 }
  0x13   : > { %p574_p12 = pnand %p572_p11, %p560_p10  ;;  %s578_s3 = scalar_lea.vmem %s577_s2, 8192 }
  0x14   : > { %p579_p0 = scmp.lt.s32.totalorder %s115_s26, %s577_s2  ;;  %p580_p1 = scmp.lt.s32.totalorder %s578_s3, %s571_s29 }
  0x15   : > { %p575_p13 = pneg %p574_p12 }
  0x16   : > { %p581_p2 = por %p580_p1, %p579_p0 }
  0x18   : > { %p582_p3 = pnand %p581_p2, %p575_p13 }
  0x1a   : > { %585 = shalt.err (!%p582_p3)
}
  0x1b   : > { %s639_s4 = smov 128   ;;  %s640_s5 = smov 8  }
  0x1c   : > { %506 = dma.hbm_to_vmem [thread:$0]  (!%p709_p9), %s113_s24, 4096, %s115_s26, %s101_s28, %s639_s4, %s639_s4, %s640_s5  }
  0x1d   : > { %p443_p4 = scmp.ge.s32.totalorder %s636_s11, 1  ;;  %p122_p5 = scmp.lt.s32.totalorder %s636_s11, 3 }
  0x1f   : > { %p123_p6 = pnand %p443_p4, %p122_p5 }
  0x20   : > { %s128_s6 = sand.u32 (!%p123_p6), 1, %s620_s7  }
  0x21   : > { %126 = sbr.rel (%p123_p6) target bundleno = 72 (0x48), region = 24  ;;  %s444_s12 = sshll.u32 (!%p123_p6), %s128_s6, 8 }
  0x22   : > { %s129_s14 = scalar_lea.sflag (!%p123_p6), [#allocation3], %s128_s6  ;;  %s720_s15 = scalar_lea.vmem (!%p123_p6), [#allocation2], %s444_s12 }
  0x26   : > { %611 = dma.done.wait (%p694_p7), %s129_s14, 4096  }
  0x27   : > { %613 = vsyncadd (%p694_p7), %s129_s14, 4294963200  ;;  %s445_s16 = sshll.u32 %s628_s9, 2  ;;  %v170_v0 = vld [vmem:[%s720_s15] sm:$0xff]  ;;  %v448_v1 = vld [vmem:[%s720_s15 + $0x10] sm:$0xff]  ;;  %vm253_vm0 = vcmask 130048  }
  0x28   : > { %p160_p8 = scmp.lt.s32.totalorder %s445_s16, 7  ;;  %v456_v2 = vld [vmem:[%s720_s15 + $0x20] sm:$0xff]  ;;  %v464_v3 = vld [vmem:[%s720_s15 + $0x30] sm:$0xff]  ;;  %v205_v4 = vadd.f32 %v448_v1, %v170_v0  ;;  %v171_v5 = vld [vmem:[%s720_s15 + $0x8] sm:$0xff]  ;;  %v213_v7 = vsub.f32 %v170_v0, %v448_v1 }
  0x29   : > { %v449_v6 = vld [vmem:[%s720_s15 + $0x18] sm:$0xff]  ;;  %v221_v8 = vadd.f32 %v464_v3, %v456_v2  ;;  %v457_v9 = vld [vmem:[%s720_s15 + $0x28] sm:$0xff]  ;;  %v229_v12 = vsub.f32 %v456_v2, %v464_v3  ;;  %v172_v16 = vld [vmem:[%s720_s15 + $0x40] sm:$0xff] }
  0x2a   : > { %s862_s16 = smov (!%p160_p8, %s445_s16), 7  ;;  %v465_v10 = vld [vmem:[%s720_s15 + $0x38] sm:$0xff]  ;;  %v206_v11 = vadd.f32 %v449_v6, %v171_v5  ;;  %v214_v13 = vsub.f32 %v171_v5, %v449_v6  ;;  %v450_v17 = vld [vmem:[%s720_s15 + $0x50] sm:$0xff]  ;;  %v458_v22 = vld [vmem:[%s720_s15 + $0x60] sm:$0xff] }
  0x2b   : > { %s500_s17 = sshll.u32 %s862_s16, 6  ;;  %v222_v14 = vadd.f32 %v465_v10, %v457_v9  ;;  %v230_v15 = vsub.f32 %v457_v9, %v465_v10  ;;  %v237_v18 = vadd.f32 %v221_v8, %v205_v4  ;;  %v262_v19 = vsub.f32 %v205_v4, %v221_v8  ;;  %v466_v23 = vld [vmem:[%s720_s15 + $0x70] sm:$0xff]  ;;  %v173_v24 = vld [vmem:[%s720_s15 + $0x48] sm:$0xff]  ;;  %v451_v29 = vld [vmem:[%s720_s15 + $0x58] sm:$0xff] }
  0x2c   : > { %v287_v20 = vadd.f32 %v229_v12, %v213_v7  ;;  %v312_v21 = vsub.f32 %v213_v7, %v229_v12  ;;  %s746_s20 = scalar_lea.vmem %s850_s1, %s500_s17  ;;  %v459_v30 = vld [vmem:[%s720_s15 + $0x68] sm:$0xff]  ;;  %v467_v31 = vld [vmem:[%s720_s15 + $0x78] sm:$0xff]  ;;  %v207_v40 = vadd.f32 %v450_v17, %v172_v16  ;;  %v223_v41 = vadd.f32 %v466_v23, %v458_v22  ;;  %v174_v48 = vld [vmem:[%s720_s15 + $0x80] sm:$0xff] }
  0x2d   : > { %v238_v25 = vadd.f32 %v222_v14, %v206_v11  ;;  %v263_v26 = vsub.f32 %v206_v11, %v222_v14  ;;  %v288_v27 = vadd.f32 %v230_v15, %v214_v13  ;;  %v313_v28 = vsub.f32 %v214_v13, %v230_v15  ;;  %v452_v49 = vld [vmem:[%s720_s15 + $0x90] sm:$0xff]  ;;  %v460_v54 = vld [vmem:[%s720_s15 + $0xa0] sm:$0xff]  ;;  %v175_v56 = vld [vmem:[%s720_s15 + $0x88] sm:$0xff] }
  0x2e   : > { %v245_v32 = vmul.f32 0.5, %v237_v18  ;;  %v270_v33 = vmul.f32 0.5, %v262_v19  ;;  %v295_v34 = vmul.f32 0.5, %v287_v20  ;;  %v320_v35 = vmul.f32 0.5, %v312_v21  ;;  %v468_v55 = vld [vmem:[%s720_s15 + $0xb0] sm:$0xff]  ;;  %v453_v61 = vld [vmem:[%s720_s15 + $0x98] sm:$0xff] }
  0x2f   : > { %v246_v36 = vmul.f32 0.5, %v238_v25  ;;  %v271_v37 = vmul.f32 0.5, %v263_v26  ;;  %v296_v38 = vmul.f32 0.5, %v288_v27  ;;  %v321_v39 = vmul.f32 0.5, %v313_v28  ;;  %v461_v62 = vld [vmem:[%s720_s15 + $0xa8] sm:$0xff]  ;;  %v469_v63 = vld [vmem:[%s720_s15 + $0xb8] sm:$0xff] }
  0x30   : > { %254 = vst.msk [vmem:[%s746_s20] sm:$0xff] %vm253_vm0, %v245_v32  ;;  %472 = vst.msk [vmem:[%s746_s20 + $0x10] sm:$0xff] %vm253_vm0, %v270_v33  ;;  %v208_v42 = vadd.f32 %v451_v29, %v173_v24  ;;  %v224_v43 = vadd.f32 %v467_v31, %v459_v30  ;;  %v215_v44 = vsub.f32 %v172_v16, %v450_v17  ;;  %v176_v16 = vld [vmem:[%s720_s15 + $0xc0] sm:$0xff]  ;;  %v454_v17 = vld [vmem:[%s720_s15 + $0xd0] sm:$0xff] }
  0x31   : > { %480 = vst.msk [vmem:[%s746_s20 + $0x20] sm:$0xff] %vm253_vm0, %v295_v34  ;;  %488 = vst.msk [vmem:[%s746_s20 + $0x30] sm:$0xff] %vm253_vm0, %v320_v35  ;;  %v231_v45 = vsub.f32 %v458_v22, %v466_v23  ;;  %v216_v46 = vsub.f32 %v173_v24, %v451_v29  ;;  %v232_v47 = vsub.f32 %v459_v30, %v467_v31  ;;  %v462_v22 = vld [vmem:[%s720_s15 + $0xe0] sm:$0xff]  ;;  %v470_v23 = vld [vmem:[%s720_s15 + $0xf0] sm:$0xff] }
  0x32   : > { %255 = vst.msk [vmem:[%s746_s20 + $0x8] sm:$0xff] %vm253_vm0, %v246_v36  ;;  %473 = vst.msk [vmem:[%s746_s20 + $0x18] sm:$0xff] %vm253_vm0, %v271_v37  ;;  %v239_v50 = vadd.f32 %v223_v41, %v207_v40  ;;  %v240_v51 = vadd.f32 %v224_v43, %v208_v42  ;;  %v264_v52 = vsub.f32 %v207_v40, %v223_v41  ;;  %v177_v24 = vld [vmem:[%s720_s15 + $0xc8] sm:$0xff]  ;;  %v455_v29 = vld [vmem:[%s720_s15 + $0xd8] sm:$0xff] }
  0x33   : > { %481 = vst.msk [vmem:[%s746_s20 + $0x28] sm:$0xff] %vm253_vm0, %v296_v38  ;;  %489 = vst.msk [vmem:[%s746_s20 + $0x38] sm:$0xff] %vm253_vm0, %v321_v39  ;;  %v265_v53 = vsub.f32 %v208_v42, %v224_v43  ;;  %v289_v57 = vadd.f32 %v231_v45, %v215_v44  ;;  %v290_v58 = vadd.f32 %v232_v47, %v216_v46  ;;  %v463_v30 = vld [vmem:[%s720_s15 + $0xe8] sm:$0xff]  ;;  %v471_v31 = vld [vmem:[%s720_s15 + $0xf8] sm:$0xff] }
  0x34   : > { %v314_v59 = vsub.f32 %v215_v44, %v231_v45  ;;  %v315_v60 = vsub.f32 %v216_v46, %v232_v47  ;;  %v247_v0 = vmul.f32 0.5, %v239_v50  ;;  %v248_v1 = vmul.f32 0.5, %v240_v51 }
  0x35   : > { %v272_v2 = vmul.f32 0.5, %v264_v52  ;;  %v273_v3 = vmul.f32 0.5, %v265_v53  ;;  %v297_v4 = vmul.f32 0.5, %v289_v57  ;;  %v298_v5 = vmul.f32 0.5, %v290_v58 }
  0x36   : > { %v322_v6 = vmul.f32 0.5, %v314_v59  ;;  %v323_v7 = vmul.f32 0.5, %v315_v60  ;;  %256 = vst.msk [vmem:[%s746_s20 + $0x40] sm:$0xff] %vm253_vm0, %v247_v0  ;;  %257 = vst.msk [vmem:[%s746_s20 + $0x48] sm:$0xff] %vm253_vm0, %v248_v1  ;;  %v209_v8 = vadd.f32 %v452_v49, %v174_v48  ;;  %v225_v9 = vadd.f32 %v468_v55, %v460_v54 }
  0x37   : > { %474 = vst.msk [vmem:[%s746_s20 + $0x50] sm:$0xff] %vm253_vm0, %v272_v2  ;;  %475 = vst.msk [vmem:[%s746_s20 + $0x58] sm:$0xff] %vm253_vm0, %v273_v3  ;;  %v210_v10 = vadd.f32 %v453_v61, %v175_v56  ;;  %v226_v11 = vadd.f32 %v469_v63, %v461_v62  ;;  %v217_v12 = vsub.f32 %v174_v48, %v452_v49 }
  0x38   : > { %482 = vst.msk [vmem:[%s746_s20 + $0x60] sm:$0xff] %vm253_vm0, %v297_v4  ;;  %483 = vst.msk [vmem:[%s746_s20 + $0x68] sm:$0xff] %vm253_vm0, %v298_v5  ;;  %v233_v13 = vsub.f32 %v460_v54, %v468_v55  ;;  %v218_v14 = vsub.f32 %v175_v56, %v453_v61  ;;  %v234_v15 = vsub.f32 %v461_v62, %v469_v63 }
  0x39   : > { %490 = vst.msk [vmem:[%s746_s20 + $0x70] sm:$0xff] %vm253_vm0, %v322_v6  ;;  %491 = vst.msk [vmem:[%s746_s20 + $0x78] sm:$0xff] %vm253_vm0, %v323_v7  ;;  %v241_v18 = vadd.f32 %v225_v9, %v209_v8  ;;  %v242_v19 = vadd.f32 %v226_v11, %v210_v10  ;;  %v266_v20 = vsub.f32 %v209_v8, %v225_v9 }
  0x3a   : > { %v267_v21 = vsub.f32 %v210_v10, %v226_v11  ;;  %v291_v25 = vadd.f32 %v233_v13, %v217_v12  ;;  %v292_v26 = vadd.f32 %v234_v15, %v218_v14  ;;  %v316_v27 = vsub.f32 %v217_v12, %v233_v13 }
  0x3b   : > { %v317_v28 = vsub.f32 %v218_v14, %v234_v15  ;;  %v249_v32 = vmul.f32 0.5, %v241_v18  ;;  %v250_v33 = vmul.f32 0.5, %v242_v19  ;;  %v274_v34 = vmul.f32 0.5, %v266_v20 }
  0x3c   : > { %v275_v35 = vmul.f32 0.5, %v267_v21  ;;  %v299_v36 = vmul.f32 0.5, %v291_v25  ;;  %v300_v37 = vmul.f32 0.5, %v292_v26  ;;  %v324_v38 = vmul.f32 0.5, %v316_v27 }
  0x3d   : > { %v325_v39 = vmul.f32 0.5, %v317_v28  ;;  %258 = vst.msk [vmem:[%s746_s20 + $0x80] sm:$0xff] %vm253_vm0, %v249_v32  ;;  %259 = vst.msk [vmem:[%s746_s20 + $0x88] sm:$0xff] %vm253_vm0, %v250_v33  ;;  %v211_v40 = vadd.f32 %v454_v17, %v176_v16  ;;  %v227_v41 = vadd.f32 %v470_v23, %v462_v22  ;;  %v212_v42 = vadd.f32 %v455_v29, %v177_v24 }
  0x3e   : > { %476 = vst.msk [vmem:[%s746_s20 + $0x90] sm:$0xff] %vm253_vm0, %v274_v34  ;;  %477 = vst.msk [vmem:[%s746_s20 + $0x98] sm:$0xff] %vm253_vm0, %v275_v35  ;;  %v228_v43 = vadd.f32 %v471_v31, %v463_v30  ;;  %v219_v44 = vsub.f32 %v176_v16, %v454_v17  ;;  %v235_v45 = vsub.f32 %v462_v22, %v470_v23 }
  0x3f   : > { %484 = vst.msk [vmem:[%s746_s20 + $0xa0] sm:$0xff] %vm253_vm0, %v299_v36  ;;  %485 = vst.msk [vmem:[%s746_s20 + $0xa8] sm:$0xff] %vm253_vm0, %v300_v37  ;;  %v220_v46 = vsub.f32 %v177_v24, %v455_v29  ;;  %v236_v47 = vsub.f32 %v463_v30, %v471_v31  ;;  %v243_v48 = vadd.f32 %v227_v41, %v211_v40 }
  0x40   : > { %492 = vst.msk [vmem:[%s746_s20 + $0xb0] sm:$0xff] %vm253_vm0, %v324_v38  ;;  %493 = vst.msk [vmem:[%s746_s20 + $0xb8] sm:$0xff] %vm253_vm0, %v325_v39  ;;  %v244_v49 = vadd.f32 %v228_v43, %v212_v42  ;;  %v268_v50 = vsub.f32 %v211_v40, %v227_v41  ;;  %v269_v51 = vsub.f32 %v212_v42, %v228_v43 }
  0x41   : > { %v293_v52 = vadd.f32 %v235_v45, %v219_v44  ;;  %v294_v53 = vadd.f32 %v236_v47, %v220_v46  ;;  %v318_v54 = vsub.f32 %v219_v44, %v235_v45  ;;  %v319_v55 = vsub.f32 %v220_v46, %v236_v47 }
  0x42   : > { %v251_v56 = vmul.f32 0.5, %v243_v48  ;;  %v252_v57 = vmul.f32 0.5, %v244_v49  ;;  %v276_v58 = vmul.f32 0.5, %v268_v50  ;;  %v277_v59 = vmul.f32 0.5, %v269_v51 }
  0x43   : > { %v301_v60 = vmul.f32 0.5, %v293_v52  ;;  %v302_v61 = vmul.f32 0.5, %v294_v53  ;;  %v326_v62 = vmul.f32 0.5, %v318_v54  ;;  %v327_v63 = vmul.f32 0.5, %v319_v55 }
  0x44   : > { %260 = vst.msk [vmem:[%s746_s20 + $0xc0] sm:$0xff] %vm253_vm0, %v251_v56  ;;  %261 = vst.msk [vmem:[%s746_s20 + $0xc8] sm:$0xff] %vm253_vm0, %v252_v57 }
  0x45   : > { %478 = vst.msk [vmem:[%s746_s20 + $0xd0] sm:$0xff] %vm253_vm0, %v276_v58  ;;  %479 = vst.msk [vmem:[%s746_s20 + $0xd8] sm:$0xff] %vm253_vm0, %v277_v59 }
  0x46   : > { %486 = vst.msk [vmem:[%s746_s20 + $0xe0] sm:$0xff] %vm253_vm0, %v301_v60  ;;  %487 = vst.msk [vmem:[%s746_s20 + $0xe8] sm:$0xff] %vm253_vm0, %v302_v61 }
  0x47   : > { %494 = vst.msk [vmem:[%s746_s20 + $0xf0] sm:$0xff] %vm253_vm0, %v326_v62  ;;  %495 = vst.msk [vmem:[%s746_s20 + $0xf8] sm:$0xff] %vm253_vm0, %v327_v63 }
  0x48 PF: > { %s14_s11 = sadd.s32 1, %s636_s11   ;;  %s854_s6 = smov %s620_s7 }
  0x49   : > { %p11_p7 = scmp.ge.s32.totalorder %s14_s11, 4   ;;  %s855_s7 = smov %s624_s8 }
  0x4a   : > { %s856_s8 = smov %s700_s18  ;;  %s857_s9 = smov %s632_s10 }
  0x4b   : > { %s858_s10 = smov %s860_s13  ;;  %13 = sbr.rel (!%p11_p7) target bundleno = 4 (0x4), region = 70 }
  0x50   :  { %370 = vsyncpa [#allocation3], 1 }
  0x51   :  { %372 = vsyncpa [#allocation3 + $0x1], 1 }

</bundles_post_ra>
